<compile_context>
chip_gen: v7x
topology: tpu7x:2x2x1
jax: 0.10.0
libtpu: 0.0.40
codegen_flags: <defaults>
</compile_context>

<pallas_src>
import functools

import jax
import jax.numpy as jnp
from jax.experimental import pallas as pl
from jax.experimental.pallas import tpu as pltpu


# ----------------------------------------------------------------------------
# Host-side parameter folding (parameter-only work, traced once under jit).
# ----------------------------------------------------------------------------
def fold_params(params, A, *, K, C, T, V, Cin):
    KC = K * C
    VC = V * C
    Wc = params["conv_w"]          # (K*C, Cin)   torch conv weight[:, :, 0, 0]
    bc = params["conv_b"]          # (K*C,)
    Wl = params["lin_w"]           # (C, K)       torch Linear weight
    bl = params["lin_b"]           # (C,)
    pos = params["pos"][0]         # (V, C)

    # r = t0*KC + k*C + c  ->  conv channel j = r // T, time step t = r % T
    r = (jnp.arange(T)[:, None, None] * KC
         + jnp.arange(K)[None, :, None] * C
         + jnp.arange(C)[None, None, :])                        # (T, K, C)
    j = r // T
    tt = r % T
    onehot_t = jax.nn.one_hot(tt, T, dtype=jnp.float32)         # (T, K, C, T)
    Mfold = jnp.einsum("akci,akct->akit", Wc[j], onehot_t)      # (T, K, Cin, T)
    M = jnp.transpose(Mfold, (1, 0, 2, 3)).reshape(K, T, Cin * T)

    # G_k[v, w*C+co] = A[k, v, w] * Wl[co, k]
    G = jnp.einsum("kvw,ck->kvwc", A, Wl).reshape(K, V, VC)

    # conv bias pushed through view/sum/einsum/linear, plus Linear bias + pos.
    Bfold = bc[j].sum(axis=-1)                                   # (T, K)
    Asum = A.sum(axis=1)                                         # (K, V)
    zb_conv = jnp.einsum("ak,kw,ck->awc", Bfold, Asum, Wl)       # (T, V, C)
    Zbias = (zb_conv + bl[None, None, :] + pos[None, :, :]).reshape(T, VC)

    # Fold the k-sum into a single GEMM weight: (Cin*T*V, T*V*C), ~5.4 MB f32.
    Wbig = jnp.einsum("ktp,kvq->pvtq", M, G).reshape(Cin * T * V, T * VC)
    Zb = Zbias.reshape(1, T * VC)
    return Wbig, Zb


# ----------------------------------------------------------------------------
# Kernel 1: fused GCN GEMM + per-column BN partial statistics (no Z to HBM).
# ----------------------------------------------------------------------------
def _gcn_stats_kernel(x_ref, w_ref, zb_ref, s_ref, sq_ref):
    # x_ref:  (NB, P)      block of flattened input rows
    # w_ref:  (P, CT)      folded weights (resident)
    # zb_ref: (1, CT)      folded additive term (resident)
    # s_ref / sq_ref: (1, 1, CT)   per-block column sum / sum-of-squares
    z = jnp.dot(x_ref[...], w_ref[...], preferred_element_type=jnp.float32)
    z = z + zb_ref[...]
    s_ref[0] = jnp.sum(z, axis=0, keepdims=True)
    sq_ref[0] = jnp.sum(z * z, axis=0, keepdims=True)


# ----------------------------------------------------------------------------
# Kernel 2: fused GCN GEMM + BN apply (scale/shift pre-folded per column).
# ----------------------------------------------------------------------------
def _gcn_bn_apply_kernel(x_ref, w_ref, zb_ref, sc_ref, sh_ref, o_ref):
    z = jnp.dot(x_ref[...], w_ref[...], preferred_element_type=jnp.float32)
    z = z + zb_ref[...]
    o_ref[...] = z * sc_ref[...] + sh_ref[...]


def _pick_batch_block(n, max_nb=256):
    """Largest batch block <= max_nb that divides N and respects (8,128) tiling."""
    if n <= max_nb:
        return n
    for nb in range(max_nb, 7, -1):
        if nb % 8 == 0 and n % nb == 0:
            return nb
    # TODO(synk): ragged N with no multiple-of-8 divisor -> single-block fallback.
    return n


_COMPILER_PARAMS = pltpu.CompilerParams(
    dimension_semantics=("parallel",),
    vmem_limit_bytes=40 * 1024 * 1024,   # headroom-safe on v7x (64 MiB physical)
)


def gcn_bn_stats(Xf, Wbig, Zb, nb):
    N, P = Xf.shape
    CT = Wbig.shape[1]
    nblk = N // nb
    return pl.pallas_call(
        _gcn_stats_kernel,
        out_shape=(
            jax.ShapeDtypeStruct((nblk, 1, CT), jnp.float32),
            jax.ShapeDtypeStruct((nblk, 1, CT), jnp.float32),
        ),
        grid=(nblk,),
        in_specs=[
            pl.BlockSpec((nb, P), lambda i: (i, 0)),
            pl.BlockSpec((P, CT), lambda i: (0, 0)),    # resident params
            pl.BlockSpec((1, CT), lambda i: (0, 0)),
        ],
        out_specs=(
            pl.BlockSpec((1, 1, CT), lambda i: (i, 0, 0)),
            pl.BlockSpec((1, 1, CT), lambda i: (i, 0, 0)),
        ),
        compiler_params=_COMPILER_PARAMS,
    )(Xf, Wbig, Zb)


def gcn_bn_apply(Xf, Wbig, Zb, scale, shift, nb):
    N, P = Xf.shape
    CT = Wbig.shape[1]
    nblk = N // nb
    return pl.pallas_call(
        _gcn_bn_apply_kernel,
        out_shape=jax.ShapeDtypeStruct((N, CT), jnp.float32),
        grid=(nblk,),
        in_specs=[
            pl.BlockSpec((nb, P), lambda i: (i, 0)),
            pl.BlockSpec((P, CT), lambda i: (0, 0)),    # resident params
            pl.BlockSpec((1, CT), lambda i: (0, 0)),
            pl.BlockSpec((1, CT), lambda i: (0, 0)),
            pl.BlockSpec((1, CT), lambda i: (0, 0)),
        ],
        out_specs=pl.BlockSpec((nb, CT), lambda i: (i, 0)),
        compiler_params=_COMPILER_PARAMS,
    )(Xf, Wbig, Zb, scale, shift)


def _finalize_bn(psum, psq, gamma, beta, *, N, T, VC, eps):
    """Tiny (T*V*C)-sized parameter work: per-channel mean/var -> scale/shift."""
    colsum = psum.sum(axis=(0, 1))                     # (T*VC,)
    colsq = psq.sum(axis=(0, 1))
    cnt = float(N * T)
    chsum = colsum.reshape(VC, T).sum(axis=1)          # BN channel = col // T
    chsq = colsq.reshape(VC, T).sum(axis=1)
    mean = chsum / cnt
    var = chsq / cnt - mean * mean                     # biased batch variance
    scale = gamma * jax.lax.rsqrt(var + eps)
    shift = beta - mean * scale
    scale_ct = jnp.repeat(scale, T).reshape(1, VC * T)
    shift_ct = jnp.repeat(shift, T).reshape(1, VC * T)
    return scale_ct, shift_ct


# ----------------------------------------------------------------------------
# InfoGCN forward: two 'parallel'-grid pallas_calls, no transposes, only
# torch-mandated row-major reshapes outside the kernels.
# ----------------------------------------------------------------------------
def infogcn_forward(params, x, A, *, kernel_size, out_channels, eps=1e-5):
    N, Cin, T, V = x.shape
    K, C = kernel_size, out_channels
    assert A.shape[0] == K
    VC = V * C
    P = Cin * T * V

    Wbig, Zb = fold_params(params, A, K=K, C=C, T=T, V=V, Cin=Cin)

    # (N, Cin, T, V) -> (N, Cin*T*V): pure row-major flatten, no data movement.
    Xf = x.reshape(N, P)
    nb = _pick_batch_block(N)

    psum, psq = gcn_bn_stats(Xf, Wbig, Zb, nb)
    scale, shift = _finalize_bn(psum, psq, params["bn_g"], params["bn_b"],
                                N=N, T=T, VC=VC, eps=eps)
    y = gcn_bn_apply(Xf, Wbig, Zb, scale, shift, nb)   # (N, T*V*C), lane-dense

    # torch: .view(n, v*k, t) -> BatchNorm1d -> .view(n, k, t, v); both are raw
    # reinterpretations of the same contiguous per-batch buffer, so the final
    # tensor is just a row-major reshape of the flat columns.
    out = y.reshape(N, C, T, V)
    # TODO(synk): self.l1 = EncodingBlock(...) is not defined in the provided
    # source; return the tensor that would be passed to it.
    return out


# ----------------------------------------------------------------------------
# Pure-JAX reference that mirrors the PyTorch forward literally.
# ----------------------------------------------------------------------------
def ref_forward(params, x, A, *, kernel_size, out_channels, eps=1e-5):
    N, Cin, T, V = x.shape
    K, C = kernel_size, out_channels
    y = (jnp.einsum("ji,nitv->njtv", params["conv_w"], x)
         + params["conv_b"][None, :, None, None])
    xr = y.reshape(N * T, K, C, V)                     # torch .view
    e = jnp.einsum("nkcv,kvw->nwk", xr, A)
    z = jnp.einsum("nwk,ck->nwc", e, params["lin_w"]) + params["lin_b"]
    z = z + params["pos"][:, :V]
    zb = z.reshape(N, V * C, T)                        # torch .view
    mean = zb.mean(axis=(0, 2), keepdims=True)
    var = ((zb - mean) ** 2).mean(axis=(0, 2), keepdims=True)
    g = params["bn_g"][None, :, None]
    b = params["bn_b"][None, :, None]
    yb = (zb - mean) * jax.lax.rsqrt(var + eps) * g + b
    return yb.reshape(N, C, T, V)


if __name__ == "__main__":
    # Small shapes consistent with the module (num_point is hard-coded to 21).
    N, C_in, T = 2, 3, 8
    V = 21                      # num_point (pos_embedding / data_bn width)
    K = 3                       # kernel_size == A.shape[0] (== num_heads)
    C_out = 16                  # out_channels

    key = jax.random.PRNGKey(0)
    ks = jax.random.split(key, 10)

    params = {
        "conv_w": 0.1 * jax.random.normal(ks[0], (K * C_out, C_in), jnp.float32),
        "conv_b": 0.1 * jax.random.normal(ks[1], (K * C_out,), jnp.float32),
        "lin_w": 0.1 * jax.random.normal(ks[2], (C_out, K), jnp.float32),
        "lin_b": 0.1 * jax.random.normal(ks[3], (C_out,), jnp.float32),
        "pos": 0.1 * jax.random.normal(ks[4], (1, V, C_out), jnp.float32),
        "bn_g": 1.0 + 0.1 * jax.random.normal(ks[5], (V * C_out,), jnp.float32),
        "bn_b": 0.1 * jax.random.normal(ks[6], (V * C_out,), jnp.float32),
    }
    x = jax.random.normal(ks[7], (N, C_in, T, V), jnp.float32)
    A = jax.random.normal(ks[8], (K, V, V), jnp.float32)

    fwd = jax.jit(functools.partial(infogcn_forward,
                                    kernel_size=K, out_channels=C_out))
    out = jax.block_until_ready(fwd(params, x, A))
    assert out.shape == (N, C_out, T, V), out.shape

    ref = jax.block_until_ready(
        ref_forward(params, x, A, kernel_size=K, out_channels=C_out))
    err = float(jnp.max(jnp.abs(out - ref)))
    assert jnp.allclose(out, ref, atol=1e-3, rtol=1e-3), err

    print("KERNEL_OK")
</pallas_src>

<mosaic_0001>
module attributes {stable_mosaic.version = 11 : i64} {
  func.func @_gcn_stats_kernel(%arg0: i32, %arg1: memref<2x504xf32, #tpu.memory_space<vmem>>, %arg2: memref<504x2688xf32, #tpu.memory_space<vmem>>, %arg3: memref<1x2688xf32, #tpu.memory_space<vmem>>, %arg4: memref<1x1x2688xf32, #tpu.memory_space<vmem>>, %arg5: memref<1x1x2688xf32, #tpu.memory_space<vmem>>) attributes {dimension_semantics = [#tpu.dimension_semantics<parallel>], iteration_bounds = array<i64: 1>, scalar_prefetch = 0 : i64, scratch_operands = 0 : i64, tpu.core_type = #tpu.core_type<tc>, window_params = [{transform_indices = @transform_0, window_bounds = array<i64: 2, 504>}, {pipeline_mode = #tpu.pipeline_mode<synchronous>, transform_indices = @transform_1, window_bounds = array<i64: 504, 2688>}, {pipeline_mode = #tpu.pipeline_mode<synchronous>, transform_indices = @transform_2, window_bounds = array<i64: 1, 2688>}, {transform_indices = @transform_3, window_bounds = array<i64: 1, 1, 2688>}, {transform_indices = @transform_4, window_bounds = array<i64: 1, 1, 2688>}]} {
    %c0 = arith.constant 0 : index
    %c0_0 = arith.constant 0 : index
    %0 = vector.load %arg1[%c0, %c0_0] : memref<2x504xf32, #tpu.memory_space<vmem>>, vector<2x504xf32>
    %c0_1 = arith.constant 0 : index
    %c0_2 = arith.constant 0 : index
    %1 = vector.load %arg2[%c0_1, %c0_2] : memref<504x2688xf32, #tpu.memory_space<vmem>>, vector<504x2688xf32>
    %cst = arith.constant dense<0.000000e+00> : vector<2x2688xf32>
    %2 = tpu.matmul %0, %1, %cst {dimension_numbers = #tpu.dot_dimension_numbers<[1], [0], [0], [1], [0, 0, 1, 1], [], []>} : vector<2x504xf32>, vector<504x2688xf32>, vector<2x2688xf32> -> vector<2x2688xf32>
    %c0_3 = arith.constant 0 : index
    %c0_4 = arith.constant 0 : index
    %3 = vector.load %arg3[%c0_3, %c0_4] : memref<1x2688xf32, #tpu.memory_space<vmem>>, vector<1x2688xf32>
    %4 = vector.broadcast %3 : vector<1x2688xf32> to vector<2x2688xf32>
    %5 = arith.addf %2, %4 : vector<2x2688xf32>
    %cst_5 = arith.constant dense<0.000000e+00> : vector<2688xf32>
    %6 = vector.multi_reduction <add>, %5, %cst_5 [0] : vector<2x2688xf32> to vector<2688xf32>
    %7 = vector.shape_cast %6 : vector<2688xf32> to vector<1x2688xf32>
    %c0_6 = arith.constant 0 : index
    %c0_7 = arith.constant 0 : index
    %c0_8 = arith.constant 0 : index
    %8 = vector.load %arg4[%c0_6, %c0_7, %c0_8] : memref<1x1x2688xf32, #tpu.memory_space<vmem>>, vector<1x1x2688xf32>
    %9 = vector.shape_cast %8 : vector<1x1x2688xf32> to vector<1x2688xf32>
    %10 = vector.shape_cast %7 : vector<1x2688xf32> to vector<1x1x2688xf32>
    tpu.vector_store %arg4[%c0_6, %c0_7, %c0_8], %10 {strides = array<i32>} : memref<1x1x2688xf32, #tpu.memory_space<vmem>>, vector<1x1x2688xf32>,
    %11 = arith.mulf %5, %5 : vector<2x2688xf32>
    %cst_9 = arith.constant dense<0.000000e+00> : vector<2688xf32>
    %12 = vector.multi_reduction <add>, %11, %cst_9 [0] : vector<2x2688xf32> to vector<2688xf32>
    %13 = vector.shape_cast %12 : vector<2688xf32> to vector<1x2688xf32>
    %c0_10 = arith.constant 0 : index
    %c0_11 = arith.constant 0 : index
    %c0_12 = arith.constant 0 : index
    %14 = vector.load %arg5[%c0_10, %c0_11, %c0_12] : memref<1x1x2688xf32, #tpu.memory_space<vmem>>, vector<1x1x2688xf32>
    %15 = vector.shape_cast %14 : vector<1x1x2688xf32> to vector<1x2688xf32>
    %16 = vector.shape_cast %13 : vector<1x2688xf32> to vector<1x1x2688xf32>
    tpu.vector_store %arg5[%c0_10, %c0_11, %c0_12], %16 {strides = array<i32>} : memref<1x1x2688xf32, #tpu.memory_space<vmem>>, vector<1x1x2688xf32>,
    return
  }
  func.func @transform_0(%arg0: i32) -> (i32, i32) {
    %c0_i32 = arith.constant 0 : i32
    %c0_i32_0 = arith.constant 0 : i32
    return %arg0, %c0_i32 : i32, i32
  }
  func.func @transform_1(%arg0: i32) -> (i32, i32) {
    %c0_i32 = arith.constant 0 : i32
    %c0_i32_0 = arith.constant 0 : i32
    %c0_i32_1 = arith.constant 0 : i32
    return %c0_i32, %c0_i32_0 : i32, i32
  }
  func.func @transform_2(%arg0: i32) -> (i32, i32) {
    %c0_i32 = arith.constant 0 : i32
    %c0_i32_0 = arith.constant 0 : i32
    %c0_i32_1 = arith.constant 0 : i32
    return %c0_i32, %c0_i32_0 : i32, i32
  }
  func.func @transform_3(%arg0: i32) -> (i32, i32, i32) {
    %c0_i32 = arith.constant 0 : i32
    %c0_i32_0 = arith.constant 0 : i32
    %c0_i32_1 = arith.constant 0 : i32
    return %arg0, %c0_i32, %c0_i32_0 : i32, i32, i32
  }
  func.func @transform_4(%arg0: i32) -> (i32, i32, i32) {
    %c0_i32 = arith.constant 0 : i32
    %c0_i32_0 = arith.constant 0 : i32
    %c0_i32_1 = arith.constant 0 : i32
    return %arg0, %c0_i32, %c0_i32_0 : i32, i32, i32
  }
}

module attributes {stable_mosaic.version = 11 : i64} {
  func.func @_gcn_bn_apply_kernel(%arg0: i32, %arg1: memref<2x504xf32, #tpu.memory_space<vmem>>, %arg2: memref<504x2688xf32, #tpu.memory_space<vmem>>, %arg3: memref<1x2688xf32, #tpu.memory_space<vmem>>, %arg4: memref<1x2688xf32, #tpu.memory_space<vmem>>, %arg5: memref<1x2688xf32, #tpu.memory_space<vmem>>, %arg6: memref<2x2688xf32, #tpu.memory_space<vmem>>) attributes {dimension_semantics = [#tpu.dimension_semantics<parallel>], iteration_bounds = array<i64: 1>, scalar_prefetch = 0 : i64, scratch_operands = 0 : i64, tpu.core_type = #tpu.core_type<tc>, window_params = [{transform_indices = @transform_0, window_bounds = array<i64: 2, 504>}, {pipeline_mode = #tpu.pipeline_mode<synchronous>, transform_indices = @transform_1, window_bounds = array<i64: 504, 2688>}, {pipeline_mode = #tpu.pipeline_mode<synchronous>, transform_indices = @transform_2, window_bounds = array<i64: 1, 2688>}, {pipeline_mode = #tpu.pipeline_mode<synchronous>, transform_indices = @transform_3, window_bounds = array<i64: 1, 2688>}, {pipeline_mode = #tpu.pipeline_mode<synchronous>, transform_indices = @transform_4, window_bounds = array<i64: 1, 2688>}, {transform_indices = @transform_5, window_bounds = array<i64: 2, 2688>}]} {
    %c0 = arith.constant 0 : index
    %c0_0 = arith.constant 0 : index
    %0 = vector.load %arg1[%c0, %c0_0] : memref<2x504xf32, #tpu.memory_space<vmem>>, vector<2x504xf32>
    %c0_1 = arith.constant 0 : index
    %c0_2 = arith.constant 0 : index
    %1 = vector.load %arg2[%c0_1, %c0_2] : memref<504x2688xf32, #tpu.memory_space<vmem>>, vector<504x2688xf32>
    %cst = arith.constant dense<0.000000e+00> : vector<2x2688xf32>
    %2 = tpu.matmul %0, %1, %cst {dimension_numbers = #tpu.dot_dimension_numbers<[1], [0], [0], [1], [0, 0, 1, 1], [], []>} : vector<2x504xf32>, vector<504x2688xf32>, vector<2x2688xf32> -> vector<2x2688xf32>
    %c0_3 = arith.constant 0 : index
    %c0_4 = arith.constant 0 : index
    %3 = vector.load %arg3[%c0_3, %c0_4] : memref<1x2688xf32, #tpu.memory_space<vmem>>, vector<1x2688xf32>
    %4 = vector.broadcast %3 : vector<1x2688xf32> to vector<2x2688xf32>
    %5 = arith.addf %2, %4 : vector<2x2688xf32>
    %c0_5 = arith.constant 0 : index
    %c0_6 = arith.constant 0 : index
    %6 = vector.load %arg4[%c0_5, %c0_6] : memref<1x2688xf32, #tpu.memory_space<vmem>>, vector<1x2688xf32>
    %7 = vector.broadcast %6 : vector<1x2688xf32> to vector<2x2688xf32>
    %8 = arith.mulf %5, %7 : vector<2x2688xf32>
    %c0_7 = arith.constant 0 : index
    %c0_8 = arith.constant 0 : index
    %9 = vector.load %arg5[%c0_7, %c0_8] : memref<1x2688xf32, #tpu.memory_space<vmem>>, vector<1x2688xf32>
    %10 = vector.broadcast %9 : vector<1x2688xf32> to vector<2x2688xf32>
    %11 = arith.addf %8, %10 : vector<2x2688xf32>
    %c0_9 = arith.constant 0 : index
    %c0_10 = arith.constant 0 : index
    %12 = vector.load %arg6[%c0_9, %c0_10] : memref<2x2688xf32, #tpu.memory_space<vmem>>, vector<2x2688xf32>
    tpu.vector_store %arg6[%c0_9, %c0_10], %11 {strides = array<i32>} : memref<2x2688xf32, #tpu.memory_space<vmem>>, vector<2x2688xf32>,
    return
  }
  func.func @transform_0(%arg0: i32) -> (i32, i32) {
    %c0_i32 = arith.constant 0 : i32
    %c0_i32_0 = arith.constant 0 : i32
    return %arg0, %c0_i32 : i32, i32
  }
  func.func @transform_1(%arg0: i32) -> (i32, i32) {
    %c0_i32 = arith.constant 0 : i32
    %c0_i32_0 = arith.constant 0 : i32
    %c0_i32_1 = arith.constant 0 : i32
    return %c0_i32, %c0_i32_0 : i32, i32
  }
  func.func @transform_2(%arg0: i32) -> (i32, i32) {
    %c0_i32 = arith.constant 0 : i32
    %c0_i32_0 = arith.constant 0 : i32
    %c0_i32_1 = arith.constant 0 : i32
    return %c0_i32, %c0_i32_0 : i32, i32
  }
  func.func @transform_3(%arg0: i32) -> (i32, i32) {
    %c0_i32 = arith.constant 0 : i32
    %c0_i32_0 = arith.constant 0 : i32
    %c0_i32_1 = arith.constant 0 : i32
    return %c0_i32, %c0_i32_0 : i32, i32
  }
  func.func @transform_4(%arg0: i32) -> (i32, i32) {
    %c0_i32 = arith.constant 0 : i32
    %c0_i32_0 = arith.constant 0 : i32
    %c0_i32_1 = arith.constant 0 : i32
    return %c0_i32, %c0_i32_0 : i32, i32
  }
  func.func @transform_5(%arg0: i32) -> (i32, i32) {
    %c0_i32 = arith.constant 0 : i32
    %c0_i32_0 = arith.constant 0 : i32
    return %arg0, %c0_i32 : i32, i32
  }
}

</mosaic_0001>

<bundles_post_ra>
// kernel: infogcn_forward.2
= control target key start
LH: loop header
LB: loop body
LE: loop exit
PB: predicated region body
PF: predicated region fallthrough
CT: control target
= control target key end

     0   :  { %vm1472_vm0 = vcmask 982016   ;;  %vm3035_vm1 = vcmask 1041408   ;;  %s9902_s1 = inlined_call_operand.vmem [shape: f32[504,2688], index: 1, kind: input, shape index: {}]   ;;  %s9903_s0 = inlined_call_operand.vmem [shape: f32[2,504], index: 0, kind: input, shape index: {}]   ;;  %s9904_s2 = inlined_call_operand.vmem [shape: f32[1,2688], index: 2, kind: input, shape index: {}]   ;;  %s9905_s3 = inlined_call_operand.vmem [shape: f32[1,1,2688], index: 3, kind: output, shape index: {0}]   ;;  %s9906_s4 = inlined_call_operand.vmem [shape: f32[1,1,2688], index: 4, kind: output, shape index: {1}]  }
   0x1   :  { %v18_v0 = vld [vmem:[%s9902_s1 + $0x8] sm:$0xff]  ;;  %v39_v1 = vld [vmem:[%s9902_s1 + $0xb0] sm:$0xff]  ;;  %v20_v2 = vld [vmem:[%s9902_s1 + $0x18] sm:$0xff] }
   0x2   :  { %v3737_v3 = vpack.c.bf16 %v39_v1, %v18_v0  ;;  %v41_v4 = vld [vmem:[%s9902_s1 + $0xc0] sm:$0xff]  ;;  %v38_v6 = vld [vmem:[%s9902_s1 + $0xa8] sm:$0xff]  ;;  %v19_v9 = vld [vmem:[%s9902_s1 + $0x10] sm:$0xff] }
   0x3   :  { %v17_v5 = vld [vmem:[%s9902_s1] sm:$0xff]  ;;  %v3861_v7 = vpack.c.bf16 %v41_v4, %v20_v2  ;;  %v40_v10 = vld [vmem:[%s9902_s1 + $0xb8] sm:$0xff]  ;;  %v62_v14 = vld [vmem:[%s9902_s1 + $0x168] sm:$0xff] }
   0x4   :  { %v3739_v8 = vpack.c.bf16 %v38_v6, %v17_v5  ;;  %v60_v11 = vld [vmem:[%s9902_s1 + $0x158] sm:$0xff]  ;;  %3738 = vmatprep.subr.bf16.mxu0 %v3737_v3  ;;  %v3863_v12 = vpack.c.bf16 %v40_v10, %v19_v9  ;;  %v81_v13 = vld [vmem:[%s9902_s1 + $0x200] sm:$0xff]  ;;  %v83_v15 = vld [vmem:[%s9902_s1 + $0x210] sm:$0xff] }
   0x5   :  { %3862 = vmatprep.subr.bf16.mxu1 %v3861_v7  ;;  %v3741_v16 = vpack.c.bf16 %v81_v13, %v60_v11  ;;  %v3865_v17 = vpack.c.bf16 %v83_v15, %v62_v14  ;;  %v59_v18 = vld [vmem:[%s9902_s1 + $0x150] sm:$0xff]  ;;  %v80_v19 = vld [vmem:[%s9902_s1 + $0x1f8] sm:$0xff]  ;;  %v61_v20 = vld [vmem:[%s9902_s1 + $0x160] sm:$0xff] }
   0x6   :  { %3740 = vmatpush1.bf16.msra.mxu0 %v3739_v8  ;;  %3864 = vmatpush1.bf16.msra.mxu1 %v3863_v12  ;;  %v3743_v21 = vpack.c.bf16 %v80_v19, %v59_v18  ;;  %v82_v22 = vld [vmem:[%s9902_s1 + $0x208] sm:$0xff]  ;;  %v123_v24 = vld [vmem:[%s9902_s1 + $0x350] sm:$0xff]  ;;  %v104_v27 = vld [vmem:[%s9902_s1 + $0x2b8] sm:$0xff] }
   0x7   :  { %v102_v23 = vld [vmem:[%s9902_s1 + $0x2a8] sm:$0xff]  ;;  %3742 = vmatprep.subr.bf16.mxu0 %v3741_v16  ;;  %3866 = vmatprep.subr.bf16.mxu1 %v3865_v17  ;;  %v3867_v25 = vpack.c.bf16 %v82_v22, %v61_v20  ;;  %v125_v28 = vld [vmem:[%s9902_s1 + $0x360] sm:$0xff]  ;;  %v103_v32 = vld [vmem:[%s9902_s1 + $0x2b0] sm:$0xff] }
   0x8   :  { %v3745_v26 = vpack.c.bf16 %v123_v24, %v102_v23  ;;  %v101_v29 = vld [vmem:[%s9902_s1 + $0x2a0] sm:$0xff]  ;;  %v3869_v30 = vpack.c.bf16 %v125_v28, %v104_v27  ;;  %v122_v31 = vld [vmem:[%s9902_s1 + $0x348] sm:$0xff]  ;;  %v124_v33 = vld [vmem:[%s9902_s1 + $0x358] sm:$0xff] }
   0x9   :  { %v3747_v34 = vpack.c.bf16 %v122_v31, %v101_v29  ;;  %v144_v35 = vld [vmem:[%s9902_s1 + $0x3f8] sm:$0xff]  ;;  %v165_v36 = vld [vmem:[%s9902_s1 + $0x4a0] sm:$0xff]  ;;  %v146_v37 = vld [vmem:[%s9902_s1 + $0x408] sm:$0xff]  ;;  %v3871_v38 = vpack.c.bf16 %v124_v33, %v103_v32 }
   0xa   :  { %3744 = vmatpush1.bf16.msra.mxu0 %v3743_v21  ;;  %3868 = vmatpush1.bf16.msra.mxu1 %v3867_v25  ;;  %v3749_v39 = vpack.c.bf16 %v165_v36, %v144_v35  ;;  %v167_v40 = vld [vmem:[%s9902_s1 + $0x4b0] sm:$0xff]  ;;  %v164_v42 = vld [vmem:[%s9902_s1 + $0x498] sm:$0xff]  ;;  %v145_v44 = vld [vmem:[%s9902_s1 + $0x400] sm:$0xff] }
   0xb   :  { %3746 = vmatprep.subr.bf16.mxu0 %v3745_v26  ;;  %v143_v41 = vld [vmem:[%s9902_s1 + $0x3f0] sm:$0xff]  ;;  %3870 = vmatprep.subr.bf16.mxu1 %v3869_v30  ;;  %v3873_v43 = vpack.c.bf16 %v167_v40, %v146_v37  ;;  %v166_v45 = vld [vmem:[%s9902_s1 + $0x4a8] sm:$0xff]  ;;  %v188_v48 = vld [vmem:[%s9902_s1 + $0x558] sm:$0xff] }
   0xc   :  { %v186_v46 = vld [vmem:[%s9902_s1 + $0x548] sm:$0xff]  ;;  %v207_v47 = vld [vmem:[%s9902_s1 + $0x5f0] sm:$0xff]  ;;  %v209_v49 = vld [vmem:[%s9902_s1 + $0x600] sm:$0xff]  ;;  %v3751_v50 = vpack.c.bf16 %v164_v42, %v143_v41  ;;  %v3875_v51 = vpack.c.bf16 %v166_v45, %v145_v44 }
   0xd   :  { %v3753_v52 = vpack.c.bf16 %v207_v47, %v186_v46  ;;  %v185_v53 = vld [vmem:[%s9902_s1 + $0x540] sm:$0xff]  ;;  %v206_v54 = vld [vmem:[%s9902_s1 + $0x5e8] sm:$0xff]  ;;  %v187_v55 = vld [vmem:[%s9902_s1 + $0x550] sm:$0xff]  ;;  %v3877_v56 = vpack.c.bf16 %v209_v49, %v188_v48  ;;  %v9907_v46 = vlaneseq  ;;  %v5100_v47 = vmov 1983009808  }
   0xe   :  { %3748 = vmatpush1.bf16.msra.mxu0 %v3747_v34  ;;  %3872 = vmatpush1.bf16.msra.mxu1 %v3871_v38  ;;  %v208_v57 = vld [vmem:[%s9902_s1 + $0x5f8] sm:$0xff]  ;;  %v249_v59 = vld [vmem:[%s9902_s1 + $0x740] sm:$0xff]  ;;  %v230_v60 = vld [vmem:[%s9902_s1 + $0x6a8] sm:$0xff]  ;;  %v3755_v62 = vpack.c.bf16 %v206_v54, %v185_v53  ;;  %v1454_v48 = vunpack.c.l.s4 %v5100_v47 }
   0xf   :  { %3750 = vmatprep.subr.bf16.mxu0 %v3749_v39  ;;  %3874 = vmatprep.subr.bf16.mxu1 %v3873_v43  ;;  %v228_v58 = vld [vmem:[%s9902_s1 + $0x698] sm:$0xff]  ;;  %v251_v61 = vld [vmem:[%s9902_s1 + $0x750] sm:$0xff]  ;;  %v3879_v63 = vpack.c.bf16 %v208_v57, %v187_v55  ;;  %v229_v3 = vld [vmem:[%s9902_s1 + $0x6a0] sm:$0xff] }
  0x10   :  { %v3757_v0 = vpack.c.bf16 %v249_v59, %v228_v58  ;;  %v227_v1 = vld [vmem:[%s9902_s1 + $0x690] sm:$0xff]  ;;  %v248_v2 = vld [vmem:[%s9902_s1 + $0x738] sm:$0xff]  ;;  %v3881_v4 = vpack.c.bf16 %v251_v61, %v230_v60  ;;  %v250_v5 = vld [vmem:[%s9902_s1 + $0x748] sm:$0xff]  ;;  %v5382_v61 = vshrl.u32 %v9907_v46, 7 }
  0x11   :  { %v270_v6 = vld [vmem:[%s9902_s1 + $0x7e8] sm:$0xff]  ;;  %v291_v7 = vld [vmem:[%s9902_s1 + $0x890] sm:$0xff]  ;;  %v272_v8 = vld [vmem:[%s9902_s1 + $0x7f8] sm:$0xff]  ;;  %v3759_v10 = vpack.c.bf16 %v248_v2, %v227_v1  ;;  %v3883_v11 = vpack.c.bf16 %v250_v5, %v229_v3 }
  0x12   :  { %3752 = vmatpush1.bf16.msra.mxu0 %v3751_v50  ;;  %3876 = vmatpush1.bf16.msra.mxu1 %v3875_v51  ;;  %v293_v9 = vld [vmem:[%s9902_s1 + $0x8a0] sm:$0xff]  ;;  %v3761_v12 = vpack.c.bf16 %v291_v7, %v270_v6  ;;  %v290_v14 = vld [vmem:[%s9902_s1 + $0x888] sm:$0xff]  ;;  %v271_v15 = vld [vmem:[%s9902_s1 + $0x7f0] sm:$0xff]  ;;  %9913 = vst [vmem:[#allocation2_spill] sm:$0xff] %v5382_v61 }
  0x13   :  { %3754 = vmatprep.subr.bf16.mxu0 %v3753_v52  ;;  %3878 = vmatprep.subr.bf16.mxu1 %v3877_v56  ;;  %v269_v13 = vld [vmem:[%s9902_s1 + $0x7e0] sm:$0xff]  ;;  %v3885_v16 = vpack.c.bf16 %v293_v9, %v272_v8  ;;  %v292_v17 = vld [vmem:[%s9902_s1 + $0x898] sm:$0xff]  ;;  %v314_v20 = vld [vmem:[%s9902_s1 + $0x948] sm:$0xff] }
  0x14   :  { %v312_v18 = vld [vmem:[%s9902_s1 + $0x938] sm:$0xff]  ;;  %v333_v19 = vld [vmem:[%s9902_s1 + $0x9e0] sm:$0xff]  ;;  %v335_v21 = vld [vmem:[%s9902_s1 + $0x9f0] sm:$0xff]  ;;  %v3763_v22 = vpack.c.bf16 %v290_v14, %v269_v13  ;;  %v3887_v23 = vpack.c.bf16 %v292_v17, %v271_v15 }
  0x15   :  { %v3765_v24 = vpack.c.bf16 %v333_v19, %v312_v18  ;;  %v311_v25 = vld [vmem:[%s9902_s1 + $0x930] sm:$0xff]  ;;  %v332_v26 = vld [vmem:[%s9902_s1 + $0x9d8] sm:$0xff]  ;;  %v313_v27 = vld [vmem:[%s9902_s1 + $0x940] sm:$0xff]  ;;  %v3889_v28 = vpack.c.bf16 %v335_v21, %v314_v20 }
  0x16   :  { %3756 = vmatpush1.bf16.msra.mxu0 %v3755_v62  ;;  %3880 = vmatpush1.bf16.msra.mxu1 %v3879_v63  ;;  %v334_v29 = vld [vmem:[%s9902_s1 + $0x9e8] sm:$0xff]  ;;  %v375_v31 = vld [vmem:[%s9902_s1 + $0xb30] sm:$0xff]  ;;  %v356_v32 = vld [vmem:[%s9902_s1 + $0xa98] sm:$0xff]  ;;  %v3767_v34 = vpack.c.bf16 %v332_v26, %v311_v25  ;;  %v1455_v62 = vunpack.c.0.s8 %v1454_v48 }
  0x17   :  { %3758 = vmatprep.subr.bf16.mxu0 %v3757_v0  ;;  %3882 = vmatprep.subr.bf16.mxu1 %v3881_v4  ;;  %v354_v30 = vld [vmem:[%s9902_s1 + $0xa88] sm:$0xff]  ;;  %v377_v33 = vld [vmem:[%s9902_s1 + $0xb40] sm:$0xff]  ;;  %v3891_v35 = vpack.c.bf16 %v334_v29, %v313_v27  ;;  %v355_v39 = vld [vmem:[%s9902_s1 + $0xa90] sm:$0xff] }
  0x18   :  { %v3769_v36 = vpack.c.bf16 %v375_v31, %v354_v30  ;;  %v353_v37 = vld [vmem:[%s9902_s1 + $0xa80] sm:$0xff]  ;;  %v374_v38 = vld [vmem:[%s9902_s1 + $0xb28] sm:$0xff]  ;;  %v3893_v40 = vpack.c.bf16 %v377_v33, %v356_v32  ;;  %v376_v41 = vld [vmem:[%s9902_s1 + $0xb38] sm:$0xff] }
  0x19   :  { %v396_v42 = vld [vmem:[%s9902_s1 + $0xbd8] sm:$0xff]  ;;  %v417_v43 = vld [vmem:[%s9902_s1 + $0xc80] sm:$0xff]  ;;  %v398_v44 = vld [vmem:[%s9902_s1 + $0xbe8] sm:$0xff]  ;;  %v3771_v49 = vpack.c.bf16 %v374_v38, %v353_v37  ;;  %v3895_v50 = vpack.c.bf16 %v376_v41, %v355_v39 }
  0x1a   :  { %3760 = vmatpush1.bf16.msra.mxu0 %v3759_v10  ;;  %3884 = vmatpush1.bf16.msra.mxu1 %v3883_v11  ;;  %v419_v45 = vld [vmem:[%s9902_s1 + $0xc90] sm:$0xff]  ;;  %v3773_v51 = vpack.c.bf16 %v417_v43, %v396_v42  ;;  %v416_v53 = vld [vmem:[%s9902_s1 + $0xc78] sm:$0xff]  ;;  %v397_v54 = vld [vmem:[%s9902_s1 + $0xbe0] sm:$0xff]  ;;  %v5409_v11 = vsub.s32 %v1455_v62, %v5382_v61 }
  0x1b   :  { %3762 = vmatprep.subr.bf16.mxu0 %v3761_v12  ;;  %3886 = vmatprep.subr.bf16.mxu1 %v3885_v16  ;;  %v395_v52 = vld [vmem:[%s9902_s1 + $0xbd0] sm:$0xff]  ;;  %v3897_v55 = vpack.c.bf16 %v419_v45, %v398_v44  ;;  %v418_v56 = vld [vmem:[%s9902_s1 + $0xc88] sm:$0xff]  ;;  %v440_v59 = vld [vmem:[%s9902_s1 + $0xd38] sm:$0xff] }
  0x1c   :  { %v438_v57 = vld [vmem:[%s9902_s1 + $0xd28] sm:$0xff]  ;;  %v459_v58 = vld [vmem:[%s9902_s1 + $0xdd0] sm:$0xff]  ;;  %v461_v60 = vld [vmem:[%s9902_s1 + $0xde0] sm:$0xff]  ;;  %v3775_v63 = vpack.c.bf16 %v416_v53, %v395_v52  ;;  %v3899_v0 = vpack.c.bf16 %v418_v56, %v397_v54 }
  0x1d   :  { %v3777_v1 = vpack.c.bf16 %v459_v58, %v438_v57  ;;  %v437_v2 = vld [vmem:[%s9902_s1 + $0xd20] sm:$0xff]  ;;  %v458_v3 = vld [vmem:[%s9902_s1 + $0xdc8] sm:$0xff]  ;;  %v439_v4 = vld [vmem:[%s9902_s1 + $0xd30] sm:$0xff]  ;;  %v3901_v5 = vpack.c.bf16 %v461_v60, %v440_v59 }
  0x1e   :  { %3764 = vmatpush1.bf16.msra.mxu0 %v3763_v22  ;;  %3888 = vmatpush1.bf16.msra.mxu1 %v3887_v23  ;;  %v460_v6 = vld [vmem:[%s9902_s1 + $0xdd8] sm:$0xff]  ;;  %v501_v8 = vld [vmem:[%s9902_s1 + $0xf20] sm:$0xff]  ;;  %v482_v9 = vld [vmem:[%s9902_s1 + $0xe88] sm:$0xff]  ;;  %v3779_v12 = vpack.c.bf16 %v458_v3, %v437_v2 }
  0x1f   :  { %3766 = vmatprep.subr.bf16.mxu0 %v3765_v24  ;;  %3890 = vmatprep.subr.bf16.mxu1 %v3889_v28  ;;  %v480_v7 = vld [vmem:[%s9902_s1 + $0xe78] sm:$0xff]  ;;  %v503_v10 = vld [vmem:[%s9902_s1 + $0xf30] sm:$0xff]  ;;  %v3903_v14 = vpack.c.bf16 %v460_v6, %v439_v4  ;;  %v481_v17 = vld [vmem:[%s9902_s1 + $0xe80] sm:$0xff] }
  0x20   :  { %v479_v13 = vld [vmem:[%s9902_s1 + $0xe70] sm:$0xff]  ;;  %v3781_v15 = vpack.c.bf16 %v501_v8, %v480_v7  ;;  %v500_v16 = vld [vmem:[%s9902_s1 + $0xf18] sm:$0xff]  ;;  %v502_v18 = vld [vmem:[%s9902_s1 + $0xf28] sm:$0xff]  ;;  %v3905_v19 = vpack.c.bf16 %v503_v10, %v482_v9 }
  0x21   :  { %v522_v20 = vld [vmem:[%s9902_s1 + $0xfc8] sm:$0xff]  ;;  %v543_v21 = vld [vmem:[%s9902_s1 + $0x1070] sm:$0xff]  ;;  %v5432_v22 = vld [vmem:[%s9903_s0] sm:$0xff]  ;;  %v3783_v26 = vpack.c.bf16 %v500_v16, %v479_v13  ;;  %v3907_v27 = vpack.c.bf16 %v502_v18, %v481_v17 }
  0x22   :  { %3768 = vmatpush1.bf16.msra.mxu0 %v3767_v34  ;;  %3892 = vmatpush1.bf16.msra.mxu1 %v3891_v35  ;;  %v524_v23 = vld [vmem:[%s9902_s1 + $0xfd8] sm:$0xff]  ;;  %v545_v24 = vld [vmem:[%s9902_s1 + $0x1080] sm:$0xff]  ;;  %v5442_v25 = vrot.slane %v5432_v22, %v5409_v11  ;;  %v3785_v28 = vpack.c.bf16 %v543_v21, %v522_v20  ;;  %v542_v30 = vld [vmem:[%s9902_s1 + $0x1068] sm:$0xff] }
  0x23   :  { %3770 = vmatprep.subr.bf16.mxu0 %v3769_v36  ;;  %3894 = vmatprep.subr.bf16.mxu1 %v3893_v40  ;;  %v521_v29 = vld [vmem:[%s9902_s1 + $0xfc0] sm:$0xff]  ;;  %v523_v31 = vld [vmem:[%s9902_s1 + $0xfd0] sm:$0xff]  ;;  %v3909_v33 = vpack.c.bf16 %v545_v24, %v524_v23  ;;  %v544_v34 = vld [vmem:[%s9902_s1 + $0x1078] sm:$0xff] }
  0x24   :  { %v5455_v32 = vcombine.high %v5442_v25, %v5442_v25  ;;  %v564_v35 = vld [vmem:[%s9902_s1 + $0x1118] sm:$0xff]  ;;  %v585_v36 = vld [vmem:[%s9902_s1 + $0x11c0] sm:$0xff]  ;;  %v566_v37 = vld [vmem:[%s9902_s1 + $0x1128] sm:$0xff]  ;;  %v3787_v39 = vpack.c.bf16 %v542_v30, %v521_v29  ;;  %v3911_v40 = vpack.c.bf16 %v544_v34, %v523_v31 }
  0x25   :  { %v587_v38 = vld [vmem:[%s9902_s1 + $0x11d0] sm:$0xff]  ;;  %v3789_v41 = vpack.c.bf16 %v585_v36, %v564_v35  ;;  %v584_v43 = vld [vmem:[%s9902_s1 + $0x11b8] sm:$0xff]  ;;  %v565_v44 = vld [vmem:[%s9902_s1 + $0x1120] sm:$0xff] }
  0x26   :  { %3772 = vmatpush1.bf16.msra.mxu0 %v3771_v49  ;;  %3896 = vmatpush1.bf16.msra.mxu1 %v3895_v50  ;;  %v563_v42 = vld [vmem:[%s9902_s1 + $0x1110] sm:$0xff]  ;;  %v3913_v45 = vpack.c.bf16 %v587_v38, %v566_v37  ;;  %v586_v47 = vld [vmem:[%s9902_s1 + $0x11c8] sm:$0xff]  ;;  %v608_v50 = vld [vmem:[%s9902_s1 + $0x1278] sm:$0xff] }
  0x27   :  { %3774 = vmatprep.subr.bf16.mxu0 %v3773_v51  ;;  %3898 = vmatprep.subr.bf16.mxu1 %v3897_v55  ;;  %v606_v48 = vld [vmem:[%s9902_s1 + $0x1268] sm:$0xff]  ;;  %v627_v49 = vld [vmem:[%s9902_s1 + $0x1310] sm:$0xff]  ;;  %v629_v51 = vld [vmem:[%s9902_s1 + $0x1320] sm:$0xff]  ;;  %v3791_v52 = vpack.c.bf16 %v584_v43, %v563_v42  ;;  %v3915_v53 = vpack.c.bf16 %v586_v47, %v565_v44 }
  0x28   :  { %1539 = vmatprep.mubr.f32.mxu0 %v5455_v32  ;;  %1681 = vmatprep.mubr.f32.mxu1 %v5455_v32  ;;  %v3793_v54 = vpack.c.bf16 %v627_v49, %v606_v48  ;;  %v605_v55 = vld [vmem:[%s9902_s1 + $0x1260] sm:$0xff]  ;;  %v626_v56 = vld [vmem:[%s9902_s1 + $0x1308] sm:$0xff]  ;;  %v607_v57 = vld [vmem:[%s9902_s1 + $0x1270] sm:$0xff]  ;;  %v3917_v58 = vpack.c.bf16 %v629_v51, %v608_v50 }
  0x29   :  { %v628_v59 = vld [vmem:[%s9902_s1 + $0x1318] sm:$0xff]  ;;  %v669_v62 = vld [vmem:[%s9902_s1 + $0x1460] sm:$0xff]  ;;  %v647_v4 = vld [vmem:[%s9902_s1 + $0x13b0] sm:$0xff] }
  0x2a   :  { %3776 = vmatpush1.bf16.msra.mxu0 %v3775_v63  ;;  %3900 = vmatpush1.bf16.msra.mxu1 %v3899_v0  ;;  %v648_v60 = vld [vmem:[%s9902_s1 + $0x13b8] sm:$0xff]  ;;  %v650_v63 = vld [vmem:[%s9902_s1 + $0x13c8] sm:$0xff]  ;;  %v671_v0 = vld [vmem:[%s9902_s1 + $0x1470] sm:$0xff]  ;;  %v3919_v2 = vpack.c.bf16 %v628_v59, %v607_v57 }
  0x2b   :  { %3778 = vmatprep.subr.bf16.mxu0 %v3777_v1  ;;  %3902 = vmatprep.subr.bf16.mxu1 %v3901_v5  ;;  %v3795_v1 = vpack.c.bf16 %v626_v56, %v605_v55  ;;  %v3797_v3 = vpack.c.bf16 %v669_v62, %v648_v60  ;;  %v668_v5 = vld [vmem:[%s9902_s1 + $0x1458] sm:$0xff]  ;;  %v649_v6 = vld [vmem:[%s9902_s1 + $0x13c0] sm:$0xff]  ;;  %v3921_v7 = vpack.c.bf16 %v671_v0, %v650_v63  ;;  %v670_v8 = vld [vmem:[%s9902_s1 + $0x1468] sm:$0xff] }
  0x2c   :  { %v690_v9 = vld [vmem:[%s9902_s1 + $0x1508] sm:$0xff]  ;;  %v711_v10 = vld [vmem:[%s9902_s1 + $0x15b0] sm:$0xff]  ;;  %v692_v13 = vld [vmem:[%s9902_s1 + $0x1518] sm:$0xff]  ;;  %v3923_v16 = vpack.c.bf16 %v670_v8, %v649_v6 }
  0x2d   :  { %v3801_v17 = vpack.c.bf16 %v711_v10, %v690_v9  ;;  %v689_v18 = vld [vmem:[%s9902_s1 + $0x1500] sm:$0xff]  ;;  %v691_v20 = vld [vmem:[%s9902_s1 + $0x1510] sm:$0xff]  ;;  %v732_v23 = vld [vmem:[%s9902_s1 + $0x1658] sm:$0xff] }
  0x2e   :  { %3780 = vmatpush1.bf16.msra.mxu0 %v3779_v12  ;;  %3904 = vmatpush1.bf16.msra.mxu1 %v3903_v14  ;;  %v1452_v12 = vcombine.high %v5432_v22, %v5432_v22  ;;  %v713_v14 = vld [vmem:[%s9902_s1 + $0x15c0] sm:$0xff]  ;;  %v712_v22 = vld [vmem:[%s9902_s1 + $0x15b8] sm:$0xff]  ;;  %v754_v36 = vld [vmem:[%s9902_s1 + $0x1708] sm:$0xff] }
  0x2f   :  { %3782 = vmatprep.subr.bf16.mxu0 %v3781_v15  ;;  %3906 = vmatprep.subr.bf16.mxu1 %v3905_v19  ;;  %v3799_v15 = vpack.c.bf16 %v668_v5, %v647_v4  ;;  %v710_v19 = vld [vmem:[%s9902_s1 + $0x15a8] sm:$0xff]  ;;  %v3925_v21 = vpack.c.bf16 %v713_v14, %v692_v13  ;;  %v753_v24 = vld [vmem:[%s9902_s1 + $0x1700] sm:$0xff]  ;;  %v3927_v30 = vpack.c.bf16 %v712_v22, %v691_v20  ;;  %v795_v38 = vld [vmem:[%s9902_s1 + $0x1850] sm:$0xff] }
  0x30   :  { %v3803_v29 = vpack.c.bf16 %v710_v19, %v689_v18  ;;  %v3805_v31 = vpack.c.bf16 %v753_v24, %v732_v23  ;;  %v733_v34 = vld [vmem:[%s9902_s1 + $0x1660] sm:$0xff]  ;;  %v774_v37 = vld [vmem:[%s9902_s1 + $0x17a8] sm:$0xff]  ;;  %v775_v48 = vld [vmem:[%s9902_s1 + $0x17b0] sm:$0xff] }
  0x31   :  { %v3931_v43 = vpack.c.bf16 %v754_v36, %v733_v34  ;;  %v3809_v44 = vpack.c.bf16 %v795_v38, %v774_v37  ;;  %v794_v47 = vld [vmem:[%s9902_s1 + $0x1848] sm:$0xff]  ;;  %v796_v50 = vld [vmem:[%s9902_s1 + $0x1858] sm:$0xff]  ;;  %v817_v60 = vld [vmem:[%s9902_s1 + $0x1900] sm:$0xff] }
  0x32   :  { %3784 = vmatpush1.bf16.msra.mxu0 %v3783_v26  ;;  %3908 = vmatpush1.bf16.msra.mxu1 %v3907_v27  ;;  %v5567_v26 = vrot.slane %v1452_v12, %v5409_v11  ;;  %v734_v27 = vld [vmem:[%s9902_s1 + $0x1668] sm:$0xff]  ;;  %v752_v11 = vld [vmem:[%s9902_s1 + $0x16f8] sm:$0xff]  ;;  %v3935_v56 = vpack.c.bf16 %v796_v50, %v775_v48  ;;  %v859_v9 = vld [vmem:[%s9902_s1 + $0x1a50] sm:$0xff] }
  0x33   :  { %3786 = vmatprep.subr.bf16.mxu0 %v3785_v28  ;;  %3910 = vmatprep.subr.bf16.mxu1 %v3909_v33  ;;  %v755_v28 = vld [vmem:[%s9902_s1 + $0x1710] sm:$0xff]  ;;  %v816_v51 = vld [vmem:[%s9902_s1 + $0x18f8] sm:$0xff]  ;;  %v838_v63 = vld [vmem:[%s9902_s1 + $0x19a8] sm:$0xff] }
  0x34   :  { %v731_v33 = vld [vmem:[%s9902_s1 + $0x1650] sm:$0xff]  ;;  %v3929_v35 = vpack.c.bf16 %v755_v28, %v734_v27  ;;  %v836_v59 = vld [vmem:[%s9902_s1 + $0x1998] sm:$0xff]  ;;  %v858_v0 = vld [vmem:[%s9902_s1 + $0x1a48] sm:$0xff]  ;;  %v3939_v5 = vpack.c.bf16 %v838_v63, %v817_v60 }
  0x35   :  { %v3807_v42 = vpack.c.bf16 %v752_v11, %v731_v33  ;;  %v878_v8 = vld [vmem:[%s9902_s1 + $0x1ae8] sm:$0xff]  ;;  %v880_v12 = vld [vmem:[%s9902_s1 + $0x1af8] sm:$0xff]  ;;  %v921_v14 = vld [vmem:[%s9902_s1 + $0x1c40] sm:$0xff] }
  0x36   :  { %3788 = vmatpush1.bf16.msra.mxu0 %v3787_v39  ;;  %3912 = vmatpush1.bf16.msra.mxu1 %v3911_v40  ;;  %v5595_v39 = vcombine.high %v5567_v26, %v5567_v26  ;;  %v776_v40 = vld [vmem:[%s9902_s1 + $0x17b8] sm:$0xff]  ;;  %v3943_v18 = vpack.c.bf16 %v880_v12, %v859_v9  ;;  %v899_v20 = vld [vmem:[%s9902_s1 + $0x1b90] sm:$0xff]  ;;  %v901_v22 = vld [vmem:[%s9902_s1 + $0x1ba0] sm:$0xff] }
  0x37   :  { %3790 = vmatprep.subr.bf16.mxu0 %v3789_v41  ;;  %3914 = vmatprep.subr.bf16.mxu1 %v3913_v45  ;;  %v797_v41 = vld [vmem:[%s9902_s1 + $0x1860] sm:$0xff]  ;;  %v900_v13 = vld [vmem:[%s9902_s1 + $0x1b98] sm:$0xff]  ;;  %v922_v24 = vld [vmem:[%s9902_s1 + $0x1c48] sm:$0xff] }
  0x38   :  { %v773_v45 = vld [vmem:[%s9902_s1 + $0x17a0] sm:$0xff]  ;;  %v3933_v49 = vpack.c.bf16 %v797_v41, %v776_v40  ;;  %v3821_v19 = vpack.c.bf16 %v921_v14, %v900_v13  ;;  %v942_v27 = vld [vmem:[%s9902_s1 + $0x1ce8] sm:$0xff]  ;;  %v963_v28 = vld [vmem:[%s9902_s1 + $0x1d90] sm:$0xff]  ;;  %v3947_v33 = vpack.c.bf16 %v922_v24, %v901_v22 }
  0x39   :  { %v3811_v55 = vpack.c.bf16 %v794_v47, %v773_v45  ;;  %v3825_v11 = vpack.c.bf16 %v963_v28, %v942_v27  ;;  %v941_v34 = vld [vmem:[%s9902_s1 + $0x1ce0] sm:$0xff]  ;;  %v943_v36 = vld [vmem:[%s9902_s1 + $0x1cf0] sm:$0xff]  ;;  %v964_v38 = vld [vmem:[%s9902_s1 + $0x1d98] sm:$0xff] }
  0x3a   :  { %3792 = vmatpush1.bf16.msra.mxu0 %v3791_v52  ;;  %3916 = vmatpush1.bf16.msra.mxu1 %v3915_v53  ;;  %v837_v52 = vld [vmem:[%s9902_s1 + $0x19a0] sm:$0xff]  ;;  %v818_v53 = vld [vmem:[%s9902_s1 + $0x1908] sm:$0xff]  ;;  %v984_v40 = vld [vmem:[%s9902_s1 + $0x1e38] sm:$0xff]  ;;  %v3951_v45 = vpack.c.bf16 %v964_v38, %v943_v36 }
  0x3b   :  { %3794 = vmatprep.subr.bf16.mxu0 %v3793_v54  ;;  %3918 = vmatprep.subr.bf16.mxu1 %v3917_v58  ;;  %v839_v54 = vld [vmem:[%s9902_s1 + $0x19b0] sm:$0xff]  ;;  %v3813_v57 = vpack.c.bf16 %v837_v52, %v816_v51  ;;  %v1005_v41 = vld [vmem:[%s9902_s1 + $0x1ee0] sm:$0xff]  ;;  %v1006_v52 = vld [vmem:[%s9902_s1 + $0x1ee8] sm:$0xff] }
  0x3c   :  { %v815_v58 = vld [vmem:[%s9902_s1 + $0x18f0] sm:$0xff]  ;;  %v3937_v62 = vpack.c.bf16 %v839_v54, %v818_v53  ;;  %v3829_v47 = vpack.c.bf16 %v1005_v41, %v984_v40  ;;  %v985_v50 = vld [vmem:[%s9902_s1 + $0x1e40] sm:$0xff]  ;;  %v1026_v53 = vld [vmem:[%s9902_s1 + $0x1f88] sm:$0xff] }
  0x3d   :  { %v3815_v4 = vpack.c.bf16 %v836_v59, %v815_v58  ;;  %v983_v48 = vld [vmem:[%s9902_s1 + $0x1e30] sm:$0xff]  ;;  %v3955_v58 = vpack.c.bf16 %v1006_v52, %v985_v50  ;;  %v1025_v60 = vld [vmem:[%s9902_s1 + $0x1f80] sm:$0xff]  ;;  %v1090_v14 = vld [vmem:[%s9902_s1 + $0x2188] sm:$0xff] }
  0x3e   :  { %3796 = vmatpush1.bf16.msra.mxu0 %v3795_v1  ;;  %3920 = vmatpush1.bf16.msra.mxu1 %v3919_v2  ;;  %v879_v1 = vld [vmem:[%s9902_s1 + $0x1af0] sm:$0xff]  ;;  %v860_v2 = vld [vmem:[%s9902_s1 + $0x1a58] sm:$0xff]  ;;  %v1069_v12 = vld [vmem:[%s9902_s1 + $0x20e0] sm:$0xff] }
  0x3f   :  { %3798 = vmatprep.subr.bf16.mxu0 %v3797_v3  ;;  %3922 = vmatprep.subr.bf16.mxu1 %v3921_v7  ;;  %v881_v3 = vld [vmem:[%s9902_s1 + $0x1b00] sm:$0xff]  ;;  %v3817_v6 = vpack.c.bf16 %v879_v1, %v858_v0  ;;  %v1047_v54 = vld [vmem:[%s9902_s1 + $0x2030] sm:$0xff]  ;;  %v1048_v1 = vld [vmem:[%s9902_s1 + $0x2038] sm:$0xff] }
  0x40   :  { %v857_v7 = vld [vmem:[%s9902_s1 + $0x1a40] sm:$0xff]  ;;  %v3941_v10 = vpack.c.bf16 %v881_v3, %v860_v2  ;;  %v3833_v59 = vpack.c.bf16 %v1047_v54, %v1026_v53  ;;  %v1027_v63 = vld [vmem:[%s9902_s1 + $0x1f90] sm:$0xff]  ;;  %v1068_v2 = vld [vmem:[%s9902_s1 + $0x20d8] sm:$0xff] }
  0x41   :  { %v1089_v3 = vld [vmem:[%s9902_s1 + $0x2180] sm:$0xff]  ;;  %v1067_v9 = vld [vmem:[%s9902_s1 + $0x20d0] sm:$0xff]  ;;  %v1132_v28 = vld [vmem:[%s9902_s1 + $0x22d8] sm:$0xff] }
  0x42   :  { %3800 = vmatpush1.bf16.msra.mxu0 %v3799_v15  ;;  %3924 = vmatpush1.bf16.msra.mxu1 %v3923_v16  ;;  %v902_v15 = vld [vmem:[%s9902_s1 + $0x1ba8] sm:$0xff]  ;;  %v923_v16 = vld [vmem:[%s9902_s1 + $0x1c50] sm:$0xff]  ;;  %v1109_v22 = vld [vmem:[%s9902_s1 + $0x2220] sm:$0xff] }
  0x43   :  { %3802 = vmatprep.subr.bf16.mxu0 %v3801_v17  ;;  %3926 = vmatprep.subr.bf16.mxu1 %v3925_v21  ;;  %v3819_v17 = vpack.c.bf16 %v878_v8, %v857_v7  ;;  %v920_v21 = vld [vmem:[%s9902_s1 + $0x1c38] sm:$0xff]  ;;  %v3945_v23 = vpack.c.bf16 %v923_v16, %v902_v15  ;;  %v3959_v7 = vpack.c.bf16 %v1048_v1, %v1027_v63  ;;  %v1110_v15 = vld [vmem:[%s9902_s1 + $0x2228] sm:$0xff]  ;;  %v1131_v16 = vld [vmem:[%s9902_s1 + $0x22d0] sm:$0xff] }
  0x44   :  { %v3837_v8 = vpack.c.bf16 %v1089_v3, %v1068_v2  ;;  %v1111_v24 = vld [vmem:[%s9902_s1 + $0x2230] sm:$0xff]  ;;  %v1153_v38 = vld [vmem:[%s9902_s1 + $0x2380] sm:$0xff]  ;;  %v1174_v41 = vld [vmem:[%s9902_s1 + $0x2428] sm:$0xff] }
  0x45   :  { %1540 = vmatmul.mubr.f32.vlgmr.msra.gmra.mrb[0].mxu0 %v5442_v25  ;;  %1682 = vmatmul.mubr.f32.vlgmr.msra.gmra.mrb[0].mxu1 %v5442_v25  ;;  %v1151_v36 = vld [vmem:[%s9902_s1 + $0x2370] sm:$0xff]  ;;  %v1193_v50 = vld [vmem:[%s9902_s1 + $0x24c0] sm:$0xff]  ;;  %v1216_v54 = vld [vmem:[%s9902_s1 + $0x2578] sm:$0xff] }
  0x46   :  { %3804 = vmatpush1.bf16.msra.mxu0 %v3803_v29  ;;  %3928 = vmatpush1.bf16.msra.mxu1 %v3927_v30  ;;  %v944_v29 = vld [vmem:[%s9902_s1 + $0x1cf8] sm:$0xff]  ;;  %v965_v30 = vld [vmem:[%s9902_s1 + $0x1da0] sm:$0xff]  ;;  %v1195_v52 = vld [vmem:[%s9902_s1 + $0x24d0] sm:$0xff] }
  0x47   :  { %3806 = vmatprep.subr.bf16.mxu0 %v3805_v31  ;;  %3930 = vmatprep.subr.bf16.mxu1 %v3929_v35  ;;  %v3823_v31 = vpack.c.bf16 %v920_v21, %v899_v20  ;;  %v962_v35 = vld [vmem:[%s9902_s1 + $0x1d88] sm:$0xff]  ;;  %v3949_v37 = vpack.c.bf16 %v965_v30, %v944_v29  ;;  %v3963_v20 = vpack.c.bf16 %v1090_v14, %v1069_v12  ;;  %v1152_v29 = vld [vmem:[%s9902_s1 + $0x2378] sm:$0xff]  ;;  %v1173_v30 = vld [vmem:[%s9902_s1 + $0x2420] sm:$0xff] }
  0x48   :  { %3691 = vmatprep.mubr.msk.f32.mxu0 %vm1472_vm0, %v5595_v39  ;;  %3692 = vmatprep.mubr.msk.f32.mxu1 %vm1472_vm0, %v5595_v39  ;;  %v3841_v21 = vpack.c.bf16 %v1131_v16, %v1110_v15  ;;  %v1235_v63 = vld [vmem:[%s9902_s1 + $0x2610] sm:$0xff]  ;;  %v1237_v1 = vld [vmem:[%s9902_s1 + $0x2620] sm:$0xff]  ;;  %v1258_v3 = vld [vmem:[%s9902_s1 + $0x26c8] sm:$0xff] }
  0x49   :  { %v1277_v12 = vld [vmem:[%s9902_s1 + $0x2760] sm:$0xff]  ;;  %v1279_v15 = vld [vmem:[%s9902_s1 + $0x2770] sm:$0xff]  ;;  %v1300_v16 = vld [vmem:[%s9902_s1 + $0x2818] sm:$0xff] }
  0x4a   :  { %3808 = vmatpush1.bf16.msra.mxu0 %v3807_v42  ;;  %3932 = vmatpush1.bf16.msra.mxu1 %v3931_v43  ;;  %v986_v42 = vld [vmem:[%s9902_s1 + $0x1e48] sm:$0xff]  ;;  %v1007_v43 = vld [vmem:[%s9902_s1 + $0x1ef0] sm:$0xff] }
  0x4b   :  { %3810 = vmatprep.subr.bf16.mxu0 %v3809_v44  ;;  %3934 = vmatprep.subr.bf16.mxu1 %v3933_v49  ;;  %v3827_v44 = vpack.c.bf16 %v962_v35, %v941_v34  ;;  %v1004_v49 = vld [vmem:[%s9902_s1 + $0x1ed8] sm:$0xff]  ;;  %v3953_v51 = vpack.c.bf16 %v1007_v43, %v986_v42  ;;  %v3967_v34 = vpack.c.bf16 %v1132_v28, %v1111_v24  ;;  %v1194_v42 = vld [vmem:[%s9902_s1 + $0x24c8] sm:$0xff]  ;;  %v1215_v43 = vld [vmem:[%s9902_s1 + $0x2570] sm:$0xff] }
  0x4c   :  { %v3845_v35 = vpack.c.bf16 %v1173_v30, %v1152_v29  ;;  %v24_v24 = vld [vmem:[%s9902_s1 + $0x38] sm:$0xff]  ;;  %v21_v28 = vld [vmem:[%s9902_s1 + $0x20] sm:$0xff]  ;;  %v42_v29 = vld [vmem:[%s9902_s1 + $0xc8] sm:$0xff] }
  0x4d   :  { %v23_v30 = vld [vmem:[%s9902_s1 + $0x30] sm:$0xff] }
  0x4e   :  { %3812 = vmatpush1.bf16.msra.mxu0 %v3811_v55  ;;  %3936 = vmatpush1.bf16.msra.mxu1 %v3935_v56  ;;  %v1028_v55 = vld [vmem:[%s9902_s1 + $0x1f98] sm:$0xff]  ;;  %v1049_v56 = vld [vmem:[%s9902_s1 + $0x2040] sm:$0xff] }
  0x4f   :  { %3814 = vmatprep.subr.bf16.mxu0 %v3813_v57  ;;  %3938 = vmatprep.subr.bf16.mxu1 %v3937_v62  ;;  %v3831_v57 = vpack.c.bf16 %v1004_v49, %v983_v48  ;;  %v1046_v62 = vld [vmem:[%s9902_s1 + $0x2028] sm:$0xff]  ;;  %v3957_v0 = vpack.c.bf16 %v1049_v56, %v1028_v55  ;;  %v3971_v48 = vpack.c.bf16 %v1174_v41, %v1153_v38  ;;  %v1236_v55 = vld [vmem:[%s9902_s1 + $0x2618] sm:$0xff]  ;;  %v1257_v56 = vld [vmem:[%s9902_s1 + $0x26c0] sm:$0xff] }
  0x50   :  { %v3849_v49 = vpack.c.bf16 %v1215_v43, %v1194_v42  ;;  %v63_v43 = vld [vmem:[%s9902_s1 + $0x170] sm:$0xff] }
  0x52   :  { %3816 = vmatpush1.bf16.msra.mxu0 %v3815_v4  ;;  %3940 = vmatpush1.bf16.msra.mxu1 %v3939_v5  ;;  %v1070_v4 = vld [vmem:[%s9902_s1 + $0x20e8] sm:$0xff]  ;;  %v1091_v5 = vld [vmem:[%s9902_s1 + $0x2190] sm:$0xff] }
  0x53   :  { %3818 = vmatprep.subr.bf16.mxu0 %v3817_v6  ;;  %3942 = vmatprep.subr.bf16.mxu1 %v3941_v10  ;;  %v3835_v6 = vpack.c.bf16 %v1046_v62, %v1025_v60  ;;  %v1088_v10 = vld [vmem:[%s9902_s1 + $0x2178] sm:$0xff]  ;;  %v3961_v13 = vpack.c.bf16 %v1091_v5, %v1070_v4  ;;  %v3975_v60 = vpack.c.bf16 %v1216_v54, %v1195_v52  ;;  %v1278_v4 = vld [vmem:[%s9902_s1 + $0x2768] sm:$0xff]  ;;  %v1299_v5 = vld [vmem:[%s9902_s1 + $0x2810] sm:$0xff] }
  0x54   :  { %v3853_v62 = vpack.c.bf16 %v1257_v56, %v1236_v55  ;;  %v129_v52 = vld [vmem:[%s9902_s1 + $0x380] sm:$0xff] }
  0x55   :  { %v105_v56 = vld [vmem:[%s9902_s1 + $0x2c0] sm:$0xff] }
  0x56   :  { %3820 = vmatpush1.bf16.msra.mxu0 %v3819_v17  ;;  %3944 = vmatpush1.bf16.msra.mxu1 %v3943_v18  ;;  %v1112_v17 = vld [vmem:[%s9902_s1 + $0x2238] sm:$0xff]  ;;  %v1133_v18 = vld [vmem:[%s9902_s1 + $0x22e0] sm:$0xff] }
  0x57   :  { %3822 = vmatprep.subr.bf16.mxu0 %v3821_v19  ;;  %3946 = vmatprep.subr.bf16.mxu1 %v3945_v23  ;;  %v3839_v19 = vpack.c.bf16 %v1088_v10, %v1067_v9  ;;  %v1130_v23 = vld [vmem:[%s9902_s1 + $0x22c8] sm:$0xff]  ;;  %v3965_v27 = vpack.c.bf16 %v1133_v18, %v1112_v17  ;;  %v3979_v9 = vpack.c.bf16 %v1258_v3, %v1237_v1  ;;  %v171_v1 = vld [vmem:[%s9902_s1 + $0x4d0] sm:$0xff] }
  0x58   :  { %v3857_v10 = vpack.c.bf16 %v1299_v5, %v1278_v4  ;;  %v3983_v18 = vpack.c.bf16 %v1300_v16, %v1279_v15  ;;  %v147_v5 = vld [vmem:[%s9902_s1 + $0x410] sm:$0xff] }
  0x5a   :  { %3824 = vmatpush1.bf16.msra.mxu0 %v3823_v31  ;;  %3948 = vmatpush1.bf16.msra.mxu1 %v3947_v33  ;;  %v1154_v31 = vld [vmem:[%s9902_s1 + $0x2388] sm:$0xff]  ;;  %v1175_v33 = vld [vmem:[%s9902_s1 + $0x2430] sm:$0xff] }
  0x5b   :  { %3826 = vmatprep.subr.bf16.mxu0 %v3825_v11  ;;  %3950 = vmatprep.subr.bf16.mxu1 %v3949_v37  ;;  %v3843_v11 = vpack.c.bf16 %v1130_v23, %v1109_v22  ;;  %v1172_v37 = vld [vmem:[%s9902_s1 + $0x2418] sm:$0xff]  ;;  %v3969_v40 = vpack.c.bf16 %v1175_v33, %v1154_v31  ;;  %v1319_v22 = vld [vmem:[%s9902_s1 + $0x28b0] sm:$0xff] }
  0x5c   :  { %v43_v23 = vld [vmem:[%s9902_s1 + $0xd0] sm:$0xff]  ;;  %v44_v31 = vld [vmem:[%s9902_s1 + $0xd8] sm:$0xff] }
  0x5d   :  { %v64_v33 = vld [vmem:[%s9902_s1 + $0x178] sm:$0xff]  ;;  %v4111_v41 = vpack.c.bf16 %v44_v31, %v23_v30 }
  0x5e   :  { %3828 = vmatpush1.bf16.msra.mxu0 %v3827_v44  ;;  %3952 = vmatpush1.bf16.msra.mxu1 %v3951_v45  ;;  %v1196_v44 = vld [vmem:[%s9902_s1 + $0x24d8] sm:$0xff]  ;;  %v1217_v45 = vld [vmem:[%s9902_s1 + $0x2580] sm:$0xff] }
  0x5f   :  { %3830 = vmatprep.subr.bf16.mxu0 %v3829_v47  ;;  %3954 = vmatprep.subr.bf16.mxu1 %v3953_v51  ;;  %v3847_v47 = vpack.c.bf16 %v1172_v37, %v1151_v36  ;;  %v1214_v51 = vld [vmem:[%s9902_s1 + $0x2568] sm:$0xff]  ;;  %v3973_v53 = vpack.c.bf16 %v1217_v45, %v1196_v44  ;;  %v87_v37 = vld [vmem:[%s9902_s1 + $0x230] sm:$0xff]  ;;  %v84_v44 = vld [vmem:[%s9902_s1 + $0x218] sm:$0xff] }
  0x60   :  { %v66_v36 = vld [vmem:[%s9902_s1 + $0x188] sm:$0xff]  ;;  %v65_v45 = vld [vmem:[%s9902_s1 + $0x180] sm:$0xff] }
  0x62   :  { %3832 = vmatpush1.bf16.msra.mxu0 %v3831_v57  ;;  %3956 = vmatpush1.bf16.msra.mxu1 %v3955_v58  ;;  %v1238_v57 = vld [vmem:[%s9902_s1 + $0x2628] sm:$0xff]  ;;  %v1259_v58 = vld [vmem:[%s9902_s1 + $0x26d0] sm:$0xff] }
  0x63   :  { %3834 = vmatprep.subr.bf16.mxu0 %v3833_v59  ;;  %3958 = vmatprep.subr.bf16.mxu1 %v3957_v0  ;;  %v3851_v59 = vpack.c.bf16 %v1214_v51, %v1193_v50  ;;  %v1256_v0 = vld [vmem:[%s9902_s1 + $0x26b8] sm:$0xff]  ;;  %v3977_v2 = vpack.c.bf16 %v1259_v58, %v1238_v57  ;;  %v127_v50 = vld [vmem:[%s9902_s1 + $0x370] sm:$0xff]  ;;  %v126_v57 = vld [vmem:[%s9902_s1 + $0x368] sm:$0xff] }
  0x64   :  { %v108_v51 = vld [vmem:[%s9902_s1 + $0x2d8] sm:$0xff]  ;;  %v107_v58 = vld [vmem:[%s9902_s1 + $0x2d0] sm:$0xff] }
  0x66   :  { %3836 = vmatpush1.bf16.msra.mxu0 %v3835_v6  ;;  %3960 = vmatpush1.bf16.msra.mxu1 %v3959_v7  ;;  %v1280_v6 = vld [vmem:[%s9902_s1 + $0x2778] sm:$0xff]  ;;  %v1301_v7 = vld [vmem:[%s9902_s1 + $0x2820] sm:$0xff] }
  0x67   :  { %3838 = vmatprep.subr.bf16.mxu0 %v3837_v8  ;;  %3962 = vmatprep.subr.bf16.mxu1 %v3961_v13  ;;  %v3855_v8 = vpack.c.bf16 %v1256_v0, %v1235_v63  ;;  %v1298_v13 = vld [vmem:[%s9902_s1 + $0x2808] sm:$0xff]  ;;  %v3981_v14 = vpack.c.bf16 %v1301_v7, %v1280_v6  ;;  %v169_v63 = vld [vmem:[%s9902_s1 + $0x4c0] sm:$0xff]  ;;  %v168_v6 = vld [vmem:[%s9902_s1 + $0x4b8] sm:$0xff] }
  0x68   :  { %v3859_v17 = vpack.c.bf16 %v1298_v13, %v1277_v12  ;;  %v150_v0 = vld [vmem:[%s9902_s1 + $0x428] sm:$0xff]  ;;  %v149_v7 = vld [vmem:[%s9902_s1 + $0x420] sm:$0xff]  ;;  %v211_v12 = vld [vmem:[%s9902_s1 + $0x610] sm:$0xff]  ;;  %v3999_v15 = vpack.c.bf16 %v168_v6, %v147_v5 }
  0x69   :  { %v192_v13 = vld [vmem:[%s9902_s1 + $0x578] sm:$0xff] }
  0x6a   :  { %3840 = vmatpush1.bf16.msra.mxu0 %v3839_v19  ;;  %3964 = vmatpush1.bf16.msra.mxu1 %v3963_v20  ;;  %v1320_v19 = vld [vmem:[%s9902_s1 + $0x28b8] sm:$0xff]  ;;  %v1322_v20 = vld [vmem:[%s9902_s1 + $0x28c8] sm:$0xff] }
  0x6b   :  { %3842 = vmatprep.subr.bf16.mxu0 %v3841_v21  ;;  %3966 = vmatprep.subr.bf16.mxu1 %v3965_v27  ;;  %v22_v21 = vld [vmem:[%s9902_s1 + $0x28] sm:$0xff]  ;;  %v45_v27 = vld [vmem:[%s9902_s1 + $0xe0] sm:$0xff] }
  0x6c   :  { %v4109_v38 = vpack.c.bf16 %v45_v27, %v24_v24  ;;  %v253_v24 = vld [vmem:[%s9902_s1 + $0x760] sm:$0xff]  ;;  %v234_v27 = vld [vmem:[%s9902_s1 + $0x6c8] sm:$0xff] }
  0x6e   :  { %3844 = vmatpush1.bf16.msra.mxu0 %v3843_v11  ;;  %3968 = vmatpush1.bf16.msra.mxu1 %v3967_v34  ;;  %v85_v11 = vld [vmem:[%s9902_s1 + $0x220] sm:$0xff] }
  0x6f   :  { %3846 = vmatprep.subr.bf16.mxu0 %v3845_v35  ;;  %3970 = vmatprep.subr.bf16.mxu1 %v3969_v40  ;;  %v1321_v34 = vld [vmem:[%s9902_s1 + $0x28c0] sm:$0xff]  ;;  %v3985_v35 = vpack.c.bf16 %v43_v23, %v22_v21  ;;  %v3987_v40 = vpack.c.bf16 %v42_v29, %v21_v28  ;;  %v3989_v42 = vpack.c.bf16 %v85_v11, %v64_v33  ;;  %v232_v23 = vld [vmem:[%s9902_s1 + $0x6b8] sm:$0xff]  ;;  %v255_v28 = vld [vmem:[%s9902_s1 + $0x770] sm:$0xff] }
  0x70   :  { %v4005_v31 = vpack.c.bf16 %v253_v24, %v232_v23  ;;  %v231_v33 = vld [vmem:[%s9902_s1 + $0x6b0] sm:$0xff]  ;;  %v252_v11 = vld [vmem:[%s9902_s1 + $0x758] sm:$0xff]  ;;  %v422_v24 = vld [vmem:[%s9902_s1 + $0xca8] sm:$0xff] }
  0x72   :  { %3848 = vmatpush1.bf16.msra.mxu0 %v3847_v47  ;;  %3972 = vmatpush1.bf16.msra.mxu1 %v3971_v48  ;;  %v4113_v47 = vpack.c.bf16 %v87_v37, %v66_v36  ;;  %v86_v48 = vld [vmem:[%s9902_s1 + $0x228] sm:$0xff] }
  0x73   :  { %3850 = vmatprep.subr.bf16.mxu0 %v3849_v49  ;;  %3974 = vmatprep.subr.bf16.mxu1 %v3973_v53  ;;  %v106_v49 = vld [vmem:[%s9902_s1 + $0x2c8] sm:$0xff]  ;;  %v3991_v53 = vpack.c.bf16 %v84_v44, %v63_v43  ;;  %v4115_v54 = vpack.c.bf16 %v86_v48, %v65_v45  ;;  %v273_v45 = vld [vmem:[%s9902_s1 + $0x800] sm:$0xff]  ;;  %v275_v48 = vld [vmem:[%s9902_s1 + $0x810] sm:$0xff] }
  0x74   :  { %v3993_v55 = vpack.c.bf16 %v127_v50, %v106_v49  ;;  %v254_v36 = vld [vmem:[%s9902_s1 + $0x768] sm:$0xff]  ;;  %v296_v50 = vld [vmem:[%s9902_s1 + $0x8b8] sm:$0xff] }
  0x75   :  { %v274_v37 = vld [vmem:[%s9902_s1 + $0x808] sm:$0xff] }
  0x76   :  { %3852 = vmatpush1.bf16.msra.mxu0 %v3851_v59  ;;  %3976 = vmatpush1.bf16.msra.mxu1 %v3975_v60  ;;  %v4117_v59 = vpack.c.bf16 %v129_v52, %v108_v51  ;;  %v128_v60 = vld [vmem:[%s9902_s1 + $0x378] sm:$0xff]  ;;  %v337_v52 = vld [vmem:[%s9902_s1 + $0xa00] sm:$0xff] }
  0x77   :  { %3854 = vmatprep.subr.bf16.mxu0 %v3853_v62  ;;  %3978 = vmatprep.subr.bf16.mxu1 %v3977_v2  ;;  %v148_v62 = vld [vmem:[%s9902_s1 + $0x418] sm:$0xff]  ;;  %v3995_v2 = vpack.c.bf16 %v126_v57, %v105_v56  ;;  %v4119_v3 = vpack.c.bf16 %v128_v60, %v107_v58  ;;  %v4135_v56 = vpack.c.bf16 %v296_v50, %v275_v48  ;;  %v315_v58 = vld [vmem:[%s9902_s1 + $0x950] sm:$0xff]  ;;  %v317_v60 = vld [vmem:[%s9902_s1 + $0x960] sm:$0xff] }
  0x78   :  { %v3997_v4 = vpack.c.bf16 %v169_v63, %v148_v62  ;;  %v316_v51 = vld [vmem:[%s9902_s1 + $0x958] sm:$0xff]  ;;  %v338_v63 = vld [vmem:[%s9902_s1 + $0xa08] sm:$0xff]  ;;  %v483_v48 = vld [vmem:[%s9902_s1 + $0xe90] sm:$0xff] }
  0x79   :  { %v4013_v57 = vpack.c.bf16 %v337_v52, %v316_v51  ;;  %v4139_v5 = vpack.c.bf16 %v338_v63, %v317_v60  ;;  %v485_v50 = vld [vmem:[%s9902_s1 + $0xea0] sm:$0xff]  ;;  %v506_v52 = vld [vmem:[%s9902_s1 + $0xf48] sm:$0xff]  ;;  %v527_v63 = vld [vmem:[%s9902_s1 + $0xff0] sm:$0xff] }
  0x7a   :  { %3856 = vmatpush1.bf16.msra.mxu0 %v3855_v8  ;;  %3980 = vmatpush1.bf16.msra.mxu1 %v3979_v9  ;;  %v4121_v8 = vpack.c.bf16 %v171_v1, %v150_v0  ;;  %v170_v9 = vld [vmem:[%s9902_s1 + $0x4c8] sm:$0xff]  ;;  %v379_v1 = vld [vmem:[%s9902_s1 + $0xb50] sm:$0xff]  ;;  %v525_v60 = vld [vmem:[%s9902_s1 + $0xfe0] sm:$0xff] }
  0x7b   :  { %3858 = vmatprep.subr.bf16.mxu0 %v3857_v10  ;;  %3982 = vmatprep.subr.bf16.mxu1 %v3981_v14  ;;  %v190_v10 = vld [vmem:[%s9902_s1 + $0x568] sm:$0xff]  ;;  %v213_v14 = vld [vmem:[%s9902_s1 + $0x620] sm:$0xff]  ;;  %v4123_v16 = vpack.c.bf16 %v170_v9, %v149_v7  ;;  %v359_v9 = vld [vmem:[%s9902_s1 + $0xab0] sm:$0xff] }
  0x7c   :  { %v4125_v21 = vpack.c.bf16 %v213_v14, %v192_v13  ;;  %v358_v0 = vld [vmem:[%s9902_s1 + $0xaa8] sm:$0xff]  ;;  %v357_v7 = vld [vmem:[%s9902_s1 + $0xaa0] sm:$0xff]  ;;  %v400_v13 = vld [vmem:[%s9902_s1 + $0xbf8] sm:$0xff] }
  0x7d   :  { %v4017_v6 = vpack.c.bf16 %v379_v1, %v358_v0  ;;  %v421_v14 = vld [vmem:[%s9902_s1 + $0xca0] sm:$0xff]  ;;  %v548_v1 = vld [vmem:[%s9902_s1 + $0x1098] sm:$0xff] }
  0x7e   :  { %3860 = vmatpush1.bf16.msra.mxu0 %v3859_v17  ;;  %3984 = vmatpush1.bf16.msra.mxu1 %v3983_v18  ;;  %v4001_v17 = vpack.c.bf16 %v211_v12, %v190_v10  ;;  %v189_v18 = vld [vmem:[%s9902_s1 + $0x560] sm:$0xff]  ;;  %v380_v12 = vld [vmem:[%s9902_s1 + $0xb58] sm:$0xff] }
  0x7f   :  { %1606 = vmatprep.subr.mxu0 %v1320_v19  ;;  %1748 = vmatprep.subr.mxu1 %v1322_v20  ;;  %v210_v19 = vld [vmem:[%s9902_s1 + $0x608] sm:$0xff]  ;;  %v191_v20 = vld [vmem:[%s9902_s1 + $0x570] sm:$0xff] }
  0x80   :  { %v4003_v29 = vpack.c.bf16 %v210_v19, %v189_v18  ;;  %v4143_v18 = vpack.c.bf16 %v380_v12, %v359_v9  ;;  %v4021_v19 = vpack.c.bf16 %v421_v14, %v400_v13  ;;  %v567_v9 = vld [vmem:[%s9902_s1 + $0x1130] sm:$0xff]  ;;  %v569_v12 = vld [vmem:[%s9902_s1 + $0x1140] sm:$0xff]  ;;  %v590_v14 = vld [vmem:[%s9902_s1 + $0x11e8] sm:$0xff] }
  0x82   :  { %1607 = vmatpush1.msra.mxu0 %v1319_v22  ;;  %1749 = vmatpush1.msra.mxu1 %v1321_v34  ;;  %v212_v22 = vld [vmem:[%s9902_s1 + $0x618] sm:$0xff]  ;;  %v233_v34 = vld [vmem:[%s9902_s1 + $0x6c0] sm:$0xff] }
  0x83   :  { %1611 = vmatmul.mubr.f32.vlgmr.msra.gmra.mrb[0].mxu0 %v5567_v26  ;;  %1753 = vmatmul.mubr.f32.vlgmr.msra.gmra.mrb[0].mxu1 %v5567_v26  ;;  %v4127_v30 = vpack.c.bf16 %v212_v22, %v191_v20  ;;  %v4131_v43 = vpack.c.bf16 %v254_v36, %v233_v34  ;;  %v399_v20 = vld [vmem:[%s9902_s1 + $0xbf0] sm:$0xff]  ;;  %v401_v22 = vld [vmem:[%s9902_s1 + $0xc00] sm:$0xff] }
  0x84   :  { %3986 = vmatprep.subr.bf16.mxu0 %v3985_v35  ;;  %4110 = vmatprep.subr.bf16.mxu1 %v4109_v38  ;;  %v4129_v35 = vpack.c.bf16 %v255_v28, %v234_v27  ;;  %v295_v38 = vld [vmem:[%s9902_s1 + $0x8b0] sm:$0xff]  ;;  %v442_v27 = vld [vmem:[%s9902_s1 + $0xd48] sm:$0xff]  ;;  %v441_v34 = vld [vmem:[%s9902_s1 + $0xd40] sm:$0xff] }
  0x85   :  { %3988 = vmatpush1.bf16.msra.mxu0 %v3987_v40  ;;  %4112 = vmatpush1.bf16.msra.mxu1 %v4111_v41  ;;  %v276_v40 = vld [vmem:[%s9902_s1 + $0x818] sm:$0xff]  ;;  %v297_v41 = vld [vmem:[%s9902_s1 + $0x8c0] sm:$0xff]  ;;  %v4009_v44 = vpack.c.bf16 %v295_v38, %v274_v37  ;;  %v463_v28 = vld [vmem:[%s9902_s1 + $0xdf0] sm:$0xff] }
  0x86   :  { %3990 = vmatprep.subr.bf16.mxu0 %v3989_v42  ;;  %4114 = vmatprep.subr.bf16.mxu1 %v4113_v47  ;;  %v4007_v42 = vpack.c.bf16 %v252_v11, %v231_v33  ;;  %v294_v47 = vld [vmem:[%s9902_s1 + $0x8a8] sm:$0xff]  ;;  %v4133_v49 = vpack.c.bf16 %v297_v41, %v276_v40  ;;  %v4147_v33 = vpack.c.bf16 %v422_v24, %v401_v22  ;;  %v443_v36 = vld [vmem:[%s9902_s1 + $0xd50] sm:$0xff]  ;;  %v464_v38 = vld [vmem:[%s9902_s1 + $0xdf8] sm:$0xff] }
  0x87   :  { %1823 = vmatprep.mubr.f32.mxu0 %v5455_v32  ;;  %1965 = vmatprep.mubr.f32.mxu1 %v5455_v32  ;;  %v4025_v11 = vpack.c.bf16 %v463_v28, %v442_v27  ;;  %v484_v40 = vld [vmem:[%s9902_s1 + $0xe98] sm:$0xff]  ;;  %v505_v41 = vld [vmem:[%s9902_s1 + $0xf40] sm:$0xff]  ;;  %v611_v24 = vld [vmem:[%s9902_s1 + $0x1290] sm:$0xff] }
  0x88   :  { %v609_v22 = vld [vmem:[%s9902_s1 + $0x1280] sm:$0xff]  ;;  %v632_v28 = vld [vmem:[%s9902_s1 + $0x1338] sm:$0xff] }
  0x89   :  { %3992 = vmatpush1.bf16.msra.mxu0 %v3991_v53  ;;  %4116 = vmatpush1.bf16.msra.mxu1 %v4115_v54  ;;  %v318_v53 = vld [vmem:[%s9902_s1 + $0x968] sm:$0xff]  ;;  %v339_v54 = vld [vmem:[%s9902_s1 + $0xa10] sm:$0xff] }
  0x8a   :  { %3994 = vmatprep.subr.bf16.mxu0 %v3993_v55  ;;  %4118 = vmatprep.subr.bf16.mxu1 %v4117_v59  ;;  %v4011_v55 = vpack.c.bf16 %v294_v47, %v273_v45  ;;  %v336_v59 = vld [vmem:[%s9902_s1 + $0x9f8] sm:$0xff]  ;;  %v4137_v62 = vpack.c.bf16 %v339_v54, %v318_v53  ;;  %v4151_v45 = vpack.c.bf16 %v464_v38, %v443_v36  ;;  %v526_v53 = vld [vmem:[%s9902_s1 + $0xfe8] sm:$0xff]  ;;  %v547_v54 = vld [vmem:[%s9902_s1 + $0x1090] sm:$0xff] }
  0x8b   :  { %v4029_v47 = vpack.c.bf16 %v505_v41, %v484_v40  ;;  %v651_v36 = vld [vmem:[%s9902_s1 + $0x13d0] sm:$0xff]  ;;  %v653_v38 = vld [vmem:[%s9902_s1 + $0x13e0] sm:$0xff]  ;;  %v674_v41 = vld [vmem:[%s9902_s1 + $0x1488] sm:$0xff] }
  0x8d   :  { %3996 = vmatpush1.bf16.msra.mxu0 %v3995_v2  ;;  %4120 = vmatpush1.bf16.msra.mxu1 %v4119_v3  ;;  %v360_v2 = vld [vmem:[%s9902_s1 + $0xab8] sm:$0xff]  ;;  %v381_v3 = vld [vmem:[%s9902_s1 + $0xb60] sm:$0xff] }
  0x8e   :  { %3998 = vmatprep.subr.bf16.mxu0 %v3997_v4  ;;  %4122 = vmatprep.subr.bf16.mxu1 %v4121_v8  ;;  %v4015_v4 = vpack.c.bf16 %v336_v59, %v315_v58  ;;  %v378_v8 = vld [vmem:[%s9902_s1 + $0xb48] sm:$0xff]  ;;  %v4141_v10 = vpack.c.bf16 %v381_v3, %v360_v2  ;;  %v4155_v58 = vpack.c.bf16 %v506_v52, %v485_v50  ;;  %v568_v2 = vld [vmem:[%s9902_s1 + $0x1138] sm:$0xff]  ;;  %v589_v3 = vld [vmem:[%s9902_s1 + $0x11e0] sm:$0xff] }
  0x8f   :  { %v4033_v59 = vpack.c.bf16 %v547_v54, %v526_v53  ;;  %v693_v50 = vld [vmem:[%s9902_s1 + $0x1520] sm:$0xff]  ;;  %v695_v52 = vld [vmem:[%s9902_s1 + $0x1530] sm:$0xff]  ;;  %v716_v54 = vld [vmem:[%s9902_s1 + $0x15d8] sm:$0xff] }
  0x91   :  { %4000 = vmatpush1.bf16.msra.mxu0 %v3999_v15  ;;  %4124 = vmatpush1.bf16.msra.mxu1 %v4123_v16  ;;  %v402_v15 = vld [vmem:[%s9902_s1 + $0xc08] sm:$0xff]  ;;  %v423_v16 = vld [vmem:[%s9902_s1 + $0xcb0] sm:$0xff] }
  0x92   :  { %4002 = vmatprep.subr.bf16.mxu0 %v4001_v17  ;;  %4126 = vmatprep.subr.bf16.mxu1 %v4125_v21  ;;  %v4019_v17 = vpack.c.bf16 %v378_v8, %v357_v7  ;;  %v420_v21 = vld [vmem:[%s9902_s1 + $0xc98] sm:$0xff]  ;;  %v4145_v23 = vpack.c.bf16 %v423_v16, %v402_v15  ;;  %v4159_v7 = vpack.c.bf16 %v548_v1, %v527_v63  ;;  %v610_v15 = vld [vmem:[%s9902_s1 + $0x1288] sm:$0xff]  ;;  %v631_v16 = vld [vmem:[%s9902_s1 + $0x1330] sm:$0xff] }
  0x93   :  { %v4037_v8 = vpack.c.bf16 %v589_v3, %v568_v2  ;;  %v735_v63 = vld [vmem:[%s9902_s1 + $0x1670] sm:$0xff]  ;;  %v737_v1 = vld [vmem:[%s9902_s1 + $0x1680] sm:$0xff]  ;;  %v758_v3 = vld [vmem:[%s9902_s1 + $0x1728] sm:$0xff] }
  0x95   :  { %4004 = vmatpush1.bf16.msra.mxu0 %v4003_v29  ;;  %4128 = vmatpush1.bf16.msra.mxu1 %v4127_v30  ;;  %v444_v29 = vld [vmem:[%s9902_s1 + $0xd58] sm:$0xff]  ;;  %v465_v30 = vld [vmem:[%s9902_s1 + $0xe00] sm:$0xff] }
  0x96   :  { %4006 = vmatprep.subr.bf16.mxu0 %v4005_v31  ;;  %4130 = vmatprep.subr.bf16.mxu1 %v4129_v35  ;;  %v4023_v31 = vpack.c.bf16 %v420_v21, %v399_v20  ;;  %v462_v35 = vld [vmem:[%s9902_s1 + $0xde8] sm:$0xff]  ;;  %v4149_v37 = vpack.c.bf16 %v465_v30, %v444_v29  ;;  %v4163_v20 = vpack.c.bf16 %v590_v14, %v569_v12  ;;  %v652_v29 = vld [vmem:[%s9902_s1 + $0x13d8] sm:$0xff]  ;;  %v673_v30 = vld [vmem:[%s9902_s1 + $0x1480] sm:$0xff] }
  0x97   :  { %v4041_v21 = vpack.c.bf16 %v631_v16, %v610_v15  ;;  %v777_v12 = vld [vmem:[%s9902_s1 + $0x17c0] sm:$0xff]  ;;  %v779_v14 = vld [vmem:[%s9902_s1 + $0x17d0] sm:$0xff]  ;;  %v800_v16 = vld [vmem:[%s9902_s1 + $0x1878] sm:$0xff] }
  0x99   :  { %4008 = vmatpush1.bf16.msra.mxu0 %v4007_v42  ;;  %4132 = vmatpush1.bf16.msra.mxu1 %v4131_v43  ;;  %v486_v42 = vld [vmem:[%s9902_s1 + $0xea8] sm:$0xff]  ;;  %v507_v43 = vld [vmem:[%s9902_s1 + $0xf50] sm:$0xff] }
  0x9a   :  { %4010 = vmatprep.subr.bf16.mxu0 %v4009_v44  ;;  %4134 = vmatprep.subr.bf16.mxu1 %v4133_v49  ;;  %v4027_v44 = vpack.c.bf16 %v462_v35, %v441_v34  ;;  %v504_v49 = vld [vmem:[%s9902_s1 + $0xf38] sm:$0xff]  ;;  %v4153_v51 = vpack.c.bf16 %v507_v43, %v486_v42  ;;  %v4167_v34 = vpack.c.bf16 %v632_v28, %v611_v24  ;;  %v694_v42 = vld [vmem:[%s9902_s1 + $0x1528] sm:$0xff]  ;;  %v715_v43 = vld [vmem:[%s9902_s1 + $0x15d0] sm:$0xff] }
  0x9b   :  { %v4045_v35 = vpack.c.bf16 %v673_v30, %v652_v29  ;;  %v819_v24 = vld [vmem:[%s9902_s1 + $0x1910] sm:$0xff]  ;;  %v821_v28 = vld [vmem:[%s9902_s1 + $0x1920] sm:$0xff]  ;;  %v842_v30 = vld [vmem:[%s9902_s1 + $0x19c8] sm:$0xff] }
  0x9d   :  { %4012 = vmatpush1.bf16.msra.mxu0 %v4011_v55  ;;  %4136 = vmatpush1.bf16.msra.mxu1 %v4135_v56  ;;  %v528_v55 = vld [vmem:[%s9902_s1 + $0xff8] sm:$0xff]  ;;  %v549_v56 = vld [vmem:[%s9902_s1 + $0x10a0] sm:$0xff] }
  0x9e   :  { %4014 = vmatprep.subr.bf16.mxu0 %v4013_v57  ;;  %4138 = vmatprep.subr.bf16.mxu1 %v4137_v62  ;;  %v4031_v57 = vpack.c.bf16 %v504_v49, %v483_v48  ;;  %v546_v62 = vld [vmem:[%s9902_s1 + $0x1088] sm:$0xff]  ;;  %v4157_v0 = vpack.c.bf16 %v549_v56, %v528_v55  ;;  %v4171_v48 = vpack.c.bf16 %v674_v41, %v653_v38  ;;  %v736_v55 = vld [vmem:[%s9902_s1 + $0x1678] sm:$0xff]  ;;  %v757_v56 = vld [vmem:[%s9902_s1 + $0x1720] sm:$0xff] }
  0x9f   :  { %v4049_v49 = vpack.c.bf16 %v715_v43, %v694_v42  ;;  %v861_v38 = vld [vmem:[%s9902_s1 + $0x1a60] sm:$0xff]  ;;  %v863_v41 = vld [vmem:[%s9902_s1 + $0x1a70] sm:$0xff]  ;;  %v884_v43 = vld [vmem:[%s9902_s1 + $0x1b18] sm:$0xff] }
  0xa1   :  { %4016 = vmatpush1.bf16.msra.mxu0 %v4015_v4  ;;  %4140 = vmatpush1.bf16.msra.mxu1 %v4139_v5  ;;  %v570_v4 = vld [vmem:[%s9902_s1 + $0x1148] sm:$0xff]  ;;  %v591_v5 = vld [vmem:[%s9902_s1 + $0x11f0] sm:$0xff] }
  0xa2   :  { %4018 = vmatprep.subr.bf16.mxu0 %v4017_v6  ;;  %4142 = vmatprep.subr.bf16.mxu1 %v4141_v10  ;;  %v4035_v6 = vpack.c.bf16 %v546_v62, %v525_v60  ;;  %v588_v10 = vld [vmem:[%s9902_s1 + $0x11d8] sm:$0xff]  ;;  %v4161_v13 = vpack.c.bf16 %v591_v5, %v570_v4  ;;  %v4175_v60 = vpack.c.bf16 %v716_v54, %v695_v52  ;;  %v778_v4 = vld [vmem:[%s9902_s1 + $0x17c8] sm:$0xff]  ;;  %v799_v5 = vld [vmem:[%s9902_s1 + $0x1870] sm:$0xff] }
  0xa3   :  { %v4053_v62 = vpack.c.bf16 %v757_v56, %v736_v55  ;;  %v903_v52 = vld [vmem:[%s9902_s1 + $0x1bb0] sm:$0xff]  ;;  %v905_v54 = vld [vmem:[%s9902_s1 + $0x1bc0] sm:$0xff]  ;;  %v926_v56 = vld [vmem:[%s9902_s1 + $0x1c68] sm:$0xff] }
  0xa5   :  { %4020 = vmatpush1.bf16.msra.mxu0 %v4019_v17  ;;  %4144 = vmatpush1.bf16.msra.mxu1 %v4143_v18  ;;  %v612_v17 = vld [vmem:[%s9902_s1 + $0x1298] sm:$0xff]  ;;  %v633_v18 = vld [vmem:[%s9902_s1 + $0x1340] sm:$0xff] }
  0xa6   :  { %4022 = vmatprep.subr.bf16.mxu0 %v4021_v19  ;;  %4146 = vmatprep.subr.bf16.mxu1 %v4145_v23  ;;  %v4039_v19 = vpack.c.bf16 %v588_v10, %v567_v9  ;;  %v630_v23 = vld [vmem:[%s9902_s1 + $0x1328] sm:$0xff]  ;;  %v4165_v27 = vpack.c.bf16 %v633_v18, %v612_v17  ;;  %v4179_v9 = vpack.c.bf16 %v758_v3, %v737_v1  ;;  %v820_v17 = vld [vmem:[%s9902_s1 + $0x1918] sm:$0xff]  ;;  %v841_v18 = vld [vmem:[%s9902_s1 + $0x19c0] sm:$0xff] }
  0xa7   :  { %v4057_v10 = vpack.c.bf16 %v799_v5, %v778_v4  ;;  %v945_v1 = vld [vmem:[%s9902_s1 + $0x1d00] sm:$0xff]  ;;  %v947_v3 = vld [vmem:[%s9902_s1 + $0x1d10] sm:$0xff]  ;;  %v968_v5 = vld [vmem:[%s9902_s1 + $0x1db8] sm:$0xff] }
  0xa9   :  { %4024 = vmatpush1.bf16.msra.mxu0 %v4023_v31  ;;  %4148 = vmatpush1.bf16.msra.mxu1 %v4147_v33  ;;  %v654_v31 = vld [vmem:[%s9902_s1 + $0x13e8] sm:$0xff]  ;;  %v675_v33 = vld [vmem:[%s9902_s1 + $0x1490] sm:$0xff] }
  0xaa   :  { %4026 = vmatprep.subr.bf16.mxu0 %v4025_v11  ;;  %4150 = vmatprep.subr.bf16.mxu1 %v4149_v37  ;;  %v4043_v11 = vpack.c.bf16 %v630_v23, %v609_v22  ;;  %v672_v37 = vld [vmem:[%s9902_s1 + $0x1478] sm:$0xff]  ;;  %v4169_v40 = vpack.c.bf16 %v675_v33, %v654_v31  ;;  %v4183_v22 = vpack.c.bf16 %v800_v16, %v779_v14  ;;  %v862_v31 = vld [vmem:[%s9902_s1 + $0x1a68] sm:$0xff]  ;;  %v883_v33 = vld [vmem:[%s9902_s1 + $0x1b10] sm:$0xff] }
  0xab   :  { %v4061_v23 = vpack.c.bf16 %v841_v18, %v820_v17  ;;  %v987_v14 = vld [vmem:[%s9902_s1 + $0x1e50] sm:$0xff]  ;;  %v989_v16 = vld [vmem:[%s9902_s1 + $0x1e60] sm:$0xff]  ;;  %v1010_v18 = vld [vmem:[%s9902_s1 + $0x1f08] sm:$0xff] }
  0xad   :  { %4028 = vmatpush1.bf16.msra.mxu0 %v4027_v44  ;;  %4152 = vmatpush1.bf16.msra.mxu1 %v4151_v45  ;;  %v696_v44 = vld [vmem:[%s9902_s1 + $0x1538] sm:$0xff]  ;;  %v717_v45 = vld [vmem:[%s9902_s1 + $0x15e0] sm:$0xff] }
  0xae   :  { %4030 = vmatprep.subr.bf16.mxu0 %v4029_v47  ;;  %4154 = vmatprep.subr.bf16.mxu1 %v4153_v51  ;;  %v4047_v47 = vpack.c.bf16 %v672_v37, %v651_v36  ;;  %v714_v51 = vld [vmem:[%s9902_s1 + $0x15c8] sm:$0xff]  ;;  %v4173_v53 = vpack.c.bf16 %v717_v45, %v696_v44  ;;  %v4187_v36 = vpack.c.bf16 %v842_v30, %v821_v28  ;;  %v904_v44 = vld [vmem:[%s9902_s1 + $0x1bb8] sm:$0xff]  ;;  %v925_v45 = vld [vmem:[%s9902_s1 + $0x1c60] sm:$0xff] }
  0xaf   :  { %v4065_v37 = vpack.c.bf16 %v883_v33, %v862_v31  ;;  %v1029_v28 = vld [vmem:[%s9902_s1 + $0x1fa0] sm:$0xff]  ;;  %v1031_v30 = vld [vmem:[%s9902_s1 + $0x1fb0] sm:$0xff]  ;;  %v1052_v33 = vld [vmem:[%s9902_s1 + $0x2058] sm:$0xff] }
  0xb1   :  { %4032 = vmatpush1.bf16.msra.mxu0 %v4031_v57  ;;  %4156 = vmatpush1.bf16.msra.mxu1 %v4155_v58  ;;  %v738_v57 = vld [vmem:[%s9902_s1 + $0x1688] sm:$0xff]  ;;  %v759_v58 = vld [vmem:[%s9902_s1 + $0x1730] sm:$0xff] }
  0xb2   :  { %4034 = vmatprep.subr.bf16.mxu0 %v4033_v59  ;;  %4158 = vmatprep.subr.bf16.mxu1 %v4157_v0  ;;  %v4051_v59 = vpack.c.bf16 %v714_v51, %v693_v50  ;;  %v756_v0 = vld [vmem:[%s9902_s1 + $0x1718] sm:$0xff]  ;;  %v4177_v2 = vpack.c.bf16 %v759_v58, %v738_v57  ;;  %v4191_v50 = vpack.c.bf16 %v884_v43, %v863_v41  ;;  %v946_v57 = vld [vmem:[%s9902_s1 + $0x1d08] sm:$0xff]  ;;  %v967_v58 = vld [vmem:[%s9902_s1 + $0x1db0] sm:$0xff] }
  0xb3   :  { %v4069_v51 = vpack.c.bf16 %v925_v45, %v904_v44  ;;  %v1071_v41 = vld [vmem:[%s9902_s1 + $0x20f0] sm:$0xff]  ;;  %v1073_v43 = vld [vmem:[%s9902_s1 + $0x2100] sm:$0xff]  ;;  %v1094_v45 = vld [vmem:[%s9902_s1 + $0x21a8] sm:$0xff] }
  0xb5   :  { %4036 = vmatpush1.bf16.msra.mxu0 %v4035_v6  ;;  %4160 = vmatpush1.bf16.msra.mxu1 %v4159_v7  ;;  %v780_v6 = vld [vmem:[%s9902_s1 + $0x17d8] sm:$0xff]  ;;  %v801_v7 = vld [vmem:[%s9902_s1 + $0x1880] sm:$0xff] }
  0xb6   :  { %4038 = vmatprep.subr.bf16.mxu0 %v4037_v8  ;;  %4162 = vmatprep.subr.bf16.mxu1 %v4161_v13  ;;  %v4055_v8 = vpack.c.bf16 %v756_v0, %v735_v63  ;;  %v798_v13 = vld [vmem:[%s9902_s1 + $0x1868] sm:$0xff]  ;;  %v4181_v15 = vpack.c.bf16 %v801_v7, %v780_v6  ;;  %v4195_v63 = vpack.c.bf16 %v926_v56, %v905_v54  ;;  %v988_v6 = vld [vmem:[%s9902_s1 + $0x1e58] sm:$0xff]  ;;  %v1009_v7 = vld [vmem:[%s9902_s1 + $0x1f00] sm:$0xff] }
  0xb7   :  { %v4073_v0 = vpack.c.bf16 %v967_v58, %v946_v57  ;;  %v1113_v54 = vld [vmem:[%s9902_s1 + $0x2240] sm:$0xff]  ;;  %v1115_v56 = vld [vmem:[%s9902_s1 + $0x2250] sm:$0xff]  ;;  %v1136_v58 = vld [vmem:[%s9902_s1 + $0x22f8] sm:$0xff] }
  0xb9   :  { %4040 = vmatpush1.bf16.msra.mxu0 %v4039_v19  ;;  %4164 = vmatpush1.bf16.msra.mxu1 %v4163_v20  ;;  %v822_v19 = vld [vmem:[%s9902_s1 + $0x1928] sm:$0xff]  ;;  %v843_v20 = vld [vmem:[%s9902_s1 + $0x19d0] sm:$0xff] }
  0xba   :  { %4042 = vmatprep.subr.bf16.mxu0 %v4041_v21  ;;  %4166 = vmatprep.subr.bf16.mxu1 %v4165_v27  ;;  %v4059_v21 = vpack.c.bf16 %v798_v13, %v777_v12  ;;  %v840_v27 = vld [vmem:[%s9902_s1 + $0x19b8] sm:$0xff]  ;;  %v4185_v29 = vpack.c.bf16 %v843_v20, %v822_v19  ;;  %v4199_v12 = vpack.c.bf16 %v968_v5, %v947_v3  ;;  %v1030_v19 = vld [vmem:[%s9902_s1 + $0x1fa8] sm:$0xff]  ;;  %v1051_v20 = vld [vmem:[%s9902_s1 + $0x2050] sm:$0xff] }
  0xbb   :  { %v4077_v13 = vpack.c.bf16 %v1009_v7, %v988_v6  ;;  %v1155_v3 = vld [vmem:[%s9902_s1 + $0x2390] sm:$0xff]  ;;  %v1157_v5 = vld [vmem:[%s9902_s1 + $0x23a0] sm:$0xff]  ;;  %v1178_v7 = vld [vmem:[%s9902_s1 + $0x2448] sm:$0xff] }
  0xbd   :  { %4044 = vmatpush1.bf16.msra.mxu0 %v4043_v11  ;;  %4168 = vmatpush1.bf16.msra.mxu1 %v4167_v34  ;;  %v864_v11 = vld [vmem:[%s9902_s1 + $0x1a78] sm:$0xff]  ;;  %v885_v34 = vld [vmem:[%s9902_s1 + $0x1b20] sm:$0xff] }
  0xbe   :  { %4046 = vmatprep.subr.bf16.mxu0 %v4045_v35  ;;  %4170 = vmatprep.subr.bf16.mxu1 %v4169_v40  ;;  %v4063_v35 = vpack.c.bf16 %v840_v27, %v819_v24  ;;  %v882_v40 = vld [vmem:[%s9902_s1 + $0x1b08] sm:$0xff]  ;;  %v4189_v42 = vpack.c.bf16 %v885_v34, %v864_v11  ;;  %v4203_v24 = vpack.c.bf16 %v1010_v18, %v989_v16  ;;  %v1072_v11 = vld [vmem:[%s9902_s1 + $0x20f8] sm:$0xff]  ;;  %v1093_v34 = vld [vmem:[%s9902_s1 + $0x21a0] sm:$0xff] }
  0xbf   :  { %v4081_v27 = vpack.c.bf16 %v1051_v20, %v1030_v19  ;;  %v1197_v16 = vld [vmem:[%s9902_s1 + $0x24e0] sm:$0xff]  ;;  %v1199_v18 = vld [vmem:[%s9902_s1 + $0x24f0] sm:$0xff]  ;;  %v1220_v20 = vld [vmem:[%s9902_s1 + $0x2598] sm:$0xff] }
  0xc1   :  { %4048 = vmatpush1.bf16.msra.mxu0 %v4047_v47  ;;  %4172 = vmatpush1.bf16.msra.mxu1 %v4171_v48  ;;  %v906_v47 = vld [vmem:[%s9902_s1 + $0x1bc8] sm:$0xff]  ;;  %v927_v48 = vld [vmem:[%s9902_s1 + $0x1c70] sm:$0xff] }
  0xc2   :  { %4050 = vmatprep.subr.bf16.mxu0 %v4049_v49  ;;  %4174 = vmatprep.subr.bf16.mxu1 %v4173_v53  ;;  %v4067_v49 = vpack.c.bf16 %v882_v40, %v861_v38  ;;  %v924_v53 = vld [vmem:[%s9902_s1 + $0x1c58] sm:$0xff]  ;;  %v4193_v55 = vpack.c.bf16 %v927_v48, %v906_v47  ;;  %v4207_v38 = vpack.c.bf16 %v1052_v33, %v1031_v30  ;;  %v1114_v47 = vld [vmem:[%s9902_s1 + $0x2248] sm:$0xff]  ;;  %v1135_v48 = vld [vmem:[%s9902_s1 + $0x22f0] sm:$0xff] }
  0xc3   :  { %v4085_v40 = vpack.c.bf16 %v1093_v34, %v1072_v11  ;;  %v1239_v30 = vld [vmem:[%s9902_s1 + $0x2630] sm:$0xff]  ;;  %v1241_v33 = vld [vmem:[%s9902_s1 + $0x2640] sm:$0xff]  ;;  %v1262_v34 = vld [vmem:[%s9902_s1 + $0x26e8] sm:$0xff] }
  0xc4   :  { %1824 = vmatmul.mubr.f32.vlgmr.msra.gmra.mrb[2].mxu0 %v5442_v25  ;;  %1966 = vmatmul.mubr.f32.vlgmr.msra.gmra.mrb[2].mxu1 %v5442_v25 }
  0xc5   :  { %4052 = vmatpush1.bf16.msra.mxu0 %v4051_v59  ;;  %4176 = vmatpush1.bf16.msra.mxu1 %v4175_v60  ;;  %v948_v59 = vld [vmem:[%s9902_s1 + $0x1d18] sm:$0xff]  ;;  %v969_v60 = vld [vmem:[%s9902_s1 + $0x1dc0] sm:$0xff] }
  0xc6   :  { %4054 = vmatprep.subr.bf16.mxu0 %v4053_v62  ;;  %4178 = vmatprep.subr.bf16.mxu1 %v4177_v2  ;;  %v4071_v62 = vpack.c.bf16 %v924_v53, %v903_v52  ;;  %v966_v2 = vld [vmem:[%s9902_s1 + $0x1da8] sm:$0xff]  ;;  %v4197_v4 = vpack.c.bf16 %v969_v60, %v948_v59  ;;  %v4211_v52 = vpack.c.bf16 %v1094_v45, %v1073_v43  ;;  %v1156_v59 = vld [vmem:[%s9902_s1 + $0x2398] sm:$0xff]  ;;  %v1177_v60 = vld [vmem:[%s9902_s1 + $0x2440] sm:$0xff] }
  0xc7   :  { %3693 = vmatprep.mubr.msk.f32.mxu0 %vm1472_vm0, %v5595_v39  ;;  %3694 = vmatprep.mubr.msk.f32.mxu1 %vm1472_vm0, %v5595_v39  ;;  %v4089_v53 = vpack.c.bf16 %v1135_v48, %v1114_v47  ;;  %v1281_v43 = vld [vmem:[%s9902_s1 + $0x2780] sm:$0xff]  ;;  %v1283_v47 = vld [vmem:[%s9902_s1 + $0x2790] sm:$0xff]  ;;  %v1304_v48 = vld [vmem:[%s9902_s1 + $0x2838] sm:$0xff] }
  0xc9   :  { %4056 = vmatpush1.bf16.msra.mxu0 %v4055_v8  ;;  %4180 = vmatpush1.bf16.msra.mxu1 %v4179_v9  ;;  %v990_v8 = vld [vmem:[%s9902_s1 + $0x1e68] sm:$0xff]  ;;  %v1011_v9 = vld [vmem:[%s9902_s1 + $0x1f10] sm:$0xff] }
  0xca   :  { %4058 = vmatprep.subr.bf16.mxu0 %v4057_v10  ;;  %4182 = vmatprep.subr.bf16.mxu1 %v4181_v15  ;;  %v4075_v10 = vpack.c.bf16 %v966_v2, %v945_v1  ;;  %v1008_v15 = vld [vmem:[%s9902_s1 + $0x1ef8] sm:$0xff]  ;;  %v4201_v17 = vpack.c.bf16 %v1011_v9, %v990_v8  ;;  %v4215_v1 = vpack.c.bf16 %v1136_v58, %v1115_v56  ;;  %v1198_v8 = vld [vmem:[%s9902_s1 + $0x24e8] sm:$0xff]  ;;  %v1219_v9 = vld [vmem:[%s9902_s1 + $0x2590] sm:$0xff] }
  0xcb   :  { %v4093_v2 = vpack.c.bf16 %v1177_v60, %v1156_v59  ;;  %v28_v56 = vld [vmem:[%s9902_s1 + $0x58] sm:$0xff]  ;;  %v25_v58 = vld [vmem:[%s9902_s1 + $0x40] sm:$0xff]  ;;  %v46_v59 = vld [vmem:[%s9902_s1 + $0xe8] sm:$0xff] }
  0xcc   :  { %v27_v60 = vld [vmem:[%s9902_s1 + $0x50] sm:$0xff] }
  0xcd   :  { %4060 = vmatpush1.bf16.msra.mxu0 %v4059_v21  ;;  %4184 = vmatpush1.bf16.msra.mxu1 %v4183_v22  ;;  %v1032_v21 = vld [vmem:[%s9902_s1 + $0x1fb8] sm:$0xff]  ;;  %v1053_v22 = vld [vmem:[%s9902_s1 + $0x2060] sm:$0xff] }
  0xce   :  { %4062 = vmatprep.subr.bf16.mxu0 %v4061_v23  ;;  %4186 = vmatprep.subr.bf16.mxu1 %v4185_v29  ;;  %v4079_v23 = vpack.c.bf16 %v1008_v15, %v987_v14  ;;  %v1050_v29 = vld [vmem:[%s9902_s1 + $0x2048] sm:$0xff]  ;;  %v4205_v31 = vpack.c.bf16 %v1053_v22, %v1032_v21  ;;  %v4219_v14 = vpack.c.bf16 %v1178_v7, %v1157_v5  ;;  %v1240_v21 = vld [vmem:[%s9902_s1 + $0x2638] sm:$0xff]  ;;  %v1261_v22 = vld [vmem:[%s9902_s1 + $0x26e0] sm:$0xff] }
  0xcf   :  { %v4097_v15 = vpack.c.bf16 %v1219_v9, %v1198_v8  ;;  %v67_v9 = vld [vmem:[%s9902_s1 + $0x190] sm:$0xff] }
  0xd1   :  { %4064 = vmatpush1.bf16.msra.mxu0 %v4063_v35  ;;  %4188 = vmatpush1.bf16.msra.mxu1 %v4187_v36  ;;  %v1074_v35 = vld [vmem:[%s9902_s1 + $0x2108] sm:$0xff]  ;;  %v1095_v36 = vld [vmem:[%s9902_s1 + $0x21b0] sm:$0xff] }
  0xd2   :  { %4066 = vmatprep.subr.bf16.mxu0 %v4065_v37  ;;  %4190 = vmatprep.subr.bf16.mxu1 %v4189_v42  ;;  %v4083_v37 = vpack.c.bf16 %v1050_v29, %v1029_v28  ;;  %v1092_v42 = vld [vmem:[%s9902_s1 + $0x2198] sm:$0xff]  ;;  %v4209_v44 = vpack.c.bf16 %v1095_v36, %v1074_v35  ;;  %v4223_v28 = vpack.c.bf16 %v1220_v20, %v1199_v18  ;;  %v1282_v35 = vld [vmem:[%s9902_s1 + $0x2788] sm:$0xff]  ;;  %v1303_v36 = vld [vmem:[%s9902_s1 + $0x2830] sm:$0xff] }
  0xd3   :  { %v4101_v29 = vpack.c.bf16 %v1261_v22, %v1240_v21  ;;  %v133_v18 = vld [vmem:[%s9902_s1 + $0x3a0] sm:$0xff] }
  0xd4   :  { %v109_v22 = vld [vmem:[%s9902_s1 + $0x2e0] sm:$0xff] }
  0xd5   :  { %4068 = vmatpush1.bf16.msra.mxu0 %v4067_v49  ;;  %4192 = vmatpush1.bf16.msra.mxu1 %v4191_v50  ;;  %v1116_v49 = vld [vmem:[%s9902_s1 + $0x2258] sm:$0xff]  ;;  %v1137_v50 = vld [vmem:[%s9902_s1 + $0x2300] sm:$0xff] }
  0xd6   :  { %4070 = vmatprep.subr.bf16.mxu0 %v4069_v51  ;;  %4194 = vmatprep.subr.bf16.mxu1 %v4193_v55  ;;  %v4087_v51 = vpack.c.bf16 %v1092_v42, %v1071_v41  ;;  %v1134_v55 = vld [vmem:[%s9902_s1 + $0x22e8] sm:$0xff]  ;;  %v4213_v57 = vpack.c.bf16 %v1137_v50, %v1116_v49  ;;  %v4227_v41 = vpack.c.bf16 %v1262_v34, %v1241_v33  ;;  %v175_v33 = vld [vmem:[%s9902_s1 + $0x4f0] sm:$0xff] }
  0xd7   :  { %v4105_v42 = vpack.c.bf16 %v1303_v36, %v1282_v35  ;;  %v4231_v50 = vpack.c.bf16 %v1304_v48, %v1283_v47  ;;  %v151_v36 = vld [vmem:[%s9902_s1 + $0x430] sm:$0xff] }
  0xd9   :  { %4072 = vmatpush1.bf16.msra.mxu0 %v4071_v62  ;;  %4196 = vmatpush1.bf16.msra.mxu1 %v4195_v63  ;;  %v1158_v62 = vld [vmem:[%s9902_s1 + $0x23a8] sm:$0xff]  ;;  %v1179_v63 = vld [vmem:[%s9902_s1 + $0x2450] sm:$0xff] }
  0xda   :  { %4074 = vmatprep.subr.bf16.mxu0 %v4073_v0  ;;  %4198 = vmatprep.subr.bf16.mxu1 %v4197_v4  ;;  %v4091_v0 = vpack.c.bf16 %v1134_v55, %v1113_v54  ;;  %v1176_v4 = vld [vmem:[%s9902_s1 + $0x2438] sm:$0xff]  ;;  %v4217_v6 = vpack.c.bf16 %v1179_v63, %v1158_v62  ;;  %v1323_v54 = vld [vmem:[%s9902_s1 + $0x28d0] sm:$0xff] }
  0xdb   :  { %v47_v55 = vld [vmem:[%s9902_s1 + $0xf0] sm:$0xff]  ;;  %v48_v62 = vld [vmem:[%s9902_s1 + $0xf8] sm:$0xff] }
  0xdc   :  { %v68_v63 = vld [vmem:[%s9902_s1 + $0x198] sm:$0xff]  ;;  %v4359_v7 = vpack.c.bf16 %v48_v62, %v27_v60 }
  0xdd   :  { %4076 = vmatpush1.bf16.msra.mxu0 %v4075_v10  ;;  %4200 = vmatpush1.bf16.msra.mxu1 %v4199_v12  ;;  %v1200_v10 = vld [vmem:[%s9902_s1 + $0x24f8] sm:$0xff]  ;;  %v1221_v12 = vld [vmem:[%s9902_s1 + $0x25a0] sm:$0xff] }
  0xde   :  { %4078 = vmatprep.subr.bf16.mxu0 %v4077_v13  ;;  %4202 = vmatprep.subr.bf16.mxu1 %v4201_v17  ;;  %v4095_v13 = vpack.c.bf16 %v1176_v4, %v1155_v3  ;;  %v1218_v17 = vld [vmem:[%s9902_s1 + $0x2588] sm:$0xff]  ;;  %v4221_v19 = vpack.c.bf16 %v1221_v12, %v1200_v10  ;;  %v91_v4 = vld [vmem:[%s9902_s1 + $0x250] sm:$0xff]  ;;  %v88_v10 = vld [vmem:[%s9902_s1 + $0x238] sm:$0xff] }
  0xdf   :  { %v70_v3 = vld [vmem:[%s9902_s1 + $0x1a8] sm:$0xff]  ;;  %v69_v12 = vld [vmem:[%s9902_s1 + $0x1a0] sm:$0xff] }
  0xe1   :  { %4080 = vmatpush1.bf16.msra.mxu0 %v4079_v23  ;;  %4204 = vmatpush1.bf16.msra.mxu1 %v4203_v24  ;;  %v1242_v23 = vld [vmem:[%s9902_s1 + $0x2648] sm:$0xff]  ;;  %v1263_v24 = vld [vmem:[%s9902_s1 + $0x26f0] sm:$0xff] }
  0xe2   :  { %4082 = vmatprep.subr.bf16.mxu0 %v4081_v27  ;;  %4206 = vmatprep.subr.bf16.mxu1 %v4205_v31  ;;  %v4099_v27 = vpack.c.bf16 %v1218_v17, %v1197_v16  ;;  %v1260_v31 = vld [vmem:[%s9902_s1 + $0x26d8] sm:$0xff]  ;;  %v4225_v11 = vpack.c.bf16 %v1263_v24, %v1242_v23  ;;  %v131_v16 = vld [vmem:[%s9902_s1 + $0x390] sm:$0xff]  ;;  %v130_v23 = vld [vmem:[%s9902_s1 + $0x388] sm:$0xff] }
  0xe3   :  { %v112_v17 = vld [vmem:[%s9902_s1 + $0x2f8] sm:$0xff]  ;;  %v111_v24 = vld [vmem:[%s9902_s1 + $0x2f0] sm:$0xff] }
  0xe5   :  { %4084 = vmatpush1.bf16.msra.mxu0 %v4083_v37  ;;  %4208 = vmatpush1.bf16.msra.mxu1 %v4207_v38  ;;  %v1284_v37 = vld [vmem:[%s9902_s1 + $0x2798] sm:$0xff]  ;;  %v1305_v38 = vld [vmem:[%s9902_s1 + $0x2840] sm:$0xff] }
  0xe6   :  { %4086 = vmatprep.subr.bf16.mxu0 %v4085_v40  ;;  %4210 = vmatprep.subr.bf16.mxu1 %v4209_v44  ;;  %v4103_v40 = vpack.c.bf16 %v1260_v31, %v1239_v30  ;;  %v1302_v44 = vld [vmem:[%s9902_s1 + $0x2828] sm:$0xff]  ;;  %v4229_v45 = vpack.c.bf16 %v1305_v38, %v1284_v37  ;;  %v173_v30 = vld [vmem:[%s9902_s1 + $0x4e0] sm:$0xff]  ;;  %v172_v37 = vld [vmem:[%s9902_s1 + $0x4d8] sm:$0xff] }
  0xe7   :  { %v4107_v49 = vpack.c.bf16 %v1302_v44, %v1281_v43  ;;  %v154_v31 = vld [vmem:[%s9902_s1 + $0x448] sm:$0xff]  ;;  %v153_v38 = vld [vmem:[%s9902_s1 + $0x440] sm:$0xff]  ;;  %v215_v43 = vld [vmem:[%s9902_s1 + $0x630] sm:$0xff]  ;;  %v4247_v47 = vpack.c.bf16 %v172_v37, %v151_v36 }
  0xe8   :  { %v196_v44 = vld [vmem:[%s9902_s1 + $0x598] sm:$0xff] }
  0xe9   :  { %4088 = vmatpush1.bf16.msra.mxu0 %v4087_v51  ;;  %4212 = vmatpush1.bf16.msra.mxu1 %v4211_v52  ;;  %v1324_v51 = vld [vmem:[%s9902_s1 + $0x28d8] sm:$0xff]  ;;  %v1326_v52 = vld [vmem:[%s9902_s1 + $0x28e8] sm:$0xff] }
  0xea   :  { %4090 = vmatprep.subr.bf16.mxu0 %v4089_v53  ;;  %4214 = vmatprep.subr.bf16.mxu1 %v4213_v57  ;;  %v26_v53 = vld [vmem:[%s9902_s1 + $0x48] sm:$0xff]  ;;  %v49_v57 = vld [vmem:[%s9902_s1 + $0x100] sm:$0xff] }
  0xeb   :  { %v4357_v5 = vpack.c.bf16 %v49_v57, %v28_v56  ;;  %v257_v56 = vld [vmem:[%s9902_s1 + $0x780] sm:$0xff]  ;;  %v238_v57 = vld [vmem:[%s9902_s1 + $0x6e8] sm:$0xff] }
  0xed   :  { %4092 = vmatpush1.bf16.msra.mxu0 %v4091_v0  ;;  %4216 = vmatpush1.bf16.msra.mxu1 %v4215_v1  ;;  %v89_v0 = vld [vmem:[%s9902_s1 + $0x240] sm:$0xff] }
  0xee   :  { %4094 = vmatprep.subr.bf16.mxu0 %v4093_v2  ;;  %4218 = vmatprep.subr.bf16.mxu1 %v4217_v6  ;;  %v1325_v1 = vld [vmem:[%s9902_s1 + $0x28e0] sm:$0xff]  ;;  %v4233_v2 = vpack.c.bf16 %v47_v55, %v26_v53  ;;  %v4235_v6 = vpack.c.bf16 %v46_v59, %v25_v58  ;;  %v4237_v8 = vpack.c.bf16 %v89_v0, %v68_v63  ;;  %v236_v55 = vld [vmem:[%s9902_s1 + $0x6d8] sm:$0xff]  ;;  %v259_v58 = vld [vmem:[%s9902_s1 + $0x790] sm:$0xff] }
  0xef   :  { %v4253_v62 = vpack.c.bf16 %v257_v56, %v236_v55  ;;  %v235_v63 = vld [vmem:[%s9902_s1 + $0x6d0] sm:$0xff]  ;;  %v256_v0 = vld [vmem:[%s9902_s1 + $0x778] sm:$0xff]  ;;  %v426_v56 = vld [vmem:[%s9902_s1 + $0xcc8] sm:$0xff] }
  0xf1   :  { %4096 = vmatpush1.bf16.msra.mxu0 %v4095_v13  ;;  %4220 = vmatpush1.bf16.msra.mxu1 %v4219_v14  ;;  %v4361_v13 = vpack.c.bf16 %v91_v4, %v70_v3  ;;  %v90_v14 = vld [vmem:[%s9902_s1 + $0x248] sm:$0xff] }
  0xf2   :  { %4098 = vmatprep.subr.bf16.mxu0 %v4097_v15  ;;  %4222 = vmatprep.subr.bf16.mxu1 %v4221_v19  ;;  %v110_v15 = vld [vmem:[%s9902_s1 + $0x2e8] sm:$0xff]  ;;  %v4239_v19 = vpack.c.bf16 %v88_v10, %v67_v9  ;;  %v4363_v20 = vpack.c.bf16 %v90_v14, %v69_v12  ;;  %v277_v12 = vld [vmem:[%s9902_s1 + $0x820] sm:$0xff]  ;;  %v279_v14 = vld [vmem:[%s9902_s1 + $0x830] sm:$0xff] }
  0xf3   :  { %v4241_v21 = vpack.c.bf16 %v131_v16, %v110_v15  ;;  %v258_v3 = vld [vmem:[%s9902_s1 + $0x788] sm:$0xff]  ;;  %v300_v16 = vld [vmem:[%s9902_s1 + $0x8d8] sm:$0xff] }
  0xf4   :  { %v278_v4 = vld [vmem:[%s9902_s1 + $0x828] sm:$0xff] }
  0xf5   :  { %4100 = vmatpush1.bf16.msra.mxu0 %v4099_v27  ;;  %4224 = vmatpush1.bf16.msra.mxu1 %v4223_v28  ;;  %v4365_v27 = vpack.c.bf16 %v133_v18, %v112_v17  ;;  %v132_v28 = vld [vmem:[%s9902_s1 + $0x398] sm:$0xff]  ;;  %v341_v18 = vld [vmem:[%s9902_s1 + $0xa20] sm:$0xff] }
  0xf6   :  { %4102 = vmatprep.subr.bf16.mxu0 %v4101_v29  ;;  %4226 = vmatprep.subr.bf16.mxu1 %v4225_v11  ;;  %v152_v29 = vld [vmem:[%s9902_s1 + $0x438] sm:$0xff]  ;;  %v4243_v11 = vpack.c.bf16 %v130_v23, %v109_v22  ;;  %v4367_v34 = vpack.c.bf16 %v132_v28, %v111_v24  ;;  %v4383_v22 = vpack.c.bf16 %v300_v16, %v279_v14  ;;  %v319_v24 = vld [vmem:[%s9902_s1 + $0x970] sm:$0xff]  ;;  %v321_v28 = vld [vmem:[%s9902_s1 + $0x980] sm:$0xff] }
  0xf7   :  { %v4245_v35 = vpack.c.bf16 %v173_v30, %v152_v29  ;;  %v320_v17 = vld [vmem:[%s9902_s1 + $0x978] sm:$0xff]  ;;  %v342_v30 = vld [vmem:[%s9902_s1 + $0xa28] sm:$0xff]  ;;  %v487_v14 = vld [vmem:[%s9902_s1 + $0xeb0] sm:$0xff] }
  0xf8   :  { %v4261_v23 = vpack.c.bf16 %v341_v18, %v320_v17  ;;  %v4387_v36 = vpack.c.bf16 %v342_v30, %v321_v28  ;;  %v489_v16 = vld [vmem:[%s9902_s1 + $0xec0] sm:$0xff]  ;;  %v510_v18 = vld [vmem:[%s9902_s1 + $0xf68] sm:$0xff]  ;;  %v531_v30 = vld [vmem:[%s9902_s1 + $0x1010] sm:$0xff] }
  0xf9   :  { %4104 = vmatpush1.bf16.msra.mxu0 %v4103_v40  ;;  %4228 = vmatpush1.bf16.msra.mxu1 %v4227_v41  ;;  %v4369_v40 = vpack.c.bf16 %v175_v33, %v154_v31  ;;  %v174_v41 = vld [vmem:[%s9902_s1 + $0x4e8] sm:$0xff]  ;;  %v383_v33 = vld [vmem:[%s9902_s1 + $0xb70] sm:$0xff]  ;;  %v529_v28 = vld [vmem:[%s9902_s1 + $0x1000] sm:$0xff] }
  0xfa   :  { %4106 = vmatprep.subr.bf16.mxu0 %v4105_v42  ;;  %4230 = vmatprep.subr.bf16.mxu1 %v4229_v45  ;;  %v194_v42 = vld [vmem:[%s9902_s1 + $0x588] sm:$0xff]  ;;  %v217_v45 = vld [vmem:[%s9902_s1 + $0x640] sm:$0xff]  ;;  %v4371_v48 = vpack.c.bf16 %v174_v41, %v153_v38  ;;  %v363_v41 = vld [vmem:[%s9902_s1 + $0xad0] sm:$0xff] }
  0xfb   :  { %v4373_v53 = vpack.c.bf16 %v217_v45, %v196_v44  ;;  %v362_v31 = vld [vmem:[%s9902_s1 + $0xac8] sm:$0xff]  ;;  %v361_v38 = vld [vmem:[%s9902_s1 + $0xac0] sm:$0xff]  ;;  %v404_v44 = vld [vmem:[%s9902_s1 + $0xc18] sm:$0xff] }
  0xfc   :  { %v4265_v37 = vpack.c.bf16 %v383_v33, %v362_v31  ;;  %v425_v45 = vld [vmem:[%s9902_s1 + $0xcc0] sm:$0xff]  ;;  %v552_v33 = vld [vmem:[%s9902_s1 + $0x10b8] sm:$0xff] }
  0xfd   :  { %4108 = vmatpush1.bf16.msra.mxu0 %v4107_v49  ;;  %4232 = vmatpush1.bf16.msra.mxu1 %v4231_v50  ;;  %v4249_v49 = vpack.c.bf16 %v215_v43, %v194_v42  ;;  %v193_v50 = vld [vmem:[%s9902_s1 + $0x580] sm:$0xff]  ;;  %v384_v43 = vld [vmem:[%s9902_s1 + $0xb78] sm:$0xff] }
  0xfe   :  { %1890 = vmatprep.subr.mxu0 %v1324_v51  ;;  %2032 = vmatprep.subr.mxu1 %v1326_v52  ;;  %v214_v51 = vld [vmem:[%s9902_s1 + $0x628] sm:$0xff]  ;;  %v195_v52 = vld [vmem:[%s9902_s1 + $0x590] sm:$0xff] }
  0xff   :  { %v4251_v59 = vpack.c.bf16 %v214_v51, %v193_v50  ;;  %v4391_v50 = vpack.c.bf16 %v384_v43, %v363_v41  ;;  %v4269_v51 = vpack.c.bf16 %v425_v45, %v404_v44  ;;  %v571_v41 = vld [vmem:[%s9902_s1 + $0x1150] sm:$0xff]  ;;  %v573_v43 = vld [vmem:[%s9902_s1 + $0x1160] sm:$0xff]  ;;  %v594_v45 = vld [vmem:[%s9902_s1 + $0x1208] sm:$0xff] }
 0x101   :  { %1891 = vmatpush1.msra.mxu0 %v1323_v54  ;;  %2033 = vmatpush1.msra.mxu1 %v1325_v1  ;;  %v216_v54 = vld [vmem:[%s9902_s1 + $0x638] sm:$0xff]  ;;  %v237_v1 = vld [vmem:[%s9902_s1 + $0x6e0] sm:$0xff] }
 0x102   :  { %1895 = vmatmul.mubr.f32.vlgmr.msra.gmra.mrb[2].mxu0 %v5567_v26  ;;  %2037 = vmatmul.mubr.f32.vlgmr.msra.gmra.mrb[2].mxu1 %v5567_v26  ;;  %v4375_v60 = vpack.c.bf16 %v216_v54, %v195_v52  ;;  %v4379_v9 = vpack.c.bf16 %v258_v3, %v237_v1  ;;  %v403_v52 = vld [vmem:[%s9902_s1 + $0xc10] sm:$0xff]  ;;  %v405_v54 = vld [vmem:[%s9902_s1 + $0xc20] sm:$0xff] }
 0x103   :  { %4234 = vmatprep.subr.bf16.mxu0 %v4233_v2  ;;  %4358 = vmatprep.subr.bf16.mxu1 %v4357_v5  ;;  %v4377_v2 = vpack.c.bf16 %v259_v58, %v238_v57  ;;  %v299_v5 = vld [vmem:[%s9902_s1 + $0x8d0] sm:$0xff]  ;;  %v446_v57 = vld [vmem:[%s9902_s1 + $0xd68] sm:$0xff]  ;;  %v445_v1 = vld [vmem:[%s9902_s1 + $0xd60] sm:$0xff] }
 0x104   :  { %4236 = vmatpush1.bf16.msra.mxu0 %v4235_v6  ;;  %4360 = vmatpush1.bf16.msra.mxu1 %v4359_v7  ;;  %v280_v6 = vld [vmem:[%s9902_s1 + $0x838] sm:$0xff]  ;;  %v301_v7 = vld [vmem:[%s9902_s1 + $0x8e0] sm:$0xff]  ;;  %v4257_v10 = vpack.c.bf16 %v299_v5, %v278_v4  ;;  %v467_v58 = vld [vmem:[%s9902_s1 + $0xe10] sm:$0xff] }
 0x105   :  { %4238 = vmatprep.subr.bf16.mxu0 %v4237_v8  ;;  %4362 = vmatprep.subr.bf16.mxu1 %v4361_v13  ;;  %v4255_v8 = vpack.c.bf16 %v256_v0, %v235_v63  ;;  %v298_v13 = vld [vmem:[%s9902_s1 + $0x8c8] sm:$0xff]  ;;  %v4381_v15 = vpack.c.bf16 %v301_v7, %v280_v6  ;;  %v4395_v63 = vpack.c.bf16 %v426_v56, %v405_v54  ;;  %v447_v3 = vld [vmem:[%s9902_s1 + $0xd70] sm:$0xff]  ;;  %v468_v5 = vld [vmem:[%s9902_s1 + $0xe18] sm:$0xff] }
 0x106   :  { %2107 = vmatprep.mubr.f32.mxu0 %v5455_v32  ;;  %2249 = vmatprep.mubr.f32.mxu1 %v5455_v32  ;;  %v4273_v0 = vpack.c.bf16 %v467_v58, %v446_v57  ;;  %v488_v6 = vld [vmem:[%s9902_s1 + $0xeb8] sm:$0xff]  ;;  %v509_v7 = vld [vmem:[%s9902_s1 + $0xf60] sm:$0xff]  ;;  %v615_v56 = vld [vmem:[%s9902_s1 + $0x12b0] sm:$0xff] }
 0x107   :  { %v613_v54 = vld [vmem:[%s9902_s1 + $0x12a0] sm:$0xff]  ;;  %v636_v58 = vld [vmem:[%s9902_s1 + $0x1358] sm:$0xff] }
 0x108   :  { %4240 = vmatpush1.bf16.msra.mxu0 %v4239_v19  ;;  %4364 = vmatpush1.bf16.msra.mxu1 %v4363_v20  ;;  %v322_v19 = vld [vmem:[%s9902_s1 + $0x988] sm:$0xff]  ;;  %v343_v20 = vld [vmem:[%s9902_s1 + $0xa30] sm:$0xff] }
 0x109   :  { %4242 = vmatprep.subr.bf16.mxu0 %v4241_v21  ;;  %4366 = vmatprep.subr.bf16.mxu1 %v4365_v27  ;;  %v4259_v21 = vpack.c.bf16 %v298_v13, %v277_v12  ;;  %v340_v27 = vld [vmem:[%s9902_s1 + $0xa18] sm:$0xff]  ;;  %v4385_v29 = vpack.c.bf16 %v343_v20, %v322_v19  ;;  %v4399_v12 = vpack.c.bf16 %v468_v5, %v447_v3  ;;  %v530_v19 = vld [vmem:[%s9902_s1 + $0x1008] sm:$0xff]  ;;  %v551_v20 = vld [vmem:[%s9902_s1 + $0x10b0] sm:$0xff] }
 0x10a   :  { %v4277_v13 = vpack.c.bf16 %v509_v7, %v488_v6  ;;  %v655_v3 = vld [vmem:[%s9902_s1 + $0x13f0] sm:$0xff]  ;;  %v657_v5 = vld [vmem:[%s9902_s1 + $0x1400] sm:$0xff]  ;;  %v678_v7 = vld [vmem:[%s9902_s1 + $0x14a8] sm:$0xff] }
 0x10c   :  { %4244 = vmatpush1.bf16.msra.mxu0 %v4243_v11  ;;  %4368 = vmatpush1.bf16.msra.mxu1 %v4367_v34  ;;  %v364_v11 = vld [vmem:[%s9902_s1 + $0xad8] sm:$0xff]  ;;  %v385_v34 = vld [vmem:[%s9902_s1 + $0xb80] sm:$0xff] }
 0x10d   :  { %4246 = vmatprep.subr.bf16.mxu0 %v4245_v35  ;;  %4370 = vmatprep.subr.bf16.mxu1 %v4369_v40  ;;  %v4263_v35 = vpack.c.bf16 %v340_v27, %v319_v24  ;;  %v382_v40 = vld [vmem:[%s9902_s1 + $0xb68] sm:$0xff]  ;;  %v4389_v42 = vpack.c.bf16 %v385_v34, %v364_v11  ;;  %v4403_v24 = vpack.c.bf16 %v510_v18, %v489_v16  ;;  %v572_v11 = vld [vmem:[%s9902_s1 + $0x1158] sm:$0xff]  ;;  %v593_v34 = vld [vmem:[%s9902_s1 + $0x1200] sm:$0xff] }
 0x10e   :  { %v4281_v27 = vpack.c.bf16 %v551_v20, %v530_v19  ;;  %v697_v16 = vld [vmem:[%s9902_s1 + $0x1540] sm:$0xff]  ;;  %v699_v18 = vld [vmem:[%s9902_s1 + $0x1550] sm:$0xff]  ;;  %v720_v20 = vld [vmem:[%s9902_s1 + $0x15f8] sm:$0xff] }
 0x110   :  { %4248 = vmatpush1.bf16.msra.mxu0 %v4247_v47  ;;  %4372 = vmatpush1.bf16.msra.mxu1 %v4371_v48  ;;  %v406_v47 = vld [vmem:[%s9902_s1 + $0xc28] sm:$0xff]  ;;  %v427_v48 = vld [vmem:[%s9902_s1 + $0xcd0] sm:$0xff] }
 0x111   :  { %4250 = vmatprep.subr.bf16.mxu0 %v4249_v49  ;;  %4374 = vmatprep.subr.bf16.mxu1 %v4373_v53  ;;  %v4267_v49 = vpack.c.bf16 %v382_v40, %v361_v38  ;;  %v424_v53 = vld [vmem:[%s9902_s1 + $0xcb8] sm:$0xff]  ;;  %v4393_v55 = vpack.c.bf16 %v427_v48, %v406_v47  ;;  %v4407_v38 = vpack.c.bf16 %v552_v33, %v531_v30  ;;  %v614_v47 = vld [vmem:[%s9902_s1 + $0x12a8] sm:$0xff]  ;;  %v635_v48 = vld [vmem:[%s9902_s1 + $0x1350] sm:$0xff] }
 0x112   :  { %v4285_v40 = vpack.c.bf16 %v593_v34, %v572_v11  ;;  %v739_v30 = vld [vmem:[%s9902_s1 + $0x1690] sm:$0xff]  ;;  %v741_v33 = vld [vmem:[%s9902_s1 + $0x16a0] sm:$0xff]  ;;  %v762_v34 = vld [vmem:[%s9902_s1 + $0x1748] sm:$0xff] }
 0x114   :  { %4252 = vmatpush1.bf16.msra.mxu0 %v4251_v59  ;;  %4376 = vmatpush1.bf16.msra.mxu1 %v4375_v60  ;;  %v448_v59 = vld [vmem:[%s9902_s1 + $0xd78] sm:$0xff]  ;;  %v469_v60 = vld [vmem:[%s9902_s1 + $0xe20] sm:$0xff] }
 0x115   :  { %4254 = vmatprep.subr.bf16.mxu0 %v4253_v62  ;;  %4378 = vmatprep.subr.bf16.mxu1 %v4377_v2  ;;  %v4271_v62 = vpack.c.bf16 %v424_v53, %v403_v52  ;;  %v466_v2 = vld [vmem:[%s9902_s1 + $0xe08] sm:$0xff]  ;;  %v4397_v4 = vpack.c.bf16 %v469_v60, %v448_v59  ;;  %v4411_v52 = vpack.c.bf16 %v594_v45, %v573_v43  ;;  %v656_v59 = vld [vmem:[%s9902_s1 + $0x13f8] sm:$0xff]  ;;  %v677_v60 = vld [vmem:[%s9902_s1 + $0x14a0] sm:$0xff] }
 0x116   :  { %v4289_v53 = vpack.c.bf16 %v635_v48, %v614_v47  ;;  %v781_v43 = vld [vmem:[%s9902_s1 + $0x17e0] sm:$0xff]  ;;  %v783_v45 = vld [vmem:[%s9902_s1 + $0x17f0] sm:$0xff]  ;;  %v804_v48 = vld [vmem:[%s9902_s1 + $0x1898] sm:$0xff] }
 0x118   :  { %4256 = vmatpush1.bf16.msra.mxu0 %v4255_v8  ;;  %4380 = vmatpush1.bf16.msra.mxu1 %v4379_v9  ;;  %v490_v8 = vld [vmem:[%s9902_s1 + $0xec8] sm:$0xff]  ;;  %v511_v9 = vld [vmem:[%s9902_s1 + $0xf70] sm:$0xff] }
 0x119   :  { %4258 = vmatprep.subr.bf16.mxu0 %v4257_v10  ;;  %4382 = vmatprep.subr.bf16.mxu1 %v4381_v15  ;;  %v4275_v10 = vpack.c.bf16 %v466_v2, %v445_v1  ;;  %v508_v15 = vld [vmem:[%s9902_s1 + $0xf58] sm:$0xff]  ;;  %v4401_v17 = vpack.c.bf16 %v511_v9, %v490_v8  ;;  %v4415_v1 = vpack.c.bf16 %v636_v58, %v615_v56  ;;  %v698_v8 = vld [vmem:[%s9902_s1 + $0x1548] sm:$0xff]  ;;  %v719_v9 = vld [vmem:[%s9902_s1 + $0x15f0] sm:$0xff] }
 0x11a   :  { %v4293_v2 = vpack.c.bf16 %v677_v60, %v656_v59  ;;  %v825_v58 = vld [vmem:[%s9902_s1 + $0x1940] sm:$0xff]  ;;  %v846_v59 = vld [vmem:[%s9902_s1 + $0x19e8] sm:$0xff] }
 0x11c   :  { %4260 = vmatpush1.bf16.msra.mxu0 %v4259_v21  ;;  %4384 = vmatpush1.bf16.msra.mxu1 %v4383_v22  ;;  %v532_v21 = vld [vmem:[%s9902_s1 + $0x1018] sm:$0xff]  ;;  %v553_v22 = vld [vmem:[%s9902_s1 + $0x10c0] sm:$0xff] }
 0x11d   :  { %4262 = vmatprep.subr.bf16.mxu0 %v4261_v23  ;;  %4386 = vmatprep.subr.bf16.mxu1 %v4385_v29  ;;  %v4279_v23 = vpack.c.bf16 %v508_v15, %v487_v14  ;;  %v550_v29 = vld [vmem:[%s9902_s1 + $0x10a8] sm:$0xff]  ;;  %v4405_v31 = vpack.c.bf16 %v553_v22, %v532_v21  ;;  %v4419_v14 = vpack.c.bf16 %v678_v7, %v657_v5  ;;  %v740_v21 = vld [vmem:[%s9902_s1 + $0x1698] sm:$0xff]  ;;  %v761_v22 = vld [vmem:[%s9902_s1 + $0x1740] sm:$0xff] }
 0x11e   :  { %v4297_v15 = vpack.c.bf16 %v719_v9, %v698_v8  ;;  %v7202_v5 = vld [vmem:[%s9902_s1 + $0x1a90] sm:$0xff]  ;;  %v7212_v7 = vld [vmem:[%s9902_s1 + $0x1bd8] sm:$0xff]  ;;  %v7217_v8 = vld [vmem:[%s9902_s1 + $0x1c80] sm:$0xff]  ;;  %v4435_v9 = vpack.c.bf16 %v846_v59, %v825_v58 }
 0x11f   :  { %v7386_v58 = vld [vmem:[%s9902_s1 + $0x1fc0] sm:$0xff]  ;;  %v7391_v59 = vld [vmem:[%s9902_s1 + $0x2068] sm:$0xff] }
 0x120   :  { %4264 = vmatpush1.bf16.msra.mxu0 %v4263_v35  ;;  %4388 = vmatpush1.bf16.msra.mxu1 %v4387_v36  ;;  %v574_v35 = vld [vmem:[%s9902_s1 + $0x1168] sm:$0xff]  ;;  %v595_v36 = vld [vmem:[%s9902_s1 + $0x1210] sm:$0xff] }
 0x121   :  { %4266 = vmatprep.subr.bf16.mxu0 %v4265_v37  ;;  %4390 = vmatprep.subr.bf16.mxu1 %v4389_v42  ;;  %v4283_v37 = vpack.c.bf16 %v550_v29, %v529_v28  ;;  %v592_v42 = vld [vmem:[%s9902_s1 + $0x11f8] sm:$0xff]  ;;  %v4409_v44 = vpack.c.bf16 %v595_v36, %v574_v35  ;;  %v4423_v28 = vpack.c.bf16 %v720_v20, %v699_v18  ;;  %v782_v35 = vld [vmem:[%s9902_s1 + $0x17e8] sm:$0xff]  ;;  %v803_v36 = vld [vmem:[%s9902_s1 + $0x1890] sm:$0xff]  ;;  %v7237_v18 = vsub.s32 0, %v5382_v61 }
 0x122   :  { %v4301_v29 = vpack.c.bf16 %v761_v22, %v740_v21  ;;  %v7245_v20 = vld [vmem:[%s9902_s1 + $0x1bd0] sm:$0xff]  ;;  %v7250_v21 = vld [vmem:[%s9902_s1 + $0x1c78] sm:$0xff]  ;;  %v7255_v22 = vld [vmem:[%s9902_s1 + $0x1be0] sm:$0xff] }
 0x124   :  { %4268 = vmatpush1.bf16.msra.mxu0 %v4267_v49  ;;  %4392 = vmatpush1.bf16.msra.mxu1 %v4391_v50  ;;  %v616_v49 = vld [vmem:[%s9902_s1 + $0x12b8] sm:$0xff]  ;;  %v637_v50 = vld [vmem:[%s9902_s1 + $0x1360] sm:$0xff] }
 0x125   :  { %4270 = vmatprep.subr.bf16.mxu0 %v4269_v51  ;;  %4394 = vmatprep.subr.bf16.mxu1 %v4393_v55  ;;  %v4287_v51 = vpack.c.bf16 %v592_v42, %v571_v41  ;;  %v634_v55 = vld [vmem:[%s9902_s1 + $0x1348] sm:$0xff]  ;;  %v4413_v57 = vpack.c.bf16 %v637_v50, %v616_v49  ;;  %v4427_v41 = vpack.c.bf16 %v762_v34, %v741_v33  ;;  %v824_v49 = vld [vmem:[%s9902_s1 + $0x1938] sm:$0xff]  ;;  %v845_v50 = vld [vmem:[%s9902_s1 + $0x19e0] sm:$0xff] }
 0x126   :  { %v4305_v42 = vpack.c.bf16 %v803_v36, %v782_v35  ;;  %v4309_v56 = vpack.c.bf16 %v845_v50, %v824_v49  ;;  %v7291_v33 = vld [vmem:[%s9902_s1 + $0x1d20] sm:$0xff]  ;;  %v7301_v34 = vld [vmem:[%s9902_s1 + $0x1d30] sm:$0xff]  ;;  %v7306_v35 = vld [vmem:[%s9902_s1 + $0x1dd8] sm:$0xff] }
 0x127   :  { %v7311_v36 = vld [vmem:[%s9902_s1 + $0x1e78] sm:$0xff]  ;;  %v7353_v49 = vld [vmem:[%s9902_s1 + $0x1f28] sm:$0xff] }
 0x128   :  { %4272 = vmatpush1.bf16.msra.mxu0 %v4271_v62  ;;  %4396 = vmatpush1.bf16.msra.mxu1 %v4395_v63  ;;  %v658_v62 = vld [vmem:[%s9902_s1 + $0x1408] sm:$0xff]  ;;  %v679_v63 = vld [vmem:[%s9902_s1 + $0x14b0] sm:$0xff] }
 0x129   :  { %4274 = vmatprep.subr.bf16.mxu0 %v4273_v0  ;;  %4398 = vmatprep.subr.bf16.mxu1 %v4397_v4  ;;  %v4291_v0 = vpack.c.bf16 %v634_v55, %v613_v54  ;;  %v676_v4 = vld [vmem:[%s9902_s1 + $0x1498] sm:$0xff]  ;;  %v4417_v6 = vpack.c.bf16 %v679_v63, %v658_v62  ;;  %v823_v54 = vld [vmem:[%s9902_s1 + $0x1930] sm:$0xff]  ;;  %v4431_v55 = vpack.c.bf16 %v804_v48, %v783_v45  ;;  %v866_v62 = vld [vmem:[%s9902_s1 + $0x1a88] sm:$0xff] }
 0x12a   :  { %v887_v63 = vld [vmem:[%s9902_s1 + $0x1b30] sm:$0xff]  ;;  %v4317_v45 = vpack.c.bf16 %v7217_v8, %v7212_v7  ;;  %v7348_v48 = vld [vmem:[%s9902_s1 + $0x1e80] sm:$0xff]  ;;  %v7358_v50 = vld [vmem:[%s9902_s1 + $0x1fc8] sm:$0xff]  ;;  %v4447_v7 = vpack.c.bf16 %v7306_v35, %v7301_v34 }
 0x12c   :  { %4276 = vmatpush1.bf16.msra.mxu0 %v4275_v10  ;;  %4400 = vmatpush1.bf16.msra.mxu1 %v4399_v12  ;;  %v700_v10 = vld [vmem:[%s9902_s1 + $0x1558] sm:$0xff]  ;;  %v721_v12 = vld [vmem:[%s9902_s1 + $0x1600] sm:$0xff] }
 0x12d   :  { %4278 = vmatprep.subr.bf16.mxu0 %v4277_v13  ;;  %4402 = vmatprep.subr.bf16.mxu1 %v4401_v17  ;;  %v4295_v13 = vpack.c.bf16 %v676_v4, %v655_v3  ;;  %v718_v17 = vld [vmem:[%s9902_s1 + $0x15e8] sm:$0xff]  ;;  %v4421_v19 = vpack.c.bf16 %v721_v12, %v700_v10  ;;  %v4313_v10 = vpack.c.bf16 %v887_v63, %v866_v62 }
 0x12e   :  { %v7197_v3 = vld [vmem:[%s9902_s1 + $0x1b28] sm:$0xff]  ;;  %v4319_v62 = vpack.c.bf16 %v7250_v21, %v7245_v20 }
 0x12f   :  { %v7222_v12 = vld [vmem:[%s9902_s1 + $0x1be8] sm:$0xff] }
 0x130   :  { %4280 = vmatpush1.bf16.msra.mxu0 %v4279_v23  ;;  %4404 = vmatpush1.bf16.msra.mxu1 %v4403_v24  ;;  %v742_v23 = vld [vmem:[%s9902_s1 + $0x16a8] sm:$0xff]  ;;  %v763_v24 = vld [vmem:[%s9902_s1 + $0x1750] sm:$0xff] }
 0x131   :  { %4282 = vmatprep.subr.bf16.mxu0 %v4281_v27  ;;  %4406 = vmatprep.subr.bf16.mxu1 %v4405_v31  ;;  %v4299_v27 = vpack.c.bf16 %v718_v17, %v697_v16  ;;  %v760_v31 = vld [vmem:[%s9902_s1 + $0x1738] sm:$0xff]  ;;  %v4425_v11 = vpack.c.bf16 %v763_v24, %v742_v23  ;;  %v7260_v23 = vld [vmem:[%s9902_s1 + $0x1c88] sm:$0xff]  ;;  %v7263_v24 = vsub.s32 1, %v5382_v61 }
 0x132   :  { %v4443_v63 = vpack.c.bf16 %v7260_v23, %v7255_v22  ;;  %v7464_v20 = vld [vmem:[%s9902_s1 + $0x21c8] sm:$0xff]  ;;  %v4451_v22 = vpack.c.bf16 %v7353_v49, %v7348_v48 }
 0x134   :  { %4284 = vmatpush1.bf16.msra.mxu0 %v4283_v37  ;;  %4408 = vmatpush1.bf16.msra.mxu1 %v4407_v38  ;;  %v784_v37 = vld [vmem:[%s9902_s1 + $0x17f8] sm:$0xff]  ;;  %v805_v38 = vld [vmem:[%s9902_s1 + $0x18a0] sm:$0xff] }
 0x135   :  { %4286 = vmatprep.subr.bf16.mxu0 %v4285_v40  ;;  %4410 = vmatprep.subr.bf16.mxu1 %v4409_v44  ;;  %v4303_v40 = vpack.c.bf16 %v760_v31, %v739_v30  ;;  %v802_v44 = vld [vmem:[%s9902_s1 + $0x1888] sm:$0xff]  ;;  %v4429_v47 = vpack.c.bf16 %v805_v38, %v784_v37  ;;  %v7281_v30 = vld [vmem:[%s9902_s1 + $0x1d38] sm:$0xff]  ;;  %v7286_v31 = vld [vmem:[%s9902_s1 + $0x1de0] sm:$0xff] }
 0x136   :  { %v7316_v37 = vld [vmem:[%s9902_s1 + $0x1f20] sm:$0xff] }
 0x137   :  { %v4325_v8 = vpack.c.bf16 %v7316_v37, %v7311_v36 }
 0x138   :  { %4288 = vmatpush1.bf16.msra.mxu0 %v4287_v51  ;;  %4412 = vmatpush1.bf16.msra.mxu1 %v4411_v52  ;;  %v826_v51 = vld [vmem:[%s9902_s1 + $0x1948] sm:$0xff]  ;;  %v847_v52 = vld [vmem:[%s9902_s1 + $0x19f0] sm:$0xff] }
 0x139   :  { %4290 = vmatprep.subr.bf16.mxu0 %v4289_v53  ;;  %4414 = vmatprep.subr.bf16.mxu1 %v4413_v57  ;;  %v4307_v53 = vpack.c.bf16 %v802_v44, %v781_v43  ;;  %v844_v57 = vld [vmem:[%s9902_s1 + $0x19d8] sm:$0xff]  ;;  %v4433_v60 = vpack.c.bf16 %v847_v52, %v826_v51  ;;  %v7363_v51 = vld [vmem:[%s9902_s1 + $0x2070] sm:$0xff] }
 0x13a   :  { %v4311_v4 = vpack.c.bf16 %v844_v57, %v823_v54  ;;  %v7338_v43 = vld [vmem:[%s9902_s1 + $0x1f18] sm:$0xff]  ;;  %v4329_v23 = vpack.c.bf16 %v7363_v51, %v7358_v50 }
 0x13b   :  { %v7368_v52 = vld [vmem:[%s9902_s1 + $0x1fd8] sm:$0xff] }
 0x13c   :  { %4292 = vmatpush1.bf16.msra.mxu0 %v4291_v0  ;;  %4416 = vmatpush1.bf16.msra.mxu1 %v4415_v1  ;;  %v868_v0 = vld [vmem:[%s9902_s1 + $0x1a98] sm:$0xff]  ;;  %v889_v1 = vld [vmem:[%s9902_s1 + $0x1b40] sm:$0xff] }
 0x13d   :  { %4294 = vmatprep.subr.bf16.mxu0 %v4293_v2  ;;  %4418 = vmatprep.subr.bf16.mxu1 %v4417_v6  ;;  %v7192_v2 = vld [vmem:[%s9902_s1 + $0x1a80] sm:$0xff]  ;;  %v7207_v6 = vld [vmem:[%s9902_s1 + $0x1b38] sm:$0xff]  ;;  %v4437_v17 = vpack.c.bf16 %v889_v1, %v868_v0 }
 0x13e   :  { %v4315_v38 = vpack.c.bf16 %v7197_v3, %v7192_v2  ;;  %v4439_v44 = vpack.c.bf16 %v7207_v6, %v7202_v5  ;;  %v7409_v2 = vld [vmem:[%s9902_s1 + $0x2078] sm:$0xff]  ;;  %v4445_v5 = vpack.c.bf16 %v7286_v31, %v7281_v30  ;;  %v7477_v30 = vld [vmem:[%s9902_s1 + $0x2268] sm:$0xff]  ;;  %v7482_v31 = vld [vmem:[%s9902_s1 + $0x2310] sm:$0xff] }
 0x13f   :  { %v7414_v3 = vld [vmem:[%s9902_s1 + $0x2118] sm:$0xff] }
 0x140   :  { %4296 = vmatpush1.bf16.msra.mxu0 %v4295_v13  ;;  %4420 = vmatpush1.bf16.msra.mxu1 %v4419_v14  ;;  %v7227_v13 = vld [vmem:[%s9902_s1 + $0x1c90] sm:$0xff]  ;;  %v7232_v14 = vld [vmem:[%s9904_s2] sm:$0xff] }
 0x141   :  { %4298 = vmatprep.subr.bf16.mxu0 %v4297_v15  ;;  %4422 = vmatprep.subr.bf16.mxu1 %v4421_v19  ;;  %v5101_v15 = vmov 1966171168   ;;  %v7240_v19 = vsub.s32 2, %v5382_v61  ;;  %v4441_v54 = vpack.c.bf16 %v7227_v13, %v7222_v12  ;;  %v1353_v57 = vrot.slane %v7232_v14, %v7263_v24  ;;  %v7442_v12 = vld [vmem:[%s9902_s1 + $0x2110] sm:$0xff] }
 0x142   :  { %v7234_v16 = vunpack.c.l.s4 %v5101_v15 }
 0x143   :  { %2108 = vmatmul.mubr.f32.vlgmr.msra.gmra.mrb[4].mxu0 %v5442_v25  ;;  %2250 = vmatmul.mubr.f32.vlgmr.msra.gmra.mrb[4].mxu1 %v5442_v25 }
 0x144   :  { %4300 = vmatpush1.bf16.msra.mxu0 %v4299_v27  ;;  %4424 = vmatpush1.bf16.msra.mxu1 %v4423_v28  ;;  %v7268_v27 = vld [vmem:[%s9902_s1 + $0x1d28] sm:$0xff]  ;;  %v7273_v28 = vld [vmem:[%s9902_s1 + $0x1dd0] sm:$0xff] }
 0x145   :  { %4302 = vmatprep.subr.bf16.mxu0 %v4301_v29  ;;  %4426 = vmatprep.subr.bf16.mxu1 %v4425_v11  ;;  %v7276_v29 = vsub.s32 3, %v5382_v61  ;;  %v7296_v11 = vld [vmem:[%s9902_s1 + $0x1dc8] sm:$0xff]  ;;  %v4321_v1 = vpack.c.bf16 %v7273_v28, %v7268_v27  ;;  %v4331_v28 = vpack.c.bf16 %v7391_v59, %v7386_v58  ;;  %v1119_v59 = vld [vmem:[%s9902_s1 + $0x2270] sm:$0xff] }
 0x146   :  { %3695 = vmatprep.mubr.msk.f32.mxu0 %vm1472_vm0, %v5595_v39  ;;  %3696 = vmatprep.mubr.msk.f32.mxu1 %vm1472_vm0, %v5595_v39  ;;  %v4323_v6 = vpack.c.bf16 %v7296_v11, %v7291_v33  ;;  %v1138_v58 = vld [vmem:[%s9902_s1 + $0x2308] sm:$0xff] }
 0x147   :  { %v1361_v0 = vrot.slane %v7232_v14, %v7276_v29 }
 0x148   :  { %4304 = vmatpush1.bf16.msra.mxu0 %v4303_v40  ;;  %4428 = vmatpush1.bf16.msra.mxu1 %v4427_v41  ;;  %v7323_v40 = vld [vmem:[%s9902_s1 + $0x1e88] sm:$0xff]  ;;  %v7328_v41 = vld [vmem:[%s9902_s1 + $0x1f30] sm:$0xff] }
 0x149   :  { %4306 = vmatprep.subr.bf16.mxu0 %v4305_v42  ;;  %4430 = vmatprep.subr.bf16.mxu1 %v4429_v47  ;;  %v7333_v42 = vld [vmem:[%s9902_s1 + $0x1e70] sm:$0xff]  ;;  %v3210_v47 = vunpack.c.0.s8 %v7234_v16  ;;  %v7454_v16 = vld [vmem:[%s9902_s1 + $0x21b8] sm:$0xff] }
 0x14a   :  { %v4327_v15 = vpack.c.bf16 %v7338_v43, %v7333_v42  ;;  %v1120_v42 = vld [vmem:[%s9902_s1 + $0x2278] sm:$0xff] }
 0x14b   :  { %v7445_v13 = vsub.s32 %v3210_v47, %v5382_v61 }
 0x14c   :  { %4308 = vmatpush1.bf16.msra.mxu0 %v4307_v53  ;;  %4432 = vmatpush1.bf16.msra.mxu1 %v4431_v55  ;;  %v7373_v53 = vld [vmem:[%s9902_s1 + $0x2080] sm:$0xff]  ;;  %v1349_v55 = vrot.slane %v7232_v14, %v7237_v18 }
 0x14d   :  { %4310 = vmatprep.subr.bf16.mxu0 %v4309_v56  ;;  %4434 = vmatprep.subr.bf16.mxu1 %v4433_v60  ;;  %v1357_v56 = vrot.slane %v7232_v14, %v7240_v19  ;;  %v7396_v60 = vld [vmem:[%s9902_s1 + $0x1fd0] sm:$0xff]  ;;  %v4449_v14 = vpack.c.bf16 %v7328_v41, %v7323_v40  ;;  %v4453_v27 = vpack.c.bf16 %v7373_v53, %v7368_v52 }
 0x14e   :  { %v4455_v35 = vpack.c.bf16 %v7409_v2, %v7396_v60 }
 0x150   :  { %4312 = vmatpush1.bf16.msra.mxu0 %v4311_v4  ;;  %4436 = vmatpush1.bf16.msra.mxu1 %v4435_v9  ;;  %v7419_v4 = vld [vmem:[%s9902_s1 + $0x21c0] sm:$0xff]  ;;  %v7432_v9 = vld [vmem:[%s9902_s1 + $0x2128] sm:$0xff] }
 0x151   :  { %4314 = vmatprep.subr.bf16.mxu0 %v4313_v10  ;;  %4438 = vmatprep.subr.bf16.mxu1 %v4437_v17  ;;  %v7437_v10 = vld [vmem:[%s9902_s1 + $0x21d0] sm:$0xff]  ;;  %v7459_v17 = vld [vmem:[%s9902_s1 + $0x2120] sm:$0xff] }
 0x154   :  { %4316 = vmatpush1.bf16.msra.mxu0 %v4315_v38  ;;  %4440 = vmatpush1.bf16.msra.mxu1 %v4439_v44 }
 0x155   :  { %4318 = vmatprep.subr.bf16.mxu0 %v4317_v45  ;;  %4442 = vmatprep.subr.bf16.mxu1 %v4441_v54 }
 0x156   :  { %v1612_v21 = vpop.f32.mrb[0].mxu0  ;;  %v1754_v11 = vpop.f32.mrb[0].mxu1 }
 0x157   :  { %v5054_v33 = vadd.f32 %v1612_v21, %v1349_v55  ;;  %v1614_v34 = vpop.f32.mrb[1].mxu0  ;;  %v5056_v38 = vadd.f32 %v1754_v11, %v1357_v56  ;;  %v1756_v41 = vpop.f32.mrb[1].mxu1 }
 0x158   :  { %4320 = vmatpush1.bf16.msra.mxu0 %v4319_v62  ;;  %v5055_v40 = vadd.f32 %v1614_v34, %v1353_v57  ;;  %4444 = vmatpush1.bf16.msra.mxu1 %v4443_v63  ;;  %v5057_v49 = vadd.f32 %v1756_v41, %v1361_v0 }
 0x159   :  { %v3036_v47 = vsel %vm3035_vm1, %v5054_v33, 0.0  ;;  %v3351_v48 = vmul.f32 %v5054_v33, %v5054_v33  ;;  %4322 = vmatprep.subr.bf16.mxu0 %v4321_v1  ;;  %v3050_v54 = vsel %vm3035_vm1, %v5056_v38, 0.0  ;;  %v3353_v55 = vmul.f32 %v5056_v38, %v5056_v38  ;;  %4446 = vmatprep.subr.bf16.mxu1 %v4445_v5 }
 0x15a   :  { %v3037_v51 = vrot.slane %v3036_v47, 4  ;;  %v3043_v56 = vsel %vm3035_vm1, %v5055_v40, 0.0  ;;  %v3051_v62 = vrot.slane %v3050_v54, 4  ;;  %v3352_v11 = vmul.f32 %v5055_v40, %v5055_v40 }
 0x15b   :  { %v3372_v57 = vsel %vm3035_vm1, %v3351_v48, 0.0  ;;  %v3044_v21 = vrot.slane %v3043_v56, 4  ;;  %v3386_v63 = vsel %vm3035_vm1, %v3353_v55, 0.0  ;;  %v3057_v0 = vsel %vm3035_vm1, %v5057_v49, 0.0 }
 0x15c   :  { %v3038_v34 = vadd.f32 %v3037_v51, %v3036_v47  ;;  %v3373_v33 = vrot.slane %v3372_v57, 4  ;;  %4324 = vmatpush1.bf16.msra.mxu0 %v4323_v6  ;;  %v3052_v1 = vadd.f32 %v3051_v62, %v3050_v54  ;;  %v3387_v41 = vrot.slane %v3386_v63, 4  ;;  %4448 = vmatpush1.bf16.msra.mxu1 %v4447_v7 }
 0x15d   :  { %v3045_v46 = vadd.f32 %v3044_v21, %v3043_v56  ;;  %v3379_v38 = vsel %vm3035_vm1, %v3352_v11, 0.0  ;;  %4326 = vmatprep.subr.bf16.mxu0 %v4325_v8  ;;  %v3058_v45 = vrot.slane %v3057_v0, 4  ;;  %4450 = vmatprep.subr.bf16.mxu1 %v4449_v14  ;;  %v3354_v44 = vmul.f32 %v5057_v49, %v5057_v49  ;;  %v1160_v11 = vld [vmem:[%s9902_s1 + $0x23b8] sm:$0xff] }
 0x15e   :  { %v3039_v5 = vrot.slane %v3038_v34, 2  ;;  %v3374_v50 = vadd.f32 %v3373_v33, %v3372_v57  ;;  %v3380_v48 = vrot.slane %v3379_v38, 4  ;;  %v3053_v40 = vrot.slane %v3052_v1, 2 }
 0x15f   :  { %v3388_v47 = vadd.f32 %v3387_v41, %v3386_v63  ;;  %v3046_v51 = vrot.slane %v3045_v46, 2  ;;  %v3059_v6 = vadd.f32 %v3058_v45, %v3057_v0  ;;  %v3393_v56 = vsel %vm3035_vm1, %v3354_v44, 0.0 }
 0x160   :  { %v3040_v55 = vadd.f32 %v3039_v5, %v3038_v34  ;;  %v3375_v37 = vrot.slane %v3374_v50, 2  ;;  %v3381_v36 = vadd.f32 %v3380_v48, %v3379_v38  ;;  %4328 = vmatpush1.bf16.msra.mxu0 %v4327_v15  ;;  %v3054_v54 = vadd.f32 %v3053_v40, %v3052_v1  ;;  %4452 = vmatpush1.bf16.msra.mxu1 %v4451_v22  ;;  %v1181_v34 = vld [vmem:[%s9902_s1 + $0x2460] sm:$0xff] }
 0x161   :  { %v3389_v7 = vrot.slane %v3388_v47, 2  ;;  %v3047_v8 = vadd.f32 %v3046_v51, %v3045_v46  ;;  %4330 = vmatprep.subr.bf16.mxu0 %v4329_v23  ;;  %v3060_v21 = vrot.slane %v3059_v6, 2  ;;  %4454 = vmatprep.subr.bf16.mxu1 %v4453_v27  ;;  %v1141_v46 = vld [vmem:[%s9902_s1 + $0x2320] sm:$0xff]  ;;  %v3394_v23 = vrot.slane %v3393_v56, 4 }
 0x162   :  { %v3041_v14 = vrot.slane %v3040_v55, 1  ;;  %v3376_v57 = vadd.f32 %v3375_v37, %v3374_v50  ;;  %v3382_v62 = vrot.slane %v3381_v36, 2  ;;  %v3055_v43 = vrot.slane %v3054_v54, 1 }
 0x163   :  { %v3390_v15 = vadd.f32 %v3389_v7, %v3388_v47  ;;  %v3048_v22 = vrot.slane %v3047_v8, 1  ;;  %v3061_v49 = vadd.f32 %v3060_v21, %v3059_v6  ;;  %v3395_v53 = vadd.f32 %v3394_v23, %v3393_v56  ;;  %v1159_v6 = vld [vmem:[%s9902_s1 + $0x23b0] sm:$0xff]  ;;  %v1202_v7 = vld [vmem:[%s9902_s1 + $0x2508] sm:$0xff] }
 0x164   :  { %v3042_v44 = vadd.f32 %v3041_v14, %v3040_v55  ;;  %v3377_v37 = vrot.slane %v3376_v57, 1  ;;  %v3383_v45 = vadd.f32 %v3382_v62, %v3381_v36  ;;  %4332 = vmatpush1.bf16.msra.mxu0 %v4331_v28  ;;  %4456 = vmatpush1.bf16.msra.mxu1 %v4455_v35  ;;  %v9914_v27 = vpack.c.bf16 %v7419_v4, %v7414_v3  ;;  %v1117_v36 = vld [vmem:[%s9902_s1 + $0x2260] sm:$0xff]  ;;  %v1140_v4 = vld [vmem:[%s9902_s1 + $0x2318] sm:$0xff]  ;;  %v1222_v23 = vld [vmem:[%s9902_s1 + $0x25a8] sm:$0xff] }
 0x165   :  { %v3049_v52 = vadd.f32 %v3048_v22, %v3047_v8  ;;  %v4461_v50 = vpack.c.bf16 %v1141_v46, %v1120_v42  ;;  %v3056_v60 = vadd.f32 %v3055_v43, %v3054_v54  ;;  %v3062_v35 = vrot.slane %v3061_v49, 1  ;;  %v1182_v54 = vld [vmem:[%s9902_s1 + $0x2468] sm:$0xff]  ;;  %v1223_v8 = vld [vmem:[%s9902_s1 + $0x25b0] sm:$0xff]  ;;  %v1225_v62 = vld [vmem:[%s9902_s1 + $0x25c0] sm:$0xff] }
 0x166   :  { %4334 = vmatprep.subr.bf16.mxu0 %v9914_v27  ;;  %v3378_v28 = vadd.f32 %v3377_v37, %v3376_v57  ;;  %v3384_v2 = vrot.slane %v3383_v45, 1  ;;  %v9915_v3 = vpack.c.bf16 %v7437_v10, %v7432_v9  ;;  %v3391_v33 = vrot.slane %v3390_v15, 1  ;;  %v1162_v9 = vld [vmem:[%s9902_s1 + $0x23c8] sm:$0xff]  ;;  %v1183_v10 = vld [vmem:[%s9902_s1 + $0x2470] sm:$0xff]  ;;  %v1204_v57 = vld [vmem:[%s9902_s1 + $0x2518] sm:$0xff] }
 0x167   :  { %v3204_v63 = vcombine.low %v3042_v44, %v3049_v52  ;;  %v3396_v0 = vrot.slane %v3395_v53, 2  ;;  %v3063_v41 = vadd.f32 %v3062_v35, %v3061_v49  ;;  %v9916_v38 = vpack.c.bf16 %v7454_v16, %v7442_v12  ;;  %v1180_v12 = vld [vmem:[%s9902_s1 + $0x2458] sm:$0xff]  ;;  %v1161_v16 = vld [vmem:[%s9902_s1 + $0x23c0] sm:$0xff]  ;;  %v1203_v44 = vld [vmem:[%s9902_s1 + $0x2510] sm:$0xff] }
 0x168   :  { %4458 = vmatprep.subr.bf16.mxu1 %v9915_v3  ;;  %v3385_v1 = vadd.f32 %v3384_v2, %v3383_v45  ;;  %v4339_v5 = vpack.c.bf16 %v1138_v58, %v1117_v36  ;;  %v9917_v40 = vpack.c.bf16 %v7464_v20, %v7459_v17  ;;  %v9918_v47 = vpack.c.bf16 %v7482_v31, %v7477_v30  ;;  %v1224_v49 = vld [vmem:[%s9902_s1 + $0x25b8] sm:$0xff]  ;;  %v1246_v36 = vld [vmem:[%s9902_s1 + $0x2668] sm:$0xff]  ;;  %v1267_v58 = vld [vmem:[%s9902_s1 + $0x2710] sm:$0xff] }
 0x169   :  { %4336 = vmatpush1.bf16.msra.mxu0 %v9916_v38  ;;  %v3397_v48 = vadd.f32 %v3396_v0, %v3395_v53  ;;  %v4463_v51 = vpack.c.bf16 %v1140_v4, %v1119_v59  ;;  %v4341_v55 = vpack.c.bf16 %v1181_v34, %v1160_v11  ;;  %v7571_v17 = vrot.slane %v3204_v63, %v7445_v13  ;;  %v1244_v52 = vld [vmem:[%s9902_s1 + $0x2658] sm:$0xff]  ;;  %v1265_v53 = vld [vmem:[%s9902_s1 + $0x2700] sm:$0xff]  ;;  %v1243_v35 = vld [vmem:[%s9902_s1 + $0x2650] sm:$0xff] }
 0x16a   :  { %4460 = vmatpush1.bf16.msra.mxu1 %v9917_v40  ;;  %4338 = vmatprep.subr.bf16.mxu0 %v9918_v47  ;;  %v3540_v20 = vcombine.low %v3378_v28, %v3385_v1  ;;  %v3205_v30 = vcombine.low %v3056_v60, %v3063_v41  ;;  %v4465_v31 = vpack.c.bf16 %v1183_v10, %v1162_v9  ;;  %v1264_v3 = vld [vmem:[%s9902_s1 + $0x26f8] sm:$0xff]  ;;  %v1245_v4 = vld [vmem:[%s9902_s1 + $0x2660] sm:$0xff]  ;;  %v1266_v34 = vld [vmem:[%s9902_s1 + $0x2708] sm:$0xff] }
 0x16b   :  { %4462 = vmatprep.subr.bf16.mxu1 %v4461_v50  ;;  %v3392_v56 = vadd.f32 %v3391_v33, %v3390_v15  ;;  %v3398_v14 = vrot.slane %v3397_v48, 1  ;;  %v4343_v42 = vpack.c.bf16 %v1180_v12, %v1159_v6  ;;  %v4467_v43 = vpack.c.bf16 %v1182_v54, %v1161_v16  ;;  %v1201_v15 = vld [vmem:[%s9902_s1 + $0x2500] sm:$0xff]  ;;  %v1286_v33 = vld [vmem:[%s9902_s1 + $0x27a8] sm:$0xff]  ;;  %v1307_v63 = vld [vmem:[%s9902_s1 + $0x2850] sm:$0xff] }
 0x16c   :  { %v7589_v21 = vrot.slane %v3205_v30, %v7445_v13  ;;  %v4345_v22 = vpack.c.bf16 %v1223_v8, %v1202_v7  ;;  %v4469_v45 = vpack.c.bf16 %v1225_v62, %v1204_v57  ;;  %v7612_v27 = vrot.slane %v3540_v20, %v7445_v13  ;;  %v1288_v9 = vld [vmem:[%s9902_s1 + $0x27b8] sm:$0xff]  ;;  %v1309_v10 = vld [vmem:[%s9902_s1 + $0x2860] sm:$0xff]  ;;  %v1287_v47 = vld [vmem:[%s9902_s1 + $0x27b0] sm:$0xff] }
 0x16d   :  { %4340 = vmatpush1.bf16.msra.mxu0 %v4339_v5  ;;  %v3399_v46 = vadd.f32 %v3398_v14, %v3397_v48  ;;  %v4347_v59 = vpack.c.bf16 %v1222_v23, %v1201_v15  ;;  %v4471_v60 = vpack.c.bf16 %v1224_v49, %v1203_v44  ;;  %v4349_v2 = vpack.c.bf16 %v1265_v53, %v1244_v52  ;;  %v1285_v5 = vld [vmem:[%s9902_s1 + $0x27a0] sm:$0xff]  ;;  %v1306_v48 = vld [vmem:[%s9902_s1 + $0x2848] sm:$0xff]  ;;  %v1328_v12 = vld [vmem:[%s9902_s1 + $0x28f8] sm:$0xff] }
 0x16e   :  { %4464 = vmatpush1.bf16.msra.mxu1 %v4463_v51  ;;  %4342 = vmatprep.subr.bf16.mxu0 %v4341_v55  ;;  %v4473_v11 = vpack.c.bf16 %v1267_v58, %v1246_v36  ;;  %v4351_v1 = vpack.c.bf16 %v1264_v3, %v1243_v35  ;;  %v4475_v41 = vpack.c.bf16 %v1266_v34, %v1245_v4  ;;  %v1308_v51 = vld [vmem:[%s9902_s1 + $0x2858] sm:$0xff]  ;;  %v1330_v16 = vld [vmem:[%s9902_s1 + $0x2908] sm:$0xff]  ;;  %v1327_v30 = vld [vmem:[%s9902_s1 + $0x28f0] sm:$0xff] }
 0x16f   :  { %4466 = vmatprep.subr.bf16.mxu1 %v4465_v31  ;;  %v3541_v50 = vcombine.low %v3392_v56, %v3399_v46  ;;  %v4353_v38 = vpack.c.bf16 %v1307_v63, %v1286_v33  ;;  %v4477_v40 = vpack.c.bf16 %v1309_v10, %v1288_v9  ;;  %v4355_v55 = vpack.c.bf16 %v1306_v48, %v1285_v5  ;;  %v30_v20 = vld [vmem:[%s9902_s1 + $0x68] sm:$0xff]  ;;  %v51_v31 = vld [vmem:[%s9902_s1 + $0x110] sm:$0xff]  ;;  %v32_v54 = vld [vmem:[%s9902_s1 + $0x78] sm:$0xff] }
 0x170   :  { %v4479_v6 = vpack.c.bf16 %v1308_v51, %v1287_v47  ;;  %v53_v7 = vld [vmem:[%s9902_s1 + $0x120] sm:$0xff]  ;;  %v50_v56 = vld [vmem:[%s9902_s1 + $0x108] sm:$0xff]  ;;  %v31_v14 = vld [vmem:[%s9902_s1 + $0x70] sm:$0xff] }
 0x171   :  { %4344 = vmatpush1.bf16.msra.mxu0 %v4343_v42  ;;  %v7621_v28 = vrot.slane %v3541_v50, %v7445_v13  ;;  %v29_v8 = vld [vmem:[%s9902_s1 + $0x60] sm:$0xff]  ;;  %v52_v57 = vld [vmem:[%s9902_s1 + $0x118] sm:$0xff]  ;;  %v95_v15 = vld [vmem:[%s9902_s1 + $0x270] sm:$0xff]  ;;  %v4605_v23 = vpack.c.bf16 %v53_v7, %v32_v54 }
 0x172   :  { %4468 = vmatpush1.bf16.msra.mxu1 %v4467_v43  ;;  %4346 = vmatprep.subr.bf16.mxu0 %v4345_v22  ;;  %v72_v62 = vld [vmem:[%s9902_s1 + $0x1b8] sm:$0xff]  ;;  %v93_v42 = vld [vmem:[%s9902_s1 + $0x260] sm:$0xff]  ;;  %v4481_v43 = vpack.c.bf16 %v51_v31, %v30_v20  ;;  %v74_v22 = vld [vmem:[%s9902_s1 + $0x1c8] sm:$0xff]  ;;  %v4483_v44 = vpack.c.bf16 %v50_v56, %v29_v8 }
 0x173   :  { %4470 = vmatprep.subr.bf16.mxu1 %v4469_v45  ;;  %v1329_v46 = vld [vmem:[%s9902_s1 + $0x2900] sm:$0xff]  ;;  %v4607_v45 = vpack.c.bf16 %v52_v57, %v31_v14  ;;  %v4485_v49 = vpack.c.bf16 %v93_v42, %v72_v62  ;;  %v71_v52 = vld [vmem:[%s9902_s1 + $0x1b0] sm:$0xff]  ;;  %v92_v53 = vld [vmem:[%s9902_s1 + $0x258] sm:$0xff]  ;;  %v4609_v36 = vpack.c.bf16 %v95_v15, %v74_v22 }
 0x174   :  { %v73_v50 = vld [vmem:[%s9902_s1 + $0x1c0] sm:$0xff]  ;;  %v94_v58 = vld [vmem:[%s9902_s1 + $0x268] sm:$0xff]  ;;  %v4487_v3 = vpack.c.bf16 %v92_v53, %v71_v52  ;;  %v115_v63 = vld [vmem:[%s9902_s1 + $0x310] sm:$0xff] }
 0x175   :  { %4348 = vmatpush1.bf16.msra.mxu0 %v4347_v59  ;;  %v114_v59 = vld [vmem:[%s9902_s1 + $0x308] sm:$0xff]  ;;  %v137_v35 = vld [vmem:[%s9902_s1 + $0x3c0] sm:$0xff]  ;;  %v4611_v4 = vpack.c.bf16 %v94_v58, %v73_v50  ;;  %v136_v10 = vld [vmem:[%s9902_s1 + $0x3b8] sm:$0xff] }
 0x176   :  { %4472 = vmatpush1.bf16.msra.mxu1 %v4471_v60  ;;  %4350 = vmatprep.subr.bf16.mxu0 %v4349_v2  ;;  %v135_v60 = vld [vmem:[%s9902_s1 + $0x3b0] sm:$0xff]  ;;  %v116_v2 = vld [vmem:[%s9902_s1 + $0x318] sm:$0xff]  ;;  %v113_v34 = vld [vmem:[%s9902_s1 + $0x300] sm:$0xff] }
 0x177   :  { %4474 = vmatprep.subr.bf16.mxu1 %v4473_v11  ;;  %v4489_v11 = vpack.c.bf16 %v135_v60, %v114_v59  ;;  %v134_v33 = vld [vmem:[%s9902_s1 + $0x3a8] sm:$0xff]  ;;  %v4613_v9 = vpack.c.bf16 %v137_v35, %v116_v2  ;;  %v179_v5 = vld [vmem:[%s9902_s1 + $0x510] sm:$0xff]  ;;  %v200_v31 = vld [vmem:[%s9902_s1 + $0x5b8] sm:$0xff] }
 0x178   :  { %v4491_v48 = vpack.c.bf16 %v134_v33, %v113_v34  ;;  %v155_v51 = vld [vmem:[%s9902_s1 + $0x450] sm:$0xff]  ;;  %v198_v20 = vld [vmem:[%s9902_s1 + $0x5a8] sm:$0xff]  ;;  %v221_v54 = vld [vmem:[%s9902_s1 + $0x660] sm:$0xff] }
 0x179   :  { %4352 = vmatpush1.bf16.msra.mxu0 %v4351_v1  ;;  %v156_v1 = vld [vmem:[%s9902_s1 + $0x458] sm:$0xff]  ;;  %v197_v14 = vld [vmem:[%s9902_s1 + $0x5a0] sm:$0xff]  ;;  %v218_v57 = vld [vmem:[%s9902_s1 + $0x648] sm:$0xff]  ;;  %v4621_v42 = vpack.c.bf16 %v221_v54, %v200_v31 }
 0x17a   :  { %4476 = vmatpush1.bf16.msra.mxu1 %v4475_v41  ;;  %4354 = vmatprep.subr.bf16.mxu0 %v4353_v38  ;;  %v177_v41 = vld [vmem:[%s9902_s1 + $0x500] sm:$0xff]  ;;  %v158_v38 = vld [vmem:[%s9902_s1 + $0x468] sm:$0xff]  ;;  %v199_v62 = vld [vmem:[%s9902_s1 + $0x5b0] sm:$0xff] }
 0x17b   :  { %4478 = vmatprep.subr.bf16.mxu1 %v4477_v40  ;;  %v4615_v40 = vpack.c.bf16 %v136_v10, %v115_v63  ;;  %v4493_v47 = vpack.c.bf16 %v177_v41, %v156_v1  ;;  %v261_v22 = vld [vmem:[%s9902_s1 + $0x7a0] sm:$0xff]  ;;  %v242_v15 = vld [vmem:[%s9902_s1 + $0x708] sm:$0xff]  ;;  %v239_v52 = vld [vmem:[%s9902_s1 + $0x6f0] sm:$0xff] }
 0x17c   :  { %v260_v53 = vld [vmem:[%s9902_s1 + $0x798] sm:$0xff]  ;;  %v241_v50 = vld [vmem:[%s9902_s1 + $0x700] sm:$0xff]  ;;  %v262_v58 = vld [vmem:[%s9902_s1 + $0x7a8] sm:$0xff] }
 0x17d   :  { %4356 = vmatpush1.bf16.msra.mxu0 %v4355_v55  ;;  %v176_v55 = vld [vmem:[%s9902_s1 + $0x4f8] sm:$0xff]  ;;  %v282_v59 = vld [vmem:[%s9902_s1 + $0x848] sm:$0xff]  ;;  %v303_v60 = vld [vmem:[%s9902_s1 + $0x8f0] sm:$0xff] }
 0x17e   :  { %4480 = vmatpush1.bf16.msra.mxu1 %v4479_v6  ;;  %2174 = vmatprep.subr.mxu0 %v1328_v12  ;;  %v157_v6 = vld [vmem:[%s9902_s1 + $0x460] sm:$0xff]  ;;  %v4617_v12 = vpack.c.bf16 %v179_v5, %v158_v38  ;;  %v4495_v7 = vpack.c.bf16 %v176_v55, %v155_v51  ;;  %v284_v2 = vld [vmem:[%s9902_s1 + $0x858] sm:$0xff]  ;;  %v302_v33 = vld [vmem:[%s9902_s1 + $0x8e8] sm:$0xff] }
 0x17f   :  { %2316 = vmatprep.subr.mxu1 %v1330_v16  ;;  %v178_v16 = vld [vmem:[%s9902_s1 + $0x508] sm:$0xff]  ;;  %v305_v35 = vld [vmem:[%s9902_s1 + $0x900] sm:$0xff]  ;;  %v283_v63 = vld [vmem:[%s9902_s1 + $0x850] sm:$0xff] }
 0x180   :  { %v4619_v8 = vpack.c.bf16 %v178_v16, %v157_v6  ;;  %v281_v34 = vld [vmem:[%s9902_s1 + $0x840] sm:$0xff]  ;;  %v304_v10 = vld [vmem:[%s9902_s1 + $0x8f8] sm:$0xff]  ;;  %v326_v38 = vld [vmem:[%s9902_s1 + $0x9a8] sm:$0xff] }
 0x181   :  { %2175 = vmatpush1.msra.mxu0 %v1327_v30  ;;  %v219_v30 = vld [vmem:[%s9902_s1 + $0x650] sm:$0xff]  ;;  %v324_v1 = vld [vmem:[%s9902_s1 + $0x998] sm:$0xff]  ;;  %v345_v41 = vld [vmem:[%s9902_s1 + $0xa40] sm:$0xff] }
 0x182   :  { %2317 = vmatpush1.msra.mxu1 %v1329_v46  ;;  %2179 = vmatmul.mubr.f32.vlgmr.msra.gmra.mrb[4].mxu0 %v5567_v26  ;;  %v4497_v56 = vpack.c.bf16 %v219_v30, %v198_v20  ;;  %v220_v46 = vld [vmem:[%s9902_s1 + $0x658] sm:$0xff]  ;;  %v347_v5 = vld [vmem:[%s9902_s1 + $0xa50] sm:$0xff]  ;;  %v325_v6 = vld [vmem:[%s9902_s1 + $0x9a0] sm:$0xff] }
 0x183   :  { %2321 = vmatmul.mubr.f32.vlgmr.msra.gmra.mrb[4].mxu1 %v5567_v26  ;;  %4482 = vmatprep.subr.bf16.mxu0 %v4481_v43  ;;  %v240_v43 = vld [vmem:[%s9902_s1 + $0x6f8] sm:$0xff]  ;;  %v323_v51 = vld [vmem:[%s9902_s1 + $0x990] sm:$0xff]  ;;  %v346_v16 = vld [vmem:[%s9902_s1 + $0xa48] sm:$0xff] }
 0x184   :  { %4606 = vmatprep.subr.bf16.mxu1 %v4605_v23  ;;  %4484 = vmatpush1.bf16.msra.mxu0 %v4483_v44  ;;  %v263_v23 = vld [vmem:[%s9902_s1 + $0x7b0] sm:$0xff]  ;;  %v4499_v44 = vpack.c.bf16 %v218_v57, %v197_v14  ;;  %v344_v55 = vld [vmem:[%s9902_s1 + $0xa38] sm:$0xff]  ;;  %v366_v20 = vld [vmem:[%s9902_s1 + $0xae8] sm:$0xff] }
 0x185   :  { %4608 = vmatpush1.bf16.msra.mxu1 %v4607_v45  ;;  %4486 = vmatprep.subr.bf16.mxu0 %v4485_v49  ;;  %v4623_v45 = vpack.c.bf16 %v220_v46, %v199_v62  ;;  %v4501_v49 = vpack.c.bf16 %v261_v22, %v240_v43  ;;  %v387_v30 = vld [vmem:[%s9902_s1 + $0xb90] sm:$0xff]  ;;  %v368_v31 = vld [vmem:[%s9902_s1 + $0xaf8] sm:$0xff]  ;;  %v389_v54 = vld [vmem:[%s9902_s1 + $0xba0] sm:$0xff] }
 0x186   :  { %4610 = vmatprep.subr.bf16.mxu1 %v4609_v36  ;;  %2391 = vmatprep.mubr.f32.mxu0 %v5455_v32  ;;  %v4625_v36 = vpack.c.bf16 %v263_v23, %v242_v15  ;;  %v365_v14 = vld [vmem:[%s9902_s1 + $0xae0] sm:$0xff]  ;;  %v386_v57 = vld [vmem:[%s9902_s1 + $0xb88] sm:$0xff]  ;;  %v367_v62 = vld [vmem:[%s9902_s1 + $0xaf0] sm:$0xff] }
 0x187   :  { %2533 = vmatprep.mubr.f32.mxu1 %v5455_v32  ;;  %v388_v46 = vld [vmem:[%s9902_s1 + $0xb98] sm:$0xff]  ;;  %v429_v22 = vld [vmem:[%s9902_s1 + $0xce0] sm:$0xff]  ;;  %v410_v15 = vld [vmem:[%s9902_s1 + $0xc48] sm:$0xff] }
 0x188   :  { %4488 = vmatpush1.bf16.msra.mxu0 %v4487_v3  ;;  %v4503_v3 = vpack.c.bf16 %v260_v53, %v239_v52  ;;  %v408_v43 = vld [vmem:[%s9902_s1 + $0xc38] sm:$0xff]  ;;  %v431_v23 = vld [vmem:[%s9902_s1 + $0xcf0] sm:$0xff] }
 0x189   :  { %4612 = vmatpush1.bf16.msra.mxu1 %v4611_v4  ;;  %4490 = vmatprep.subr.bf16.mxu0 %v4489_v11  ;;  %v4627_v4 = vpack.c.bf16 %v262_v58, %v241_v50  ;;  %v4505_v11 = vpack.c.bf16 %v303_v60, %v282_v59  ;;  %v407_v52 = vld [vmem:[%s9902_s1 + $0xc30] sm:$0xff]  ;;  %v428_v53 = vld [vmem:[%s9902_s1 + $0xcd8] sm:$0xff]  ;;  %v409_v50 = vld [vmem:[%s9902_s1 + $0xc40] sm:$0xff] }
 0x18a   :  { %4614 = vmatprep.subr.bf16.mxu1 %v4613_v9  ;;  %v4629_v9 = vpack.c.bf16 %v305_v35, %v284_v2  ;;  %v430_v58 = vld [vmem:[%s9902_s1 + $0xce8] sm:$0xff]  ;;  %v471_v60 = vld [vmem:[%s9902_s1 + $0xe30] sm:$0xff]  ;;  %v452_v2 = vld [vmem:[%s9902_s1 + $0xd98] sm:$0xff] }
 0x18b   :  { %v450_v59 = vld [vmem:[%s9902_s1 + $0xd88] sm:$0xff]  ;;  %v473_v35 = vld [vmem:[%s9902_s1 + $0xe40] sm:$0xff] }
 0x18c   :  { %4492 = vmatpush1.bf16.msra.mxu0 %v4491_v48  ;;  %v4507_v48 = vpack.c.bf16 %v302_v33, %v281_v34  ;;  %v449_v34 = vld [vmem:[%s9902_s1 + $0xd80] sm:$0xff]  ;;  %v470_v33 = vld [vmem:[%s9902_s1 + $0xe28] sm:$0xff] }
 0x18d   :  { %4616 = vmatpush1.bf16.msra.mxu1 %v4615_v40  ;;  %4494 = vmatprep.subr.bf16.mxu0 %v4493_v47  ;;  %v4631_v40 = vpack.c.bf16 %v304_v10, %v283_v63  ;;  %v4509_v47 = vpack.c.bf16 %v345_v41, %v324_v1  ;;  %v451_v63 = vld [vmem:[%s9902_s1 + $0xd90] sm:$0xff]  ;;  %v472_v10 = vld [vmem:[%s9902_s1 + $0xe38] sm:$0xff]  ;;  %v513_v41 = vld [vmem:[%s9902_s1 + $0xf80] sm:$0xff] }
 0x18e   :  { %4618 = vmatprep.subr.bf16.mxu1 %v4617_v12  ;;  %v4633_v12 = vpack.c.bf16 %v347_v5, %v326_v38  ;;  %v492_v1 = vld [vmem:[%s9902_s1 + $0xed8] sm:$0xff]  ;;  %v494_v38 = vld [vmem:[%s9902_s1 + $0xee8] sm:$0xff]  ;;  %v515_v5 = vld [vmem:[%s9902_s1 + $0xf90] sm:$0xff] }
 0x190   :  { %4496 = vmatpush1.bf16.msra.mxu0 %v4495_v7  ;;  %v4511_v7 = vpack.c.bf16 %v344_v55, %v323_v51  ;;  %v491_v51 = vld [vmem:[%s9902_s1 + $0xed0] sm:$0xff]  ;;  %v512_v55 = vld [vmem:[%s9902_s1 + $0xf78] sm:$0xff] }
 0x191   :  { %4620 = vmatpush1.bf16.msra.mxu1 %v4619_v8  ;;  %4498 = vmatprep.subr.bf16.mxu0 %v4497_v56  ;;  %v4635_v8 = vpack.c.bf16 %v346_v16, %v325_v6  ;;  %v4513_v56 = vpack.c.bf16 %v387_v30, %v366_v20  ;;  %v493_v6 = vld [vmem:[%s9902_s1 + $0xee0] sm:$0xff]  ;;  %v514_v16 = vld [vmem:[%s9902_s1 + $0xf88] sm:$0xff]  ;;  %v555_v30 = vld [vmem:[%s9902_s1 + $0x10d0] sm:$0xff] }
 0x192   :  { %4622 = vmatprep.subr.bf16.mxu1 %v4621_v42  ;;  %v4637_v42 = vpack.c.bf16 %v389_v54, %v368_v31  ;;  %v534_v20 = vld [vmem:[%s9902_s1 + $0x1028] sm:$0xff]  ;;  %v536_v31 = vld [vmem:[%s9902_s1 + $0x1038] sm:$0xff]  ;;  %v557_v54 = vld [vmem:[%s9902_s1 + $0x10e0] sm:$0xff] }
 0x194   :  { %4500 = vmatpush1.bf16.msra.mxu0 %v4499_v44  ;;  %v4515_v44 = vpack.c.bf16 %v386_v57, %v365_v14  ;;  %v533_v14 = vld [vmem:[%s9902_s1 + $0x1020] sm:$0xff]  ;;  %v554_v57 = vld [vmem:[%s9902_s1 + $0x10c8] sm:$0xff] }
 0x195   :  { %4624 = vmatpush1.bf16.msra.mxu1 %v4623_v45  ;;  %4502 = vmatprep.subr.bf16.mxu0 %v4501_v49  ;;  %v4639_v45 = vpack.c.bf16 %v388_v46, %v367_v62  ;;  %v4517_v49 = vpack.c.bf16 %v429_v22, %v408_v43  ;;  %v535_v62 = vld [vmem:[%s9902_s1 + $0x1030] sm:$0xff]  ;;  %v556_v46 = vld [vmem:[%s9902_s1 + $0x10d8] sm:$0xff]  ;;  %v597_v22 = vld [vmem:[%s9902_s1 + $0x1220] sm:$0xff] }
 0x196   :  { %4626 = vmatprep.subr.bf16.mxu1 %v4625_v36  ;;  %v4641_v36 = vpack.c.bf16 %v431_v23, %v410_v15  ;;  %v576_v43 = vld [vmem:[%s9902_s1 + $0x1178] sm:$0xff]  ;;  %v578_v15 = vld [vmem:[%s9902_s1 + $0x1188] sm:$0xff]  ;;  %v599_v23 = vld [vmem:[%s9902_s1 + $0x1230] sm:$0xff] }
 0x198   :  { %4504 = vmatpush1.bf16.msra.mxu0 %v4503_v3  ;;  %v4519_v3 = vpack.c.bf16 %v428_v53, %v407_v52  ;;  %v575_v52 = vld [vmem:[%s9902_s1 + $0x1170] sm:$0xff]  ;;  %v596_v53 = vld [vmem:[%s9902_s1 + $0x1218] sm:$0xff] }
 0x199   :  { %4628 = vmatpush1.bf16.msra.mxu1 %v4627_v4  ;;  %4506 = vmatprep.subr.bf16.mxu0 %v4505_v11  ;;  %v4643_v4 = vpack.c.bf16 %v430_v58, %v409_v50  ;;  %v4521_v11 = vpack.c.bf16 %v471_v60, %v450_v59  ;;  %v577_v50 = vld [vmem:[%s9902_s1 + $0x1180] sm:$0xff]  ;;  %v598_v58 = vld [vmem:[%s9902_s1 + $0x1228] sm:$0xff]  ;;  %v639_v60 = vld [vmem:[%s9902_s1 + $0x1370] sm:$0xff] }
 0x19a   :  { %4630 = vmatprep.subr.bf16.mxu1 %v4629_v9  ;;  %v4645_v9 = vpack.c.bf16 %v473_v35, %v452_v2  ;;  %v618_v59 = vld [vmem:[%s9902_s1 + $0x12c8] sm:$0xff]  ;;  %v620_v2 = vld [vmem:[%s9902_s1 + $0x12d8] sm:$0xff]  ;;  %v641_v35 = vld [vmem:[%s9902_s1 + $0x1380] sm:$0xff] }
 0x19c   :  { %4508 = vmatpush1.bf16.msra.mxu0 %v4507_v48  ;;  %v4523_v48 = vpack.c.bf16 %v470_v33, %v449_v34  ;;  %v617_v34 = vld [vmem:[%s9902_s1 + $0x12c0] sm:$0xff]  ;;  %v638_v33 = vld [vmem:[%s9902_s1 + $0x1368] sm:$0xff] }
 0x19d   :  { %4632 = vmatpush1.bf16.msra.mxu1 %v4631_v40  ;;  %4510 = vmatprep.subr.bf16.mxu0 %v4509_v47  ;;  %v4647_v40 = vpack.c.bf16 %v472_v10, %v451_v63  ;;  %v4525_v47 = vpack.c.bf16 %v513_v41, %v492_v1  ;;  %v619_v63 = vld [vmem:[%s9902_s1 + $0x12d0] sm:$0xff]  ;;  %v640_v10 = vld [vmem:[%s9902_s1 + $0x1378] sm:$0xff]  ;;  %v681_v41 = vld [vmem:[%s9902_s1 + $0x14c0] sm:$0xff] }
 0x19e   :  { %4634 = vmatprep.subr.bf16.mxu1 %v4633_v12  ;;  %v4649_v12 = vpack.c.bf16 %v515_v5, %v494_v38  ;;  %v660_v1 = vld [vmem:[%s9902_s1 + $0x1418] sm:$0xff]  ;;  %v662_v38 = vld [vmem:[%s9902_s1 + $0x1428] sm:$0xff]  ;;  %v683_v5 = vld [vmem:[%s9902_s1 + $0x14d0] sm:$0xff] }
 0x1a0   :  { %4512 = vmatpush1.bf16.msra.mxu0 %v4511_v7  ;;  %v4527_v7 = vpack.c.bf16 %v512_v55, %v491_v51  ;;  %v659_v51 = vld [vmem:[%s9902_s1 + $0x1410] sm:$0xff]  ;;  %v680_v55 = vld [vmem:[%s9902_s1 + $0x14b8] sm:$0xff] }
 0x1a1   :  { %4636 = vmatpush1.bf16.msra.mxu1 %v4635_v8  ;;  %4514 = vmatprep.subr.bf16.mxu0 %v4513_v56  ;;  %v4651_v8 = vpack.c.bf16 %v514_v16, %v493_v6  ;;  %v4529_v56 = vpack.c.bf16 %v555_v30, %v534_v20  ;;  %v661_v6 = vld [vmem:[%s9902_s1 + $0x1420] sm:$0xff]  ;;  %v682_v16 = vld [vmem:[%s9902_s1 + $0x14c8] sm:$0xff]  ;;  %v723_v30 = vld [vmem:[%s9902_s1 + $0x1610] sm:$0xff] }
 0x1a2   :  { %4638 = vmatprep.subr.bf16.mxu1 %v4637_v42  ;;  %v4653_v42 = vpack.c.bf16 %v557_v54, %v536_v31  ;;  %v702_v20 = vld [vmem:[%s9902_s1 + $0x1568] sm:$0xff]  ;;  %v704_v31 = vld [vmem:[%s9902_s1 + $0x1578] sm:$0xff]  ;;  %v725_v54 = vld [vmem:[%s9902_s1 + $0x1620] sm:$0xff] }
 0x1a4   :  { %4516 = vmatpush1.bf16.msra.mxu0 %v4515_v44  ;;  %v4531_v44 = vpack.c.bf16 %v554_v57, %v533_v14  ;;  %v701_v14 = vld [vmem:[%s9902_s1 + $0x1560] sm:$0xff]  ;;  %v722_v57 = vld [vmem:[%s9902_s1 + $0x1608] sm:$0xff] }
 0x1a5   :  { %4640 = vmatpush1.bf16.msra.mxu1 %v4639_v45  ;;  %4518 = vmatprep.subr.bf16.mxu0 %v4517_v49  ;;  %v4655_v45 = vpack.c.bf16 %v556_v46, %v535_v62  ;;  %v4533_v49 = vpack.c.bf16 %v597_v22, %v576_v43  ;;  %v703_v62 = vld [vmem:[%s9902_s1 + $0x1570] sm:$0xff]  ;;  %v724_v46 = vld [vmem:[%s9902_s1 + $0x1618] sm:$0xff]  ;;  %v765_v22 = vld [vmem:[%s9902_s1 + $0x1760] sm:$0xff] }
 0x1a6   :  { %4642 = vmatprep.subr.bf16.mxu1 %v4641_v36  ;;  %v4657_v36 = vpack.c.bf16 %v599_v23, %v578_v15  ;;  %v744_v43 = vld [vmem:[%s9902_s1 + $0x16b8] sm:$0xff]  ;;  %v746_v15 = vld [vmem:[%s9902_s1 + $0x16c8] sm:$0xff]  ;;  %v767_v23 = vld [vmem:[%s9902_s1 + $0x1770] sm:$0xff] }
 0x1a8   :  { %4520 = vmatpush1.bf16.msra.mxu0 %v4519_v3  ;;  %v4535_v3 = vpack.c.bf16 %v596_v53, %v575_v52  ;;  %v743_v52 = vld [vmem:[%s9902_s1 + $0x16b0] sm:$0xff]  ;;  %v764_v53 = vld [vmem:[%s9902_s1 + $0x1758] sm:$0xff] }
 0x1a9   :  { %4644 = vmatpush1.bf16.msra.mxu1 %v4643_v4  ;;  %4522 = vmatprep.subr.bf16.mxu0 %v4521_v11  ;;  %v4659_v4 = vpack.c.bf16 %v598_v58, %v577_v50  ;;  %v4537_v11 = vpack.c.bf16 %v639_v60, %v618_v59  ;;  %v745_v50 = vld [vmem:[%s9902_s1 + $0x16c0] sm:$0xff]  ;;  %v766_v58 = vld [vmem:[%s9902_s1 + $0x1768] sm:$0xff]  ;;  %v807_v60 = vld [vmem:[%s9902_s1 + $0x18b0] sm:$0xff] }
 0x1aa   :  { %4646 = vmatprep.subr.bf16.mxu1 %v4645_v9  ;;  %v4661_v9 = vpack.c.bf16 %v641_v35, %v620_v2  ;;  %v786_v59 = vld [vmem:[%s9902_s1 + $0x1808] sm:$0xff]  ;;  %v788_v2 = vld [vmem:[%s9902_s1 + $0x1818] sm:$0xff]  ;;  %v809_v35 = vld [vmem:[%s9902_s1 + $0x18c0] sm:$0xff] }
 0x1ac   :  { %4524 = vmatpush1.bf16.msra.mxu0 %v4523_v48  ;;  %v4539_v48 = vpack.c.bf16 %v638_v33, %v617_v34  ;;  %v785_v34 = vld [vmem:[%s9902_s1 + $0x1800] sm:$0xff]  ;;  %v806_v33 = vld [vmem:[%s9902_s1 + $0x18a8] sm:$0xff] }
 0x1ad   :  { %4648 = vmatpush1.bf16.msra.mxu1 %v4647_v40  ;;  %4526 = vmatprep.subr.bf16.mxu0 %v4525_v47  ;;  %v4663_v40 = vpack.c.bf16 %v640_v10, %v619_v63  ;;  %v4541_v47 = vpack.c.bf16 %v681_v41, %v660_v1  ;;  %v787_v63 = vld [vmem:[%s9902_s1 + $0x1810] sm:$0xff]  ;;  %v808_v10 = vld [vmem:[%s9902_s1 + $0x18b8] sm:$0xff]  ;;  %v849_v41 = vld [vmem:[%s9902_s1 + $0x1a00] sm:$0xff] }
 0x1ae   :  { %4650 = vmatprep.subr.bf16.mxu1 %v4649_v12  ;;  %v4665_v12 = vpack.c.bf16 %v683_v5, %v662_v38  ;;  %v828_v1 = vld [vmem:[%s9902_s1 + $0x1958] sm:$0xff]  ;;  %v830_v38 = vld [vmem:[%s9902_s1 + $0x1968] sm:$0xff]  ;;  %v851_v5 = vld [vmem:[%s9902_s1 + $0x1a10] sm:$0xff] }
 0x1b0   :  { %4528 = vmatpush1.bf16.msra.mxu0 %v4527_v7  ;;  %v4543_v7 = vpack.c.bf16 %v680_v55, %v659_v51  ;;  %v4557_v51 = vpack.c.bf16 %v849_v41, %v828_v1  ;;  %v848_v55 = vld [vmem:[%s9902_s1 + $0x19f8] sm:$0xff]  ;;  %v8301_v1 = vld [vmem:[%s9902_s1 + $0x1f50] sm:$0xff] }
 0x1b1   :  { %4652 = vmatpush1.bf16.msra.mxu1 %v4651_v8  ;;  %4530 = vmatprep.subr.bf16.mxu0 %v4529_v56  ;;  %v4667_v8 = vpack.c.bf16 %v682_v16, %v661_v6  ;;  %v4545_v56 = vpack.c.bf16 %v723_v30, %v702_v20  ;;  %v829_v6 = vld [vmem:[%s9902_s1 + $0x1960] sm:$0xff]  ;;  %v4681_v16 = vpack.c.bf16 %v851_v5, %v830_v38  ;;  %v870_v20 = vld [vmem:[%s9902_s1 + $0x1aa8] sm:$0xff]  ;;  %v891_v30 = vld [vmem:[%s9902_s1 + $0x1b50] sm:$0xff] }
 0x1b2   :  { %4654 = vmatprep.subr.bf16.mxu1 %v4653_v42  ;;  %v4669_v42 = vpack.c.bf16 %v725_v54, %v704_v31  ;;  %v872_v31 = vld [vmem:[%s9902_s1 + $0x1ab8] sm:$0xff]  ;;  %v893_v54 = vld [vmem:[%s9902_s1 + $0x1b60] sm:$0xff]  ;;  %v8306_v41 = vld [vmem:[%s9902_s1 + $0x1e90] sm:$0xff] }
 0x1b3   :  { %v8311_v38 = vld [vmem:[%s9902_s1 + $0x1f38] sm:$0xff] }
 0x1b4   :  { %4532 = vmatpush1.bf16.msra.mxu0 %v4531_v44  ;;  %v4547_v44 = vpack.c.bf16 %v722_v57, %v701_v14  ;;  %v8188_v14 = vld [vmem:[%s9902_s1 + $0x1ab0] sm:$0xff]  ;;  %v8193_v57 = vld [vmem:[%s9902_s1 + $0x1b58] sm:$0xff] }
 0x1b5   :  { %4656 = vmatpush1.bf16.msra.mxu1 %v4655_v45  ;;  %4534 = vmatprep.subr.bf16.mxu0 %v4533_v49  ;;  %v4671_v45 = vpack.c.bf16 %v724_v46, %v703_v62  ;;  %v4549_v49 = vpack.c.bf16 %v765_v22, %v744_v43  ;;  %v8198_v62 = vld [vmem:[%s9902_s1 + $0x1bf8] sm:$0xff]  ;;  %v4561_v43 = vpack.c.bf16 %v891_v30, %v870_v20  ;;  %v8208_v22 = vld [vmem:[%s9902_s1 + $0x1c08] sm:$0xff]  ;;  %v5099_v20 = vld [vmem:[%s9904_s2] sm:$0xff] }
 0x1b6   :  { %4658 = vmatprep.subr.bf16.mxu1 %v4657_v36  ;;  %v4673_v36 = vpack.c.bf16 %v767_v23, %v746_v15  ;;  %v8213_v15 = vld [vmem:[%s9902_s1 + $0x1cb0] sm:$0xff]  ;;  %v4687_v5 = vpack.c.bf16 %v8193_v57, %v8188_v14 }
 0x1b7   :  { %v8218_v23 = vld [vmem:[%s9902_s1 + $0x1bf0] sm:$0xff] }
 0x1b8   :  { %4536 = vmatpush1.bf16.msra.mxu0 %v4535_v3  ;;  %v4551_v3 = vpack.c.bf16 %v764_v53, %v743_v52  ;;  %v8231_v52 = vld [vmem:[%s9902_s1 + $0x1c00] sm:$0xff]  ;;  %v8236_v53 = vld [vmem:[%s9902_s1 + $0x1ca8] sm:$0xff] }
 0x1b9   :  { %4660 = vmatpush1.bf16.msra.mxu1 %v4659_v4  ;;  %4538 = vmatprep.subr.bf16.mxu0 %v4537_v11  ;;  %v4675_v4 = vpack.c.bf16 %v766_v58, %v745_v50  ;;  %v4553_v11 = vpack.c.bf16 %v807_v60, %v786_v59  ;;  %v8241_v50 = vld [vmem:[%s9902_s1 + $0x1d48] sm:$0xff]  ;;  %v9910_v58 = vsub.s32 6, %v5382_v61  ;;  %v9909_v59 = vsub.s32 5, %v5382_v61  ;;  %v8253_v60 = vld [vmem:[%s9902_s1 + $0x1d58] sm:$0xff] }
 0x1ba   :  { %4662 = vmatprep.subr.bf16.mxu1 %v4661_v9  ;;  %v4677_v9 = vpack.c.bf16 %v809_v35, %v788_v2  ;;  %v8258_v2 = vld [vmem:[%s9902_s1 + $0x1e00] sm:$0xff]  ;;  %v4691_v14 = vpack.c.bf16 %v8236_v53, %v8231_v52  ;;  %v8409_v52 = vld [vmem:[%s9902_s1 + $0x21f0] sm:$0xff] }
 0x1bb   :  { %v8263_v35 = vld [vmem:[%s9902_s1 + $0x1d40] sm:$0xff]  ;;  %v1369_v57 = vrot.slane %v5099_v20, %v9909_v59  ;;  %v8414_v53 = vld [vmem:[%s9902_s1 + $0x2130] sm:$0xff] }
 0x1bc   :  { %4540 = vmatpush1.bf16.msra.mxu0 %v4539_v48  ;;  %v4555_v48 = vpack.c.bf16 %v806_v33, %v785_v34  ;;  %v9908_v33 = vsub.s32 7, %v5382_v61 }
 0x1bd   :  { %4664 = vmatpush1.bf16.msra.mxu1 %v4663_v40  ;;  %4542 = vmatprep.subr.bf16.mxu0 %v4541_v47  ;;  %v827_v40 = vld [vmem:[%s9902_s1 + $0x1950] sm:$0xff]  ;;  %v4679_v47 = vpack.c.bf16 %v808_v10, %v787_v63  ;;  %v8286_v63 = vld [vmem:[%s9902_s1 + $0x1e98] sm:$0xff]  ;;  %v8296_v10 = vld [vmem:[%s9902_s1 + $0x1ea8] sm:$0xff] }
 0x1be   :  { %4666 = vmatprep.subr.bf16.mxu1 %v4665_v12  ;;  %v850_v12 = vld [vmem:[%s9902_s1 + $0x1a08] sm:$0xff] }
 0x1bf   :  { %v4683_v46 = vpack.c.bf16 %v850_v12, %v829_v6  ;;  %v8340_v6 = vld [vmem:[%s9902_s1 + $0x1ff8] sm:$0xff]  ;;  %v8345_v12 = vld [vmem:[%s9902_s1 + $0x20a0] sm:$0xff] }
 0x1c0   :  { %4544 = vmatpush1.bf16.msra.mxu0 %v4543_v7  ;;  %v8178_v7 = vld [vmem:[%s9902_s1 + $0x1aa0] sm:$0xff] }
 0x1c1   :  { %4668 = vmatpush1.bf16.msra.mxu1 %v4667_v8  ;;  %4546 = vmatprep.subr.bf16.mxu0 %v4545_v56  ;;  %v8183_v8 = vld [vmem:[%s9902_s1 + $0x1b48] sm:$0xff]  ;;  %v4559_v56 = vpack.c.bf16 %v848_v55, %v827_v40  ;;  %v8320_v40 = vld [vmem:[%s9902_s1 + $0x1ea0] sm:$0xff]  ;;  %v8335_v55 = vld [vmem:[%s9902_s1 + $0x2090] sm:$0xff] }
 0x1c2   :  { %4670 = vmatprep.subr.bf16.mxu1 %v4669_v42  ;;  %v8203_v42 = vld [vmem:[%s9902_s1 + $0x1ca0] sm:$0xff]  ;;  %v4563_v34 = vpack.c.bf16 %v8183_v8, %v8178_v7  ;;  %v8363_v7 = vld [vmem:[%s9902_s1 + $0x2088] sm:$0xff]  ;;  %v8368_v8 = vld [vmem:[%s9902_s1 + $0x1ff0] sm:$0xff] }
 0x1c3   :  { %2392 = vmatmul.mubr.f32.vlgmr.msra.gmra.mrb[6].mxu0 %v5442_v25 }
 0x1c4   :  { %4548 = vmatpush1.bf16.msra.mxu0 %v4547_v44  ;;  %2534 = vmatmul.mubr.f32.vlgmr.msra.gmra.mrb[6].mxu1 %v5442_v25  ;;  %v8223_v44 = vld [vmem:[%s9902_s1 + $0x1c98] sm:$0xff] }
 0x1c5   :  { %4672 = vmatpush1.bf16.msra.mxu1 %v4671_v45  ;;  %4550 = vmatprep.subr.bf16.mxu0 %v4549_v49  ;;  %v4685_v45 = vpack.c.bf16 %v893_v54, %v872_v31  ;;  %v8226_v49 = vsub.s32 4, %v5382_v61  ;;  %v4567_v31 = vpack.c.bf16 %v8223_v44, %v8218_v23  ;;  %v8358_v54 = vld [vmem:[%s9902_s1 + $0x1fe0] sm:$0xff] }
 0x1c6   :  { %4674 = vmatprep.subr.bf16.mxu1 %v4673_v36  ;;  %3697 = vmatprep.mubr.msk.f32.mxu0 %vm1472_vm0, %v5595_v39  ;;  %v8246_v36 = vld [vmem:[%s9902_s1 + $0x1df0] sm:$0xff] }
 0x1c7   :  { %3698 = vmatprep.mubr.msk.f32.mxu1 %vm1472_vm0, %v5595_v39  ;;  %v1365_v30 = vrot.slane %v5099_v20, %v8226_v49 }
 0x1c8   :  { %4552 = vmatpush1.bf16.msra.mxu0 %v4551_v3  ;;  %v8268_v3 = vld [vmem:[%s9902_s1 + $0x1de8] sm:$0xff] }
 0x1c9   :  { %4676 = vmatpush1.bf16.msra.mxu1 %v4675_v4  ;;  %4554 = vmatprep.subr.bf16.mxu0 %v4553_v11  ;;  %v8273_v4 = vld [vmem:[%s9902_s1 + $0x1d50] sm:$0xff]  ;;  %v8278_v11 = vld [vmem:[%s9902_s1 + $0x1df8] sm:$0xff]  ;;  %v4571_v23 = vpack.c.bf16 %v8268_v3, %v8263_v35  ;;  %v8430_v35 = vld [vmem:[%s9902_s1 + $0x2140] sm:$0xff] }
 0x1ca   :  { %4678 = vmatprep.subr.bf16.mxu1 %v4677_v9  ;;  %v8291_v9 = vld [vmem:[%s9902_s1 + $0x1f40] sm:$0xff]  ;;  %v4695_v44 = vpack.c.bf16 %v8278_v11, %v8273_v4  ;;  %v8435_v3 = vld [vmem:[%s9902_s1 + $0x21e8] sm:$0xff] }
 0x1cc   :  { %4556 = vmatpush1.bf16.msra.mxu0 %v4555_v48  ;;  %v4565_v48 = vpack.c.bf16 %v8203_v42, %v8198_v62  ;;  %v4569_v62 = vpack.c.bf16 %v8246_v36, %v8241_v50  ;;  %v8381_v42 = vld [vmem:[%s9902_s1 + $0x2098] sm:$0xff]  ;;  %v4573_v50 = vpack.c.bf16 %v8291_v9, %v8286_v63  ;;  %v4697_v36 = vpack.c.bf16 %v8301_v1, %v8296_v10  ;;  %v8448_v10 = vld [vmem:[%s9902_s1 + $0x2288] sm:$0xff]  ;;  %v8453_v1 = vld [vmem:[%s9902_s1 + $0x2330] sm:$0xff] }
 0x1cd   :  { %4680 = vmatpush1.bf16.msra.mxu1 %v4679_v47  ;;  %4558 = vmatprep.subr.bf16.mxu0 %v4557_v51  ;;  %v8325_v47 = vld [vmem:[%s9902_s1 + $0x1f48] sm:$0xff] }
 0x1ce   :  { %4682 = vmatprep.subr.bf16.mxu1 %v4681_v16  ;;  %v8330_v51 = vld [vmem:[%s9902_s1 + $0x1fe8] sm:$0xff]  ;;  %v4689_v16 = vpack.c.bf16 %v8213_v15, %v8208_v22  ;;  %v1377_v22 = vrot.slane %v5099_v20, %v9908_v33  ;;  %v4693_v15 = vpack.c.bf16 %v8258_v2, %v8253_v60  ;;  %v8425_v2 = vld [vmem:[%s9902_s1 + $0x21d8] sm:$0xff]  ;;  %v4699_v11 = vpack.c.bf16 %v8325_v47, %v8320_v40 }
 0x1d0   :  { %4560 = vmatpush1.bf16.msra.mxu0 %v4559_v56  ;;  %v1373_v56 = vrot.slane %v5099_v20, %v9910_v58 }
 0x1d1   :  { %4684 = vmatpush1.bf16.msra.mxu1 %v4683_v46  ;;  %4562 = vmatprep.subr.bf16.mxu0 %v4561_v43  ;;  %v8386_v46 = vld [vmem:[%s9902_s1 + $0x2138] sm:$0xff]  ;;  %v8391_v43 = vld [vmem:[%s9902_s1 + $0x21e0] sm:$0xff] }
 0x1d2   :  { %4686 = vmatprep.subr.bf16.mxu1 %v4685_v45  ;;  %v8404_v45 = vld [vmem:[%s9902_s1 + $0x2148] sm:$0xff] }
 0x1d4   :  { %4564 = vmatpush1.bf16.msra.mxu0 %v4563_v34  ;;  %v4577_v34 = vpack.c.bf16 %v8335_v55, %v8330_v51 }
 0x1d5   :  { %4688 = vmatpush1.bf16.msra.mxu1 %v4687_v5  ;;  %4566 = vmatprep.subr.bf16.mxu0 %v4565_v48  ;;  %v1896_v4 = vpop.f32.mrb[2].mxu0  ;;  %v2038_v48 = vpop.f32.mrb[2].mxu1 }
 0x1d6   :  { %4690 = vmatprep.subr.bf16.mxu1 %v4689_v16  ;;  %v5058_v5 = vadd.f32 %v1896_v4, %v1365_v30  ;;  %v1898_v40 = vpop.f32.mrb[3].mxu0  ;;  %v5060_v16 = vadd.f32 %v2038_v48, %v1373_v56  ;;  %v2040_v33 = vpop.f32.mrb[3].mxu1 }
 0x1d7   :  { %v5059_v20 = vadd.f32 %v1898_v40, %v1369_v57  ;;  %v5061_v0 = vadd.f32 %v2040_v33, %v1377_v22 }
 0x1d8   :  { %4568 = vmatpush1.bf16.msra.mxu0 %v4567_v31  ;;  %v3064_v4 = vsel %vm3035_vm1, %v5058_v5, 0.0  ;;  %v3355_v58 = vmul.f32 %v5058_v5, %v5058_v5  ;;  %v3078_v31 = vsel %vm3035_vm1, %v5060_v16, 0.0  ;;  %v3357_v56 = vmul.f32 %v5060_v16, %v5060_v16 }
 0x1d9   :  { %4692 = vmatpush1.bf16.msra.mxu1 %v4691_v14  ;;  %4570 = vmatprep.subr.bf16.mxu0 %v4569_v62  ;;  %v3065_v55 = vrot.slane %v3064_v4, 4  ;;  %v3071_v57 = vsel %vm3035_vm1, %v5059_v20, 0.0  ;;  %v3079_v40 = vrot.slane %v3078_v31, 4  ;;  %v3356_v59 = vmul.f32 %v5059_v20, %v5059_v20 }
 0x1da   :  { %4694 = vmatprep.subr.bf16.mxu1 %v4693_v15  ;;  %v3400_v48 = vsel %vm3035_vm1, %v3355_v58, 0.0  ;;  %v3072_v30 = vrot.slane %v3071_v57, 4  ;;  %v3414_v33 = vsel %vm3035_vm1, %v3357_v56, 0.0  ;;  %v3085_v14 = vsel %vm3035_vm1, %v5061_v0, 0.0 }
 0x1db   :  { %v3066_v51 = vadd.f32 %v3065_v55, %v3064_v4  ;;  %v3401_v5 = vrot.slane %v3400_v48, 4  ;;  %v3080_v62 = vadd.f32 %v3079_v40, %v3078_v31  ;;  %v3415_v22 = vrot.slane %v3414_v33, 4 }
 0x1dc   :  { %4572 = vmatpush1.bf16.msra.mxu0 %v4571_v23  ;;  %v3073_v37 = vadd.f32 %v3072_v30, %v3071_v57  ;;  %v3407_v16 = vsel %vm3035_vm1, %v3356_v59, 0.0  ;;  %v3086_v9 = vrot.slane %v3085_v14, 4  ;;  %v3358_v63 = vmul.f32 %v5061_v0, %v5061_v0 }
 0x1dd   :  { %4696 = vmatpush1.bf16.msra.mxu1 %v4695_v44  ;;  %4574 = vmatprep.subr.bf16.mxu0 %v4573_v50  ;;  %v3067_v15 = vrot.slane %v3066_v51, 2  ;;  %v3402_v47 = vadd.f32 %v3401_v5, %v3400_v48  ;;  %v3408_v58 = vrot.slane %v3407_v16, 4  ;;  %v3081_v20 = vrot.slane %v3080_v62, 2 }
 0x1de   :  { %4698 = vmatprep.subr.bf16.mxu1 %v4697_v36  ;;  %v3416_v55 = vadd.f32 %v3415_v22, %v3414_v33  ;;  %v3074_v4 = vrot.slane %v3073_v37, 2  ;;  %v3087_v23 = vadd.f32 %v3086_v9, %v3085_v14  ;;  %v9919_v30 = vpack.c.bf16 %v8311_v38, %v8306_v41  ;;  %v1124_v41 = vld [vmem:[%s9902_s1 + $0x2298] sm:$0xff] }
 0x1df   :  { %v3068_v56 = vadd.f32 %v3067_v15, %v3066_v51  ;;  %v3403_v60 = vrot.slane %v3402_v47, 2  ;;  %v3409_v61 = vadd.f32 %v3408_v58, %v3407_v16  ;;  %v3082_v59 = vadd.f32 %v3081_v20, %v3080_v62  ;;  %v1164_v15 = vld [vmem:[%s9902_s1 + $0x23d8] sm:$0xff]  ;;  %v1185_v58 = vld [vmem:[%s9902_s1 + $0x2480] sm:$0xff] }
 0x1e0   :  { %4576 = vmatpush1.bf16.msra.mxu0 %v9919_v30  ;;  %v3417_v44 = vrot.slane %v3416_v55, 2  ;;  %v3075_v50 = vadd.f32 %v3074_v4, %v3073_v37  ;;  %v3421_v31 = vsel %vm3035_vm1, %v3358_v63, 0.0  ;;  %v3088_v40 = vrot.slane %v3087_v23, 2  ;;  %v1145_v37 = vld [vmem:[%s9902_s1 + $0x2340] sm:$0xff] }
 0x1e1   :  { %4700 = vmatpush1.bf16.msra.mxu1 %v4699_v11  ;;  %4578 = vmatprep.subr.bf16.mxu0 %v4577_v34  ;;  %v3069_v36 = vrot.slane %v3068_v56, 1  ;;  %v3404_v57 = vadd.f32 %v3403_v60, %v3402_v47  ;;  %v3410_v48 = vrot.slane %v3409_v61, 2  ;;  %v9920_v0 = vpack.c.bf16 %v8345_v12, %v8340_v6 }
 0x1e2   :  { %v3083_v38 = vrot.slane %v3082_v59, 1  ;;  %v3418_v63 = vadd.f32 %v3417_v44, %v3416_v55  ;;  %v3076_v11 = vrot.slane %v3075_v50, 1  ;;  %v3422_v34 = vrot.slane %v3421_v31, 4 }
 0x1e3   :  { %4702 = vmatprep.subr.bf16.mxu1 %v9920_v0  ;;  %v3070_v9 = vadd.f32 %v3069_v36, %v3068_v56  ;;  %v3405_v60 = vrot.slane %v3404_v57, 1  ;;  %v3411_v47 = vadd.f32 %v3410_v48, %v3409_v61  ;;  %v3089_v51 = vadd.f32 %v3088_v40, %v3087_v23  ;;  %v1121_v61 = vld [vmem:[%s9902_s1 + $0x2280] sm:$0xff]  ;;  %v1163_v48 = vld [vmem:[%s9902_s1 + $0x23d0] sm:$0xff]  ;;  %v1206_v0 = vld [vmem:[%s9902_s1 + $0x2528] sm:$0xff] }
 0x1e4   :  { %v9921_v6 = vpack.c.bf16 %v8363_v7, %v8358_v54  ;;  %v3077_v12 = vadd.f32 %v3076_v11, %v3075_v50  ;;  %v3423_v5 = vadd.f32 %v3422_v34, %v3421_v31  ;;  %v9922_v33 = vpack.c.bf16 %v8381_v42, %v8368_v8  ;;  %v1142_v54 = vld [vmem:[%s9902_s1 + $0x2328] sm:$0xff]  ;;  %v1123_v7 = vld [vmem:[%s9902_s1 + $0x2290] sm:$0xff]  ;;  %v1208_v11 = vld [vmem:[%s9902_s1 + $0x2538] sm:$0xff] }
 0x1e5   :  { %v9923_v14 = vpack.c.bf16 %v8391_v43, %v8386_v46  ;;  %v4709_v62 = vpack.c.bf16 %v1145_v37, %v1124_v41  ;;  %v3406_v22 = vadd.f32 %v3405_v60, %v3404_v57  ;;  %v3084_v8 = vadd.f32 %v3083_v38, %v3082_v59  ;;  %v1144_v43 = vld [vmem:[%s9902_s1 + $0x2338] sm:$0xff]  ;;  %v1227_v41 = vld [vmem:[%s9902_s1 + $0x25d0] sm:$0xff]  ;;  %v1229_v34 = vld [vmem:[%s9902_s1 + $0x25e0] sm:$0xff] }
 0x1e6   :  { %4580 = vmatpush1.bf16.msra.mxu0 %v9921_v6  ;;  %4704 = vmatpush1.bf16.msra.mxu1 %v9922_v33  ;;  %v3412_v42 = vrot.slane %v3411_v47, 1  ;;  %v3090_v16 = vrot.slane %v3089_v51, 1  ;;  %v9924_v46 = vpack.c.bf16 %v8409_v52, %v8404_v45  ;;  %v3419_v20 = vrot.slane %v3418_v63, 1  ;;  %v1166_v45 = vld [vmem:[%s9902_s1 + $0x23e8] sm:$0xff]  ;;  %v1187_v52 = vld [vmem:[%s9902_s1 + $0x2490] sm:$0xff] }
 0x1e7   :  { %4582 = vmatprep.subr.bf16.mxu0 %v9923_v14  ;;  %v3206_v55 = vcombine.low %v3070_v9, %v3077_v12  ;;  %v3424_v4 = vrot.slane %v3423_v5, 2  ;;  %v9925_v30 = vpack.c.bf16 %v8425_v2, %v8414_v53  ;;  %v4587_v59 = vpack.c.bf16 %v1142_v54, %v1121_v61  ;;  %v1184_v53 = vld [vmem:[%s9902_s1 + $0x2478] sm:$0xff]  ;;  %v1165_v2 = vld [vmem:[%s9902_s1 + $0x23e0] sm:$0xff]  ;;  %v1226_v12 = vld [vmem:[%s9902_s1 + $0x25c8] sm:$0xff] }
 0x1e8   :  { %4706 = vmatprep.subr.bf16.mxu1 %v9924_v46  ;;  %v3413_v56 = vadd.f32 %v3412_v42, %v3411_v47  ;;  %v3091_v23 = vadd.f32 %v3090_v16, %v3089_v51  ;;  %v9926_v50 = vpack.c.bf16 %v8435_v3, %v8430_v35  ;;  %v9927_v31 = vpack.c.bf16 %v8453_v1, %v8448_v10  ;;  %v1186_v1 = vld [vmem:[%s9902_s1 + $0x2488] sm:$0xff]  ;;  %v1248_v61 = vld [vmem:[%s9902_s1 + $0x2678] sm:$0xff]  ;;  %v1269_v54 = vld [vmem:[%s9902_s1 + $0x2720] sm:$0xff] }
 0x1e9   :  { %v3425_v44 = vadd.f32 %v3424_v4, %v3423_v5  ;;  %v4711_v36 = vpack.c.bf16 %v1144_v43, %v1123_v7  ;;  %v4589_v57 = vpack.c.bf16 %v1185_v58, %v1164_v15  ;;  %v3228_v35 = vrot.slane %v3206_v55, %v7445_v13  ;;  %v1207_v5 = vld [vmem:[%s9902_s1 + $0x2530] sm:$0xff] }
 0x1ea   :  { %4584 = vmatpush1.bf16.msra.mxu0 %v9925_v30  ;;  %4708 = vmatpush1.bf16.msra.mxu1 %v9926_v50  ;;  %v3542_v3 = vcombine.low %v3406_v22, %v3413_v56  ;;  %v3207_v40 = vcombine.low %v3084_v8, %v3091_v23  ;;  %v4713_v10 = vpack.c.bf16 %v1187_v52, %v1166_v45  ;;  %v1250_v8 = vld [vmem:[%s9902_s1 + $0x2688] sm:$0xff]  ;;  %v1271_v42 = vld [vmem:[%s9902_s1 + $0x2730] sm:$0xff]  ;;  %v1268_v45 = vld [vmem:[%s9902_s1 + $0x2718] sm:$0xff] }
 0x1eb   :  { %4586 = vmatprep.subr.bf16.mxu0 %v9927_v31  ;;  %4710 = vmatprep.subr.bf16.mxu1 %v4709_v62  ;;  %v3420_v37 = vadd.f32 %v3419_v20, %v3418_v63  ;;  %v3426_v38 = vrot.slane %v3425_v44, 1  ;;  %v4591_v60 = vpack.c.bf16 %v1184_v53, %v1163_v48  ;;  %v4715_v51 = vpack.c.bf16 %v1186_v1, %v1165_v2  ;;  %v1205_v63 = vld [vmem:[%s9902_s1 + $0x2520] sm:$0xff]  ;;  %v1228_v62 = vld [vmem:[%s9902_s1 + $0x25d8] sm:$0xff]  ;;  %v1247_v4 = vld [vmem:[%s9902_s1 + $0x2670] sm:$0xff] }
 0x1ec   :  { %v3235_v9 = vrot.slane %v3207_v40, %v7445_v13  ;;  %v4593_v6 = vpack.c.bf16 %v1227_v41, %v1206_v0  ;;  %v4717_v14 = vpack.c.bf16 %v1229_v34, %v1208_v11  ;;  %v3564_v7 = vrot.slane %v3542_v3, %v7445_v13  ;;  %v1270_v56 = vld [vmem:[%s9902_s1 + $0x2728] sm:$0xff]  ;;  %v1311_v30 = vld [vmem:[%s9902_s1 + $0x2870] sm:$0xff]  ;;  %v1313_v50 = vld [vmem:[%s9902_s1 + $0x2880] sm:$0xff] }
 0x1ed   :  { %v3427_v47 = vadd.f32 %v3426_v38, %v3425_v44  ;;  %v9928_v16 = vcombine.low %v7571_v17, %v7589_v21  ;;  %v4595_v15 = vpack.c.bf16 %v1226_v12, %v1205_v63  ;;  %v4719_v20 = vpack.c.bf16 %v1228_v62, %v1207_v5  ;;  %v1249_v17 = vld [vmem:[%s9902_s1 + $0x2680] sm:$0xff]  ;;  %v1290_v23 = vld [vmem:[%s9902_s1 + $0x27c8] sm:$0xff]  ;;  %v1292_v44 = vld [vmem:[%s9902_s1 + $0x27d8] sm:$0xff] }
 0x1ee   :  { %4588 = vmatpush1.bf16.msra.mxu0 %v4587_v59  ;;  %4712 = vmatpush1.bf16.msra.mxu1 %v4711_v36  ;;  %v3237_v33 = vcombine.low %v3228_v35, %v3235_v9  ;;  %v4597_v55 = vpack.c.bf16 %v1269_v54, %v1248_v61  ;;  %v4721_v52 = vpack.c.bf16 %v1271_v42, %v1250_v8  ;;  %v1289_v35 = vld [vmem:[%s9902_s1 + $0x27c0] sm:$0xff]  ;;  %v1291_v3 = vld [vmem:[%s9902_s1 + $0x27d0] sm:$0xff]  ;;  %v1312_v40 = vld [vmem:[%s9902_s1 + $0x2878] sm:$0xff] }
 0x1ef   :  { %4590 = vmatprep.subr.bf16.mxu0 %v4589_v57  ;;  %4714 = vmatprep.subr.bf16.mxu1 %v4713_v10  ;;  %v3543_v22 = vcombine.low %v3420_v37, %v3427_v47  ;;  %v3244_v46 = vrot.slane %v9928_v16, %v7445_v13  ;;  %v9929_v31 = vcombine.low %v7612_v27, %v7621_v28  ;;  %v1310_v27 = vld [vmem:[%s9902_s1 + $0x2868] sm:$0xff]  ;;  %v1332_v41 = vld [vmem:[%s9902_s1 + $0x2918] sm:$0xff]  ;;  %v1331_v11 = vld [vmem:[%s9902_s1 + $0x2910] sm:$0xff] }
 0x1f0   :  { %v3251_v43 = vrot.slane %v3237_v33, %v7445_v13  ;;  %v4599_v57 = vpack.c.bf16 %v1268_v45, %v1247_v4  ;;  %v4723_v53 = vpack.c.bf16 %v1270_v56, %v1249_v17  ;;  %v4601_v2 = vpack.c.bf16 %v1311_v30, %v1290_v23  ;;  %v1334_v37 = vld [vmem:[%s9902_s1 + $0x2928] sm:$0xff]  ;;  %v55_v34 = vld [vmem:[%s9902_s1 + $0x130] sm:$0xff]  ;;  %v36_v9 = vld [vmem:[%s9902_s1 + $0x98] sm:$0xff] }
 0x1f1   :  { %v3571_v58 = vrot.slane %v3543_v22, %v7445_v13  ;;  %v3580_v36 = vrot.slane %v9929_v31, %v7445_v13  ;;  %v4725_v28 = vpack.c.bf16 %v1313_v50, %v1292_v44  ;;  %v4603_v1 = vpack.c.bf16 %v1310_v27, %v1289_v35  ;;  %v34_v38 = vld [vmem:[%s9902_s1 + $0x88] sm:$0xff]  ;;  %v33_v47 = vld [vmem:[%s9902_s1 + $0x80] sm:$0xff]  ;;  %v56_v63 = vld [vmem:[%s9902_s1 + $0x138] sm:$0xff] }
 0x1f2   :  { %4592 = vmatpush1.bf16.msra.mxu0 %v4591_v60  ;;  %4716 = vmatpush1.bf16.msra.mxu1 %v4715_v51  ;;  %v3252_v21 = vcombine.low %v3244_v46, %v3251_v43  ;;  %v4727_v0 = vpack.c.bf16 %v1312_v40, %v1291_v3  ;;  %v57_v60 = vld [vmem:[%s9902_s1 + $0x140] sm:$0xff]  ;;  %v54_v51 = vld [vmem:[%s9902_s1 + $0x128] sm:$0xff]  ;;  %v76_v12 = vld [vmem:[%s9902_s1 + $0x1d8] sm:$0xff] }
 0x1f3   :  { %4594 = vmatprep.subr.bf16.mxu0 %v4593_v6  ;;  %4718 = vmatprep.subr.bf16.mxu1 %v4717_v14  ;;  %v3573_v59 = vcombine.low %v3564_v7, %v3571_v58  ;;  %v35_v6 = vld [vmem:[%s9902_s1 + $0x90] sm:$0xff]  ;;  %v97_v5 = vld [vmem:[%s9902_s1 + $0x280] sm:$0xff]  ;;  %v4729_v14 = vpack.c.bf16 %v55_v34, %v34_v38  ;;  %v78_v62 = vld [vmem:[%s9902_s1 + $0x1e8] sm:$0xff]  ;;  %v4853_v54 = vpack.c.bf16 %v57_v60, %v36_v9 }
 0x1f4   :  { %3344 = vst [vmem:[%s9905_s3] sm:$0xff] %v3252_v21  ;;  %v1333_v33 = vld [vmem:[%s9902_s1 + $0x2920] sm:$0xff]  ;;  %v99_v61 = vld [vmem:[%s9902_s1 + $0x290] sm:$0xff]  ;;  %v4731_v7 = vpack.c.bf16 %v54_v51, %v33_v47  ;;  %v4855_v22 = vpack.c.bf16 %v56_v63, %v35_v6  ;;  %v4733_v8 = vpack.c.bf16 %v97_v5, %v76_v12  ;;  %v96_v16 = vld [vmem:[%s9902_s1 + $0x278] sm:$0xff] }
 0x1f5   :  { %v3587_v48 = vrot.slane %v3573_v59, %v7445_v13  ;;  %v75_v42 = vld [vmem:[%s9902_s1 + $0x1d0] sm:$0xff]  ;;  %v77_v46 = vld [vmem:[%s9902_s1 + $0x1e0] sm:$0xff]  ;;  %v4857_v43 = vpack.c.bf16 %v99_v61, %v78_v62  ;;  %v118_v58 = vld [vmem:[%s9902_s1 + $0x328] sm:$0xff] }
 0x1f6   :  { %4596 = vmatpush1.bf16.msra.mxu0 %v4595_v15  ;;  %4720 = vmatpush1.bf16.msra.mxu1 %v4719_v20  ;;  %v98_v15 = vld [vmem:[%s9902_s1 + $0x288] sm:$0xff]  ;;  %v139_v20 = vld [vmem:[%s9902_s1 + $0x3d0] sm:$0xff]  ;;  %v141_v4 = vld [vmem:[%s9902_s1 + $0x3e0] sm:$0xff]  ;;  %v4735_v45 = vpack.c.bf16 %v96_v16, %v75_v42 }
 0x1f7   :  { %4598 = vmatprep.subr.bf16.mxu0 %v4597_v55  ;;  %4722 = vmatprep.subr.bf16.mxu1 %v4721_v52  ;;  %v3588_v10 = vcombine.low %v3580_v36, %v3587_v48  ;;  %v120_v55 = vld [vmem:[%s9902_s1 + $0x338] sm:$0xff]  ;;  %v4859_v17 = vpack.c.bf16 %v98_v15, %v77_v46  ;;  %v4737_v21 = vpack.c.bf16 %v139_v20, %v118_v58  ;;  %v117_v52 = vld [vmem:[%s9902_s1 + $0x320] sm:$0xff]  ;;  %v138_v56 = vld [vmem:[%s9902_s1 + $0x3c8] sm:$0xff] }
 0x1f8   :  { %v119_v23 = vld [vmem:[%s9902_s1 + $0x330] sm:$0xff]  ;;  %v4861_v30 = vpack.c.bf16 %v141_v4, %v120_v55  ;;  %v140_v59 = vld [vmem:[%s9902_s1 + $0x3d8] sm:$0xff]  ;;  %v181_v50 = vld [vmem:[%s9902_s1 + $0x520] sm:$0xff] }
 0x1f9   :  { %3680 = vst [vmem:[%s9906_s4] sm:$0xff] %v3588_v10  ;;  %v160_v44 = vld [vmem:[%s9902_s1 + $0x478] sm:$0xff]  ;;  %v162_v31 = vld [vmem:[%s9902_s1 + $0x488] sm:$0xff]  ;;  %v183_v36 = vld [vmem:[%s9902_s1 + $0x530] sm:$0xff]  ;;  %v4863_v48 = vpack.c.bf16 %v140_v59, %v119_v23 }
 0x1fa   :  { %4600 = vmatpush1.bf16.msra.mxu0 %v4599_v57  ;;  %4724 = vmatpush1.bf16.msra.mxu1 %v4723_v53  ;;  %v4739_v57 = vpack.c.bf16 %v138_v56, %v117_v52  ;;  %v4741_v53 = vpack.c.bf16 %v181_v50, %v160_v44  ;;  %v180_v35 = vld [vmem:[%s9902_s1 + $0x518] sm:$0xff]  ;;  %v161_v27 = vld [vmem:[%s9902_s1 + $0x480] sm:$0xff]  ;;  %v182_v3 = vld [vmem:[%s9902_s1 + $0x528] sm:$0xff] }
 0x1fb   :  { %4602 = vmatprep.subr.bf16.mxu0 %v4601_v2  ;;  %4726 = vmatprep.subr.bf16.mxu1 %v4725_v28  ;;  %v159_v2 = vld [vmem:[%s9902_s1 + $0x470] sm:$0xff]  ;;  %v4865_v28 = vpack.c.bf16 %v183_v36, %v162_v31  ;;  %v202_v40 = vld [vmem:[%s9902_s1 + $0x5c8] sm:$0xff]  ;;  %v224_v47 = vld [vmem:[%s9902_s1 + $0x678] sm:$0xff] }
 0x1fc   :  { %v223_v10 = vld [vmem:[%s9902_s1 + $0x670] sm:$0xff]  ;;  %v222_v34 = vld [vmem:[%s9902_s1 + $0x668] sm:$0xff]  ;;  %v244_v51 = vld [vmem:[%s9902_s1 + $0x718] sm:$0xff] }
 0x1fd   :  { %v4745_v38 = vpack.c.bf16 %v223_v10, %v202_v40  ;;  %v203_v9 = vld [vmem:[%s9902_s1 + $0x5d0] sm:$0xff]  ;;  %v265_v6 = vld [vmem:[%s9902_s1 + $0x7c0] sm:$0xff]  ;;  %v246_v63 = vld [vmem:[%s9902_s1 + $0x728] sm:$0xff] }
 0x1fe   :  { %4604 = vmatpush1.bf16.msra.mxu0 %v4603_v1  ;;  %4728 = vmatpush1.bf16.msra.mxu1 %v4727_v0  ;;  %v204_v1 = vld [vmem:[%s9902_s1 + $0x5d8] sm:$0xff]  ;;  %v225_v0 = vld [vmem:[%s9902_s1 + $0x680] sm:$0xff]  ;;  %v267_v12 = vld [vmem:[%s9902_s1 + $0x7d0] sm:$0xff] }
 0x1ff   :  { %2458 = vmatprep.subr.mxu0 %v1332_v41  ;;  %2600 = vmatprep.subr.mxu1 %v1334_v37  ;;  %v4743_v41 = vpack.c.bf16 %v180_v35, %v159_v2  ;;  %v4867_v37 = vpack.c.bf16 %v182_v3, %v161_v27  ;;  %v4869_v60 = vpack.c.bf16 %v225_v0, %v204_v1  ;;  %v243_v62 = vld [vmem:[%s9902_s1 + $0x710] sm:$0xff]  ;;  %v264_v61 = vld [vmem:[%s9902_s1 + $0x7b8] sm:$0xff]  ;;  %v309_v46 = vld [vmem:[%s9902_s1 + $0x920] sm:$0xff] }
 0x200   :  { %v307_v42 = vld [vmem:[%s9902_s1 + $0x910] sm:$0xff]  ;;  %v288_v16 = vld [vmem:[%s9902_s1 + $0x878] sm:$0xff]  ;;  %v285_v20 = vld [vmem:[%s9902_s1 + $0x860] sm:$0xff] }
 0x201   :  { %v306_v55 = vld [vmem:[%s9902_s1 + $0x908] sm:$0xff]  ;;  %v287_v4 = vld [vmem:[%s9902_s1 + $0x870] sm:$0xff]  ;;  %v349_v52 = vld [vmem:[%s9902_s1 + $0xa60] sm:$0xff] }
 0x202   :  { %2459 = vmatpush1.msra.mxu0 %v1331_v11  ;;  %2601 = vmatpush1.msra.mxu1 %v1333_v33  ;;  %v201_v11 = vld [vmem:[%s9902_s1 + $0x5c0] sm:$0xff]  ;;  %v4871_v33 = vpack.c.bf16 %v224_v47, %v203_v9  ;;  %v330_v56 = vld [vmem:[%s9902_s1 + $0x9c8] sm:$0xff]  ;;  %v351_v23 = vld [vmem:[%s9902_s1 + $0xa70] sm:$0xff] }
 0x203   :  { %2463 = vmatmul.mubr.f32.vlgmr.msra.gmra.mrb[6].mxu0 %v5567_v26  ;;  %2605 = vmatmul.mubr.f32.vlgmr.msra.gmra.mrb[6].mxu1 %v5567_v26  ;;  %v4747_v5 = vpack.c.bf16 %v222_v34, %v201_v11  ;;  %v327_v50 = vld [vmem:[%s9902_s1 + $0x9b0] sm:$0xff]  ;;  %v348_v31 = vld [vmem:[%s9902_s1 + $0xa58] sm:$0xff]  ;;  %v329_v36 = vld [vmem:[%s9902_s1 + $0x9c0] sm:$0xff] }
 0x204   :  { %4730 = vmatprep.subr.bf16.mxu0 %v4729_v14  ;;  %4854 = vmatprep.subr.bf16.mxu1 %v4853_v54  ;;  %v4749_v14 = vpack.c.bf16 %v265_v6, %v244_v51  ;;  %v245_v54 = vld [vmem:[%s9902_s1 + $0x720] sm:$0xff]  ;;  %v391_v2 = vld [vmem:[%s9902_s1 + $0xbb0] sm:$0xff]  ;;  %v372_v35 = vld [vmem:[%s9902_s1 + $0xb18] sm:$0xff] }
 0x205   :  { %4732 = vmatpush1.bf16.msra.mxu0 %v4731_v7  ;;  %4856 = vmatpush1.bf16.msra.mxu1 %v4855_v22  ;;  %v4873_v7 = vpack.c.bf16 %v267_v12, %v246_v63  ;;  %v266_v22 = vld [vmem:[%s9902_s1 + $0x7c8] sm:$0xff]  ;;  %v393_v27 = vld [vmem:[%s9902_s1 + $0xbc0] sm:$0xff]  ;;  %v371_v0 = vld [vmem:[%s9902_s1 + $0xb10] sm:$0xff] }
 0x206   :  { %4734 = vmatprep.subr.bf16.mxu0 %v4733_v8  ;;  %4858 = vmatprep.subr.bf16.mxu1 %v4857_v43  ;;  %v286_v8 = vld [vmem:[%s9902_s1 + $0x868] sm:$0xff]  ;;  %v4751_v43 = vpack.c.bf16 %v264_v61, %v243_v62  ;;  %v4875_v15 = vpack.c.bf16 %v266_v22, %v245_v54  ;;  %v369_v10 = vld [vmem:[%s9902_s1 + $0xb00] sm:$0xff]  ;;  %v435_v9 = vld [vmem:[%s9902_s1 + $0xd10] sm:$0xff] }
 0x207   :  { %2675 = vmatprep.mubr.f32.mxu0 %v5455_v32  ;;  %2817 = vmatprep.mubr.f32.mxu1 %v5455_v32  ;;  %v4753_v58 = vpack.c.bf16 %v307_v42, %v286_v8  ;;  %v390_v1 = vld [vmem:[%s9902_s1 + $0xba8] sm:$0xff]  ;;  %v433_v11 = vld [vmem:[%s9902_s1 + $0xd00] sm:$0xff]  ;;  %v411_v6 = vld [vmem:[%s9902_s1 + $0xc50] sm:$0xff] }
 0x208   :  { %v414_v34 = vld [vmem:[%s9902_s1 + $0xc68] sm:$0xff]  ;;  %v432_v63 = vld [vmem:[%s9902_s1 + $0xcf8] sm:$0xff]  ;;  %v413_v12 = vld [vmem:[%s9902_s1 + $0xc60] sm:$0xff] }
 0x209   :  { %4736 = vmatpush1.bf16.msra.mxu0 %v4735_v45  ;;  %4860 = vmatpush1.bf16.msra.mxu1 %v4859_v17  ;;  %v4877_v45 = vpack.c.bf16 %v309_v46, %v288_v16  ;;  %v308_v17 = vld [vmem:[%s9902_s1 + $0x918] sm:$0xff]  ;;  %v475_v62 = vld [vmem:[%s9902_s1 + $0xe50] sm:$0xff]  ;;  %v477_v54 = vld [vmem:[%s9902_s1 + $0xe60] sm:$0xff] }
 0x20a   :  { %4738 = vmatprep.subr.bf16.mxu0 %v4737_v21  ;;  %4862 = vmatprep.subr.bf16.mxu1 %v4861_v30  ;;  %v328_v21 = vld [vmem:[%s9902_s1 + $0x9b8] sm:$0xff]  ;;  %v4755_v30 = vpack.c.bf16 %v306_v55, %v285_v20  ;;  %v4879_v59 = vpack.c.bf16 %v308_v17, %v287_v4  ;;  %v453_v42 = vld [vmem:[%s9902_s1 + $0xda0] sm:$0xff]  ;;  %v474_v16 = vld [vmem:[%s9902_s1 + $0xe48] sm:$0xff] }
 0x20b   :  { %v4757_v44 = vpack.c.bf16 %v349_v52, %v328_v21  ;;  %v456_v61 = vld [vmem:[%s9902_s1 + $0xdb8] sm:$0xff]  ;;  %v455_v46 = vld [vmem:[%s9902_s1 + $0xdb0] sm:$0xff]  ;;  %v517_v20 = vld [vmem:[%s9902_s1 + $0xfa0] sm:$0xff] }
 0x20c   :  { %v498_v55 = vld [vmem:[%s9902_s1 + $0xf08] sm:$0xff]  ;;  %v519_v4 = vld [vmem:[%s9902_s1 + $0xfb0] sm:$0xff] }
 0x20d   :  { %4740 = vmatpush1.bf16.msra.mxu0 %v4739_v57  ;;  %4864 = vmatpush1.bf16.msra.mxu1 %v4863_v48  ;;  %v4881_v57 = vpack.c.bf16 %v351_v23, %v330_v56  ;;  %v350_v48 = vld [vmem:[%s9902_s1 + $0xa68] sm:$0xff]  ;;  %v495_v52 = vld [vmem:[%s9902_s1 + $0xef0] sm:$0xff]  ;;  %v516_v56 = vld [vmem:[%s9902_s1 + $0xf98] sm:$0xff] }
 0x20e   :  { %4742 = vmatprep.subr.bf16.mxu0 %v4741_v53  ;;  %4866 = vmatprep.subr.bf16.mxu1 %v4865_v28  ;;  %v370_v53 = vld [vmem:[%s9902_s1 + $0xb08] sm:$0xff]  ;;  %v4759_v28 = vpack.c.bf16 %v348_v31, %v327_v50  ;;  %v4883_v3 = vpack.c.bf16 %v350_v48, %v329_v36  ;;  %v497_v23 = vld [vmem:[%s9902_s1 + $0xf00] sm:$0xff]  ;;  %v559_v50 = vld [vmem:[%s9902_s1 + $0x10f0] sm:$0xff] }
 0x20f   :  { %v4761_v40 = vpack.c.bf16 %v391_v2, %v370_v53  ;;  %v540_v31 = vld [vmem:[%s9902_s1 + $0x1058] sm:$0xff]  ;;  %v561_v36 = vld [vmem:[%s9902_s1 + $0x1100] sm:$0xff] }
 0x210   :  { %v537_v2 = vld [vmem:[%s9902_s1 + $0x1040] sm:$0xff] }
 0x211   :  { %4744 = vmatpush1.bf16.msra.mxu0 %v4743_v41  ;;  %4868 = vmatpush1.bf16.msra.mxu1 %v4867_v37  ;;  %v4885_v41 = vpack.c.bf16 %v393_v27, %v372_v35  ;;  %v392_v37 = vld [vmem:[%s9902_s1 + $0xbb8] sm:$0xff]  ;;  %v558_v35 = vld [vmem:[%s9902_s1 + $0x10e8] sm:$0xff]  ;;  %v539_v27 = vld [vmem:[%s9902_s1 + $0x1050] sm:$0xff] }
 0x212   :  { %4746 = vmatprep.subr.bf16.mxu0 %v4745_v38  ;;  %4870 = vmatprep.subr.bf16.mxu1 %v4869_v60  ;;  %v412_v38 = vld [vmem:[%s9902_s1 + $0xc58] sm:$0xff]  ;;  %v4763_v60 = vpack.c.bf16 %v390_v1, %v369_v10  ;;  %v4887_v47 = vpack.c.bf16 %v392_v37, %v371_v0  ;;  %v601_v10 = vld [vmem:[%s9902_s1 + $0x1240] sm:$0xff]  ;;  %v582_v1 = vld [vmem:[%s9902_s1 + $0x11a8] sm:$0xff] }
 0x213   :  { %v4765_v51 = vpack.c.bf16 %v433_v11, %v412_v38  ;;  %v603_v0 = vld [vmem:[%s9902_s1 + $0x1250] sm:$0xff] }
 0x214   :  { %v579_v11 = vld [vmem:[%s9902_s1 + $0x1190] sm:$0xff] }
 0x215   :  { %4748 = vmatpush1.bf16.msra.mxu0 %v4747_v5  ;;  %4872 = vmatpush1.bf16.msra.mxu1 %v4871_v33  ;;  %v4889_v5 = vpack.c.bf16 %v435_v9, %v414_v34  ;;  %v434_v33 = vld [vmem:[%s9902_s1 + $0xd08] sm:$0xff]  ;;  %v600_v34 = vld [vmem:[%s9902_s1 + $0x1238] sm:$0xff]  ;;  %v581_v9 = vld [vmem:[%s9902_s1 + $0x11a0] sm:$0xff] }
 0x216   :  { %4750 = vmatprep.subr.bf16.mxu0 %v4749_v14  ;;  %4874 = vmatprep.subr.bf16.mxu1 %v4873_v7  ;;  %v454_v14 = vld [vmem:[%s9902_s1 + $0xda8] sm:$0xff]  ;;  %v4767_v7 = vpack.c.bf16 %v432_v63, %v411_v6  ;;  %v4891_v22 = vpack.c.bf16 %v434_v33, %v413_v12  ;;  %v643_v6 = vld [vmem:[%s9902_s1 + $0x1390] sm:$0xff]  ;;  %v624_v63 = vld [vmem:[%s9902_s1 + $0x12f8] sm:$0xff] }
 0x217   :  { %v4769_v8 = vpack.c.bf16 %v475_v62, %v454_v14  ;;  %v645_v12 = vld [vmem:[%s9902_s1 + $0x13a0] sm:$0xff] }
 0x218   :  { %v621_v62 = vld [vmem:[%s9902_s1 + $0x12e0] sm:$0xff] }
 0x219   :  { %4752 = vmatpush1.bf16.msra.mxu0 %v4751_v43  ;;  %4876 = vmatpush1.bf16.msra.mxu1 %v4875_v15  ;;  %v4893_v43 = vpack.c.bf16 %v477_v54, %v456_v61  ;;  %v476_v15 = vld [vmem:[%s9902_s1 + $0xe58] sm:$0xff]  ;;  %v642_v61 = vld [vmem:[%s9902_s1 + $0x1388] sm:$0xff]  ;;  %v623_v54 = vld [vmem:[%s9902_s1 + $0x12f0] sm:$0xff] }
 0x21a   :  { %4754 = vmatprep.subr.bf16.mxu0 %v4753_v58  ;;  %4878 = vmatprep.subr.bf16.mxu1 %v4877_v45  ;;  %v496_v58 = vld [vmem:[%s9902_s1 + $0xef8] sm:$0xff]  ;;  %v4771_v45 = vpack.c.bf16 %v474_v16, %v453_v42  ;;  %v4895_v17 = vpack.c.bf16 %v476_v15, %v455_v46  ;;  %v685_v42 = vld [vmem:[%s9902_s1 + $0x14e0] sm:$0xff]  ;;  %v666_v16 = vld [vmem:[%s9902_s1 + $0x1448] sm:$0xff] }
 0x21b   :  { %v4773_v21 = vpack.c.bf16 %v517_v20, %v496_v58  ;;  %v687_v46 = vld [vmem:[%s9902_s1 + $0x14f0] sm:$0xff] }
 0x21c   :  { %v663_v20 = vld [vmem:[%s9902_s1 + $0x1430] sm:$0xff] }
 0x21d   :  { %4756 = vmatpush1.bf16.msra.mxu0 %v4755_v30  ;;  %4880 = vmatpush1.bf16.msra.mxu1 %v4879_v59  ;;  %v4897_v30 = vpack.c.bf16 %v519_v4, %v498_v55  ;;  %v518_v59 = vld [vmem:[%s9902_s1 + $0xfa8] sm:$0xff]  ;;  %v684_v55 = vld [vmem:[%s9902_s1 + $0x14d8] sm:$0xff]  ;;  %v665_v4 = vld [vmem:[%s9902_s1 + $0x1440] sm:$0xff] }
 0x21e   :  { %4758 = vmatprep.subr.bf16.mxu0 %v4757_v44  ;;  %4882 = vmatprep.subr.bf16.mxu1 %v4881_v57  ;;  %v538_v44 = vld [vmem:[%s9902_s1 + $0x1048] sm:$0xff]  ;;  %v4775_v57 = vpack.c.bf16 %v516_v56, %v495_v52  ;;  %v4899_v48 = vpack.c.bf16 %v518_v59, %v497_v23  ;;  %v727_v52 = vld [vmem:[%s9902_s1 + $0x1630] sm:$0xff]  ;;  %v708_v56 = vld [vmem:[%s9902_s1 + $0x1598] sm:$0xff] }
 0x21f   :  { %v4777_v53 = vpack.c.bf16 %v559_v50, %v538_v44  ;;  %v729_v23 = vld [vmem:[%s9902_s1 + $0x1640] sm:$0xff] }
 0x220   :  { %v705_v50 = vld [vmem:[%s9902_s1 + $0x1580] sm:$0xff] }
 0x221   :  { %4760 = vmatpush1.bf16.msra.mxu0 %v4759_v28  ;;  %4884 = vmatpush1.bf16.msra.mxu1 %v4883_v3  ;;  %v4901_v28 = vpack.c.bf16 %v561_v36, %v540_v31  ;;  %v560_v3 = vld [vmem:[%s9902_s1 + $0x10f8] sm:$0xff]  ;;  %v726_v31 = vld [vmem:[%s9902_s1 + $0x1628] sm:$0xff]  ;;  %v707_v36 = vld [vmem:[%s9902_s1 + $0x1590] sm:$0xff] }
 0x222   :  { %4762 = vmatprep.subr.bf16.mxu0 %v4761_v40  ;;  %4886 = vmatprep.subr.bf16.mxu1 %v4885_v41  ;;  %v580_v40 = vld [vmem:[%s9902_s1 + $0x1198] sm:$0xff]  ;;  %v4779_v41 = vpack.c.bf16 %v558_v35, %v537_v2  ;;  %v4903_v37 = vpack.c.bf16 %v560_v3, %v539_v27  ;;  %v769_v2 = vld [vmem:[%s9902_s1 + $0x1780] sm:$0xff]  ;;  %v750_v35 = vld [vmem:[%s9902_s1 + $0x16e8] sm:$0xff] }
 0x223   :  { %v4781_v38 = vpack.c.bf16 %v601_v10, %v580_v40  ;;  %v771_v27 = vld [vmem:[%s9902_s1 + $0x1790] sm:$0xff] }
 0x224   :  { %v747_v10 = vld [vmem:[%s9902_s1 + $0x16d0] sm:$0xff] }
 0x225   :  { %4764 = vmatpush1.bf16.msra.mxu0 %v4763_v60  ;;  %4888 = vmatpush1.bf16.msra.mxu1 %v4887_v47  ;;  %v4905_v60 = vpack.c.bf16 %v603_v0, %v582_v1  ;;  %v602_v47 = vld [vmem:[%s9902_s1 + $0x1248] sm:$0xff]  ;;  %v768_v1 = vld [vmem:[%s9902_s1 + $0x1778] sm:$0xff]  ;;  %v749_v0 = vld [vmem:[%s9902_s1 + $0x16e0] sm:$0xff] }
 0x226   :  { %4766 = vmatprep.subr.bf16.mxu0 %v4765_v51  ;;  %4890 = vmatprep.subr.bf16.mxu1 %v4889_v5  ;;  %v622_v51 = vld [vmem:[%s9902_s1 + $0x12e8] sm:$0xff]  ;;  %v4783_v5 = vpack.c.bf16 %v600_v34, %v579_v11  ;;  %v4907_v33 = vpack.c.bf16 %v602_v47, %v581_v9  ;;  %v811_v11 = vld [vmem:[%s9902_s1 + $0x18d0] sm:$0xff]  ;;  %v792_v34 = vld [vmem:[%s9902_s1 + $0x1838] sm:$0xff] }
 0x227   :  { %v4785_v14 = vpack.c.bf16 %v643_v6, %v622_v51  ;;  %v813_v9 = vld [vmem:[%s9902_s1 + $0x18e0] sm:$0xff] }
 0x228   :  { %v789_v6 = vld [vmem:[%s9902_s1 + $0x1820] sm:$0xff] }
 0x229   :  { %4768 = vmatpush1.bf16.msra.mxu0 %v4767_v7  ;;  %4892 = vmatpush1.bf16.msra.mxu1 %v4891_v22  ;;  %v4909_v7 = vpack.c.bf16 %v645_v12, %v624_v63  ;;  %v644_v22 = vld [vmem:[%s9902_s1 + $0x1398] sm:$0xff]  ;;  %v810_v63 = vld [vmem:[%s9902_s1 + $0x18c8] sm:$0xff]  ;;  %v791_v12 = vld [vmem:[%s9902_s1 + $0x1830] sm:$0xff] }
 0x22a   :  { %4770 = vmatprep.subr.bf16.mxu0 %v4769_v8  ;;  %4894 = vmatprep.subr.bf16.mxu1 %v4893_v43  ;;  %v664_v8 = vld [vmem:[%s9902_s1 + $0x1438] sm:$0xff]  ;;  %v4787_v43 = vpack.c.bf16 %v642_v61, %v621_v62  ;;  %v4911_v15 = vpack.c.bf16 %v644_v22, %v623_v54  ;;  %v853_v62 = vld [vmem:[%s9902_s1 + $0x1a20] sm:$0xff]  ;;  %v834_v61 = vld [vmem:[%s9902_s1 + $0x1988] sm:$0xff] }
 0x22b   :  { %v4789_v58 = vpack.c.bf16 %v685_v42, %v664_v8  ;;  %v855_v54 = vld [vmem:[%s9902_s1 + $0x1a30] sm:$0xff] }
 0x22c   :  { %v831_v22 = vld [vmem:[%s9902_s1 + $0x1970] sm:$0xff] }
 0x22d   :  { %4772 = vmatpush1.bf16.msra.mxu0 %v4771_v45  ;;  %4896 = vmatpush1.bf16.msra.mxu1 %v4895_v17  ;;  %v4913_v45 = vpack.c.bf16 %v687_v46, %v666_v16  ;;  %v686_v17 = vld [vmem:[%s9902_s1 + $0x14e8] sm:$0xff]  ;;  %v852_v16 = vld [vmem:[%s9902_s1 + $0x1a18] sm:$0xff]  ;;  %v833_v46 = vld [vmem:[%s9902_s1 + $0x1980] sm:$0xff] }
 0x22e   :  { %4774 = vmatprep.subr.bf16.mxu0 %v4773_v21  ;;  %4898 = vmatprep.subr.bf16.mxu1 %v4897_v30  ;;  %v706_v21 = vld [vmem:[%s9902_s1 + $0x1588] sm:$0xff]  ;;  %v4791_v30 = vpack.c.bf16 %v684_v55, %v663_v20  ;;  %v4915_v59 = vpack.c.bf16 %v686_v17, %v665_v4  ;;  %v895_v20 = vld [vmem:[%s9902_s1 + $0x1b70] sm:$0xff]  ;;  %v876_v55 = vld [vmem:[%s9902_s1 + $0x1ad8] sm:$0xff] }
 0x22f   :  { %v4793_v44 = vpack.c.bf16 %v727_v52, %v706_v21  ;;  %v897_v4 = vld [vmem:[%s9902_s1 + $0x1b80] sm:$0xff]  ;;  %v894_v17 = vld [vmem:[%s9902_s1 + $0x1b68] sm:$0xff]  ;;  %v4807_v21 = vpack.c.bf16 %v852_v16, %v831_v22  ;;  %v9159_v52 = vld [vmem:[%s9902_s1 + $0x1ad0] sm:$0xff] }
 0x230   :  { %v9324_v22 = vld [vmem:[%s9902_s1 + $0x2000] sm:$0xff] }
 0x231   :  { %4776 = vmatpush1.bf16.msra.mxu0 %v4775_v57  ;;  %4900 = vmatpush1.bf16.msra.mxu1 %v4899_v48  ;;  %v4917_v57 = vpack.c.bf16 %v729_v23, %v708_v56  ;;  %v728_v48 = vld [vmem:[%s9902_s1 + $0x1638] sm:$0xff] }
 0x232   :  { %4778 = vmatprep.subr.bf16.mxu0 %v4777_v53  ;;  %4902 = vmatprep.subr.bf16.mxu1 %v4901_v28  ;;  %v748_v53 = vld [vmem:[%s9902_s1 + $0x16d8] sm:$0xff]  ;;  %v4795_v28 = vpack.c.bf16 %v726_v31, %v705_v50  ;;  %v4919_v3 = vpack.c.bf16 %v728_v48, %v707_v36  ;;  %v9179_v50 = vld [vmem:[%s9902_s1 + $0x1c28] sm:$0xff]  ;;  %v9184_v31 = vld [vmem:[%s9902_s1 + $0x1cd0] sm:$0xff]  ;;  %v4933_v48 = vpack.c.bf16 %v897_v4, %v876_v55 }
 0x233   :  { %v4797_v40 = vpack.c.bf16 %v769_v2, %v748_v53  ;;  %v9164_v56 = vld [vmem:[%s9902_s1 + $0x1b78] sm:$0xff]  ;;  %v9189_v36 = vld [vmem:[%s9904_s2 + $0x8] sm:$0xff]  ;;  %v9204_v2 = vld [vmem:[%s9902_s1 + $0x1c20] sm:$0xff] }
 0x234   :  { %v9169_v23 = vld [vmem:[%s9902_s1 + $0x1c18] sm:$0xff]  ;;  %v1389_v16 = vrot.slane %v9189_v36, %v7240_v19  ;;  %v9357_v55 = vld [vmem:[%s9902_s1 + $0x2200] sm:$0xff] }
 0x235   :  { %4780 = vmatpush1.bf16.msra.mxu0 %v4779_v41  ;;  %4904 = vmatpush1.bf16.msra.mxu1 %v4903_v37  ;;  %v4921_v41 = vpack.c.bf16 %v771_v27, %v750_v35  ;;  %v770_v37 = vld [vmem:[%s9902_s1 + $0x1788] sm:$0xff]  ;;  %v9199_v53 = vld [vmem:[%s9902_s1 + $0x1cb8] sm:$0xff] }
 0x236   :  { %4782 = vmatprep.subr.bf16.mxu0 %v4781_v38  ;;  %4906 = vmatprep.subr.bf16.mxu1 %v4905_v60  ;;  %v790_v38 = vld [vmem:[%s9902_s1 + $0x1828] sm:$0xff]  ;;  %v4799_v60 = vpack.c.bf16 %v768_v1, %v747_v10  ;;  %v4923_v47 = vpack.c.bf16 %v770_v37, %v749_v0  ;;  %v9234_v10 = vld [vmem:[%s9902_s1 + $0x1d60] sm:$0xff]  ;;  %v9244_v0 = vld [vmem:[%s9902_s1 + $0x1d70] sm:$0xff] }
 0x237   :  { %v4801_v51 = vpack.c.bf16 %v811_v11, %v790_v38  ;;  %v9209_v35 = vld [vmem:[%s9902_s1 + $0x1cc8] sm:$0xff]  ;;  %v9254_v38 = vld [vmem:[%s9902_s1 + $0x1eb8] sm:$0xff]  ;;  %v9259_v11 = vld [vmem:[%s9902_s1 + $0x1f60] sm:$0xff] }
 0x238   :  { %v9214_v27 = vld [vmem:[%s9902_s1 + $0x1d68] sm:$0xff] }
 0x239   :  { %4784 = vmatpush1.bf16.msra.mxu0 %v4783_v5  ;;  %4908 = vmatpush1.bf16.msra.mxu1 %v4907_v33  ;;  %v4925_v5 = vpack.c.bf16 %v813_v9, %v792_v34  ;;  %v812_v33 = vld [vmem:[%s9902_s1 + $0x18d8] sm:$0xff]  ;;  %v9239_v1 = vld [vmem:[%s9902_s1 + $0x1e08] sm:$0xff]  ;;  %v9269_v9 = vld [vmem:[%s9902_s1 + $0x1f70] sm:$0xff] }
 0x23a   :  { %4786 = vmatprep.subr.bf16.mxu0 %v4785_v14  ;;  %4910 = vmatprep.subr.bf16.mxu1 %v4909_v7  ;;  %v832_v14 = vld [vmem:[%s9902_s1 + $0x1978] sm:$0xff]  ;;  %v4803_v7 = vpack.c.bf16 %v810_v63, %v789_v6  ;;  %v4927_v8 = vpack.c.bf16 %v812_v33, %v791_v12  ;;  %v9264_v34 = vld [vmem:[%s9902_s1 + $0x1ec8] sm:$0xff]  ;;  %v9288_v63 = vld [vmem:[%s9902_s1 + $0x1ec0] sm:$0xff] }
 0x23b   :  { %v4805_v42 = vpack.c.bf16 %v853_v62, %v832_v14  ;;  %v9293_v12 = vld [vmem:[%s9902_s1 + $0x1f68] sm:$0xff]  ;;  %v9303_v33 = vld [vmem:[%s9902_s1 + $0x20b0] sm:$0xff]  ;;  %v9308_v14 = vld [vmem:[%s9902_s1 + $0x2018] sm:$0xff] }
 0x23c   :  { %v9313_v62 = vld [vmem:[%s9902_s1 + $0x20c0] sm:$0xff] }
 0x23d   :  { %4788 = vmatpush1.bf16.msra.mxu0 %v4787_v43  ;;  %4912 = vmatpush1.bf16.msra.mxu1 %v4911_v15  ;;  %v854_v43 = vld [vmem:[%s9902_s1 + $0x1a28] sm:$0xff]  ;;  %v4929_v15 = vpack.c.bf16 %v855_v54, %v834_v61  ;;  %v4937_v61 = vpack.c.bf16 %v9184_v31, %v9179_v50  ;;  %v1381_v54 = vrot.slane %v9189_v36, %v7237_v18  ;;  %v9391_v50 = vld [vmem:[%s9902_s1 + $0x21f8] sm:$0xff]  ;;  %v9396_v31 = vld [vmem:[%s9902_s1 + $0x2160] sm:$0xff] }
 0x23e   :  { %4790 = vmatprep.subr.bf16.mxu0 %v4789_v58  ;;  %4914 = vmatprep.subr.bf16.mxu1 %v4913_v45  ;;  %v874_v58 = vld [vmem:[%s9902_s1 + $0x1ac8] sm:$0xff]  ;;  %v873_v45 = vld [vmem:[%s9902_s1 + $0x1ac0] sm:$0xff] }
 0x23f   :  { %v4811_v37 = vpack.c.bf16 %v894_v17, %v873_v45  ;;  %v4819_v17 = vpack.c.bf16 %v9239_v1, %v9234_v10 }
 0x241   :  { %4792 = vmatpush1.bf16.msra.mxu0 %v4791_v30  ;;  %4916 = vmatpush1.bf16.msra.mxu1 %v4915_v59  ;;  %v9174_v30 = vld [vmem:[%s9902_s1 + $0x1cc0] sm:$0xff]  ;;  %v4931_v59 = vpack.c.bf16 %v854_v43, %v833_v46  ;;  %v4939_v46 = vpack.c.bf16 %v9209_v35, %v9204_v2  ;;  %v1385_v43 = vrot.slane %v9189_v36, %v7263_v24 }
 0x242   :  { %4794 = vmatprep.subr.bf16.mxu0 %v4793_v44  ;;  %4918 = vmatprep.subr.bf16.mxu1 %v4917_v57  ;;  %v4809_v44 = vpack.c.bf16 %v895_v20, %v874_v58  ;;  %v9194_v57 = vld [vmem:[%s9902_s1 + $0x1c10] sm:$0xff]  ;;  %v4813_v6 = vpack.c.bf16 %v9174_v30, %v9169_v23  ;;  %v9347_v58 = vld [vmem:[%s9902_s1 + $0x20b8] sm:$0xff]  ;;  %v4821_v30 = vpack.c.bf16 %v9259_v11, %v9254_v38 }
 0x243   :  { %v9352_v20 = vld [vmem:[%s9902_s1 + $0x2158] sm:$0xff]  ;;  %v9380_v23 = vld [vmem:[%s9902_s1 + $0x2150] sm:$0xff]  ;;  %v4949_v35 = vpack.c.bf16 %v9313_v62, %v9308_v14 }
 0x244   :  { %2676 = vmatmul.mubr.f32.vlgmr.msra.gmra.mrb[8].mxu0 %v5442_v25  ;;  %2818 = vmatmul.mubr.f32.vlgmr.msra.gmra.mrb[8].mxu1 %v5442_v25 }
 0x245   :  { %4796 = vmatpush1.bf16.msra.mxu0 %v4795_v28  ;;  %4920 = vmatpush1.bf16.msra.mxu1 %v4919_v3  ;;  %v9219_v28 = vld [vmem:[%s9902_s1 + $0x1e10] sm:$0xff]  ;;  %v9224_v3 = vld [vmem:[%s9902_s1 + $0x1d78] sm:$0xff] }
 0x246   :  { %4798 = vmatprep.subr.bf16.mxu0 %v4797_v40  ;;  %4922 = vmatprep.subr.bf16.mxu1 %v4921_v41  ;;  %v9229_v40 = vld [vmem:[%s9902_s1 + $0x1e20] sm:$0xff]  ;;  %v9249_v41 = vld [vmem:[%s9902_s1 + $0x1e18] sm:$0xff]  ;;  %v4817_v4 = vpack.c.bf16 %v9219_v28, %v9214_v27  ;;  %v9414_v28 = vld [vmem:[%s9902_s1 + $0x22a8] sm:$0xff] }
 0x247   :  { %3699 = vmatprep.mubr.msk.f32.mxu0 %vm1472_vm0, %v5595_v39  ;;  %3700 = vmatprep.mubr.msk.f32.mxu1 %vm1472_vm0, %v5595_v39  ;;  %v4941_v45 = vpack.c.bf16 %v9229_v40, %v9224_v3  ;;  %v9419_v3 = vld [vmem:[%s9902_s1 + $0x2350] sm:$0xff] }
 0x249   :  { %4800 = vmatpush1.bf16.msra.mxu0 %v4799_v60  ;;  %4924 = vmatpush1.bf16.msra.mxu1 %v4923_v47  ;;  %v9274_v60 = vld [vmem:[%s9902_s1 + $0x1eb0] sm:$0xff]  ;;  %v9279_v47 = vld [vmem:[%s9902_s1 + $0x1f58] sm:$0xff] }
 0x24a   :  { %4802 = vmatprep.subr.bf16.mxu0 %v4801_v51  ;;  %4926 = vmatprep.subr.bf16.mxu1 %v4925_v5  ;;  %v4935_v51 = vpack.c.bf16 %v9164_v56, %v9159_v52  ;;  %v9298_v5 = vld [vmem:[%s9902_s1 + $0x2008] sm:$0xff]  ;;  %v9375_v56 = vld [vmem:[%s9902_s1 + $0x2210] sm:$0xff] }
 0x24b   :  { %v9370_v52 = vld [vmem:[%s9902_s1 + $0x2168] sm:$0xff]  ;;  %v4825_v2 = vpack.c.bf16 %v9303_v33, %v9298_v5 }
 0x24d   :  { %4804 = vmatpush1.bf16.msra.mxu0 %v4803_v7  ;;  %4928 = vmatpush1.bf16.msra.mxu1 %v4927_v8  ;;  %v4815_v7 = vpack.c.bf16 %v9199_v53, %v9194_v57  ;;  %v9329_v8 = vld [vmem:[%s9902_s1 + $0x20a8] sm:$0xff]  ;;  %v4947_v53 = vpack.c.bf16 %v9293_v12, %v9288_v63 }
 0x24e   :  { %4806 = vmatprep.subr.bf16.mxu0 %v4805_v42  ;;  %4930 = vmatprep.subr.bf16.mxu1 %v4929_v15  ;;  %v9334_v42 = vld [vmem:[%s9902_s1 + $0x2010] sm:$0xff]  ;;  %v1393_v15 = vrot.slane %v9189_v36, %v7276_v29  ;;  %v9401_v57 = vld [vmem:[%s9902_s1 + $0x2208] sm:$0xff]  ;;  %v4827_v27 = vpack.c.bf16 %v9329_v8, %v9324_v22 }
 0x24f   :  { %v1146_v22 = vld [vmem:[%s9902_s1 + $0x2348] sm:$0xff]  ;;  %v1127_v8 = vld [vmem:[%s9902_s1 + $0x22b0] sm:$0xff] }
 0x251   :  { %4808 = vmatpush1.bf16.msra.mxu0 %v4807_v21  ;;  %4932 = vmatpush1.bf16.msra.mxu1 %v4931_v59  ;;  %v4943_v21 = vpack.c.bf16 %v9249_v41, %v9244_v0  ;;  %v4945_v59 = vpack.c.bf16 %v9269_v9, %v9264_v34 }
 0x252   :  { %4810 = vmatprep.subr.bf16.mxu0 %v4809_v44  ;;  %4934 = vmatprep.subr.bf16.mxu1 %v4933_v48  ;;  %v4823_v44 = vpack.c.bf16 %v9279_v47, %v9274_v60  ;;  %v1128_v60 = vld [vmem:[%s9902_s1 + $0x22b8] sm:$0xff]  ;;  %v1149_v47 = vld [vmem:[%s9902_s1 + $0x2360] sm:$0xff] }
 0x255   :  { %4812 = vmatpush1.bf16.msra.mxu0 %v4811_v37  ;;  %4936 = vmatpush1.bf16.msra.mxu1 %v4935_v51  ;;  %v2180_v48 = vpop.f32.mrb[4].mxu0 }
 0x256   :  { %4814 = vmatprep.subr.bf16.mxu0 %v4813_v6  ;;  %4938 = vmatprep.subr.bf16.mxu1 %v4937_v61  ;;  %v5062_v40 = vadd.f32 %v2180_v48, %v1381_v54  ;;  %v2322_v10 = vpop.f32.mrb[4].mxu1  ;;  %v2182_v1 = vpop.f32.mrb[5].mxu0 }
 0x257   :  { %v5064_v38 = vadd.f32 %v2322_v10, %v1389_v16  ;;  %v5063_v11 = vadd.f32 %v2182_v1, %v1385_v43  ;;  %v2324_v34 = vpop.f32.mrb[5].mxu1 }
 0x258   :  { %v3092_v6 = vsel %vm3035_vm1, %v5062_v40, 0.0  ;;  %v3359_v63 = vmul.f32 %v5062_v40, %v5062_v40  ;;  %v5065_v12 = vadd.f32 %v2324_v34, %v1393_v15 }
 0x259   :  { %4816 = vmatpush1.bf16.msra.mxu0 %v4815_v7  ;;  %4940 = vmatpush1.bf16.msra.mxu1 %v4939_v46  ;;  %v3093_v33 = vrot.slane %v3092_v6, 4  ;;  %v3106_v61 = vsel %vm3035_vm1, %v5064_v38, 0.0  ;;  %v3361_v54 = vmul.f32 %v5064_v38, %v5064_v38  ;;  %v3099_v7 = vsel %vm3035_vm1, %v5063_v11, 0.0 }
 0x25a   :  { %4818 = vmatprep.subr.bf16.mxu0 %v4817_v4  ;;  %4942 = vmatprep.subr.bf16.mxu1 %v4941_v45  ;;  %v3428_v16 = vsel %vm3035_vm1, %v3359_v63, 0.0  ;;  %v3107_v43 = vrot.slane %v3106_v61, 4  ;;  %v3100_v48 = vrot.slane %v3099_v7, 4  ;;  %v3360_v10 = vmul.f32 %v5063_v11, %v5063_v11 }
 0x25b   :  { %v3094_v1 = vadd.f32 %v3093_v33, %v3092_v6  ;;  %v3429_v40 = vrot.slane %v3428_v16, 4  ;;  %v3442_v46 = vsel %vm3035_vm1, %v3361_v54, 0.0  ;;  %v3113_v15 = vsel %vm3035_vm1, %v5065_v12, 0.0 }
 0x25c   :  { %v3108_v4 = vadd.f32 %v3107_v43, %v3106_v61  ;;  %v3443_v34 = vrot.slane %v3442_v46, 4  ;;  %v3101_v5 = vadd.f32 %v3100_v48, %v3099_v7  ;;  %v3435_v38 = vsel %vm3035_vm1, %v3360_v10, 0.0 }
 0x25d   :  { %4820 = vmatpush1.bf16.msra.mxu0 %v4819_v17  ;;  %4944 = vmatpush1.bf16.msra.mxu1 %v4943_v21  ;;  %v3095_v45 = vrot.slane %v3094_v1, 2  ;;  %v3430_v51 = vadd.f32 %v3429_v40, %v3428_v16  ;;  %v3436_v63 = vrot.slane %v3435_v38, 4  ;;  %v3114_v9 = vrot.slane %v3113_v15, 4  ;;  %v1168_v40 = vld [vmem:[%s9902_s1 + $0x23f8] sm:$0xff] }
 0x25e   :  { %4822 = vmatprep.subr.bf16.mxu0 %v4821_v30  ;;  %4946 = vmatprep.subr.bf16.mxu1 %v4945_v59  ;;  %v3109_v11 = vrot.slane %v3108_v4, 2  ;;  %v3444_v6 = vadd.f32 %v3443_v34, %v3442_v46  ;;  %v3102_v33 = vrot.slane %v3101_v5, 2  ;;  %v3362_v37 = vmul.f32 %v5065_v12, %v5065_v12  ;;  %v1189_v46 = vld [vmem:[%s9902_s1 + $0x24a0] sm:$0xff] }
 0x25f   :  { %v3096_v54 = vadd.f32 %v3095_v45, %v3094_v1  ;;  %v3431_v41 = vrot.slane %v3430_v51, 2  ;;  %v3437_v0 = vadd.f32 %v3436_v63, %v3435_v38  ;;  %v3115_v17 = vadd.f32 %v3114_v9, %v3113_v15 }
 0x260   :  { %v3110_v61 = vadd.f32 %v3109_v11, %v3108_v4  ;;  %v3445_v21 = vrot.slane %v3444_v6, 2  ;;  %v3103_v30 = vadd.f32 %v3102_v33, %v3101_v5  ;;  %v3449_v7 = vsel %vm3035_vm1, %v3362_v37, 0.0 }
 0x261   :  { %4824 = vmatpush1.bf16.msra.mxu0 %v4823_v44  ;;  %4948 = vmatpush1.bf16.msra.mxu1 %v4947_v53  ;;  %v3097_v59 = vrot.slane %v3096_v54, 1  ;;  %v3432_v16 = vadd.f32 %v3431_v41, %v3430_v51  ;;  %v3438_v43 = vrot.slane %v3437_v0, 2  ;;  %v3116_v48 = vrot.slane %v3115_v17, 2 }
 0x262   :  { %4826 = vmatprep.subr.bf16.mxu0 %v4825_v2  ;;  %4950 = vmatprep.subr.bf16.mxu1 %v4949_v35  ;;  %v3111_v44 = vrot.slane %v3110_v61, 1  ;;  %v3446_v37 = vadd.f32 %v3445_v21, %v3444_v6  ;;  %v3104_v53 = vrot.slane %v3103_v30, 1  ;;  %v3450_v2 = vrot.slane %v3449_v7, 4  ;;  %v1167_v21 = vld [vmem:[%s9902_s1 + $0x23f0] sm:$0xff] }
 0x263   :  { %v3098_v9 = vadd.f32 %v3097_v59, %v3096_v54  ;;  %v3433_v41 = vrot.slane %v3432_v16, 1  ;;  %v3439_v51 = vadd.f32 %v3438_v43, %v3437_v0  ;;  %v3117_v12 = vadd.f32 %v3116_v48, %v3115_v17  ;;  %v1125_v0 = vld [vmem:[%s9902_s1 + $0x22a0] sm:$0xff]  ;;  %v1231_v59 = vld [vmem:[%s9902_s1 + $0x25f0] sm:$0xff]  ;;  %v1212_v48 = vld [vmem:[%s9902_s1 + $0x2558] sm:$0xff] }
 0x264   :  { %v3105_v14 = vadd.f32 %v3104_v53, %v3103_v30  ;;  %v3451_v62 = vadd.f32 %v3450_v2, %v3449_v7  ;;  %v9930_v35 = vpack.c.bf16 %v9347_v58, %v9334_v42  ;;  %v9931_v5 = vpack.c.bf16 %v9357_v55, %v9352_v20  ;;  %v1148_v55 = vld [vmem:[%s9902_s1 + $0x2358] sm:$0xff]  ;;  %v1190_v30 = vld [vmem:[%s9902_s1 + $0x24a8] sm:$0xff] }
 0x265   :  { %4828 = vmatpush1.bf16.msra.mxu0 %v4827_v27  ;;  %v4957_v10 = vpack.c.bf16 %v1149_v47, %v1128_v60  ;;  %v3434_v27 = vadd.f32 %v3433_v41, %v3432_v16  ;;  %v3112_v42 = vadd.f32 %v3111_v44, %v3110_v61  ;;  %v3440_v58 = vrot.slane %v3439_v51, 1  ;;  %v1210_v7 = vld [vmem:[%s9902_s1 + $0x2548] sm:$0xff]  ;;  %v1233_v60 = vld [vmem:[%s9902_s1 + $0x2600] sm:$0xff] }
 0x266   :  { %4952 = vmatpush1.bf16.msra.mxu1 %v9930_v35  ;;  %4830 = vmatprep.subr.bf16.mxu0 %v9931_v5  ;;  %v3118_v1 = vrot.slane %v3117_v12, 1  ;;  %v9932_v20 = vpack.c.bf16 %v9375_v56, %v9370_v52  ;;  %v3447_v15 = vrot.slane %v3446_v37, 1  ;;  %v3253_v4 = vcombine.low %v3098_v9, %v3105_v14  ;;  %v1170_v52 = vld [vmem:[%s9902_s1 + $0x2408] sm:$0xff]  ;;  %v1191_v56 = vld [vmem:[%s9902_s1 + $0x24b0] sm:$0xff]  ;;  %v1252_v35 = vld [vmem:[%s9902_s1 + $0x2698] sm:$0xff] }
 0x267   :  { %v3452_v34 = vrot.slane %v3451_v62, 2  ;;  %v3441_v38 = vadd.f32 %v3440_v58, %v3439_v51  ;;  %v9933_v63 = vpack.c.bf16 %v9391_v50, %v9380_v23  ;;  %v4835_v11 = vpack.c.bf16 %v1146_v22, %v1125_v0  ;;  %v1188_v23 = vld [vmem:[%s9902_s1 + $0x2498] sm:$0xff]  ;;  %v1169_v50 = vld [vmem:[%s9902_s1 + $0x2400] sm:$0xff]  ;;  %v1230_v41 = vld [vmem:[%s9902_s1 + $0x25e8] sm:$0xff] }
 0x268   :  { %4954 = vmatprep.subr.bf16.mxu1 %v9932_v20  ;;  %v3119_v45 = vadd.f32 %v3118_v1, %v3117_v12  ;;  %v9934_v33 = vpack.c.bf16 %v9401_v57, %v9396_v31  ;;  %v9935_v54 = vpack.c.bf16 %v9419_v3, %v9414_v28  ;;  %v4959_v17 = vpack.c.bf16 %v1148_v55, %v1127_v8  ;;  %v1211_v51 = vld [vmem:[%s9902_s1 + $0x2550] sm:$0xff]  ;;  %v1273_v5 = vld [vmem:[%s9902_s1 + $0x2740] sm:$0xff]  ;;  %v1254_v22 = vld [vmem:[%s9902_s1 + $0x26a8] sm:$0xff] }
 0x269   :  { %4832 = vmatpush1.bf16.msra.mxu0 %v9933_v63  ;;  %v3453_v6 = vadd.f32 %v3452_v34, %v3451_v62  ;;  %v4837_v61 = vpack.c.bf16 %v1189_v46, %v1168_v40  ;;  %v9508_v31 = vrot.slane %v3253_v4, %v7445_v13  ;;  %v3589_v57 = vcombine.low %v3434_v27, %v3441_v38  ;;  %v1232_v62 = vld [vmem:[%s9902_s1 + $0x25f8] sm:$0xff]  ;;  %v1275_v8 = vld [vmem:[%s9902_s1 + $0x2750] sm:$0xff]  ;;  %v1253_v40 = vld [vmem:[%s9902_s1 + $0x26a0] sm:$0xff] }
 0x26a   :  { %4956 = vmatpush1.bf16.msra.mxu1 %v9934_v33  ;;  %4834 = vmatprep.subr.bf16.mxu0 %v9935_v54  ;;  %v3254_v28 = vcombine.low %v3112_v42, %v3119_v45  ;;  %v4961_v3 = vpack.c.bf16 %v1191_v56, %v1170_v52  ;;  %v3448_v16 = vadd.f32 %v3447_v15, %v3446_v37  ;;  %v1209_v37 = vld [vmem:[%s9902_s1 + $0x2540] sm:$0xff]  ;;  %v1251_v20 = vld [vmem:[%s9902_s1 + $0x2690] sm:$0xff]  ;;  %v1272_v55 = vld [vmem:[%s9902_s1 + $0x2738] sm:$0xff] }
 0x26b   :  { %4958 = vmatprep.subr.bf16.mxu1 %v4957_v10  ;;  %v3454_v43 = vrot.slane %v3453_v6, 1  ;;  %v4839_v44 = vpack.c.bf16 %v1188_v23, %v1167_v21  ;;  %v4963_v2 = vpack.c.bf16 %v1190_v30, %v1169_v50  ;;  %v4841_v9 = vpack.c.bf16 %v1231_v59, %v1210_v7  ;;  %v1274_v15 = vld [vmem:[%s9902_s1 + $0x2748] sm:$0xff]  ;;  %v1315_v34 = vld [vmem:[%s9902_s1 + $0x2890] sm:$0xff]  ;;  %v1296_v56 = vld [vmem:[%s9902_s1 + $0x27f8] sm:$0xff] }
 0x26c   :  { %v9526_v47 = vrot.slane %v3254_v28, %v7445_v13  ;;  %v4965_v14 = vpack.c.bf16 %v1233_v60, %v1212_v48  ;;  %v9549_v10 = vrot.slane %v3589_v57, %v7445_v13  ;;  %v4843_v27 = vpack.c.bf16 %v1230_v41, %v1209_v37  ;;  %v1294_v4 = vld [vmem:[%s9902_s1 + $0x27e8] sm:$0xff]  ;;  %v1317_v38 = vld [vmem:[%s9902_s1 + $0x28a0] sm:$0xff]  ;;  %v1336_v50 = vld [vmem:[%s9902_s1 + $0x2938] sm:$0xff] }
 0x26d   :  { %4836 = vmatpush1.bf16.msra.mxu0 %v4835_v11  ;;  %v3455_v53 = vadd.f32 %v3454_v43, %v3453_v6  ;;  %v4967_v58 = vpack.c.bf16 %v1232_v62, %v1211_v51  ;;  %v4845_v1 = vpack.c.bf16 %v1273_v5, %v1252_v35  ;;  %v4969_v46 = vpack.c.bf16 %v1275_v8, %v1254_v22  ;;  %v1293_v6 = vld [vmem:[%s9902_s1 + $0x27e0] sm:$0xff]  ;;  %v1314_v33 = vld [vmem:[%s9902_s1 + $0x2888] sm:$0xff]  ;;  %v1335_v59 = vld [vmem:[%s9902_s1 + $0x2930] sm:$0xff] }
 0x26e   :  { %4960 = vmatpush1.bf16.msra.mxu1 %v4959_v17  ;;  %4838 = vmatprep.subr.bf16.mxu0 %v4837_v61  ;;  %v3285_v12 = vcombine.low %v9508_v31, %v9526_v47  ;;  %v4847_v45 = vpack.c.bf16 %v1272_v55, %v1251_v20  ;;  %v4971_v63 = vpack.c.bf16 %v1274_v15, %v1253_v40  ;;  %v1295_v17 = vld [vmem:[%s9902_s1 + $0x27f0] sm:$0xff]  ;;  %v1316_v61 = vld [vmem:[%s9902_s1 + $0x2898] sm:$0xff]  ;;  %v1338_v57 = vld [vmem:[%s9902_s1 + $0x2948] sm:$0xff]  ;;  %v5102_v35 = vmov 0.0|0.0  }
 0x26f   :  { %4962 = vmatprep.subr.bf16.mxu1 %v4961_v3  ;;  %v3590_v0 = vcombine.low %v3448_v16, %v3455_v53  ;;  %v4849_v11 = vpack.c.bf16 %v1315_v34, %v1294_v4  ;;  %v4973_v54 = vpack.c.bf16 %v1317_v38, %v1296_v56  ;;  %v4851_v21 = vpack.c.bf16 %v1314_v33, %v1293_v6  ;;  %v709_v28 = vld [vmem:[%s9902_s1 + $0x15a0] sm:$0xff]  ;;  %v730_v3 = vld [vmem:[%s9902_s1 + $0x1648] sm:$0xff]  ;;  %v415_v60 = vld [vmem:[%s9902_s1 + $0xc70] sm:$0xff] }
 0x270   :  { %v4975_v23 = vpack.c.bf16 %v1316_v61, %v1295_v17  ;;  %v373_v30 = vld [vmem:[%s9902_s1 + $0xb20] sm:$0xff]  ;;  %v394_v7 = vld [vmem:[%s9902_s1 + $0xbc8] sm:$0xff]  ;;  %v5010_v53 = vpack.c.bf16 %v730_v3, %v709_v28  ;;  %v772_v37 = vld [vmem:[%s9902_s1 + $0x1798] sm:$0xff] }
 0x271   :  { %4840 = vmatpush1.bf16.msra.mxu0 %v4839_v44  ;;  %v9558_v42 = vrot.slane %v3590_v0, %v7445_v13  ;;  %v37_v16 = vld [vmem:[%s9902_s1 + $0xa0] sm:$0xff]  ;;  %v58_v43 = vld [vmem:[%s9902_s1 + $0x148] sm:$0xff]  ;;  %v436_v44 = vld [vmem:[%s9902_s1 + $0xd18] sm:$0xff] }
 0x272   :  { %4964 = vmatpush1.bf16.msra.mxu1 %v4963_v2  ;;  %4842 = vmatprep.subr.bf16.mxu0 %v4841_v9  ;;  %v1337_v48 = vld [vmem:[%s9902_s1 + $0x2940] sm:$0xff]  ;;  %v4977_v2 = vpack.c.bf16 %v394_v7, %v373_v30  ;;  %v751_v9 = vld [vmem:[%s9902_s1 + $0x16f0] sm:$0xff]  ;;  %v4979_v41 = vpack.c.bf16 %v58_v43, %v37_v16  ;;  %v4981_v51 = vpack.c.bf16 %v436_v44, %v415_v60  ;;  %v100_v62 = vld [vmem:[%s9902_s1 + $0x298] sm:$0xff] }
 0x273   :  { %4966 = vmatprep.subr.bf16.mxu1 %v4965_v14  ;;  %v3621_v52 = vcombine.low %v9549_v10, %v9558_v42  ;;  %v79_v14 = vld [vmem:[%s9902_s1 + $0x1f0] sm:$0xff]  ;;  %v457_v5 = vld [vmem:[%s9902_s1 + $0xdc0] sm:$0xff]  ;;  %v478_v0 = vld [vmem:[%s9902_s1 + $0xe68] sm:$0xff]  ;;  %v5013_v22 = vpack.c.bf16 %v772_v37, %v751_v9 }
 0x274   :  { %v793_v8 = vld [vmem:[%s9902_s1 + $0x1840] sm:$0xff]  ;;  %v142_v55 = vld [vmem:[%s9902_s1 + $0x3e8] sm:$0xff]  ;;  %v499_v40 = vld [vmem:[%s9902_s1 + $0xf10] sm:$0xff] }
 0x275   :  { %4844 = vmatpush1.bf16.msra.mxu0 %v4843_v27  ;;  %v814_v27 = vld [vmem:[%s9902_s1 + $0x18e8] sm:$0xff]  ;;  %v121_v20 = vld [vmem:[%s9902_s1 + $0x340] sm:$0xff]  ;;  %v835_v4 = vld [vmem:[%s9902_s1 + $0x1990] sm:$0xff] }
 0x276   :  { %4968 = vmatpush1.bf16.msra.mxu1 %v4967_v58  ;;  %4846 = vmatprep.subr.bf16.mxu0 %v4845_v1  ;;  %v4983_v58 = vpack.c.bf16 %v100_v62, %v79_v14  ;;  %v4985_v1 = vpack.c.bf16 %v478_v0, %v457_v5  ;;  %v5016_v15 = vpack.c.bf16 %v814_v27, %v793_v8  ;;  %v184_v38 = vld [vmem:[%s9902_s1 + $0x538] sm:$0xff]  ;;  %v877_v6 = vld [vmem:[%s9902_s1 + $0x1ae0] sm:$0xff]  ;;  %v898_v33 = vld [vmem:[%s9902_s1 + $0x1b88] sm:$0xff] }
 0x277   :  { %4970 = vmatprep.subr.bf16.mxu1 %v4969_v46  ;;  %v520_v46 = vld [vmem:[%s9902_s1 + $0xfb8] sm:$0xff]  ;;  %v4987_v34 = vpack.c.bf16 %v142_v55, %v121_v20  ;;  %v205_v61 = vld [vmem:[%s9902_s1 + $0x5e0] sm:$0xff]  ;;  %v919_v28 = vld [vmem:[%s9902_s1 + $0x1c30] sm:$0xff] }
 0x278   :  { %v4989_v56 = vpack.c.bf16 %v520_v46, %v499_v40  ;;  %v940_v3 = vld [vmem:[%s9902_s1 + $0x1cd8] sm:$0xff]  ;;  %v625_v43 = vld [vmem:[%s9902_s1 + $0x1300] sm:$0xff]  ;;  %v1003_v5 = vld [vmem:[%s9902_s1 + $0x1ed0] sm:$0xff] }
 0x279   :  { %4848 = vmatpush1.bf16.msra.mxu0 %v4847_v45  ;;  %v541_v45 = vld [vmem:[%s9902_s1 + $0x1060] sm:$0xff]  ;;  %v268_v16 = vld [vmem:[%s9902_s1 + $0x7d8] sm:$0xff]  ;;  %v5025_v60 = vpack.c.bf16 %v940_v3, %v919_v28  ;;  %v331_v27 = vld [vmem:[%s9902_s1 + $0x9d0] sm:$0xff]  ;;  %v1397_v28 = vrot.slane %v9189_v36, %v8226_v49 }
 0x27a   :  { %4972 = vmatpush1.bf16.msra.mxu1 %v4971_v63  ;;  %4850 = vmatprep.subr.bf16.mxu0 %v4849_v11  ;;  %v562_v63 = vld [vmem:[%s9902_s1 + $0x1108] sm:$0xff]  ;;  %v961_v44 = vld [vmem:[%s9902_s1 + $0x1d80] sm:$0xff]  ;;  %v688_v14 = vld [vmem:[%s9902_s1 + $0x14f8] sm:$0xff] }
 0x27b   :  { %4974 = vmatprep.subr.bf16.mxu1 %v4973_v54  ;;  %v4993_v17 = vpack.c.bf16 %v562_v63, %v541_v45  ;;  %v289_v37 = vld [vmem:[%s9902_s1 + $0x880] sm:$0xff]  ;;  %v1024_v0 = vld [vmem:[%s9902_s1 + $0x1f78] sm:$0xff]  ;;  %v1066_v55 = vld [vmem:[%s9902_s1 + $0x20c8] sm:$0xff] }
 0x27c   :  { %v1045_v20 = vld [vmem:[%s9902_s1 + $0x2020] sm:$0xff]  ;;  %v9863_v31 = vld [vmem:[%s9904_s2 + $0x10] sm:$0x1f] }
 0x27d   :  { %4852 = vmatpush1.bf16.msra.mxu0 %v4851_v21  ;;  %v226_v21 = vld [vmem:[%s9902_s1 + $0x688] sm:$0xff]  ;;  %v5034_v46 = vpack.c.bf16 %v1066_v55, %v1045_v20  ;;  %v1213_v63 = vld [vmem:[%s9902_s1 + $0x2560] sm:$0xff]  ;;  %v1413_v47 = vrot.slane %v9863_v31, %v7237_v18  ;;  %v1417_v10 = vrot.slane %v9863_v31, %v7263_v24  ;;  %v1425_v42 = vrot.slane %v9863_v31, %v7276_v29 }
 0x27e   :  { %4976 = vmatpush1.bf16.msra.mxu1 %v4975_v23  ;;  %2742 = vmatprep.subr.mxu0 %v1336_v50  ;;  %v583_v23 = vld [vmem:[%s9902_s1 + $0x11b0] sm:$0xff]  ;;  %v604_v50 = vld [vmem:[%s9902_s1 + $0x1258] sm:$0xff]  ;;  %v4995_v30 = vpack.c.bf16 %v226_v21, %v205_v61  ;;  %v1297_v61 = vld [vmem:[%s9902_s1 + $0x2800] sm:$0xff] }
 0x27f   :  { %2884 = vmatprep.subr.mxu1 %v1338_v57  ;;  %v5022_v57 = vpack.c.bf16 %v898_v33, %v877_v6  ;;  %v4997_v7 = vpack.c.bf16 %v604_v50, %v583_v23  ;;  %v1255_v33 = vld [vmem:[%s9902_s1 + $0x26b0] sm:$0xff]  ;;  %v1318_v21 = vld [vmem:[%s9902_s1 + $0x28a8] sm:$0xff]  ;;  %v5103_v50 = vmov 0.0   ;;  %v9936_v3 = vld [vmem:[#allocation2_spill] sm:$0xff] }
 0x280   :  { %v5052_v23 = vpack.c.bf16 %v1318_v21, %v1297_v61 }
 0x281   :  { %2743 = vmatpush1.msra.mxu0 %v1335_v59  ;;  %v247_v59 = vld [vmem:[%s9902_s1 + $0x730] sm:$0xff] }
 0x282   :  { %2885 = vmatpush1.msra.mxu1 %v1337_v48  ;;  %2747 = vmatmul.mubr.f32.vlgmr.msra.gmra.mrb[8].mxu0 %v5567_v26  ;;  %v646_v48 = vld [vmem:[%s9902_s1 + $0x13a8] sm:$0xff] }
 0x283   :  { %2889 = vmatmul.mubr.f32.vlgmr.msra.gmra.mrb[8].mxu1 %v5567_v26  ;;  %5009 = vmatprep.subr.bf16.mxu1 %v5102_v35  ;;  %v5001_v9 = vpack.c.bf16 %v646_v48, %v625_v43 }
 0x284   :  { %5011 = vmatpush1.bf16.msra.mxu1 %v5010_v53  ;;  %4978 = vmatprep.subr.bf16.mxu0 %v4977_v2  ;;  %v982_v53 = vld [vmem:[%s9902_s1 + $0x1e28] sm:$0xff]  ;;  %v4999_v2 = vpack.c.bf16 %v268_v16, %v247_v59  ;;  %v9938_v59 = vsub.s32 5, %v9936_v3  ;;  %v9939_v16 = vsub.s32 7, %v9936_v3 }
 0x285   :  { %5012 = vmatprep.subr.bf16.mxu1 %v5102_v35  ;;  %4980 = vmatpush3.bf16.msra.mxu0 %v4979_v41  ;;  %v310_v41 = vld [vmem:[%s9902_s1 + $0x928] sm:$0xff]  ;;  %v5028_v62 = vpack.c.bf16 %v982_v53, %v961_v44 }
 0x286   :  { %4982 = vmatprep.subr.bf16.mxu0 %v4981_v51  ;;  %2959 = vmatprep.mubr.f32.mxu0 %v5455_v32  ;;  %v856_v32 = vld [vmem:[%s9902_s1 + $0x1a38] sm:$0xff]  ;;  %v667_v51 = vld [vmem:[%s9902_s1 + $0x1450] sm:$0xff]  ;;  %v1409_v43 = vrot.slane %v9189_v36, %v9939_v16 }
 0x287   :  { %3701 = vmatprep.mubr.msk.f32.mxu1 %vm1472_vm0, %v5595_v39  ;;  %v163_v39 = vld [vmem:[%s9902_s1 + $0x490] sm:$0xff]  ;;  %v5019_v11 = vpack.c.bf16 %v856_v32, %v835_v4  ;;  %v5005_v8 = vpack.c.bf16 %v688_v14, %v667_v51  ;;  %v1108_v4 = vld [vmem:[%s9902_s1 + $0x2218] sm:$0xff] }
 0x288   :  { %5014 = vmatpush1.bf16.msra.mxu1 %v5013_v22  ;;  %v4991_v54 = vpack.c.bf16 %v184_v38, %v163_v39  ;;  %v5003_v22 = vpack.c.bf16 %v310_v41, %v289_v37  ;;  %v1171_v38 = vld [vmem:[%s9902_s1 + $0x2410] sm:$0xff] }
 0x289   :  { %5015 = vmatprep.subr.bf16.mxu1 %v5102_v35  ;;  %4984 = vmatpush3.bf16.msra.mxu0 %v4983_v58  ;;  %v352_v58 = vld [vmem:[%s9902_s1 + $0xa78] sm:$0xff] }
 0x28a   :  { %4986 = vmatprep.subr.bf16.mxu0 %v4985_v1  ;;  %v5031_v1 = vpack.c.bf16 %v1024_v0, %v1003_v5  ;;  %v5007_v40 = vpack.c.bf16 %v352_v58, %v331_v27 }
 0x28c   :  { %5017 = vmatpush1.bf16.msra.mxu1 %v5016_v15  ;;  %v1087_v15 = vld [vmem:[%s9902_s1 + $0x2170] sm:$0xff] }
 0x28d   :  { %5018 = vmatprep.subr.bf16.mxu1 %v5102_v35  ;;  %4988 = vmatpush3.bf16.msra.mxu0 %v4987_v34  ;;  %v5037_v32 = vpack.c.bf16 %v1108_v4, %v1087_v15  ;;  %v1129_v34 = vld [vmem:[%s9902_s1 + $0x22c0] sm:$0xff] }
 0x28e   :  { %4990 = vmatprep.subr.bf16.mxu0 %v4989_v56  ;;  %v1150_v56 = vld [vmem:[%s9902_s1 + $0x2368] sm:$0xff] }
 0x28f   :  { %v5040_v39 = vpack.c.bf16 %v1150_v56, %v1129_v34 }
 0x290   :  { %5020 = vmatpush1.bf16.msra.mxu1 %v5019_v11  ;;  %v1234_v11 = vld [vmem:[%s9902_s1 + $0x2608] sm:$0xff] }
 0x291   :  { %5021 = vmatprep.subr.bf16.mxu1 %v5102_v35  ;;  %4992 = vmatpush3.bf16.msra.mxu0 %v4991_v54  ;;  %v5046_v6 = vpack.c.bf16 %v1234_v11, %v1213_v63  ;;  %v1276_v54 = vld [vmem:[%s9902_s1 + $0x2758] sm:$0xff] }
 0x292   :  { %4994 = vmatprep.subr.bf16.mxu0 %v4993_v17  ;;  %v5049_v17 = vpack.c.bf16 %v1276_v54, %v1255_v33 }
 0x294   :  { %5023 = vmatpush1.bf16.msra.mxu1 %v5022_v57  ;;  %v1339_v57 = vld [vmem:[%s9902_s1 + $0x2950] sm:$0xff] }
 0x295   :  { %5024 = vmatprep.subr.bf16.mxu1 %v5102_v35  ;;  %4996 = vmatpush3.bf16.msra.mxu0 %v4995_v30  ;;  %v9937_v30 = vsub.s32 6, %v9936_v3 }
 0x296   :  { %4998 = vmatprep.subr.bf16.mxu0 %v4997_v7 }
 0x297   :  { %v1405_v7 = vrot.slane %v9189_v36, %v9937_v30 }
 0x298   :  { %5026 = vmatpush1.bf16.msra.mxu1 %v5025_v60 }
 0x299   :  { %5027 = vmatprep.subr.bf16.mxu1 %v5102_v35  ;;  %5000 = vmatpush3.bf16.msra.mxu0 %v4999_v2 }
 0x29a   :  { %5002 = vmatprep.subr.bf16.mxu0 %v5001_v9 }
 0x29c   :  { %5029 = vmatpush1.bf16.msra.mxu1 %v5028_v62 }
 0x29d   :  { %5030 = vmatprep.subr.bf16.mxu1 %v5102_v35  ;;  %5004 = vmatpush3.bf16.msra.mxu0 %v5003_v22 }
 0x29e   :  { %5006 = vmatprep.subr.bf16.mxu0 %v5005_v8 }
 0x2a0   :  { %5032 = vmatpush1.bf16.msra.mxu1 %v5031_v1 }
 0x2a1   :  { %5033 = vmatprep.subr.bf16.mxu1 %v5102_v35  ;;  %5008 = vmatpush3.bf16.msra.mxu0 %v5007_v40 }
 0x2a4   :  { %5035 = vmatpush1.bf16.msra.mxu1 %v5034_v46  ;;  %2960 = vmatmul.mubr.f32.vlgmr.msra.gmra.mrb[10].mxu0 %v5442_v25  ;;  %v1192_v25 = vld [vmem:[%s9902_s1 + $0x24b8] sm:$0xff] }
 0x2a5   :  { %5036 = vmatprep.subr.bf16.mxu1 %v5102_v35  ;;  %v5043_v45 = vpack.c.bf16 %v1192_v25, %v1171_v38 }
 0x2a8   :  { %5038 = vmatpush1.bf16.msra.mxu1 %v5037_v32 }
 0x2a9   :  { %5039 = vmatprep.subr.bf16.mxu1 %v5102_v35 }
 0x2ac   :  { %5041 = vmatpush1.bf16.msra.mxu1 %v5040_v39 }
 0x2ad   :  { %5042 = vmatprep.subr.bf16.mxu1 %v5102_v35 }
 0x2b0   :  { %5044 = vmatpush1.bf16.msra.mxu1 %v5043_v45 }
 0x2b1   :  { %5045 = vmatprep.subr.bf16.mxu1 %v5102_v35 }
 0x2b4   :  { %5047 = vmatpush1.bf16.msra.mxu1 %v5046_v6 }
 0x2b5   :  { %5048 = vmatprep.subr.bf16.mxu1 %v5102_v35 }
 0x2b8   :  { %5050 = vmatpush1.bf16.msra.mxu1 %v5049_v17 }
 0x2b9   :  { %5051 = vmatprep.subr.bf16.mxu1 %v5102_v35  ;;  %v1401_v35 = vrot.slane %v9189_v36, %v9938_v59 }
 0x2bc   :  { %5053 = vmatpush1.bf16.msra.mxu1 %v5052_v23 }
 0x2bd   :  { %3025 = vmatprep.subr.mxu1 %v5103_v50 }
 0x2c0   :  { %3026 = vmatpush1.msra.mxu1 %v1339_v57 }
 0x2c1   :  { %3030 = vmatmul.mubr.f32.vlgmr.msra.gmra.mrb[10].mxu1 %v5567_v26 }
 0x2d6   :  { %v2464_v48 = vpop.f32.mrb[6].mxu0  ;;  %v2606_v44 = vpop.f32.mrb[6].mxu1 }
 0x2d7   :  { %v5066_v60 = vadd.f32 %v2464_v48, %v1397_v28  ;;  %v2466_v53 = vpop.f32.mrb[7].mxu0  ;;  %v5068_v26 = vadd.f32 %v2606_v44, %v1405_v7  ;;  %v2608_v9 = vpop.f32.mrb[7].mxu1 }
 0x2d8   :  { %v5067_v2 = vadd.f32 %v2466_v53, %v1401_v35  ;;  %v5069_v51 = vadd.f32 %v2608_v9, %v1409_v43 }
 0x2d9   :  { %v3120_v37 = vsel %vm3035_vm1, %v5066_v60, 0.0  ;;  %v3363_v41 = vmul.f32 %v5066_v60, %v5066_v60  ;;  %v3134_v62 = vsel %vm3035_vm1, %v5068_v26, 0.0  ;;  %v3365_v5 = vmul.f32 %v5068_v26, %v5068_v26 }
 0x2da   :  { %v3121_v14 = vrot.slane %v3120_v37, 4  ;;  %v3127_v0 = vsel %vm3035_vm1, %v5067_v2, 0.0  ;;  %v3135_v36 = vrot.slane %v3134_v62, 4  ;;  %v3364_v27 = vmul.f32 %v5067_v2, %v5067_v2 }
 0x2db   :  { %v3456_v22 = vsel %vm3035_vm1, %v3363_v41, 0.0  ;;  %v3128_v8 = vrot.slane %v3127_v0, 4  ;;  %v3470_v20 = vsel %vm3035_vm1, %v3365_v5, 0.0  ;;  %v3141_v55 = vsel %vm3035_vm1, %v5069_v51, 0.0 }
 0x2dc   :  { %v3122_v58 = vadd.f32 %v3121_v14, %v3120_v37  ;;  %v3457_v1 = vrot.slane %v3456_v22, 4  ;;  %v3136_v40 = vadd.f32 %v3135_v36, %v3134_v62  ;;  %v3471_v46 = vrot.slane %v3470_v20, 4 }
 0x2dd   :  { %v3129_v15 = vadd.f32 %v3128_v8, %v3127_v0  ;;  %v3463_v4 = vsel %vm3035_vm1, %v3364_v27, 0.0  ;;  %v3142_v39 = vrot.slane %v3141_v55, 4  ;;  %v3366_v63 = vmul.f32 %v5069_v51, %v5069_v51 }
 0x2de   :  { %v3123_v32 = vrot.slane %v3122_v58, 2  ;;  %v3458_v34 = vadd.f32 %v3457_v1, %v3456_v22  ;;  %v3464_v56 = vrot.slane %v3463_v4, 4  ;;  %v3137_v38 = vrot.slane %v3136_v40, 2 }
 0x2df   :  { %v3472_v25 = vadd.f32 %v3471_v46, %v3470_v20  ;;  %v3130_v45 = vrot.slane %v3129_v15, 2  ;;  %v3143_v54 = vadd.f32 %v3142_v39, %v3141_v55  ;;  %v3477_v23 = vsel %vm3035_vm1, %v3366_v63, 0.0 }
 0x2e0   :  { %v3124_v11 = vadd.f32 %v3123_v32, %v3122_v58  ;;  %v3459_v6 = vrot.slane %v3458_v34, 2  ;;  %v3465_v33 = vadd.f32 %v3464_v56, %v3463_v4  ;;  %v3138_v17 = vadd.f32 %v3137_v38, %v3136_v40 }
 0x2e1   :  { %v3473_v61 = vrot.slane %v3472_v25, 2  ;;  %v3131_v21 = vadd.f32 %v3130_v45, %v3129_v15  ;;  %v3144_v3 = vrot.slane %v3143_v54, 2  ;;  %v3478_v35 = vrot.slane %v3477_v23, 4 }
 0x2e2   :  { %v3125_v50 = vrot.slane %v3124_v11, 1  ;;  %v3460_v57 = vadd.f32 %v3459_v6, %v3458_v34  ;;  %v3466_v28 = vrot.slane %v3465_v33, 2  ;;  %v3139_v30 = vrot.slane %v3138_v17, 1 }
 0x2e3   :  { %v3474_v7 = vadd.f32 %v3473_v61, %v3472_v25  ;;  %v3132_v59 = vrot.slane %v3131_v21, 1  ;;  %v3145_v60 = vadd.f32 %v3144_v3, %v3143_v54  ;;  %v3479_v53 = vadd.f32 %v3478_v35, %v3477_v23 }
 0x2e4   :  { %v3126_v16 = vadd.f32 %v3125_v50, %v3124_v11  ;;  %v3461_v43 = vrot.slane %v3460_v57, 1  ;;  %v3467_v48 = vadd.f32 %v3466_v28, %v3465_v33  ;;  %v3140_v2 = vadd.f32 %v3139_v30, %v3138_v17 }
 0x2e5   :  { %v3133_v44 = vadd.f32 %v3132_v59, %v3131_v21  ;;  %v3146_v37 = vrot.slane %v3145_v60, 1  ;;  %v3475_v41 = vrot.slane %v3474_v7, 1  ;;  %v3480_v14 = vrot.slane %v3479_v53, 2 }
 0x2e6   :  { %v3462_v26 = vadd.f32 %v3461_v43, %v3460_v57  ;;  %v3468_v9 = vrot.slane %v3467_v48, 1  ;;  %v3293_v15 = vrot.slane %v3285_v12, %v7445_v13  ;;  %v3629_v39 = vrot.slane %v3621_v52, %v7445_v13 }
 0x2e7   :  { %v3255_v51 = vcombine.low %v3126_v16, %v3133_v44  ;;  %v3147_v5 = vadd.f32 %v3146_v37, %v3145_v60  ;;  %v3481_v0 = vadd.f32 %v3480_v14, %v3479_v53  ;;  %v3476_v27 = vadd.f32 %v3475_v41, %v3474_v7 }
 0x2e8   :  { %v3469_v62 = vadd.f32 %v3468_v9, %v3467_v48  ;;  %v1421_v12 = vrot.slane %v9863_v31, %v7240_v19 }
 0x2e9   :  { %v3277_v22 = vrot.slane %v3255_v51, %v7445_v13  ;;  %v3256_v8 = vcombine.low %v3140_v2, %v3147_v5  ;;  %v3482_v58 = vrot.slane %v3481_v0, 1 }
 0x2ea   :  { %v3591_v36 = vcombine.low %v3462_v26, %v3469_v62 }
 0x2eb   :  { %v3284_v1 = vrot.slane %v3256_v8, %v7445_v13  ;;  %v3483_v20 = vadd.f32 %v3482_v58, %v3481_v0 }
 0x2ec   :  { %v3613_v40 = vrot.slane %v3591_v36, %v7445_v13 }
 0x2ed   :  { %v3286_v55 = vcombine.low %v3277_v22, %v3284_v1  ;;  %v3592_v46 = vcombine.low %v3476_v27, %v3483_v20 }
 0x2ef   :  { %v3300_v4 = vrot.slane %v3286_v55, %v7445_v13  ;;  %v3620_v32 = vrot.slane %v3592_v46, %v7445_v13 }
 0x2f1   :  { %v3301_v34 = vcombine.low %v3293_v15, %v3300_v4  ;;  %v3622_v56 = vcombine.low %v3613_v40, %v3620_v32 }
 0x2f3   :  { %3345 = vst [vmem:[%s9905_s3 + $0x8] sm:$0xff] %v3301_v34  ;;  %v3636_v38 = vrot.slane %v3622_v56, %v7445_v13 }
 0x2f5   :  { %v3637_v25 = vcombine.low %v3629_v39, %v3636_v38 }
 0x2f7   :  { %3681 = vst [vmem:[%s9906_s4 + $0x8] sm:$0xff] %v3637_v25 }
 0x355   :  { %v2748_v52 = vpop.f32.mrb[8].mxu0 }
 0x356   :  { %v5070_v45 = vadd.f32 %v2748_v52, %v1413_v47  ;;  %v2890_v63 = vpop.f32.mrb[8].mxu1  ;;  %v2750_v11 = vpop.f32.mrb[9].mxu0 }
 0x357   :  { %v5072_v6 = vadd.f32 %v2890_v63, %v1421_v12  ;;  %v5071_v33 = vadd.f32 %v2750_v11, %v1417_v10  ;;  %v2892_v54 = vpop.f32.mrb[9].mxu1 }
 0x358   :  { %v3148_v17 = vsel %vm3035_vm1, %v5070_v45, 0.0  ;;  %v3367_v61 = vmul.f32 %v5070_v45, %v5070_v45  ;;  %v5073_v18 = vadd.f32 %v2892_v54, %v1425_v42 }
 0x359   :  { %v3149_v21 = vrot.slane %v3148_v17, 4  ;;  %v3162_v19 = vsel %vm3035_vm1, %v5072_v6, 0.0  ;;  %v3369_v23 = vmul.f32 %v5072_v6, %v5072_v6  ;;  %v3155_v24 = vsel %vm3035_vm1, %v5071_v33, 0.0 }
 0x35a   :  { %v3484_v50 = vsel %vm3035_vm1, %v3367_v61, 0.0  ;;  %v3163_v29 = vrot.slane %v3162_v19, 4  ;;  %v3156_v57 = vrot.slane %v3155_v24, 4  ;;  %v3368_v28 = vmul.f32 %v5071_v33, %v5071_v33 }
 0x35b   :  { %v3150_v3 = vadd.f32 %v3149_v21, %v3148_v17  ;;  %v3485_v30 = vrot.slane %v3484_v50, 4  ;;  %v3498_v7 = vsel %vm3035_vm1, %v3369_v23, 0.0  ;;  %v3169_v59 = vsel %vm3035_vm1, %v5073_v18, 0.0 }
 0x35c   :  { %v3164_v35 = vadd.f32 %v3163_v29, %v3162_v19  ;;  %v3499_v16 = vrot.slane %v3498_v7, 4  ;;  %v3157_v43 = vadd.f32 %v3156_v57, %v3155_v24  ;;  %v3491_v48 = vsel %vm3035_vm1, %v3368_v28, 0.0 }
 0x35d   :  { %v3151_v60 = vrot.slane %v3150_v3, 2  ;;  %v3486_v44 = vadd.f32 %v3485_v30, %v3484_v50  ;;  %v3492_v53 = vrot.slane %v3491_v48, 4  ;;  %v3170_v26 = vrot.slane %v3169_v59, 4 }
 0x35e   :  { %v3165_v2 = vrot.slane %v3164_v35, 2  ;;  %v3500_v9 = vadd.f32 %v3499_v16, %v3498_v7  ;;  %v3158_v37 = vrot.slane %v3157_v43, 2  ;;  %v3370_v41 = vmul.f32 %v5073_v18, %v5073_v18 }
 0x35f   :  { %v3152_v51 = vadd.f32 %v3151_v60, %v3150_v3  ;;  %v3487_v14 = vrot.slane %v3486_v44, 2  ;;  %v3493_v62 = vadd.f32 %v3492_v53, %v3491_v48  ;;  %v3171_v5 = vadd.f32 %v3170_v26, %v3169_v59 }
 0x360   :  { %v3166_v0 = vadd.f32 %v3165_v2, %v3164_v35  ;;  %v3501_v22 = vrot.slane %v3500_v9, 2  ;;  %v3159_v36 = vadd.f32 %v3158_v37, %v3157_v43  ;;  %v3505_v8 = vsel %vm3035_vm1, %v3370_v41, 0.0 }
 0x361   :  { %v3153_v27 = vrot.slane %v3152_v51, 1  ;;  %v3488_v58 = vadd.f32 %v3487_v14, %v3486_v44  ;;  %v3494_v1 = vrot.slane %v3493_v62, 2  ;;  %v3172_v20 = vrot.slane %v3171_v5, 2 }
 0x362   :  { %v3167_v55 = vrot.slane %v3166_v0, 1  ;;  %v3502_v40 = vadd.f32 %v3501_v22, %v3500_v9  ;;  %v3160_v46 = vrot.slane %v3159_v36, 1  ;;  %v3506_v15 = vrot.slane %v3505_v8, 4 }
 0x363   :  { %v3154_v4 = vadd.f32 %v3153_v27, %v3152_v51  ;;  %v3489_v32 = vrot.slane %v3488_v58, 1  ;;  %v3495_v34 = vadd.f32 %v3494_v1, %v3493_v62  ;;  %v3173_v56 = vadd.f32 %v3172_v20, %v3171_v5 }
 0x364   :  { %v3161_v39 = vadd.f32 %v3160_v46, %v3159_v36  ;;  %v3507_v38 = vadd.f32 %v3506_v15, %v3505_v8  ;;  %v3168_v47 = vadd.f32 %v3167_v55, %v3166_v0  ;;  %v3503_v42 = vrot.slane %v3502_v40, 1 }
 0x365   :  { %v3490_v25 = vadd.f32 %v3489_v32, %v3488_v58  ;;  %v3496_v12 = vrot.slane %v3495_v34, 1  ;;  %v3174_v10 = vrot.slane %v3173_v56, 1  ;;  %v1429_v7 = vrot.slane %v9863_v31, %v8226_v49 }
 0x366   :  { %v3302_v52 = vcombine.low %v3154_v4, %v3161_v39  ;;  %v3508_v45 = vrot.slane %v3507_v38, 2  ;;  %v3504_v61 = vadd.f32 %v3503_v42, %v3502_v40  ;;  %v9940_v27 = vlaneseq }
 0x367   :  { %v3497_v63 = vadd.f32 %v3496_v12, %v3495_v34  ;;  %v3175_v11 = vadd.f32 %v3174_v10, %v3173_v56 }
 0x368   :  { %v3509_v6 = vadd.f32 %v3508_v45, %v3507_v38  ;;  %v3310_v33 = vrot.slane %v3302_v52, %v7445_v13  ;;  %vm3348_vm2 = vcmp.lt.s32.totalorder %v9940_v27, 640 }
 0x369   :  { %v3638_v54 = vcombine.low %v3490_v25, %v3497_v63  ;;  %v3303_v17 = vcombine.low %v3168_v47, %v3175_v11 }
 0x36a   :  { %v3510_v18 = vrot.slane %v3509_v6, 1 }
 0x36b   :  { %v3317_v21 = vrot.slane %v3303_v17, %v7445_v13  ;;  %v3646_v24 = vrot.slane %v3638_v54, %v7445_v13 }
 0x36c   :  { %v3511_v19 = vadd.f32 %v3510_v18, %v3509_v6 }
 0x36d   :  { %v3325_v23 = vcombine.low %v3310_v33, %v3317_v21 }
 0x36e   :  { %v3639_v50 = vcombine.low %v3504_v61, %v3511_v19 }
 0x36f   :  { %v3332_v22 = vrot.slane %v3325_v23, %v7445_v13 }
 0x370   :  { %v3653_v29 = vrot.slane %v3639_v50, %v7445_v13 }
 0x372   :  { %v3661_v57 = vcombine.low %v3646_v24, %v3653_v29 }
 0x374   :  { %v3668_v1 = vrot.slane %v3661_v57, %v7445_v13 }
 0x377   :  { %v3734_v28 = vpop.f32.mrb[10].mxu0 }
 0x378   :  { %v3735_v3 = vpop.f32.mrb[11].mxu0 }
 0x379   :  { %v3736_v30 = vadd.f32 %v3735_v3, %v3734_v28 }
 0x37b   :  { %v2962_v59 = vadd.f32 %v3736_v30, %v1429_v7 }
 0x394   :  { %v3031_v35 = vpop.f32.mrb[10].mxu1 }
 0x395   :  { %v3032_v16 = vadd.f32 %v3031_v35, %v2962_v59  ;;  %v3033_v43 = vpop.f32.mrb[11].mxu1 }
 0x397   :  { %v3176_v48 = vsel %vm3035_vm1, %v3032_v16, 0.0  ;;  %v3371_v60 = vmul.f32 %v3032_v16, %v3032_v16 }
 0x398   :  { %v3177_v44 = vrot.slane %v3176_v48, 4 }
 0x399   :  { %v3512_v53 = vsel %vm3035_vm1, %v3371_v60, 0.0 }
 0x39a   :  { %v3178_v26 = vadd.f32 %v3177_v44, %v3176_v48  ;;  %v3513_v2 = vrot.slane %v3512_v53, 4 }
 0x39c   :  { %v3179_v9 = vrot.slane %v3178_v26, 2  ;;  %v3514_v37 = vadd.f32 %v3513_v2, %v3512_v53 }
 0x39e   :  { %v3180_v41 = vadd.f32 %v3179_v9, %v3178_v26  ;;  %v3515_v51 = vrot.slane %v3514_v37, 2 }
 0x3a0   :  { %v3181_v14 = vrot.slane %v3180_v41, 1  ;;  %v3516_v62 = vadd.f32 %v3515_v51, %v3514_v37 }
 0x3a2   :  { %v3182_v5 = vadd.f32 %v3181_v14, %v3180_v41  ;;  %v3517_v49 = vrot.slane %v3516_v62, 1 }
 0x3a4   :  { %v3324_v31 = vrot.slane %v3182_v5, %v7445_v13  ;;  %v3518_v0 = vadd.f32 %v3517_v49, %v3516_v62 }
 0x3a6   :  { %v3339_v36 = vrot.slane %v3324_v31, %v7445_v13  ;;  %v3660_v8 = vrot.slane %v3518_v0, %v7445_v13 }
 0x3a8   :  { %v3340_v58 = vcombine.low %v3332_v22, %v3339_v36  ;;  %v3675_v20 = vrot.slane %v3660_v8, %v7445_v13 }
 0x3aa   :  { %3350 = vst.msk [vmem:[%s9905_s3 + $0x10] sm:$0x1f] %vm3348_vm2, %v3340_v58  ;;  %v3676_v55 = vcombine.low %v3668_v1, %v3675_v20 }
 0x3ac   :  { %3682 = vst.msk [vmem:[%s9906_s4 + $0x10] sm:$0x1f] %vm3348_vm2, %v3676_v55 }

// kernel: infogcn_forward.3
= control target key start
LH: loop header
LB: loop body
LE: loop exit
PB: predicated region body
PF: predicated region fallthrough
CT: control target
= control target key end

     0   :  { %vm1476_vm0 = vcmask 982016   ;;  %s9135_s1 = inlined_call_operand.vmem [shape: f32[504,2688], index: 1, kind: input, shape index: {}]   ;;  %s9136_s0 = inlined_call_operand.vmem [shape: f32[2,504], index: 0, kind: input, shape index: {}]   ;;  %s9137_s2 = inlined_call_operand.vmem [shape: f32[1,2688], index: 2, kind: input, shape index: {}]   ;;  %s9138_s3 = inlined_call_operand.vmem [shape: f32[1,2688], index: 3, kind: input, shape index: {}]   ;;  %s9139_s4 = inlined_call_operand.vmem [shape: f32[1,2688], index: 4, kind: input, shape index: {}]   ;;  %s9140_s5 = inlined_call_operand.vmem [shape: f32[2,2688], index: 5, kind: output, shape index: {}]  }
   0x1   :  { %v22_v0 = vld [vmem:[%s9135_s1 + $0x8] sm:$0xff]  ;;  %v43_v1 = vld [vmem:[%s9135_s1 + $0xb0] sm:$0xff]  ;;  %v24_v2 = vld [vmem:[%s9135_s1 + $0x18] sm:$0xff] }
   0x2   :  { %v3479_v3 = vpack.c.bf16 %v43_v1, %v22_v0  ;;  %v45_v4 = vld [vmem:[%s9135_s1 + $0xc0] sm:$0xff]  ;;  %v42_v6 = vld [vmem:[%s9135_s1 + $0xa8] sm:$0xff]  ;;  %v23_v9 = vld [vmem:[%s9135_s1 + $0x10] sm:$0xff] }
   0x3   :  { %v21_v5 = vld [vmem:[%s9135_s1] sm:$0xff]  ;;  %v3603_v7 = vpack.c.bf16 %v45_v4, %v24_v2  ;;  %v44_v10 = vld [vmem:[%s9135_s1 + $0xb8] sm:$0xff]  ;;  %v66_v14 = vld [vmem:[%s9135_s1 + $0x168] sm:$0xff] }
   0x4   :  { %v3481_v8 = vpack.c.bf16 %v42_v6, %v21_v5  ;;  %v64_v11 = vld [vmem:[%s9135_s1 + $0x158] sm:$0xff]  ;;  %3480 = vmatprep.subr.bf16.mxu0 %v3479_v3  ;;  %v3605_v12 = vpack.c.bf16 %v44_v10, %v23_v9  ;;  %v85_v13 = vld [vmem:[%s9135_s1 + $0x200] sm:$0xff]  ;;  %v87_v15 = vld [vmem:[%s9135_s1 + $0x210] sm:$0xff] }
   0x5   :  { %3604 = vmatprep.subr.bf16.mxu1 %v3603_v7  ;;  %v3483_v16 = vpack.c.bf16 %v85_v13, %v64_v11  ;;  %v3607_v17 = vpack.c.bf16 %v87_v15, %v66_v14  ;;  %v63_v18 = vld [vmem:[%s9135_s1 + $0x150] sm:$0xff]  ;;  %v84_v19 = vld [vmem:[%s9135_s1 + $0x1f8] sm:$0xff]  ;;  %v65_v20 = vld [vmem:[%s9135_s1 + $0x160] sm:$0xff] }
   0x6   :  { %3482 = vmatpush1.bf16.msra.mxu0 %v3481_v8  ;;  %3606 = vmatpush1.bf16.msra.mxu1 %v3605_v12  ;;  %v3485_v21 = vpack.c.bf16 %v84_v19, %v63_v18  ;;  %v86_v22 = vld [vmem:[%s9135_s1 + $0x208] sm:$0xff]  ;;  %v127_v24 = vld [vmem:[%s9135_s1 + $0x350] sm:$0xff]  ;;  %v108_v27 = vld [vmem:[%s9135_s1 + $0x2b8] sm:$0xff] }
   0x7   :  { %v106_v23 = vld [vmem:[%s9135_s1 + $0x2a8] sm:$0xff]  ;;  %3484 = vmatprep.subr.bf16.mxu0 %v3483_v16  ;;  %3608 = vmatprep.subr.bf16.mxu1 %v3607_v17  ;;  %v3609_v25 = vpack.c.bf16 %v86_v22, %v65_v20  ;;  %v129_v28 = vld [vmem:[%s9135_s1 + $0x360] sm:$0xff]  ;;  %v107_v32 = vld [vmem:[%s9135_s1 + $0x2b0] sm:$0xff] }
   0x8   :  { %v3487_v26 = vpack.c.bf16 %v127_v24, %v106_v23  ;;  %v105_v29 = vld [vmem:[%s9135_s1 + $0x2a0] sm:$0xff]  ;;  %v3611_v30 = vpack.c.bf16 %v129_v28, %v108_v27  ;;  %v126_v31 = vld [vmem:[%s9135_s1 + $0x348] sm:$0xff]  ;;  %v128_v33 = vld [vmem:[%s9135_s1 + $0x358] sm:$0xff] }
   0x9   :  { %v3489_v34 = vpack.c.bf16 %v126_v31, %v105_v29  ;;  %v148_v35 = vld [vmem:[%s9135_s1 + $0x3f8] sm:$0xff]  ;;  %v169_v36 = vld [vmem:[%s9135_s1 + $0x4a0] sm:$0xff]  ;;  %v150_v37 = vld [vmem:[%s9135_s1 + $0x408] sm:$0xff]  ;;  %v3613_v38 = vpack.c.bf16 %v128_v33, %v107_v32 }
   0xa   :  { %3486 = vmatpush1.bf16.msra.mxu0 %v3485_v21  ;;  %3610 = vmatpush1.bf16.msra.mxu1 %v3609_v25  ;;  %v3491_v39 = vpack.c.bf16 %v169_v36, %v148_v35  ;;  %v171_v40 = vld [vmem:[%s9135_s1 + $0x4b0] sm:$0xff]  ;;  %v168_v42 = vld [vmem:[%s9135_s1 + $0x498] sm:$0xff]  ;;  %v149_v44 = vld [vmem:[%s9135_s1 + $0x400] sm:$0xff] }
   0xb   :  { %3488 = vmatprep.subr.bf16.mxu0 %v3487_v26  ;;  %v147_v41 = vld [vmem:[%s9135_s1 + $0x3f0] sm:$0xff]  ;;  %3612 = vmatprep.subr.bf16.mxu1 %v3611_v30  ;;  %v3615_v43 = vpack.c.bf16 %v171_v40, %v150_v37  ;;  %v170_v45 = vld [vmem:[%s9135_s1 + $0x4a8] sm:$0xff]  ;;  %v192_v48 = vld [vmem:[%s9135_s1 + $0x558] sm:$0xff] }
   0xc   :  { %v190_v46 = vld [vmem:[%s9135_s1 + $0x548] sm:$0xff]  ;;  %v211_v47 = vld [vmem:[%s9135_s1 + $0x5f0] sm:$0xff]  ;;  %v213_v49 = vld [vmem:[%s9135_s1 + $0x600] sm:$0xff]  ;;  %v3493_v50 = vpack.c.bf16 %v168_v42, %v147_v41  ;;  %v3617_v51 = vpack.c.bf16 %v170_v45, %v149_v44 }
   0xd   :  { %v3495_v52 = vpack.c.bf16 %v211_v47, %v190_v46  ;;  %v189_v53 = vld [vmem:[%s9135_s1 + $0x540] sm:$0xff]  ;;  %v210_v54 = vld [vmem:[%s9135_s1 + $0x5e8] sm:$0xff]  ;;  %v191_v55 = vld [vmem:[%s9135_s1 + $0x550] sm:$0xff]  ;;  %v3619_v56 = vpack.c.bf16 %v213_v49, %v192_v48  ;;  %v1350_v46 = vlaneseq  ;;  %v4843_v47 = vmov 1983009808  }
   0xe   :  { %3490 = vmatpush1.bf16.msra.mxu0 %v3489_v34  ;;  %3614 = vmatpush1.bf16.msra.mxu1 %v3613_v38  ;;  %v212_v57 = vld [vmem:[%s9135_s1 + $0x5f8] sm:$0xff]  ;;  %v253_v59 = vld [vmem:[%s9135_s1 + $0x740] sm:$0xff]  ;;  %v234_v60 = vld [vmem:[%s9135_s1 + $0x6a8] sm:$0xff]  ;;  %v3497_v62 = vpack.c.bf16 %v210_v54, %v189_v53  ;;  %v1458_v48 = vunpack.c.l.s4 %v4843_v47 }
   0xf   :  { %3492 = vmatprep.subr.bf16.mxu0 %v3491_v39  ;;  %3616 = vmatprep.subr.bf16.mxu1 %v3615_v43  ;;  %v232_v58 = vld [vmem:[%s9135_s1 + $0x698] sm:$0xff]  ;;  %v255_v61 = vld [vmem:[%s9135_s1 + $0x750] sm:$0xff]  ;;  %v3621_v63 = vpack.c.bf16 %v212_v57, %v191_v55  ;;  %v233_v3 = vld [vmem:[%s9135_s1 + $0x6a0] sm:$0xff] }
  0x10   :  { %v3499_v0 = vpack.c.bf16 %v253_v59, %v232_v58  ;;  %v231_v1 = vld [vmem:[%s9135_s1 + $0x690] sm:$0xff]  ;;  %v252_v2 = vld [vmem:[%s9135_s1 + $0x738] sm:$0xff]  ;;  %v3623_v4 = vpack.c.bf16 %v255_v61, %v234_v60  ;;  %v254_v5 = vld [vmem:[%s9135_s1 + $0x748] sm:$0xff]  ;;  %v5128_v61 = vshrl.u32 %v1350_v46, 7 }
  0x11   :  { %v274_v6 = vld [vmem:[%s9135_s1 + $0x7e8] sm:$0xff]  ;;  %v295_v7 = vld [vmem:[%s9135_s1 + $0x890] sm:$0xff]  ;;  %v276_v8 = vld [vmem:[%s9135_s1 + $0x7f8] sm:$0xff]  ;;  %v3501_v10 = vpack.c.bf16 %v252_v2, %v231_v1  ;;  %v3625_v11 = vpack.c.bf16 %v254_v5, %v233_v3 }
  0x12   :  { %3494 = vmatpush1.bf16.msra.mxu0 %v3493_v50  ;;  %3618 = vmatpush1.bf16.msra.mxu1 %v3617_v51  ;;  %v297_v9 = vld [vmem:[%s9135_s1 + $0x8a0] sm:$0xff]  ;;  %v3503_v12 = vpack.c.bf16 %v295_v7, %v274_v6  ;;  %v294_v14 = vld [vmem:[%s9135_s1 + $0x888] sm:$0xff]  ;;  %v275_v15 = vld [vmem:[%s9135_s1 + $0x7f0] sm:$0xff] }
  0x13   :  { %3496 = vmatprep.subr.bf16.mxu0 %v3495_v52  ;;  %3620 = vmatprep.subr.bf16.mxu1 %v3619_v56  ;;  %v273_v13 = vld [vmem:[%s9135_s1 + $0x7e0] sm:$0xff]  ;;  %v3627_v16 = vpack.c.bf16 %v297_v9, %v276_v8  ;;  %v296_v17 = vld [vmem:[%s9135_s1 + $0x898] sm:$0xff]  ;;  %v318_v20 = vld [vmem:[%s9135_s1 + $0x948] sm:$0xff] }
  0x14   :  { %v316_v18 = vld [vmem:[%s9135_s1 + $0x938] sm:$0xff]  ;;  %v337_v19 = vld [vmem:[%s9135_s1 + $0x9e0] sm:$0xff]  ;;  %v339_v21 = vld [vmem:[%s9135_s1 + $0x9f0] sm:$0xff]  ;;  %v3505_v22 = vpack.c.bf16 %v294_v14, %v273_v13  ;;  %v3629_v23 = vpack.c.bf16 %v296_v17, %v275_v15 }
  0x15   :  { %v3507_v24 = vpack.c.bf16 %v337_v19, %v316_v18  ;;  %v315_v25 = vld [vmem:[%s9135_s1 + $0x930] sm:$0xff]  ;;  %v336_v26 = vld [vmem:[%s9135_s1 + $0x9d8] sm:$0xff]  ;;  %v317_v27 = vld [vmem:[%s9135_s1 + $0x940] sm:$0xff]  ;;  %v3631_v28 = vpack.c.bf16 %v339_v21, %v318_v20 }
  0x16   :  { %3498 = vmatpush1.bf16.msra.mxu0 %v3497_v62  ;;  %3622 = vmatpush1.bf16.msra.mxu1 %v3621_v63  ;;  %v338_v29 = vld [vmem:[%s9135_s1 + $0x9e8] sm:$0xff]  ;;  %v379_v31 = vld [vmem:[%s9135_s1 + $0xb30] sm:$0xff]  ;;  %v360_v32 = vld [vmem:[%s9135_s1 + $0xa98] sm:$0xff]  ;;  %v3509_v34 = vpack.c.bf16 %v336_v26, %v315_v25  ;;  %v1459_v62 = vunpack.c.0.s8 %v1458_v48 }
  0x17   :  { %3500 = vmatprep.subr.bf16.mxu0 %v3499_v0  ;;  %3624 = vmatprep.subr.bf16.mxu1 %v3623_v4  ;;  %v358_v30 = vld [vmem:[%s9135_s1 + $0xa88] sm:$0xff]  ;;  %v381_v33 = vld [vmem:[%s9135_s1 + $0xb40] sm:$0xff]  ;;  %v3633_v35 = vpack.c.bf16 %v338_v29, %v317_v27  ;;  %v359_v39 = vld [vmem:[%s9135_s1 + $0xa90] sm:$0xff] }
  0x18   :  { %v3511_v36 = vpack.c.bf16 %v379_v31, %v358_v30  ;;  %v357_v37 = vld [vmem:[%s9135_s1 + $0xa80] sm:$0xff]  ;;  %v378_v38 = vld [vmem:[%s9135_s1 + $0xb28] sm:$0xff]  ;;  %v3635_v40 = vpack.c.bf16 %v381_v33, %v360_v32  ;;  %v380_v41 = vld [vmem:[%s9135_s1 + $0xb38] sm:$0xff] }
  0x19   :  { %v400_v42 = vld [vmem:[%s9135_s1 + $0xbd8] sm:$0xff]  ;;  %v421_v43 = vld [vmem:[%s9135_s1 + $0xc80] sm:$0xff]  ;;  %v402_v44 = vld [vmem:[%s9135_s1 + $0xbe8] sm:$0xff]  ;;  %v3513_v49 = vpack.c.bf16 %v378_v38, %v357_v37  ;;  %v3637_v50 = vpack.c.bf16 %v380_v41, %v359_v39 }
  0x1a   :  { %3502 = vmatpush1.bf16.msra.mxu0 %v3501_v10  ;;  %3626 = vmatpush1.bf16.msra.mxu1 %v3625_v11  ;;  %v423_v45 = vld [vmem:[%s9135_s1 + $0xc90] sm:$0xff]  ;;  %v3515_v51 = vpack.c.bf16 %v421_v43, %v400_v42  ;;  %v420_v53 = vld [vmem:[%s9135_s1 + $0xc78] sm:$0xff]  ;;  %v401_v54 = vld [vmem:[%s9135_s1 + $0xbe0] sm:$0xff]  ;;  %v5155_v11 = vsub.s32 %v1459_v62, %v5128_v61 }
  0x1b   :  { %3504 = vmatprep.subr.bf16.mxu0 %v3503_v12  ;;  %3628 = vmatprep.subr.bf16.mxu1 %v3627_v16  ;;  %v399_v52 = vld [vmem:[%s9135_s1 + $0xbd0] sm:$0xff]  ;;  %v3639_v55 = vpack.c.bf16 %v423_v45, %v402_v44  ;;  %v422_v56 = vld [vmem:[%s9135_s1 + $0xc88] sm:$0xff]  ;;  %v444_v59 = vld [vmem:[%s9135_s1 + $0xd38] sm:$0xff] }
  0x1c   :  { %v442_v57 = vld [vmem:[%s9135_s1 + $0xd28] sm:$0xff]  ;;  %v463_v58 = vld [vmem:[%s9135_s1 + $0xdd0] sm:$0xff]  ;;  %v465_v60 = vld [vmem:[%s9135_s1 + $0xde0] sm:$0xff]  ;;  %v3517_v63 = vpack.c.bf16 %v420_v53, %v399_v52  ;;  %v3641_v0 = vpack.c.bf16 %v422_v56, %v401_v54 }
  0x1d   :  { %v3519_v1 = vpack.c.bf16 %v463_v58, %v442_v57  ;;  %v441_v2 = vld [vmem:[%s9135_s1 + $0xd20] sm:$0xff]  ;;  %v462_v3 = vld [vmem:[%s9135_s1 + $0xdc8] sm:$0xff]  ;;  %v443_v4 = vld [vmem:[%s9135_s1 + $0xd30] sm:$0xff]  ;;  %v3643_v5 = vpack.c.bf16 %v465_v60, %v444_v59 }
  0x1e   :  { %3506 = vmatpush1.bf16.msra.mxu0 %v3505_v22  ;;  %3630 = vmatpush1.bf16.msra.mxu1 %v3629_v23  ;;  %v464_v6 = vld [vmem:[%s9135_s1 + $0xdd8] sm:$0xff]  ;;  %v505_v8 = vld [vmem:[%s9135_s1 + $0xf20] sm:$0xff]  ;;  %v486_v9 = vld [vmem:[%s9135_s1 + $0xe88] sm:$0xff]  ;;  %v3521_v12 = vpack.c.bf16 %v462_v3, %v441_v2 }
  0x1f   :  { %3508 = vmatprep.subr.bf16.mxu0 %v3507_v24  ;;  %3632 = vmatprep.subr.bf16.mxu1 %v3631_v28  ;;  %v484_v7 = vld [vmem:[%s9135_s1 + $0xe78] sm:$0xff]  ;;  %v507_v10 = vld [vmem:[%s9135_s1 + $0xf30] sm:$0xff]  ;;  %v3645_v14 = vpack.c.bf16 %v464_v6, %v443_v4  ;;  %v485_v17 = vld [vmem:[%s9135_s1 + $0xe80] sm:$0xff] }
  0x20   :  { %v483_v13 = vld [vmem:[%s9135_s1 + $0xe70] sm:$0xff]  ;;  %v3523_v15 = vpack.c.bf16 %v505_v8, %v484_v7  ;;  %v504_v16 = vld [vmem:[%s9135_s1 + $0xf18] sm:$0xff]  ;;  %v506_v18 = vld [vmem:[%s9135_s1 + $0xf28] sm:$0xff]  ;;  %v3647_v19 = vpack.c.bf16 %v507_v10, %v486_v9 }
  0x21   :  { %v526_v20 = vld [vmem:[%s9135_s1 + $0xfc8] sm:$0xff]  ;;  %v547_v21 = vld [vmem:[%s9135_s1 + $0x1070] sm:$0xff]  ;;  %v5178_v22 = vld [vmem:[%s9136_s0] sm:$0xff]  ;;  %v3525_v26 = vpack.c.bf16 %v504_v16, %v483_v13  ;;  %v3649_v27 = vpack.c.bf16 %v506_v18, %v485_v17 }
  0x22   :  { %3510 = vmatpush1.bf16.msra.mxu0 %v3509_v34  ;;  %3634 = vmatpush1.bf16.msra.mxu1 %v3633_v35  ;;  %v528_v23 = vld [vmem:[%s9135_s1 + $0xfd8] sm:$0xff]  ;;  %v549_v24 = vld [vmem:[%s9135_s1 + $0x1080] sm:$0xff]  ;;  %v5188_v25 = vrot.slane %v5178_v22, %v5155_v11  ;;  %v3527_v28 = vpack.c.bf16 %v547_v21, %v526_v20  ;;  %v546_v30 = vld [vmem:[%s9135_s1 + $0x1068] sm:$0xff]  ;;  %v1456_v10 = vcombine.high %v5178_v22, %v5178_v22 }
  0x23   :  { %3512 = vmatprep.subr.bf16.mxu0 %v3511_v36  ;;  %3636 = vmatprep.subr.bf16.mxu1 %v3635_v40  ;;  %v525_v29 = vld [vmem:[%s9135_s1 + $0xfc0] sm:$0xff]  ;;  %v527_v31 = vld [vmem:[%s9135_s1 + $0xfd0] sm:$0xff]  ;;  %v3651_v33 = vpack.c.bf16 %v549_v24, %v528_v23  ;;  %v548_v34 = vld [vmem:[%s9135_s1 + $0x1078] sm:$0xff] }
  0x24   :  { %v5201_v32 = vcombine.high %v5188_v25, %v5188_v25  ;;  %v568_v35 = vld [vmem:[%s9135_s1 + $0x1118] sm:$0xff]  ;;  %v589_v36 = vld [vmem:[%s9135_s1 + $0x11c0] sm:$0xff]  ;;  %v570_v37 = vld [vmem:[%s9135_s1 + $0x1128] sm:$0xff]  ;;  %v3529_v39 = vpack.c.bf16 %v546_v30, %v525_v29  ;;  %v3653_v40 = vpack.c.bf16 %v548_v34, %v527_v31  ;;  %v5313_v24 = vrot.slane %v1456_v10, %v5155_v11 }
  0x25   :  { %v591_v38 = vld [vmem:[%s9135_s1 + $0x11d0] sm:$0xff]  ;;  %v3531_v41 = vpack.c.bf16 %v589_v36, %v568_v35  ;;  %v588_v43 = vld [vmem:[%s9135_s1 + $0x11b8] sm:$0xff]  ;;  %v569_v44 = vld [vmem:[%s9135_s1 + $0x1120] sm:$0xff] }
  0x26   :  { %3514 = vmatpush1.bf16.msra.mxu0 %v3513_v49  ;;  %3638 = vmatpush1.bf16.msra.mxu1 %v3637_v50  ;;  %v567_v42 = vld [vmem:[%s9135_s1 + $0x1110] sm:$0xff]  ;;  %v3655_v45 = vpack.c.bf16 %v591_v38, %v570_v37  ;;  %v590_v46 = vld [vmem:[%s9135_s1 + $0x11c8] sm:$0xff]  ;;  %v612_v49 = vld [vmem:[%s9135_s1 + $0x1278] sm:$0xff] }
  0x27   :  { %3516 = vmatprep.subr.bf16.mxu0 %v3515_v51  ;;  %3640 = vmatprep.subr.bf16.mxu1 %v3639_v55  ;;  %v610_v47 = vld [vmem:[%s9135_s1 + $0x1268] sm:$0xff]  ;;  %v631_v48 = vld [vmem:[%s9135_s1 + $0x1310] sm:$0xff]  ;;  %v633_v50 = vld [vmem:[%s9135_s1 + $0x1320] sm:$0xff]  ;;  %v3533_v51 = vpack.c.bf16 %v588_v43, %v567_v42  ;;  %v3657_v52 = vpack.c.bf16 %v590_v46, %v569_v44 }
  0x28   :  { %1543 = vmatprep.mubr.f32.mxu0 %v5201_v32  ;;  %1685 = vmatprep.mubr.f32.mxu1 %v5201_v32  ;;  %v3535_v53 = vpack.c.bf16 %v631_v48, %v610_v47  ;;  %v609_v54 = vld [vmem:[%s9135_s1 + $0x1260] sm:$0xff]  ;;  %v630_v55 = vld [vmem:[%s9135_s1 + $0x1308] sm:$0xff]  ;;  %v611_v56 = vld [vmem:[%s9135_s1 + $0x1270] sm:$0xff]  ;;  %v3659_v57 = vpack.c.bf16 %v633_v50, %v612_v49 }
  0x29   :  { %v632_v58 = vld [vmem:[%s9135_s1 + $0x1318] sm:$0xff]  ;;  %v673_v60 = vld [vmem:[%s9135_s1 + $0x1460] sm:$0xff]  ;;  %v654_v62 = vld [vmem:[%s9135_s1 + $0x13c8] sm:$0xff] }
  0x2a   :  { %3518 = vmatpush1.bf16.msra.mxu0 %v3517_v63  ;;  %3642 = vmatpush1.bf16.msra.mxu1 %v3641_v0  ;;  %v652_v59 = vld [vmem:[%s9135_s1 + $0x13b8] sm:$0xff]  ;;  %v675_v63 = vld [vmem:[%s9135_s1 + $0x1470] sm:$0xff]  ;;  %v3537_v0 = vpack.c.bf16 %v630_v55, %v609_v54  ;;  %v674_v7 = vld [vmem:[%s9135_s1 + $0x1468] sm:$0xff] }
  0x2b   :  { %3520 = vmatprep.subr.bf16.mxu0 %v3519_v1  ;;  %3644 = vmatprep.subr.bf16.mxu1 %v3643_v5  ;;  %v3661_v1 = vpack.c.bf16 %v632_v58, %v611_v56  ;;  %v3539_v2 = vpack.c.bf16 %v673_v60, %v652_v59  ;;  %v651_v3 = vld [vmem:[%s9135_s1 + $0x13b0] sm:$0xff]  ;;  %v672_v4 = vld [vmem:[%s9135_s1 + $0x1458] sm:$0xff]  ;;  %v653_v5 = vld [vmem:[%s9135_s1 + $0x13c0] sm:$0xff]  ;;  %v3663_v6 = vpack.c.bf16 %v675_v63, %v654_v62 }
  0x2c   :  { %v694_v8 = vld [vmem:[%s9135_s1 + $0x1508] sm:$0xff]  ;;  %v715_v9 = vld [vmem:[%s9135_s1 + $0x15b0] sm:$0xff]  ;;  %v717_v13 = vld [vmem:[%s9135_s1 + $0x15c0] sm:$0xff] }
  0x2d   :  { %v3543_v16 = vpack.c.bf16 %v715_v9, %v694_v8  ;;  %v693_v17 = vld [vmem:[%s9135_s1 + $0x1500] sm:$0xff]  ;;  %v714_v18 = vld [vmem:[%s9135_s1 + $0x15a8] sm:$0xff]  ;;  %v716_v21 = vld [vmem:[%s9135_s1 + $0x15b8] sm:$0xff] }
  0x2e   :  { %3522 = vmatpush1.bf16.msra.mxu0 %v3521_v12  ;;  %3646 = vmatpush1.bf16.msra.mxu1 %v3645_v14  ;;  %v696_v12 = vld [vmem:[%s9135_s1 + $0x1518] sm:$0xff]  ;;  %v3541_v14 = vpack.c.bf16 %v672_v4, %v651_v3  ;;  %v757_v23 = vld [vmem:[%s9135_s1 + $0x1700] sm:$0xff]  ;;  %v735_v31 = vld [vmem:[%s9135_s1 + $0x1650] sm:$0xff] }
  0x2f   :  { %3524 = vmatprep.subr.bf16.mxu0 %v3523_v15  ;;  %3648 = vmatprep.subr.bf16.mxu1 %v3647_v19  ;;  %v3665_v15 = vpack.c.bf16 %v674_v7, %v653_v5  ;;  %v695_v19 = vld [vmem:[%s9135_s1 + $0x1510] sm:$0xff]  ;;  %v3667_v20 = vpack.c.bf16 %v717_v13, %v696_v12  ;;  %v736_v22 = vld [vmem:[%s9135_s1 + $0x1658] sm:$0xff]  ;;  %v737_v34 = vld [vmem:[%s9135_s1 + $0x1660] sm:$0xff] }
  0x30   :  { %v3669_v29 = vpack.c.bf16 %v716_v21, %v695_v19  ;;  %v3547_v30 = vpack.c.bf16 %v757_v23, %v736_v22  ;;  %v758_v36 = vld [vmem:[%s9135_s1 + $0x1708] sm:$0xff]  ;;  %v799_v38 = vld [vmem:[%s9135_s1 + $0x1850] sm:$0xff]  ;;  %v800_v49 = vld [vmem:[%s9135_s1 + $0x1858] sm:$0xff] }
  0x31   :  { %v778_v37 = vld [vmem:[%s9135_s1 + $0x17a8] sm:$0xff]  ;;  %v3673_v43 = vpack.c.bf16 %v758_v36, %v737_v34  ;;  %v779_v47 = vld [vmem:[%s9135_s1 + $0x17b0] sm:$0xff]  ;;  %v820_v50 = vld [vmem:[%s9135_s1 + $0x18f8] sm:$0xff] }
  0x32   :  { %3526 = vmatpush1.bf16.msra.mxu0 %v3525_v26  ;;  %3650 = vmatpush1.bf16.msra.mxu1 %v3649_v27  ;;  %v738_v26 = vld [vmem:[%s9135_s1 + $0x1668] sm:$0xff]  ;;  %v759_v27 = vld [vmem:[%s9135_s1 + $0x1710] sm:$0xff]  ;;  %v3551_v44 = vpack.c.bf16 %v799_v38, %v778_v37  ;;  %v3677_v55 = vpack.c.bf16 %v800_v49, %v779_v47  ;;  %v840_v58 = vld [vmem:[%s9135_s1 + $0x1998] sm:$0xff] }
  0x33   :  { %3528 = vmatprep.subr.bf16.mxu0 %v3527_v28  ;;  %3652 = vmatprep.subr.bf16.mxu1 %v3651_v33  ;;  %v3545_v28 = vpack.c.bf16 %v714_v18, %v693_v17  ;;  %v756_v33 = vld [vmem:[%s9135_s1 + $0x16f8] sm:$0xff]  ;;  %v3671_v35 = vpack.c.bf16 %v759_v27, %v738_v26  ;;  %v798_v46 = vld [vmem:[%s9135_s1 + $0x1848] sm:$0xff]  ;;  %v821_v59 = vld [vmem:[%s9135_s1 + $0x1900] sm:$0xff] }
  0x34   :  { %v3549_v42 = vpack.c.bf16 %v756_v33, %v735_v31  ;;  %v842_v62 = vld [vmem:[%s9135_s1 + $0x19a8] sm:$0xff]  ;;  %v863_v8 = vld [vmem:[%s9135_s1 + $0x1a50] sm:$0xff]  ;;  %v884_v10 = vld [vmem:[%s9135_s1 + $0x1af8] sm:$0xff] }
  0x35   :  { %v862_v63 = vld [vmem:[%s9135_s1 + $0x1a48] sm:$0xff]  ;;  %v3681_v4 = vpack.c.bf16 %v842_v62, %v821_v59  ;;  %v904_v12 = vld [vmem:[%s9135_s1 + $0x1b98] sm:$0xff]  ;;  %v925_v13 = vld [vmem:[%s9135_s1 + $0x1c40] sm:$0xff]  ;;  %v3685_v17 = vpack.c.bf16 %v884_v10, %v863_v8 }
  0x36   :  { %3530 = vmatpush1.bf16.msra.mxu0 %v3529_v39  ;;  %3654 = vmatpush1.bf16.msra.mxu1 %v3653_v40  ;;  %v5341_v39 = vcombine.high %v5313_v24, %v5313_v24  ;;  %v780_v40 = vld [vmem:[%s9135_s1 + $0x17b8] sm:$0xff]  ;;  %v882_v7 = vld [vmem:[%s9135_s1 + $0x1ae8] sm:$0xff]  ;;  %v3563_v18 = vpack.c.bf16 %v925_v13, %v904_v12  ;;  %v903_v19 = vld [vmem:[%s9135_s1 + $0x1b90] sm:$0xff] }
  0x37   :  { %3532 = vmatprep.subr.bf16.mxu0 %v3531_v41  ;;  %3656 = vmatprep.subr.bf16.mxu1 %v3655_v45  ;;  %v801_v41 = vld [vmem:[%s9135_s1 + $0x1860] sm:$0xff]  ;;  %v926_v23 = vld [vmem:[%s9135_s1 + $0x1c48] sm:$0xff]  ;;  %v967_v27 = vld [vmem:[%s9135_s1 + $0x1d90] sm:$0xff] }
  0x38   :  { %v777_v45 = vld [vmem:[%s9135_s1 + $0x17a0] sm:$0xff]  ;;  %v3675_v48 = vpack.c.bf16 %v801_v41, %v780_v40  ;;  %v946_v26 = vld [vmem:[%s9135_s1 + $0x1ce8] sm:$0xff]  ;;  %v947_v36 = vld [vmem:[%s9135_s1 + $0x1cf0] sm:$0xff] }
  0x39   :  { %v3553_v54 = vpack.c.bf16 %v798_v46, %v777_v45  ;;  %v905_v21 = vld [vmem:[%s9135_s1 + $0x1ba0] sm:$0xff]  ;;  %v3567_v33 = vpack.c.bf16 %v967_v27, %v946_v26  ;;  %v968_v38 = vld [vmem:[%s9135_s1 + $0x1d98] sm:$0xff]  ;;  %v987_v47 = vld [vmem:[%s9135_s1 + $0x1e30] sm:$0xff] }
  0x3a   :  { %3534 = vmatpush1.bf16.msra.mxu0 %v3533_v51  ;;  %3658 = vmatpush1.bf16.msra.mxu1 %v3657_v52  ;;  %v841_v51 = vld [vmem:[%s9135_s1 + $0x19a0] sm:$0xff]  ;;  %v822_v52 = vld [vmem:[%s9135_s1 + $0x1908] sm:$0xff]  ;;  %v3689_v31 = vpack.c.bf16 %v926_v23, %v905_v21  ;;  %v988_v40 = vld [vmem:[%s9135_s1 + $0x1e38] sm:$0xff]  ;;  %v3693_v45 = vpack.c.bf16 %v968_v38, %v947_v36 }
  0x3b   :  { %3536 = vmatprep.subr.bf16.mxu0 %v3535_v53  ;;  %3660 = vmatprep.subr.bf16.mxu1 %v3659_v57  ;;  %v843_v53 = vld [vmem:[%s9135_s1 + $0x19b0] sm:$0xff]  ;;  %v3555_v56 = vpack.c.bf16 %v841_v51, %v820_v50  ;;  %v945_v34 = vld [vmem:[%s9135_s1 + $0x1ce0] sm:$0xff]  ;;  %v1010_v51 = vld [vmem:[%s9135_s1 + $0x1ee8] sm:$0xff] }
  0x3c   :  { %v819_v57 = vld [vmem:[%s9135_s1 + $0x18f0] sm:$0xff]  ;;  %v3679_v60 = vpack.c.bf16 %v843_v53, %v822_v52  ;;  %v1009_v41 = vld [vmem:[%s9135_s1 + $0x1ee0] sm:$0xff]  ;;  %v1030_v52 = vld [vmem:[%s9135_s1 + $0x1f88] sm:$0xff] }
  0x3d   :  { %v3557_v3 = vpack.c.bf16 %v840_v58, %v819_v57  ;;  %v3571_v46 = vpack.c.bf16 %v1009_v41, %v988_v40  ;;  %v989_v49 = vld [vmem:[%s9135_s1 + $0x1e40] sm:$0xff]  ;;  %v1051_v53 = vld [vmem:[%s9135_s1 + $0x2030] sm:$0xff]  ;;  %v1094_v13 = vld [vmem:[%s9135_s1 + $0x2188] sm:$0xff] }
  0x3e   :  { %3538 = vmatpush1.bf16.msra.mxu0 %v3537_v0  ;;  %3662 = vmatpush1.bf16.msra.mxu1 %v3661_v1  ;;  %v883_v0 = vld [vmem:[%s9135_s1 + $0x1af0] sm:$0xff]  ;;  %v864_v1 = vld [vmem:[%s9135_s1 + $0x1a58] sm:$0xff]  ;;  %v3697_v57 = vpack.c.bf16 %v1010_v51, %v989_v49  ;;  %v3575_v58 = vpack.c.bf16 %v1051_v53, %v1030_v52  ;;  %v1029_v59 = vld [vmem:[%s9135_s1 + $0x1f80] sm:$0xff] }
  0x3f   :  { %3540 = vmatprep.subr.bf16.mxu0 %v3539_v2  ;;  %3664 = vmatprep.subr.bf16.mxu1 %v3663_v6  ;;  %v885_v2 = vld [vmem:[%s9135_s1 + $0x1b00] sm:$0xff]  ;;  %v3559_v5 = vpack.c.bf16 %v883_v0, %v862_v63  ;;  %v1031_v62 = vld [vmem:[%s9135_s1 + $0x1f90] sm:$0xff]  ;;  %v1052_v0 = vld [vmem:[%s9135_s1 + $0x2038] sm:$0xff] }
  0x40   :  { %v861_v6 = vld [vmem:[%s9135_s1 + $0x1a40] sm:$0xff]  ;;  %v3683_v9 = vpack.c.bf16 %v885_v2, %v864_v1  ;;  %v1072_v1 = vld [vmem:[%s9135_s1 + $0x20d8] sm:$0xff]  ;;  %v1071_v8 = vld [vmem:[%s9135_s1 + $0x20d0] sm:$0xff] }
  0x41   :  { %v1093_v2 = vld [vmem:[%s9135_s1 + $0x2180] sm:$0xff]  ;;  %v1115_v23 = vld [vmem:[%s9135_s1 + $0x2230] sm:$0xff]  ;;  %v1136_v27 = vld [vmem:[%s9135_s1 + $0x22d8] sm:$0xff] }
  0x42   :  { %3542 = vmatpush1.bf16.msra.mxu0 %v3541_v14  ;;  %3666 = vmatpush1.bf16.msra.mxu1 %v3665_v15  ;;  %v906_v14 = vld [vmem:[%s9135_s1 + $0x1ba8] sm:$0xff]  ;;  %v927_v15 = vld [vmem:[%s9135_s1 + $0x1c50] sm:$0xff]  ;;  %v1073_v10 = vld [vmem:[%s9135_s1 + $0x20e0] sm:$0xff] }
  0x43   :  { %3544 = vmatprep.subr.bf16.mxu0 %v3543_v16  ;;  %3668 = vmatprep.subr.bf16.mxu1 %v3667_v20  ;;  %v3561_v16 = vpack.c.bf16 %v882_v7, %v861_v6  ;;  %v924_v20 = vld [vmem:[%s9135_s1 + $0x1c38] sm:$0xff]  ;;  %v3687_v22 = vpack.c.bf16 %v927_v15, %v906_v14  ;;  %v3701_v6 = vpack.c.bf16 %v1052_v0, %v1031_v62  ;;  %v1114_v14 = vld [vmem:[%s9135_s1 + $0x2228] sm:$0xff]  ;;  %v1135_v15 = vld [vmem:[%s9135_s1 + $0x22d0] sm:$0xff] }
  0x44   :  { %v3579_v7 = vpack.c.bf16 %v1093_v2, %v1072_v1  ;;  %v1113_v21 = vld [vmem:[%s9135_s1 + $0x2220] sm:$0xff]  ;;  %v1155_v36 = vld [vmem:[%s9135_s1 + $0x2370] sm:$0xff]  ;;  %v1178_v41 = vld [vmem:[%s9135_s1 + $0x2428] sm:$0xff] }
  0x45   :  { %1544 = vmatmul.mubr.f32.vlgmr.msra.gmra.mrb[0].mxu0 %v5188_v25  ;;  %1686 = vmatmul.mubr.f32.vlgmr.msra.gmra.mrb[0].mxu1 %v5188_v25  ;;  %v1157_v38 = vld [vmem:[%s9135_s1 + $0x2380] sm:$0xff]  ;;  %v1199_v51 = vld [vmem:[%s9135_s1 + $0x24d0] sm:$0xff]  ;;  %v1220_v53 = vld [vmem:[%s9135_s1 + $0x2578] sm:$0xff] }
  0x46   :  { %3546 = vmatpush1.bf16.msra.mxu0 %v3545_v28  ;;  %3670 = vmatpush1.bf16.msra.mxu1 %v3669_v29  ;;  %v948_v28 = vld [vmem:[%s9135_s1 + $0x1cf8] sm:$0xff]  ;;  %v969_v29 = vld [vmem:[%s9135_s1 + $0x1da0] sm:$0xff]  ;;  %v1239_v62 = vld [vmem:[%s9135_s1 + $0x2610] sm:$0xff] }
  0x47   :  { %3548 = vmatprep.subr.bf16.mxu0 %v3547_v30  ;;  %3672 = vmatprep.subr.bf16.mxu1 %v3671_v35  ;;  %v3565_v30 = vpack.c.bf16 %v924_v20, %v903_v19  ;;  %v966_v35 = vld [vmem:[%s9135_s1 + $0x1d88] sm:$0xff]  ;;  %v3691_v37 = vpack.c.bf16 %v969_v29, %v948_v28  ;;  %v3705_v19 = vpack.c.bf16 %v1094_v13, %v1073_v10  ;;  %v1156_v28 = vld [vmem:[%s9135_s1 + $0x2378] sm:$0xff]  ;;  %v1177_v29 = vld [vmem:[%s9135_s1 + $0x2420] sm:$0xff] }
  0x48   :  { %3432 = vmatprep.mubr.msk.f32.mxu0 %vm1476_vm0, %v5341_v39  ;;  %3433 = vmatprep.mubr.msk.f32.mxu1 %vm1476_vm0, %v5341_v39  ;;  %v3583_v20 = vpack.c.bf16 %v1135_v15, %v1114_v14  ;;  %v1197_v49 = vld [vmem:[%s9135_s1 + $0x24c0] sm:$0xff]  ;;  %v1262_v2 = vld [vmem:[%s9135_s1 + $0x26c8] sm:$0xff]  ;;  %v1283_v14 = vld [vmem:[%s9135_s1 + $0x2770] sm:$0xff] }
  0x49   :  { %v1241_v0 = vld [vmem:[%s9135_s1 + $0x2620] sm:$0xff]  ;;  %v1304_v15 = vld [vmem:[%s9135_s1 + $0x2818] sm:$0xff] }
  0x4a   :  { %3550 = vmatpush1.bf16.msra.mxu0 %v3549_v42  ;;  %3674 = vmatpush1.bf16.msra.mxu1 %v3673_v43  ;;  %v990_v42 = vld [vmem:[%s9135_s1 + $0x1e48] sm:$0xff]  ;;  %v1011_v43 = vld [vmem:[%s9135_s1 + $0x1ef0] sm:$0xff]  ;;  %v1281_v10 = vld [vmem:[%s9135_s1 + $0x2760] sm:$0xff] }
  0x4b   :  { %3552 = vmatprep.subr.bf16.mxu0 %v3551_v44  ;;  %3676 = vmatprep.subr.bf16.mxu1 %v3675_v48  ;;  %v3569_v44 = vpack.c.bf16 %v966_v35, %v945_v34  ;;  %v1008_v48 = vld [vmem:[%s9135_s1 + $0x1ed8] sm:$0xff]  ;;  %v3695_v50 = vpack.c.bf16 %v1011_v43, %v990_v42  ;;  %v3709_v34 = vpack.c.bf16 %v1136_v27, %v1115_v23  ;;  %v1198_v42 = vld [vmem:[%s9135_s1 + $0x24c8] sm:$0xff]  ;;  %v1219_v43 = vld [vmem:[%s9135_s1 + $0x2570] sm:$0xff] }
  0x4c   :  { %v3587_v35 = vpack.c.bf16 %v1177_v29, %v1156_v28  ;;  %v28_v23 = vld [vmem:[%s9135_s1 + $0x38] sm:$0xff]  ;;  %v25_v27 = vld [vmem:[%s9135_s1 + $0x20] sm:$0xff]  ;;  %v46_v28 = vld [vmem:[%s9135_s1 + $0xc8] sm:$0xff] }
  0x4d   :  { %v27_v29 = vld [vmem:[%s9135_s1 + $0x30] sm:$0xff] }
  0x4e   :  { %3554 = vmatpush1.bf16.msra.mxu0 %v3553_v54  ;;  %3678 = vmatpush1.bf16.msra.mxu1 %v3677_v55  ;;  %v1032_v54 = vld [vmem:[%s9135_s1 + $0x1f98] sm:$0xff]  ;;  %v1053_v55 = vld [vmem:[%s9135_s1 + $0x2040] sm:$0xff] }
  0x4f   :  { %3556 = vmatprep.subr.bf16.mxu0 %v3555_v56  ;;  %3680 = vmatprep.subr.bf16.mxu1 %v3679_v60  ;;  %v3573_v56 = vpack.c.bf16 %v1008_v48, %v987_v47  ;;  %v1050_v60 = vld [vmem:[%s9135_s1 + $0x2028] sm:$0xff]  ;;  %v3699_v63 = vpack.c.bf16 %v1053_v55, %v1032_v54  ;;  %v3713_v47 = vpack.c.bf16 %v1178_v41, %v1157_v38  ;;  %v1240_v54 = vld [vmem:[%s9135_s1 + $0x2618] sm:$0xff]  ;;  %v1261_v55 = vld [vmem:[%s9135_s1 + $0x26c0] sm:$0xff] }
  0x50   :  { %v3591_v48 = vpack.c.bf16 %v1219_v43, %v1198_v42  ;;  %v67_v43 = vld [vmem:[%s9135_s1 + $0x170] sm:$0xff] }
  0x52   :  { %3558 = vmatpush1.bf16.msra.mxu0 %v3557_v3  ;;  %3682 = vmatpush1.bf16.msra.mxu1 %v3681_v4  ;;  %v1074_v3 = vld [vmem:[%s9135_s1 + $0x20e8] sm:$0xff]  ;;  %v1095_v4 = vld [vmem:[%s9135_s1 + $0x2190] sm:$0xff] }
  0x53   :  { %3560 = vmatprep.subr.bf16.mxu0 %v3559_v5  ;;  %3684 = vmatprep.subr.bf16.mxu1 %v3683_v9  ;;  %v3577_v5 = vpack.c.bf16 %v1050_v60, %v1029_v59  ;;  %v1092_v9 = vld [vmem:[%s9135_s1 + $0x2178] sm:$0xff]  ;;  %v3703_v12 = vpack.c.bf16 %v1095_v4, %v1074_v3  ;;  %v3717_v59 = vpack.c.bf16 %v1220_v53, %v1199_v51  ;;  %v1282_v3 = vld [vmem:[%s9135_s1 + $0x2768] sm:$0xff]  ;;  %v1303_v4 = vld [vmem:[%s9135_s1 + $0x2810] sm:$0xff] }
  0x54   :  { %v3595_v60 = vpack.c.bf16 %v1261_v55, %v1240_v54  ;;  %v133_v51 = vld [vmem:[%s9135_s1 + $0x380] sm:$0xff] }
  0x55   :  { %v109_v55 = vld [vmem:[%s9135_s1 + $0x2c0] sm:$0xff] }
  0x56   :  { %3562 = vmatpush1.bf16.msra.mxu0 %v3561_v16  ;;  %3686 = vmatpush1.bf16.msra.mxu1 %v3685_v17  ;;  %v1116_v16 = vld [vmem:[%s9135_s1 + $0x2238] sm:$0xff]  ;;  %v1137_v17 = vld [vmem:[%s9135_s1 + $0x22e0] sm:$0xff] }
  0x57   :  { %3564 = vmatprep.subr.bf16.mxu0 %v3563_v18  ;;  %3688 = vmatprep.subr.bf16.mxu1 %v3687_v22  ;;  %v3581_v18 = vpack.c.bf16 %v1092_v9, %v1071_v8  ;;  %v1134_v22 = vld [vmem:[%s9135_s1 + $0x22c8] sm:$0xff]  ;;  %v3707_v26 = vpack.c.bf16 %v1137_v17, %v1116_v16  ;;  %v3721_v8 = vpack.c.bf16 %v1262_v2, %v1241_v0  ;;  %v175_v0 = vld [vmem:[%s9135_s1 + $0x4d0] sm:$0xff] }
  0x58   :  { %v3599_v9 = vpack.c.bf16 %v1303_v4, %v1282_v3  ;;  %v3725_v17 = vpack.c.bf16 %v1304_v15, %v1283_v14  ;;  %v151_v4 = vld [vmem:[%s9135_s1 + $0x410] sm:$0xff] }
  0x5a   :  { %3566 = vmatpush1.bf16.msra.mxu0 %v3565_v30  ;;  %3690 = vmatpush1.bf16.msra.mxu1 %v3689_v31  ;;  %v1158_v30 = vld [vmem:[%s9135_s1 + $0x2388] sm:$0xff]  ;;  %v1179_v31 = vld [vmem:[%s9135_s1 + $0x2430] sm:$0xff] }
  0x5b   :  { %3568 = vmatprep.subr.bf16.mxu0 %v3567_v33  ;;  %3692 = vmatprep.subr.bf16.mxu1 %v3691_v37  ;;  %v3585_v33 = vpack.c.bf16 %v1134_v22, %v1113_v21  ;;  %v1176_v37 = vld [vmem:[%s9135_s1 + $0x2418] sm:$0xff]  ;;  %v3711_v40 = vpack.c.bf16 %v1179_v31, %v1158_v30  ;;  %v1323_v21 = vld [vmem:[%s9135_s1 + $0x28b0] sm:$0xff] }
  0x5c   :  { %v47_v22 = vld [vmem:[%s9135_s1 + $0xd0] sm:$0xff]  ;;  %v48_v30 = vld [vmem:[%s9135_s1 + $0xd8] sm:$0xff] }
  0x5d   :  { %v68_v31 = vld [vmem:[%s9135_s1 + $0x178] sm:$0xff]  ;;  %v3853_v41 = vpack.c.bf16 %v48_v30, %v27_v29 }
  0x5e   :  { %3570 = vmatpush1.bf16.msra.mxu0 %v3569_v44  ;;  %3694 = vmatpush1.bf16.msra.mxu1 %v3693_v45  ;;  %v1200_v44 = vld [vmem:[%s9135_s1 + $0x24d8] sm:$0xff]  ;;  %v1221_v45 = vld [vmem:[%s9135_s1 + $0x2580] sm:$0xff] }
  0x5f   :  { %3572 = vmatprep.subr.bf16.mxu0 %v3571_v46  ;;  %3696 = vmatprep.subr.bf16.mxu1 %v3695_v50  ;;  %v3589_v46 = vpack.c.bf16 %v1176_v37, %v1155_v36  ;;  %v1218_v50 = vld [vmem:[%s9135_s1 + $0x2568] sm:$0xff]  ;;  %v3715_v52 = vpack.c.bf16 %v1221_v45, %v1200_v44  ;;  %v91_v37 = vld [vmem:[%s9135_s1 + $0x230] sm:$0xff]  ;;  %v88_v44 = vld [vmem:[%s9135_s1 + $0x218] sm:$0xff] }
  0x60   :  { %v70_v36 = vld [vmem:[%s9135_s1 + $0x188] sm:$0xff]  ;;  %v69_v45 = vld [vmem:[%s9135_s1 + $0x180] sm:$0xff] }
  0x62   :  { %3574 = vmatpush1.bf16.msra.mxu0 %v3573_v56  ;;  %3698 = vmatpush1.bf16.msra.mxu1 %v3697_v57  ;;  %v1242_v56 = vld [vmem:[%s9135_s1 + $0x2628] sm:$0xff]  ;;  %v1263_v57 = vld [vmem:[%s9135_s1 + $0x26d0] sm:$0xff] }
  0x63   :  { %3576 = vmatprep.subr.bf16.mxu0 %v3575_v58  ;;  %3700 = vmatprep.subr.bf16.mxu1 %v3699_v63  ;;  %v3593_v58 = vpack.c.bf16 %v1218_v50, %v1197_v49  ;;  %v1260_v63 = vld [vmem:[%s9135_s1 + $0x26b8] sm:$0xff]  ;;  %v3719_v1 = vpack.c.bf16 %v1263_v57, %v1242_v56  ;;  %v131_v49 = vld [vmem:[%s9135_s1 + $0x370] sm:$0xff]  ;;  %v130_v56 = vld [vmem:[%s9135_s1 + $0x368] sm:$0xff] }
  0x64   :  { %v112_v50 = vld [vmem:[%s9135_s1 + $0x2d8] sm:$0xff]  ;;  %v111_v57 = vld [vmem:[%s9135_s1 + $0x2d0] sm:$0xff] }
  0x66   :  { %3578 = vmatpush1.bf16.msra.mxu0 %v3577_v5  ;;  %3702 = vmatpush1.bf16.msra.mxu1 %v3701_v6  ;;  %v1284_v5 = vld [vmem:[%s9135_s1 + $0x2778] sm:$0xff]  ;;  %v1305_v6 = vld [vmem:[%s9135_s1 + $0x2820] sm:$0xff] }
  0x67   :  { %3580 = vmatprep.subr.bf16.mxu0 %v3579_v7  ;;  %3704 = vmatprep.subr.bf16.mxu1 %v3703_v12  ;;  %v3597_v7 = vpack.c.bf16 %v1260_v63, %v1239_v62  ;;  %v1302_v12 = vld [vmem:[%s9135_s1 + $0x2808] sm:$0xff]  ;;  %v3723_v13 = vpack.c.bf16 %v1305_v6, %v1284_v5  ;;  %v173_v62 = vld [vmem:[%s9135_s1 + $0x4c0] sm:$0xff]  ;;  %v172_v5 = vld [vmem:[%s9135_s1 + $0x4b8] sm:$0xff] }
  0x68   :  { %v3601_v16 = vpack.c.bf16 %v1302_v12, %v1281_v10  ;;  %v154_v63 = vld [vmem:[%s9135_s1 + $0x428] sm:$0xff]  ;;  %v153_v6 = vld [vmem:[%s9135_s1 + $0x420] sm:$0xff]  ;;  %v215_v10 = vld [vmem:[%s9135_s1 + $0x610] sm:$0xff]  ;;  %v3741_v14 = vpack.c.bf16 %v172_v5, %v151_v4 }
  0x69   :  { %v196_v12 = vld [vmem:[%s9135_s1 + $0x578] sm:$0xff] }
  0x6a   :  { %3582 = vmatpush1.bf16.msra.mxu0 %v3581_v18  ;;  %3706 = vmatpush1.bf16.msra.mxu1 %v3705_v19  ;;  %v1324_v18 = vld [vmem:[%s9135_s1 + $0x28b8] sm:$0xff]  ;;  %v1326_v19 = vld [vmem:[%s9135_s1 + $0x28c8] sm:$0xff] }
  0x6b   :  { %3584 = vmatprep.subr.bf16.mxu0 %v3583_v20  ;;  %3708 = vmatprep.subr.bf16.mxu1 %v3707_v26  ;;  %v26_v20 = vld [vmem:[%s9135_s1 + $0x28] sm:$0xff]  ;;  %v49_v26 = vld [vmem:[%s9135_s1 + $0xe0] sm:$0xff] }
  0x6c   :  { %v3851_v38 = vpack.c.bf16 %v49_v26, %v28_v23  ;;  %v257_v23 = vld [vmem:[%s9135_s1 + $0x760] sm:$0xff]  ;;  %v238_v26 = vld [vmem:[%s9135_s1 + $0x6c8] sm:$0xff] }
  0x6e   :  { %3586 = vmatpush1.bf16.msra.mxu0 %v3585_v33  ;;  %3710 = vmatpush1.bf16.msra.mxu1 %v3709_v34  ;;  %v89_v33 = vld [vmem:[%s9135_s1 + $0x220] sm:$0xff] }
  0x6f   :  { %3588 = vmatprep.subr.bf16.mxu0 %v3587_v35  ;;  %3712 = vmatprep.subr.bf16.mxu1 %v3711_v40  ;;  %v1325_v34 = vld [vmem:[%s9135_s1 + $0x28c0] sm:$0xff]  ;;  %v3727_v35 = vpack.c.bf16 %v47_v22, %v26_v20  ;;  %v3729_v40 = vpack.c.bf16 %v46_v28, %v25_v27  ;;  %v3731_v42 = vpack.c.bf16 %v89_v33, %v68_v31  ;;  %v236_v22 = vld [vmem:[%s9135_s1 + $0x6b8] sm:$0xff]  ;;  %v259_v27 = vld [vmem:[%s9135_s1 + $0x770] sm:$0xff] }
  0x70   :  { %v3747_v30 = vpack.c.bf16 %v257_v23, %v236_v22  ;;  %v235_v31 = vld [vmem:[%s9135_s1 + $0x6b0] sm:$0xff]  ;;  %v256_v33 = vld [vmem:[%s9135_s1 + $0x758] sm:$0xff]  ;;  %v426_v23 = vld [vmem:[%s9135_s1 + $0xca8] sm:$0xff] }
  0x72   :  { %3590 = vmatpush1.bf16.msra.mxu0 %v3589_v46  ;;  %3714 = vmatpush1.bf16.msra.mxu1 %v3713_v47  ;;  %v3855_v46 = vpack.c.bf16 %v91_v37, %v70_v36  ;;  %v90_v47 = vld [vmem:[%s9135_s1 + $0x228] sm:$0xff] }
  0x73   :  { %3592 = vmatprep.subr.bf16.mxu0 %v3591_v48  ;;  %3716 = vmatprep.subr.bf16.mxu1 %v3715_v52  ;;  %v110_v48 = vld [vmem:[%s9135_s1 + $0x2c8] sm:$0xff]  ;;  %v3733_v52 = vpack.c.bf16 %v88_v44, %v67_v43  ;;  %v3857_v53 = vpack.c.bf16 %v90_v47, %v69_v45  ;;  %v277_v45 = vld [vmem:[%s9135_s1 + $0x800] sm:$0xff]  ;;  %v279_v47 = vld [vmem:[%s9135_s1 + $0x810] sm:$0xff] }
  0x74   :  { %v3735_v54 = vpack.c.bf16 %v131_v49, %v110_v48  ;;  %v258_v36 = vld [vmem:[%s9135_s1 + $0x768] sm:$0xff]  ;;  %v300_v49 = vld [vmem:[%s9135_s1 + $0x8b8] sm:$0xff] }
  0x75   :  { %v278_v37 = vld [vmem:[%s9135_s1 + $0x808] sm:$0xff] }
  0x76   :  { %3594 = vmatpush1.bf16.msra.mxu0 %v3593_v58  ;;  %3718 = vmatpush1.bf16.msra.mxu1 %v3717_v59  ;;  %v3859_v58 = vpack.c.bf16 %v133_v51, %v112_v50  ;;  %v132_v59 = vld [vmem:[%s9135_s1 + $0x378] sm:$0xff]  ;;  %v341_v51 = vld [vmem:[%s9135_s1 + $0xa00] sm:$0xff] }
  0x77   :  { %3596 = vmatprep.subr.bf16.mxu0 %v3595_v60  ;;  %3720 = vmatprep.subr.bf16.mxu1 %v3719_v1  ;;  %v152_v60 = vld [vmem:[%s9135_s1 + $0x418] sm:$0xff]  ;;  %v3737_v1 = vpack.c.bf16 %v130_v56, %v109_v55  ;;  %v3861_v2 = vpack.c.bf16 %v132_v59, %v111_v57  ;;  %v3877_v55 = vpack.c.bf16 %v300_v49, %v279_v47  ;;  %v319_v57 = vld [vmem:[%s9135_s1 + $0x950] sm:$0xff]  ;;  %v321_v59 = vld [vmem:[%s9135_s1 + $0x960] sm:$0xff] }
  0x78   :  { %v3739_v3 = vpack.c.bf16 %v173_v62, %v152_v60  ;;  %v320_v50 = vld [vmem:[%s9135_s1 + $0x958] sm:$0xff]  ;;  %v342_v62 = vld [vmem:[%s9135_s1 + $0xa08] sm:$0xff]  ;;  %v487_v47 = vld [vmem:[%s9135_s1 + $0xe90] sm:$0xff] }
  0x79   :  { %v3755_v56 = vpack.c.bf16 %v341_v51, %v320_v50  ;;  %v3881_v4 = vpack.c.bf16 %v342_v62, %v321_v59  ;;  %v489_v49 = vld [vmem:[%s9135_s1 + $0xea0] sm:$0xff]  ;;  %v510_v51 = vld [vmem:[%s9135_s1 + $0xf48] sm:$0xff]  ;;  %v531_v62 = vld [vmem:[%s9135_s1 + $0xff0] sm:$0xff] }
  0x7a   :  { %3598 = vmatpush1.bf16.msra.mxu0 %v3597_v7  ;;  %3722 = vmatpush1.bf16.msra.mxu1 %v3721_v8  ;;  %v3863_v7 = vpack.c.bf16 %v175_v0, %v154_v63  ;;  %v174_v8 = vld [vmem:[%s9135_s1 + $0x4c8] sm:$0xff]  ;;  %v383_v0 = vld [vmem:[%s9135_s1 + $0xb50] sm:$0xff]  ;;  %v529_v59 = vld [vmem:[%s9135_s1 + $0xfe0] sm:$0xff] }
  0x7b   :  { %3600 = vmatprep.subr.bf16.mxu0 %v3599_v9  ;;  %3724 = vmatprep.subr.bf16.mxu1 %v3723_v13  ;;  %v194_v9 = vld [vmem:[%s9135_s1 + $0x568] sm:$0xff]  ;;  %v217_v13 = vld [vmem:[%s9135_s1 + $0x620] sm:$0xff]  ;;  %v3865_v15 = vpack.c.bf16 %v174_v8, %v153_v6  ;;  %v363_v8 = vld [vmem:[%s9135_s1 + $0xab0] sm:$0xff] }
  0x7c   :  { %v3867_v20 = vpack.c.bf16 %v217_v13, %v196_v12  ;;  %v362_v63 = vld [vmem:[%s9135_s1 + $0xaa8] sm:$0xff]  ;;  %v361_v6 = vld [vmem:[%s9135_s1 + $0xaa0] sm:$0xff]  ;;  %v404_v12 = vld [vmem:[%s9135_s1 + $0xbf8] sm:$0xff] }
  0x7d   :  { %v3759_v5 = vpack.c.bf16 %v383_v0, %v362_v63  ;;  %v425_v13 = vld [vmem:[%s9135_s1 + $0xca0] sm:$0xff]  ;;  %v552_v0 = vld [vmem:[%s9135_s1 + $0x1098] sm:$0xff] }
  0x7e   :  { %3602 = vmatpush1.bf16.msra.mxu0 %v3601_v16  ;;  %3726 = vmatpush1.bf16.msra.mxu1 %v3725_v17  ;;  %v3743_v16 = vpack.c.bf16 %v215_v10, %v194_v9  ;;  %v193_v17 = vld [vmem:[%s9135_s1 + $0x560] sm:$0xff]  ;;  %v384_v10 = vld [vmem:[%s9135_s1 + $0xb58] sm:$0xff] }
  0x7f   :  { %1610 = vmatprep.subr.mxu0 %v1324_v18  ;;  %1752 = vmatprep.subr.mxu1 %v1326_v19  ;;  %v214_v18 = vld [vmem:[%s9135_s1 + $0x608] sm:$0xff]  ;;  %v195_v19 = vld [vmem:[%s9135_s1 + $0x570] sm:$0xff] }
  0x80   :  { %v3745_v28 = vpack.c.bf16 %v214_v18, %v193_v17  ;;  %v3885_v17 = vpack.c.bf16 %v384_v10, %v363_v8  ;;  %v3763_v18 = vpack.c.bf16 %v425_v13, %v404_v12  ;;  %v571_v8 = vld [vmem:[%s9135_s1 + $0x1130] sm:$0xff]  ;;  %v573_v10 = vld [vmem:[%s9135_s1 + $0x1140] sm:$0xff]  ;;  %v594_v13 = vld [vmem:[%s9135_s1 + $0x11e8] sm:$0xff] }
  0x82   :  { %1611 = vmatpush1.msra.mxu0 %v1323_v21  ;;  %1753 = vmatpush1.msra.mxu1 %v1325_v34  ;;  %v216_v21 = vld [vmem:[%s9135_s1 + $0x618] sm:$0xff]  ;;  %v237_v34 = vld [vmem:[%s9135_s1 + $0x6c0] sm:$0xff] }
  0x83   :  { %1615 = vmatmul.mubr.f32.vlgmr.msra.gmra.mrb[0].mxu0 %v5313_v24  ;;  %1757 = vmatmul.mubr.f32.vlgmr.msra.gmra.mrb[0].mxu1 %v5313_v24  ;;  %v3869_v29 = vpack.c.bf16 %v216_v21, %v195_v19  ;;  %v3873_v43 = vpack.c.bf16 %v258_v36, %v237_v34  ;;  %v403_v19 = vld [vmem:[%s9135_s1 + $0xbf0] sm:$0xff]  ;;  %v405_v21 = vld [vmem:[%s9135_s1 + $0xc00] sm:$0xff] }
  0x84   :  { %3728 = vmatprep.subr.bf16.mxu0 %v3727_v35  ;;  %3852 = vmatprep.subr.bf16.mxu1 %v3851_v38  ;;  %v3871_v35 = vpack.c.bf16 %v259_v27, %v238_v26  ;;  %v299_v38 = vld [vmem:[%s9135_s1 + $0x8b0] sm:$0xff]  ;;  %v446_v26 = vld [vmem:[%s9135_s1 + $0xd48] sm:$0xff]  ;;  %v445_v34 = vld [vmem:[%s9135_s1 + $0xd40] sm:$0xff] }
  0x85   :  { %3730 = vmatpush1.bf16.msra.mxu0 %v3729_v40  ;;  %3854 = vmatpush1.bf16.msra.mxu1 %v3853_v41  ;;  %v280_v40 = vld [vmem:[%s9135_s1 + $0x818] sm:$0xff]  ;;  %v301_v41 = vld [vmem:[%s9135_s1 + $0x8c0] sm:$0xff]  ;;  %v3751_v44 = vpack.c.bf16 %v299_v38, %v278_v37  ;;  %v467_v27 = vld [vmem:[%s9135_s1 + $0xdf0] sm:$0xff] }
  0x86   :  { %3732 = vmatprep.subr.bf16.mxu0 %v3731_v42  ;;  %3856 = vmatprep.subr.bf16.mxu1 %v3855_v46  ;;  %v3749_v42 = vpack.c.bf16 %v256_v33, %v235_v31  ;;  %v298_v46 = vld [vmem:[%s9135_s1 + $0x8a8] sm:$0xff]  ;;  %v3875_v48 = vpack.c.bf16 %v301_v41, %v280_v40  ;;  %v3889_v31 = vpack.c.bf16 %v426_v23, %v405_v21  ;;  %v447_v36 = vld [vmem:[%s9135_s1 + $0xd50] sm:$0xff]  ;;  %v468_v38 = vld [vmem:[%s9135_s1 + $0xdf8] sm:$0xff] }
  0x87   :  { %1827 = vmatprep.mubr.f32.mxu0 %v5201_v32  ;;  %1969 = vmatprep.mubr.f32.mxu1 %v5201_v32  ;;  %v3767_v33 = vpack.c.bf16 %v467_v27, %v446_v26  ;;  %v488_v40 = vld [vmem:[%s9135_s1 + $0xe98] sm:$0xff]  ;;  %v509_v41 = vld [vmem:[%s9135_s1 + $0xf40] sm:$0xff]  ;;  %v615_v23 = vld [vmem:[%s9135_s1 + $0x1290] sm:$0xff] }
  0x88   :  { %v613_v21 = vld [vmem:[%s9135_s1 + $0x1280] sm:$0xff]  ;;  %v636_v27 = vld [vmem:[%s9135_s1 + $0x1338] sm:$0xff] }
  0x89   :  { %3734 = vmatpush1.bf16.msra.mxu0 %v3733_v52  ;;  %3858 = vmatpush1.bf16.msra.mxu1 %v3857_v53  ;;  %v322_v52 = vld [vmem:[%s9135_s1 + $0x968] sm:$0xff]  ;;  %v343_v53 = vld [vmem:[%s9135_s1 + $0xa10] sm:$0xff] }
  0x8a   :  { %3736 = vmatprep.subr.bf16.mxu0 %v3735_v54  ;;  %3860 = vmatprep.subr.bf16.mxu1 %v3859_v58  ;;  %v3753_v54 = vpack.c.bf16 %v298_v46, %v277_v45  ;;  %v340_v58 = vld [vmem:[%s9135_s1 + $0x9f8] sm:$0xff]  ;;  %v3879_v60 = vpack.c.bf16 %v343_v53, %v322_v52  ;;  %v3893_v45 = vpack.c.bf16 %v468_v38, %v447_v36  ;;  %v530_v52 = vld [vmem:[%s9135_s1 + $0xfe8] sm:$0xff]  ;;  %v551_v53 = vld [vmem:[%s9135_s1 + $0x1090] sm:$0xff] }
  0x8b   :  { %v3771_v46 = vpack.c.bf16 %v509_v41, %v488_v40  ;;  %v655_v36 = vld [vmem:[%s9135_s1 + $0x13d0] sm:$0xff]  ;;  %v657_v38 = vld [vmem:[%s9135_s1 + $0x13e0] sm:$0xff]  ;;  %v678_v41 = vld [vmem:[%s9135_s1 + $0x1488] sm:$0xff] }
  0x8d   :  { %3738 = vmatpush1.bf16.msra.mxu0 %v3737_v1  ;;  %3862 = vmatpush1.bf16.msra.mxu1 %v3861_v2  ;;  %v364_v1 = vld [vmem:[%s9135_s1 + $0xab8] sm:$0xff]  ;;  %v385_v2 = vld [vmem:[%s9135_s1 + $0xb60] sm:$0xff] }
  0x8e   :  { %3740 = vmatprep.subr.bf16.mxu0 %v3739_v3  ;;  %3864 = vmatprep.subr.bf16.mxu1 %v3863_v7  ;;  %v3757_v3 = vpack.c.bf16 %v340_v58, %v319_v57  ;;  %v382_v7 = vld [vmem:[%s9135_s1 + $0xb48] sm:$0xff]  ;;  %v3883_v9 = vpack.c.bf16 %v385_v2, %v364_v1  ;;  %v3897_v57 = vpack.c.bf16 %v510_v51, %v489_v49  ;;  %v572_v1 = vld [vmem:[%s9135_s1 + $0x1138] sm:$0xff]  ;;  %v593_v2 = vld [vmem:[%s9135_s1 + $0x11e0] sm:$0xff] }
  0x8f   :  { %v3775_v58 = vpack.c.bf16 %v551_v53, %v530_v52  ;;  %v697_v49 = vld [vmem:[%s9135_s1 + $0x1520] sm:$0xff]  ;;  %v699_v51 = vld [vmem:[%s9135_s1 + $0x1530] sm:$0xff]  ;;  %v720_v53 = vld [vmem:[%s9135_s1 + $0x15d8] sm:$0xff] }
  0x91   :  { %3742 = vmatpush1.bf16.msra.mxu0 %v3741_v14  ;;  %3866 = vmatpush1.bf16.msra.mxu1 %v3865_v15  ;;  %v406_v14 = vld [vmem:[%s9135_s1 + $0xc08] sm:$0xff]  ;;  %v427_v15 = vld [vmem:[%s9135_s1 + $0xcb0] sm:$0xff] }
  0x92   :  { %3744 = vmatprep.subr.bf16.mxu0 %v3743_v16  ;;  %3868 = vmatprep.subr.bf16.mxu1 %v3867_v20  ;;  %v3761_v16 = vpack.c.bf16 %v382_v7, %v361_v6  ;;  %v424_v20 = vld [vmem:[%s9135_s1 + $0xc98] sm:$0xff]  ;;  %v3887_v22 = vpack.c.bf16 %v427_v15, %v406_v14  ;;  %v3901_v6 = vpack.c.bf16 %v552_v0, %v531_v62  ;;  %v614_v14 = vld [vmem:[%s9135_s1 + $0x1288] sm:$0xff]  ;;  %v635_v15 = vld [vmem:[%s9135_s1 + $0x1330] sm:$0xff] }
  0x93   :  { %v3779_v7 = vpack.c.bf16 %v593_v2, %v572_v1  ;;  %v739_v62 = vld [vmem:[%s9135_s1 + $0x1670] sm:$0xff]  ;;  %v741_v0 = vld [vmem:[%s9135_s1 + $0x1680] sm:$0xff]  ;;  %v762_v2 = vld [vmem:[%s9135_s1 + $0x1728] sm:$0xff] }
  0x95   :  { %3746 = vmatpush1.bf16.msra.mxu0 %v3745_v28  ;;  %3870 = vmatpush1.bf16.msra.mxu1 %v3869_v29  ;;  %v448_v28 = vld [vmem:[%s9135_s1 + $0xd58] sm:$0xff]  ;;  %v469_v29 = vld [vmem:[%s9135_s1 + $0xe00] sm:$0xff] }
  0x96   :  { %3748 = vmatprep.subr.bf16.mxu0 %v3747_v30  ;;  %3872 = vmatprep.subr.bf16.mxu1 %v3871_v35  ;;  %v3765_v30 = vpack.c.bf16 %v424_v20, %v403_v19  ;;  %v466_v35 = vld [vmem:[%s9135_s1 + $0xde8] sm:$0xff]  ;;  %v3891_v37 = vpack.c.bf16 %v469_v29, %v448_v28  ;;  %v3905_v19 = vpack.c.bf16 %v594_v13, %v573_v10  ;;  %v656_v28 = vld [vmem:[%s9135_s1 + $0x13d8] sm:$0xff]  ;;  %v677_v29 = vld [vmem:[%s9135_s1 + $0x1480] sm:$0xff] }
  0x97   :  { %v3783_v20 = vpack.c.bf16 %v635_v15, %v614_v14  ;;  %v781_v10 = vld [vmem:[%s9135_s1 + $0x17c0] sm:$0xff]  ;;  %v783_v13 = vld [vmem:[%s9135_s1 + $0x17d0] sm:$0xff]  ;;  %v804_v15 = vld [vmem:[%s9135_s1 + $0x1878] sm:$0xff] }
  0x99   :  { %3750 = vmatpush1.bf16.msra.mxu0 %v3749_v42  ;;  %3874 = vmatpush1.bf16.msra.mxu1 %v3873_v43  ;;  %v490_v42 = vld [vmem:[%s9135_s1 + $0xea8] sm:$0xff]  ;;  %v511_v43 = vld [vmem:[%s9135_s1 + $0xf50] sm:$0xff] }
  0x9a   :  { %3752 = vmatprep.subr.bf16.mxu0 %v3751_v44  ;;  %3876 = vmatprep.subr.bf16.mxu1 %v3875_v48  ;;  %v3769_v44 = vpack.c.bf16 %v466_v35, %v445_v34  ;;  %v508_v48 = vld [vmem:[%s9135_s1 + $0xf38] sm:$0xff]  ;;  %v3895_v50 = vpack.c.bf16 %v511_v43, %v490_v42  ;;  %v3909_v34 = vpack.c.bf16 %v636_v27, %v615_v23  ;;  %v698_v42 = vld [vmem:[%s9135_s1 + $0x1528] sm:$0xff]  ;;  %v719_v43 = vld [vmem:[%s9135_s1 + $0x15d0] sm:$0xff] }
  0x9b   :  { %v3787_v35 = vpack.c.bf16 %v677_v29, %v656_v28  ;;  %v823_v23 = vld [vmem:[%s9135_s1 + $0x1910] sm:$0xff]  ;;  %v825_v27 = vld [vmem:[%s9135_s1 + $0x1920] sm:$0xff]  ;;  %v846_v29 = vld [vmem:[%s9135_s1 + $0x19c8] sm:$0xff] }
  0x9d   :  { %3754 = vmatpush1.bf16.msra.mxu0 %v3753_v54  ;;  %3878 = vmatpush1.bf16.msra.mxu1 %v3877_v55  ;;  %v532_v54 = vld [vmem:[%s9135_s1 + $0xff8] sm:$0xff]  ;;  %v553_v55 = vld [vmem:[%s9135_s1 + $0x10a0] sm:$0xff] }
  0x9e   :  { %3756 = vmatprep.subr.bf16.mxu0 %v3755_v56  ;;  %3880 = vmatprep.subr.bf16.mxu1 %v3879_v60  ;;  %v3773_v56 = vpack.c.bf16 %v508_v48, %v487_v47  ;;  %v550_v60 = vld [vmem:[%s9135_s1 + $0x1088] sm:$0xff]  ;;  %v3899_v63 = vpack.c.bf16 %v553_v55, %v532_v54  ;;  %v3913_v47 = vpack.c.bf16 %v678_v41, %v657_v38  ;;  %v740_v54 = vld [vmem:[%s9135_s1 + $0x1678] sm:$0xff]  ;;  %v761_v55 = vld [vmem:[%s9135_s1 + $0x1720] sm:$0xff] }
  0x9f   :  { %v3791_v48 = vpack.c.bf16 %v719_v43, %v698_v42  ;;  %v865_v38 = vld [vmem:[%s9135_s1 + $0x1a60] sm:$0xff]  ;;  %v867_v41 = vld [vmem:[%s9135_s1 + $0x1a70] sm:$0xff]  ;;  %v888_v43 = vld [vmem:[%s9135_s1 + $0x1b18] sm:$0xff] }
  0xa1   :  { %3758 = vmatpush1.bf16.msra.mxu0 %v3757_v3  ;;  %3882 = vmatpush1.bf16.msra.mxu1 %v3881_v4  ;;  %v574_v3 = vld [vmem:[%s9135_s1 + $0x1148] sm:$0xff]  ;;  %v595_v4 = vld [vmem:[%s9135_s1 + $0x11f0] sm:$0xff] }
  0xa2   :  { %3760 = vmatprep.subr.bf16.mxu0 %v3759_v5  ;;  %3884 = vmatprep.subr.bf16.mxu1 %v3883_v9  ;;  %v3777_v5 = vpack.c.bf16 %v550_v60, %v529_v59  ;;  %v592_v9 = vld [vmem:[%s9135_s1 + $0x11d8] sm:$0xff]  ;;  %v3903_v12 = vpack.c.bf16 %v595_v4, %v574_v3  ;;  %v3917_v59 = vpack.c.bf16 %v720_v53, %v699_v51  ;;  %v782_v3 = vld [vmem:[%s9135_s1 + $0x17c8] sm:$0xff]  ;;  %v803_v4 = vld [vmem:[%s9135_s1 + $0x1870] sm:$0xff] }
  0xa3   :  { %v3795_v60 = vpack.c.bf16 %v761_v55, %v740_v54  ;;  %v907_v51 = vld [vmem:[%s9135_s1 + $0x1bb0] sm:$0xff]  ;;  %v909_v53 = vld [vmem:[%s9135_s1 + $0x1bc0] sm:$0xff]  ;;  %v930_v55 = vld [vmem:[%s9135_s1 + $0x1c68] sm:$0xff] }
  0xa5   :  { %3762 = vmatpush1.bf16.msra.mxu0 %v3761_v16  ;;  %3886 = vmatpush1.bf16.msra.mxu1 %v3885_v17  ;;  %v616_v16 = vld [vmem:[%s9135_s1 + $0x1298] sm:$0xff]  ;;  %v637_v17 = vld [vmem:[%s9135_s1 + $0x1340] sm:$0xff] }
  0xa6   :  { %3764 = vmatprep.subr.bf16.mxu0 %v3763_v18  ;;  %3888 = vmatprep.subr.bf16.mxu1 %v3887_v22  ;;  %v3781_v18 = vpack.c.bf16 %v592_v9, %v571_v8  ;;  %v634_v22 = vld [vmem:[%s9135_s1 + $0x1328] sm:$0xff]  ;;  %v3907_v26 = vpack.c.bf16 %v637_v17, %v616_v16  ;;  %v3921_v8 = vpack.c.bf16 %v762_v2, %v741_v0  ;;  %v824_v16 = vld [vmem:[%s9135_s1 + $0x1918] sm:$0xff]  ;;  %v845_v17 = vld [vmem:[%s9135_s1 + $0x19c0] sm:$0xff] }
  0xa7   :  { %v3799_v9 = vpack.c.bf16 %v803_v4, %v782_v3  ;;  %v949_v0 = vld [vmem:[%s9135_s1 + $0x1d00] sm:$0xff]  ;;  %v951_v2 = vld [vmem:[%s9135_s1 + $0x1d10] sm:$0xff]  ;;  %v972_v4 = vld [vmem:[%s9135_s1 + $0x1db8] sm:$0xff] }
  0xa9   :  { %3766 = vmatpush1.bf16.msra.mxu0 %v3765_v30  ;;  %3890 = vmatpush1.bf16.msra.mxu1 %v3889_v31  ;;  %v658_v30 = vld [vmem:[%s9135_s1 + $0x13e8] sm:$0xff]  ;;  %v679_v31 = vld [vmem:[%s9135_s1 + $0x1490] sm:$0xff] }
  0xaa   :  { %3768 = vmatprep.subr.bf16.mxu0 %v3767_v33  ;;  %3892 = vmatprep.subr.bf16.mxu1 %v3891_v37  ;;  %v3785_v33 = vpack.c.bf16 %v634_v22, %v613_v21  ;;  %v676_v37 = vld [vmem:[%s9135_s1 + $0x1478] sm:$0xff]  ;;  %v3911_v40 = vpack.c.bf16 %v679_v31, %v658_v30  ;;  %v3925_v21 = vpack.c.bf16 %v804_v15, %v783_v13  ;;  %v866_v30 = vld [vmem:[%s9135_s1 + $0x1a68] sm:$0xff]  ;;  %v887_v31 = vld [vmem:[%s9135_s1 + $0x1b10] sm:$0xff] }
  0xab   :  { %v3803_v22 = vpack.c.bf16 %v845_v17, %v824_v16  ;;  %v991_v13 = vld [vmem:[%s9135_s1 + $0x1e50] sm:$0xff]  ;;  %v993_v15 = vld [vmem:[%s9135_s1 + $0x1e60] sm:$0xff]  ;;  %v1014_v17 = vld [vmem:[%s9135_s1 + $0x1f08] sm:$0xff] }
  0xad   :  { %3770 = vmatpush1.bf16.msra.mxu0 %v3769_v44  ;;  %3894 = vmatpush1.bf16.msra.mxu1 %v3893_v45  ;;  %v700_v44 = vld [vmem:[%s9135_s1 + $0x1538] sm:$0xff]  ;;  %v721_v45 = vld [vmem:[%s9135_s1 + $0x15e0] sm:$0xff] }
  0xae   :  { %3772 = vmatprep.subr.bf16.mxu0 %v3771_v46  ;;  %3896 = vmatprep.subr.bf16.mxu1 %v3895_v50  ;;  %v3789_v46 = vpack.c.bf16 %v676_v37, %v655_v36  ;;  %v718_v50 = vld [vmem:[%s9135_s1 + $0x15c8] sm:$0xff]  ;;  %v3915_v52 = vpack.c.bf16 %v721_v45, %v700_v44  ;;  %v3929_v36 = vpack.c.bf16 %v846_v29, %v825_v27  ;;  %v908_v44 = vld [vmem:[%s9135_s1 + $0x1bb8] sm:$0xff]  ;;  %v929_v45 = vld [vmem:[%s9135_s1 + $0x1c60] sm:$0xff] }
  0xaf   :  { %v3807_v37 = vpack.c.bf16 %v887_v31, %v866_v30  ;;  %v1033_v27 = vld [vmem:[%s9135_s1 + $0x1fa0] sm:$0xff]  ;;  %v1035_v29 = vld [vmem:[%s9135_s1 + $0x1fb0] sm:$0xff]  ;;  %v1056_v31 = vld [vmem:[%s9135_s1 + $0x2058] sm:$0xff] }
  0xb1   :  { %3774 = vmatpush1.bf16.msra.mxu0 %v3773_v56  ;;  %3898 = vmatpush1.bf16.msra.mxu1 %v3897_v57  ;;  %v742_v56 = vld [vmem:[%s9135_s1 + $0x1688] sm:$0xff]  ;;  %v763_v57 = vld [vmem:[%s9135_s1 + $0x1730] sm:$0xff] }
  0xb2   :  { %3776 = vmatprep.subr.bf16.mxu0 %v3775_v58  ;;  %3900 = vmatprep.subr.bf16.mxu1 %v3899_v63  ;;  %v3793_v58 = vpack.c.bf16 %v718_v50, %v697_v49  ;;  %v760_v63 = vld [vmem:[%s9135_s1 + $0x1718] sm:$0xff]  ;;  %v3919_v1 = vpack.c.bf16 %v763_v57, %v742_v56  ;;  %v3933_v49 = vpack.c.bf16 %v888_v43, %v867_v41  ;;  %v950_v56 = vld [vmem:[%s9135_s1 + $0x1d08] sm:$0xff]  ;;  %v971_v57 = vld [vmem:[%s9135_s1 + $0x1db0] sm:$0xff] }
  0xb3   :  { %v3811_v50 = vpack.c.bf16 %v929_v45, %v908_v44  ;;  %v1075_v41 = vld [vmem:[%s9135_s1 + $0x20f0] sm:$0xff]  ;;  %v1077_v43 = vld [vmem:[%s9135_s1 + $0x2100] sm:$0xff]  ;;  %v1098_v45 = vld [vmem:[%s9135_s1 + $0x21a8] sm:$0xff] }
  0xb5   :  { %3778 = vmatpush1.bf16.msra.mxu0 %v3777_v5  ;;  %3902 = vmatpush1.bf16.msra.mxu1 %v3901_v6  ;;  %v784_v5 = vld [vmem:[%s9135_s1 + $0x17d8] sm:$0xff]  ;;  %v805_v6 = vld [vmem:[%s9135_s1 + $0x1880] sm:$0xff] }
  0xb6   :  { %3780 = vmatprep.subr.bf16.mxu0 %v3779_v7  ;;  %3904 = vmatprep.subr.bf16.mxu1 %v3903_v12  ;;  %v3797_v7 = vpack.c.bf16 %v760_v63, %v739_v62  ;;  %v802_v12 = vld [vmem:[%s9135_s1 + $0x1868] sm:$0xff]  ;;  %v3923_v14 = vpack.c.bf16 %v805_v6, %v784_v5  ;;  %v3937_v62 = vpack.c.bf16 %v930_v55, %v909_v53  ;;  %v992_v5 = vld [vmem:[%s9135_s1 + $0x1e58] sm:$0xff]  ;;  %v1013_v6 = vld [vmem:[%s9135_s1 + $0x1f00] sm:$0xff] }
  0xb7   :  { %v3815_v63 = vpack.c.bf16 %v971_v57, %v950_v56  ;;  %v1117_v53 = vld [vmem:[%s9135_s1 + $0x2240] sm:$0xff]  ;;  %v1119_v55 = vld [vmem:[%s9135_s1 + $0x2250] sm:$0xff]  ;;  %v1140_v57 = vld [vmem:[%s9135_s1 + $0x22f8] sm:$0xff] }
  0xb9   :  { %3782 = vmatpush1.bf16.msra.mxu0 %v3781_v18  ;;  %3906 = vmatpush1.bf16.msra.mxu1 %v3905_v19  ;;  %v826_v18 = vld [vmem:[%s9135_s1 + $0x1928] sm:$0xff]  ;;  %v847_v19 = vld [vmem:[%s9135_s1 + $0x19d0] sm:$0xff] }
  0xba   :  { %3784 = vmatprep.subr.bf16.mxu0 %v3783_v20  ;;  %3908 = vmatprep.subr.bf16.mxu1 %v3907_v26  ;;  %v3801_v20 = vpack.c.bf16 %v802_v12, %v781_v10  ;;  %v844_v26 = vld [vmem:[%s9135_s1 + $0x19b8] sm:$0xff]  ;;  %v3927_v28 = vpack.c.bf16 %v847_v19, %v826_v18  ;;  %v3941_v10 = vpack.c.bf16 %v972_v4, %v951_v2  ;;  %v1034_v18 = vld [vmem:[%s9135_s1 + $0x1fa8] sm:$0xff]  ;;  %v1055_v19 = vld [vmem:[%s9135_s1 + $0x2050] sm:$0xff] }
  0xbb   :  { %v3819_v12 = vpack.c.bf16 %v1013_v6, %v992_v5  ;;  %v1159_v2 = vld [vmem:[%s9135_s1 + $0x2390] sm:$0xff]  ;;  %v1161_v4 = vld [vmem:[%s9135_s1 + $0x23a0] sm:$0xff]  ;;  %v1182_v6 = vld [vmem:[%s9135_s1 + $0x2448] sm:$0xff] }
  0xbd   :  { %3786 = vmatpush1.bf16.msra.mxu0 %v3785_v33  ;;  %3910 = vmatpush1.bf16.msra.mxu1 %v3909_v34  ;;  %v868_v33 = vld [vmem:[%s9135_s1 + $0x1a78] sm:$0xff]  ;;  %v889_v34 = vld [vmem:[%s9135_s1 + $0x1b20] sm:$0xff] }
  0xbe   :  { %3788 = vmatprep.subr.bf16.mxu0 %v3787_v35  ;;  %3912 = vmatprep.subr.bf16.mxu1 %v3911_v40  ;;  %v3805_v35 = vpack.c.bf16 %v844_v26, %v823_v23  ;;  %v886_v40 = vld [vmem:[%s9135_s1 + $0x1b08] sm:$0xff]  ;;  %v3931_v42 = vpack.c.bf16 %v889_v34, %v868_v33  ;;  %v3945_v23 = vpack.c.bf16 %v1014_v17, %v993_v15  ;;  %v1076_v33 = vld [vmem:[%s9135_s1 + $0x20f8] sm:$0xff]  ;;  %v1097_v34 = vld [vmem:[%s9135_s1 + $0x21a0] sm:$0xff] }
  0xbf   :  { %v3823_v26 = vpack.c.bf16 %v1055_v19, %v1034_v18  ;;  %v1201_v15 = vld [vmem:[%s9135_s1 + $0x24e0] sm:$0xff]  ;;  %v1203_v17 = vld [vmem:[%s9135_s1 + $0x24f0] sm:$0xff]  ;;  %v1224_v19 = vld [vmem:[%s9135_s1 + $0x2598] sm:$0xff] }
  0xc1   :  { %3790 = vmatpush1.bf16.msra.mxu0 %v3789_v46  ;;  %3914 = vmatpush1.bf16.msra.mxu1 %v3913_v47  ;;  %v910_v46 = vld [vmem:[%s9135_s1 + $0x1bc8] sm:$0xff]  ;;  %v931_v47 = vld [vmem:[%s9135_s1 + $0x1c70] sm:$0xff] }
  0xc2   :  { %3792 = vmatprep.subr.bf16.mxu0 %v3791_v48  ;;  %3916 = vmatprep.subr.bf16.mxu1 %v3915_v52  ;;  %v3809_v48 = vpack.c.bf16 %v886_v40, %v865_v38  ;;  %v928_v52 = vld [vmem:[%s9135_s1 + $0x1c58] sm:$0xff]  ;;  %v3935_v54 = vpack.c.bf16 %v931_v47, %v910_v46  ;;  %v3949_v38 = vpack.c.bf16 %v1056_v31, %v1035_v29  ;;  %v1118_v46 = vld [vmem:[%s9135_s1 + $0x2248] sm:$0xff]  ;;  %v1139_v47 = vld [vmem:[%s9135_s1 + $0x22f0] sm:$0xff] }
  0xc3   :  { %v3827_v40 = vpack.c.bf16 %v1097_v34, %v1076_v33  ;;  %v1243_v29 = vld [vmem:[%s9135_s1 + $0x2630] sm:$0xff]  ;;  %v1245_v31 = vld [vmem:[%s9135_s1 + $0x2640] sm:$0xff]  ;;  %v1266_v34 = vld [vmem:[%s9135_s1 + $0x26e8] sm:$0xff] }
  0xc4   :  { %1828 = vmatmul.mubr.f32.vlgmr.msra.gmra.mrb[2].mxu0 %v5188_v25  ;;  %1970 = vmatmul.mubr.f32.vlgmr.msra.gmra.mrb[2].mxu1 %v5188_v25 }
  0xc5   :  { %3794 = vmatpush1.bf16.msra.mxu0 %v3793_v58  ;;  %3918 = vmatpush1.bf16.msra.mxu1 %v3917_v59  ;;  %v952_v58 = vld [vmem:[%s9135_s1 + $0x1d18] sm:$0xff]  ;;  %v973_v59 = vld [vmem:[%s9135_s1 + $0x1dc0] sm:$0xff] }
  0xc6   :  { %3796 = vmatprep.subr.bf16.mxu0 %v3795_v60  ;;  %3920 = vmatprep.subr.bf16.mxu1 %v3919_v1  ;;  %v3813_v60 = vpack.c.bf16 %v928_v52, %v907_v51  ;;  %v970_v1 = vld [vmem:[%s9135_s1 + $0x1da8] sm:$0xff]  ;;  %v3939_v3 = vpack.c.bf16 %v973_v59, %v952_v58  ;;  %v3953_v51 = vpack.c.bf16 %v1098_v45, %v1077_v43  ;;  %v1160_v58 = vld [vmem:[%s9135_s1 + $0x2398] sm:$0xff]  ;;  %v1181_v59 = vld [vmem:[%s9135_s1 + $0x2440] sm:$0xff] }
  0xc7   :  { %3434 = vmatprep.mubr.msk.f32.mxu0 %vm1476_vm0, %v5341_v39  ;;  %3435 = vmatprep.mubr.msk.f32.mxu1 %vm1476_vm0, %v5341_v39  ;;  %v3831_v52 = vpack.c.bf16 %v1139_v47, %v1118_v46  ;;  %v1285_v43 = vld [vmem:[%s9135_s1 + $0x2780] sm:$0xff]  ;;  %v1287_v46 = vld [vmem:[%s9135_s1 + $0x2790] sm:$0xff]  ;;  %v1308_v47 = vld [vmem:[%s9135_s1 + $0x2838] sm:$0xff] }
  0xc9   :  { %3798 = vmatpush1.bf16.msra.mxu0 %v3797_v7  ;;  %3922 = vmatpush1.bf16.msra.mxu1 %v3921_v8  ;;  %v994_v7 = vld [vmem:[%s9135_s1 + $0x1e68] sm:$0xff]  ;;  %v1015_v8 = vld [vmem:[%s9135_s1 + $0x1f10] sm:$0xff] }
  0xca   :  { %3800 = vmatprep.subr.bf16.mxu0 %v3799_v9  ;;  %3924 = vmatprep.subr.bf16.mxu1 %v3923_v14  ;;  %v3817_v9 = vpack.c.bf16 %v970_v1, %v949_v0  ;;  %v1012_v14 = vld [vmem:[%s9135_s1 + $0x1ef8] sm:$0xff]  ;;  %v3943_v16 = vpack.c.bf16 %v1015_v8, %v994_v7  ;;  %v3957_v0 = vpack.c.bf16 %v1140_v57, %v1119_v55  ;;  %v1202_v7 = vld [vmem:[%s9135_s1 + $0x24e8] sm:$0xff]  ;;  %v1223_v8 = vld [vmem:[%s9135_s1 + $0x2590] sm:$0xff] }
  0xcb   :  { %v3835_v1 = vpack.c.bf16 %v1181_v59, %v1160_v58  ;;  %v32_v55 = vld [vmem:[%s9135_s1 + $0x58] sm:$0xff]  ;;  %v29_v57 = vld [vmem:[%s9135_s1 + $0x40] sm:$0xff]  ;;  %v50_v58 = vld [vmem:[%s9135_s1 + $0xe8] sm:$0xff] }
  0xcc   :  { %v31_v59 = vld [vmem:[%s9135_s1 + $0x50] sm:$0xff] }
  0xcd   :  { %3802 = vmatpush1.bf16.msra.mxu0 %v3801_v20  ;;  %3926 = vmatpush1.bf16.msra.mxu1 %v3925_v21  ;;  %v1036_v20 = vld [vmem:[%s9135_s1 + $0x1fb8] sm:$0xff]  ;;  %v1057_v21 = vld [vmem:[%s9135_s1 + $0x2060] sm:$0xff] }
  0xce   :  { %3804 = vmatprep.subr.bf16.mxu0 %v3803_v22  ;;  %3928 = vmatprep.subr.bf16.mxu1 %v3927_v28  ;;  %v3821_v22 = vpack.c.bf16 %v1012_v14, %v991_v13  ;;  %v1054_v28 = vld [vmem:[%s9135_s1 + $0x2048] sm:$0xff]  ;;  %v3947_v30 = vpack.c.bf16 %v1057_v21, %v1036_v20  ;;  %v3961_v13 = vpack.c.bf16 %v1182_v6, %v1161_v4  ;;  %v1244_v20 = vld [vmem:[%s9135_s1 + $0x2638] sm:$0xff]  ;;  %v1265_v21 = vld [vmem:[%s9135_s1 + $0x26e0] sm:$0xff] }
  0xcf   :  { %v3839_v14 = vpack.c.bf16 %v1223_v8, %v1202_v7  ;;  %v71_v8 = vld [vmem:[%s9135_s1 + $0x190] sm:$0xff] }
  0xd1   :  { %3806 = vmatpush1.bf16.msra.mxu0 %v3805_v35  ;;  %3930 = vmatpush1.bf16.msra.mxu1 %v3929_v36  ;;  %v1078_v35 = vld [vmem:[%s9135_s1 + $0x2108] sm:$0xff]  ;;  %v1099_v36 = vld [vmem:[%s9135_s1 + $0x21b0] sm:$0xff] }
  0xd2   :  { %3808 = vmatprep.subr.bf16.mxu0 %v3807_v37  ;;  %3932 = vmatprep.subr.bf16.mxu1 %v3931_v42  ;;  %v3825_v37 = vpack.c.bf16 %v1054_v28, %v1033_v27  ;;  %v1096_v42 = vld [vmem:[%s9135_s1 + $0x2198] sm:$0xff]  ;;  %v3951_v44 = vpack.c.bf16 %v1099_v36, %v1078_v35  ;;  %v3965_v27 = vpack.c.bf16 %v1224_v19, %v1203_v17  ;;  %v1286_v35 = vld [vmem:[%s9135_s1 + $0x2788] sm:$0xff]  ;;  %v1307_v36 = vld [vmem:[%s9135_s1 + $0x2830] sm:$0xff] }
  0xd3   :  { %v3843_v28 = vpack.c.bf16 %v1265_v21, %v1244_v20  ;;  %v137_v17 = vld [vmem:[%s9135_s1 + $0x3a0] sm:$0xff] }
  0xd4   :  { %v113_v21 = vld [vmem:[%s9135_s1 + $0x2e0] sm:$0xff] }
  0xd5   :  { %3810 = vmatpush1.bf16.msra.mxu0 %v3809_v48  ;;  %3934 = vmatpush1.bf16.msra.mxu1 %v3933_v49  ;;  %v1120_v48 = vld [vmem:[%s9135_s1 + $0x2258] sm:$0xff]  ;;  %v1141_v49 = vld [vmem:[%s9135_s1 + $0x2300] sm:$0xff] }
  0xd6   :  { %3812 = vmatprep.subr.bf16.mxu0 %v3811_v50  ;;  %3936 = vmatprep.subr.bf16.mxu1 %v3935_v54  ;;  %v3829_v50 = vpack.c.bf16 %v1096_v42, %v1075_v41  ;;  %v1138_v54 = vld [vmem:[%s9135_s1 + $0x22e8] sm:$0xff]  ;;  %v3955_v56 = vpack.c.bf16 %v1141_v49, %v1120_v48  ;;  %v3969_v41 = vpack.c.bf16 %v1266_v34, %v1245_v31  ;;  %v179_v31 = vld [vmem:[%s9135_s1 + $0x4f0] sm:$0xff] }
  0xd7   :  { %v3847_v42 = vpack.c.bf16 %v1307_v36, %v1286_v35  ;;  %v3973_v49 = vpack.c.bf16 %v1308_v47, %v1287_v46  ;;  %v155_v36 = vld [vmem:[%s9135_s1 + $0x430] sm:$0xff] }
  0xd9   :  { %3814 = vmatpush1.bf16.msra.mxu0 %v3813_v60  ;;  %3938 = vmatpush1.bf16.msra.mxu1 %v3937_v62  ;;  %v1162_v60 = vld [vmem:[%s9135_s1 + $0x23a8] sm:$0xff]  ;;  %v1183_v62 = vld [vmem:[%s9135_s1 + $0x2450] sm:$0xff] }
  0xda   :  { %3816 = vmatprep.subr.bf16.mxu0 %v3815_v63  ;;  %3940 = vmatprep.subr.bf16.mxu1 %v3939_v3  ;;  %v3833_v63 = vpack.c.bf16 %v1138_v54, %v1117_v53  ;;  %v1180_v3 = vld [vmem:[%s9135_s1 + $0x2438] sm:$0xff]  ;;  %v3959_v5 = vpack.c.bf16 %v1183_v62, %v1162_v60  ;;  %v1327_v53 = vld [vmem:[%s9135_s1 + $0x28d0] sm:$0xff] }
  0xdb   :  { %v51_v54 = vld [vmem:[%s9135_s1 + $0xf0] sm:$0xff]  ;;  %v52_v60 = vld [vmem:[%s9135_s1 + $0xf8] sm:$0xff] }
  0xdc   :  { %v72_v62 = vld [vmem:[%s9135_s1 + $0x198] sm:$0xff]  ;;  %v4101_v6 = vpack.c.bf16 %v52_v60, %v31_v59 }
  0xdd   :  { %3818 = vmatpush1.bf16.msra.mxu0 %v3817_v9  ;;  %3942 = vmatpush1.bf16.msra.mxu1 %v3941_v10  ;;  %v1204_v9 = vld [vmem:[%s9135_s1 + $0x24f8] sm:$0xff]  ;;  %v1225_v10 = vld [vmem:[%s9135_s1 + $0x25a0] sm:$0xff] }
  0xde   :  { %3820 = vmatprep.subr.bf16.mxu0 %v3819_v12  ;;  %3944 = vmatprep.subr.bf16.mxu1 %v3943_v16  ;;  %v3837_v12 = vpack.c.bf16 %v1180_v3, %v1159_v2  ;;  %v1222_v16 = vld [vmem:[%s9135_s1 + $0x2588] sm:$0xff]  ;;  %v3963_v18 = vpack.c.bf16 %v1225_v10, %v1204_v9  ;;  %v95_v3 = vld [vmem:[%s9135_s1 + $0x250] sm:$0xff]  ;;  %v92_v9 = vld [vmem:[%s9135_s1 + $0x238] sm:$0xff] }
  0xdf   :  { %v74_v2 = vld [vmem:[%s9135_s1 + $0x1a8] sm:$0xff]  ;;  %v73_v10 = vld [vmem:[%s9135_s1 + $0x1a0] sm:$0xff] }
  0xe1   :  { %3822 = vmatpush1.bf16.msra.mxu0 %v3821_v22  ;;  %3946 = vmatpush1.bf16.msra.mxu1 %v3945_v23  ;;  %v1246_v22 = vld [vmem:[%s9135_s1 + $0x2648] sm:$0xff]  ;;  %v1267_v23 = vld [vmem:[%s9135_s1 + $0x26f0] sm:$0xff] }
  0xe2   :  { %3824 = vmatprep.subr.bf16.mxu0 %v3823_v26  ;;  %3948 = vmatprep.subr.bf16.mxu1 %v3947_v30  ;;  %v3841_v26 = vpack.c.bf16 %v1222_v16, %v1201_v15  ;;  %v1264_v30 = vld [vmem:[%s9135_s1 + $0x26d8] sm:$0xff]  ;;  %v3967_v33 = vpack.c.bf16 %v1267_v23, %v1246_v22  ;;  %v135_v15 = vld [vmem:[%s9135_s1 + $0x390] sm:$0xff]  ;;  %v134_v22 = vld [vmem:[%s9135_s1 + $0x388] sm:$0xff] }
  0xe3   :  { %v116_v16 = vld [vmem:[%s9135_s1 + $0x2f8] sm:$0xff]  ;;  %v115_v23 = vld [vmem:[%s9135_s1 + $0x2f0] sm:$0xff] }
  0xe5   :  { %3826 = vmatpush1.bf16.msra.mxu0 %v3825_v37  ;;  %3950 = vmatpush1.bf16.msra.mxu1 %v3949_v38  ;;  %v1288_v37 = vld [vmem:[%s9135_s1 + $0x2798] sm:$0xff]  ;;  %v1309_v38 = vld [vmem:[%s9135_s1 + $0x2840] sm:$0xff] }
  0xe6   :  { %3828 = vmatprep.subr.bf16.mxu0 %v3827_v40  ;;  %3952 = vmatprep.subr.bf16.mxu1 %v3951_v44  ;;  %v3845_v40 = vpack.c.bf16 %v1264_v30, %v1243_v29  ;;  %v1306_v44 = vld [vmem:[%s9135_s1 + $0x2828] sm:$0xff]  ;;  %v3971_v45 = vpack.c.bf16 %v1309_v38, %v1288_v37  ;;  %v177_v29 = vld [vmem:[%s9135_s1 + $0x4e0] sm:$0xff]  ;;  %v176_v37 = vld [vmem:[%s9135_s1 + $0x4d8] sm:$0xff] }
  0xe7   :  { %v3849_v48 = vpack.c.bf16 %v1306_v44, %v1285_v43  ;;  %v158_v30 = vld [vmem:[%s9135_s1 + $0x448] sm:$0xff]  ;;  %v157_v38 = vld [vmem:[%s9135_s1 + $0x440] sm:$0xff]  ;;  %v219_v43 = vld [vmem:[%s9135_s1 + $0x630] sm:$0xff]  ;;  %v3989_v46 = vpack.c.bf16 %v176_v37, %v155_v36 }
  0xe8   :  { %v200_v44 = vld [vmem:[%s9135_s1 + $0x598] sm:$0xff] }
  0xe9   :  { %3830 = vmatpush1.bf16.msra.mxu0 %v3829_v50  ;;  %3954 = vmatpush1.bf16.msra.mxu1 %v3953_v51  ;;  %v1328_v50 = vld [vmem:[%s9135_s1 + $0x28d8] sm:$0xff]  ;;  %v1330_v51 = vld [vmem:[%s9135_s1 + $0x28e8] sm:$0xff] }
  0xea   :  { %3832 = vmatprep.subr.bf16.mxu0 %v3831_v52  ;;  %3956 = vmatprep.subr.bf16.mxu1 %v3955_v56  ;;  %v30_v52 = vld [vmem:[%s9135_s1 + $0x48] sm:$0xff]  ;;  %v53_v56 = vld [vmem:[%s9135_s1 + $0x100] sm:$0xff] }
  0xeb   :  { %v4099_v4 = vpack.c.bf16 %v53_v56, %v32_v55  ;;  %v261_v55 = vld [vmem:[%s9135_s1 + $0x780] sm:$0xff]  ;;  %v242_v56 = vld [vmem:[%s9135_s1 + $0x6e8] sm:$0xff] }
  0xed   :  { %3834 = vmatpush1.bf16.msra.mxu0 %v3833_v63  ;;  %3958 = vmatpush1.bf16.msra.mxu1 %v3957_v0  ;;  %v93_v63 = vld [vmem:[%s9135_s1 + $0x240] sm:$0xff] }
  0xee   :  { %3836 = vmatprep.subr.bf16.mxu0 %v3835_v1  ;;  %3960 = vmatprep.subr.bf16.mxu1 %v3959_v5  ;;  %v1329_v0 = vld [vmem:[%s9135_s1 + $0x28e0] sm:$0xff]  ;;  %v3975_v1 = vpack.c.bf16 %v51_v54, %v30_v52  ;;  %v3977_v5 = vpack.c.bf16 %v50_v58, %v29_v57  ;;  %v3979_v7 = vpack.c.bf16 %v93_v63, %v72_v62  ;;  %v240_v54 = vld [vmem:[%s9135_s1 + $0x6d8] sm:$0xff]  ;;  %v263_v57 = vld [vmem:[%s9135_s1 + $0x790] sm:$0xff] }
  0xef   :  { %v3995_v60 = vpack.c.bf16 %v261_v55, %v240_v54  ;;  %v239_v62 = vld [vmem:[%s9135_s1 + $0x6d0] sm:$0xff]  ;;  %v260_v63 = vld [vmem:[%s9135_s1 + $0x778] sm:$0xff]  ;;  %v430_v55 = vld [vmem:[%s9135_s1 + $0xcc8] sm:$0xff] }
  0xf1   :  { %3838 = vmatpush1.bf16.msra.mxu0 %v3837_v12  ;;  %3962 = vmatpush1.bf16.msra.mxu1 %v3961_v13  ;;  %v4103_v12 = vpack.c.bf16 %v95_v3, %v74_v2  ;;  %v94_v13 = vld [vmem:[%s9135_s1 + $0x248] sm:$0xff] }
  0xf2   :  { %3840 = vmatprep.subr.bf16.mxu0 %v3839_v14  ;;  %3964 = vmatprep.subr.bf16.mxu1 %v3963_v18  ;;  %v114_v14 = vld [vmem:[%s9135_s1 + $0x2e8] sm:$0xff]  ;;  %v3981_v18 = vpack.c.bf16 %v92_v9, %v71_v8  ;;  %v4105_v19 = vpack.c.bf16 %v94_v13, %v73_v10  ;;  %v281_v10 = vld [vmem:[%s9135_s1 + $0x820] sm:$0xff]  ;;  %v283_v13 = vld [vmem:[%s9135_s1 + $0x830] sm:$0xff] }
  0xf3   :  { %v3983_v20 = vpack.c.bf16 %v135_v15, %v114_v14  ;;  %v262_v2 = vld [vmem:[%s9135_s1 + $0x788] sm:$0xff]  ;;  %v304_v15 = vld [vmem:[%s9135_s1 + $0x8d8] sm:$0xff] }
  0xf4   :  { %v282_v3 = vld [vmem:[%s9135_s1 + $0x828] sm:$0xff] }
  0xf5   :  { %3842 = vmatpush1.bf16.msra.mxu0 %v3841_v26  ;;  %3966 = vmatpush1.bf16.msra.mxu1 %v3965_v27  ;;  %v4107_v26 = vpack.c.bf16 %v137_v17, %v116_v16  ;;  %v136_v27 = vld [vmem:[%s9135_s1 + $0x398] sm:$0xff]  ;;  %v345_v17 = vld [vmem:[%s9135_s1 + $0xa20] sm:$0xff] }
  0xf6   :  { %3844 = vmatprep.subr.bf16.mxu0 %v3843_v28  ;;  %3968 = vmatprep.subr.bf16.mxu1 %v3967_v33  ;;  %v156_v28 = vld [vmem:[%s9135_s1 + $0x438] sm:$0xff]  ;;  %v3985_v33 = vpack.c.bf16 %v134_v22, %v113_v21  ;;  %v4109_v34 = vpack.c.bf16 %v136_v27, %v115_v23  ;;  %v4125_v21 = vpack.c.bf16 %v304_v15, %v283_v13  ;;  %v323_v23 = vld [vmem:[%s9135_s1 + $0x970] sm:$0xff]  ;;  %v325_v27 = vld [vmem:[%s9135_s1 + $0x980] sm:$0xff] }
  0xf7   :  { %v3987_v35 = vpack.c.bf16 %v177_v29, %v156_v28  ;;  %v324_v16 = vld [vmem:[%s9135_s1 + $0x978] sm:$0xff]  ;;  %v346_v29 = vld [vmem:[%s9135_s1 + $0xa28] sm:$0xff]  ;;  %v491_v13 = vld [vmem:[%s9135_s1 + $0xeb0] sm:$0xff] }
  0xf8   :  { %v4003_v22 = vpack.c.bf16 %v345_v17, %v324_v16  ;;  %v4129_v36 = vpack.c.bf16 %v346_v29, %v325_v27  ;;  %v493_v15 = vld [vmem:[%s9135_s1 + $0xec0] sm:$0xff]  ;;  %v514_v17 = vld [vmem:[%s9135_s1 + $0xf68] sm:$0xff]  ;;  %v535_v29 = vld [vmem:[%s9135_s1 + $0x1010] sm:$0xff] }
  0xf9   :  { %3846 = vmatpush1.bf16.msra.mxu0 %v3845_v40  ;;  %3970 = vmatpush1.bf16.msra.mxu1 %v3969_v41  ;;  %v4111_v40 = vpack.c.bf16 %v179_v31, %v158_v30  ;;  %v178_v41 = vld [vmem:[%s9135_s1 + $0x4e8] sm:$0xff]  ;;  %v387_v31 = vld [vmem:[%s9135_s1 + $0xb70] sm:$0xff]  ;;  %v533_v27 = vld [vmem:[%s9135_s1 + $0x1000] sm:$0xff] }
  0xfa   :  { %3848 = vmatprep.subr.bf16.mxu0 %v3847_v42  ;;  %3972 = vmatprep.subr.bf16.mxu1 %v3971_v45  ;;  %v198_v42 = vld [vmem:[%s9135_s1 + $0x588] sm:$0xff]  ;;  %v221_v45 = vld [vmem:[%s9135_s1 + $0x640] sm:$0xff]  ;;  %v4113_v47 = vpack.c.bf16 %v178_v41, %v157_v38  ;;  %v367_v41 = vld [vmem:[%s9135_s1 + $0xad0] sm:$0xff] }
  0xfb   :  { %v4115_v52 = vpack.c.bf16 %v221_v45, %v200_v44  ;;  %v366_v30 = vld [vmem:[%s9135_s1 + $0xac8] sm:$0xff]  ;;  %v365_v38 = vld [vmem:[%s9135_s1 + $0xac0] sm:$0xff]  ;;  %v408_v44 = vld [vmem:[%s9135_s1 + $0xc18] sm:$0xff] }
  0xfc   :  { %v4007_v37 = vpack.c.bf16 %v387_v31, %v366_v30  ;;  %v429_v45 = vld [vmem:[%s9135_s1 + $0xcc0] sm:$0xff]  ;;  %v556_v31 = vld [vmem:[%s9135_s1 + $0x10b8] sm:$0xff] }
  0xfd   :  { %3850 = vmatpush1.bf16.msra.mxu0 %v3849_v48  ;;  %3974 = vmatpush1.bf16.msra.mxu1 %v3973_v49  ;;  %v3991_v48 = vpack.c.bf16 %v219_v43, %v198_v42  ;;  %v197_v49 = vld [vmem:[%s9135_s1 + $0x580] sm:$0xff]  ;;  %v388_v43 = vld [vmem:[%s9135_s1 + $0xb78] sm:$0xff] }
  0xfe   :  { %1894 = vmatprep.subr.mxu0 %v1328_v50  ;;  %2036 = vmatprep.subr.mxu1 %v1330_v51  ;;  %v218_v50 = vld [vmem:[%s9135_s1 + $0x628] sm:$0xff]  ;;  %v199_v51 = vld [vmem:[%s9135_s1 + $0x590] sm:$0xff] }
  0xff   :  { %v3993_v58 = vpack.c.bf16 %v218_v50, %v197_v49  ;;  %v4133_v49 = vpack.c.bf16 %v388_v43, %v367_v41  ;;  %v4011_v50 = vpack.c.bf16 %v429_v45, %v408_v44  ;;  %v575_v41 = vld [vmem:[%s9135_s1 + $0x1150] sm:$0xff]  ;;  %v577_v43 = vld [vmem:[%s9135_s1 + $0x1160] sm:$0xff]  ;;  %v598_v45 = vld [vmem:[%s9135_s1 + $0x1208] sm:$0xff] }
 0x101   :  { %1895 = vmatpush1.msra.mxu0 %v1327_v53  ;;  %2037 = vmatpush1.msra.mxu1 %v1329_v0  ;;  %v220_v53 = vld [vmem:[%s9135_s1 + $0x638] sm:$0xff]  ;;  %v241_v0 = vld [vmem:[%s9135_s1 + $0x6e0] sm:$0xff] }
 0x102   :  { %1899 = vmatmul.mubr.f32.vlgmr.msra.gmra.mrb[2].mxu0 %v5313_v24  ;;  %2041 = vmatmul.mubr.f32.vlgmr.msra.gmra.mrb[2].mxu1 %v5313_v24  ;;  %v4117_v59 = vpack.c.bf16 %v220_v53, %v199_v51  ;;  %v4121_v8 = vpack.c.bf16 %v262_v2, %v241_v0  ;;  %v407_v51 = vld [vmem:[%s9135_s1 + $0xc10] sm:$0xff]  ;;  %v409_v53 = vld [vmem:[%s9135_s1 + $0xc20] sm:$0xff] }
 0x103   :  { %3976 = vmatprep.subr.bf16.mxu0 %v3975_v1  ;;  %4100 = vmatprep.subr.bf16.mxu1 %v4099_v4  ;;  %v4119_v1 = vpack.c.bf16 %v263_v57, %v242_v56  ;;  %v303_v4 = vld [vmem:[%s9135_s1 + $0x8d0] sm:$0xff]  ;;  %v450_v56 = vld [vmem:[%s9135_s1 + $0xd68] sm:$0xff]  ;;  %v449_v0 = vld [vmem:[%s9135_s1 + $0xd60] sm:$0xff] }
 0x104   :  { %3978 = vmatpush1.bf16.msra.mxu0 %v3977_v5  ;;  %4102 = vmatpush1.bf16.msra.mxu1 %v4101_v6  ;;  %v284_v5 = vld [vmem:[%s9135_s1 + $0x838] sm:$0xff]  ;;  %v305_v6 = vld [vmem:[%s9135_s1 + $0x8e0] sm:$0xff]  ;;  %v3999_v9 = vpack.c.bf16 %v303_v4, %v282_v3  ;;  %v471_v57 = vld [vmem:[%s9135_s1 + $0xe10] sm:$0xff] }
 0x105   :  { %3980 = vmatprep.subr.bf16.mxu0 %v3979_v7  ;;  %4104 = vmatprep.subr.bf16.mxu1 %v4103_v12  ;;  %v3997_v7 = vpack.c.bf16 %v260_v63, %v239_v62  ;;  %v302_v12 = vld [vmem:[%s9135_s1 + $0x8c8] sm:$0xff]  ;;  %v4123_v14 = vpack.c.bf16 %v305_v6, %v284_v5  ;;  %v4137_v62 = vpack.c.bf16 %v430_v55, %v409_v53  ;;  %v451_v2 = vld [vmem:[%s9135_s1 + $0xd70] sm:$0xff]  ;;  %v472_v4 = vld [vmem:[%s9135_s1 + $0xe18] sm:$0xff] }
 0x106   :  { %2111 = vmatprep.mubr.f32.mxu0 %v5201_v32  ;;  %2253 = vmatprep.mubr.f32.mxu1 %v5201_v32  ;;  %v4015_v63 = vpack.c.bf16 %v471_v57, %v450_v56  ;;  %v492_v5 = vld [vmem:[%s9135_s1 + $0xeb8] sm:$0xff]  ;;  %v513_v6 = vld [vmem:[%s9135_s1 + $0xf60] sm:$0xff]  ;;  %v619_v55 = vld [vmem:[%s9135_s1 + $0x12b0] sm:$0xff] }
 0x107   :  { %v617_v53 = vld [vmem:[%s9135_s1 + $0x12a0] sm:$0xff]  ;;  %v640_v57 = vld [vmem:[%s9135_s1 + $0x1358] sm:$0xff] }
 0x108   :  { %3982 = vmatpush1.bf16.msra.mxu0 %v3981_v18  ;;  %4106 = vmatpush1.bf16.msra.mxu1 %v4105_v19  ;;  %v326_v18 = vld [vmem:[%s9135_s1 + $0x988] sm:$0xff]  ;;  %v347_v19 = vld [vmem:[%s9135_s1 + $0xa30] sm:$0xff] }
 0x109   :  { %3984 = vmatprep.subr.bf16.mxu0 %v3983_v20  ;;  %4108 = vmatprep.subr.bf16.mxu1 %v4107_v26  ;;  %v4001_v20 = vpack.c.bf16 %v302_v12, %v281_v10  ;;  %v344_v26 = vld [vmem:[%s9135_s1 + $0xa18] sm:$0xff]  ;;  %v4127_v28 = vpack.c.bf16 %v347_v19, %v326_v18  ;;  %v4141_v10 = vpack.c.bf16 %v472_v4, %v451_v2  ;;  %v534_v18 = vld [vmem:[%s9135_s1 + $0x1008] sm:$0xff]  ;;  %v555_v19 = vld [vmem:[%s9135_s1 + $0x10b0] sm:$0xff] }
 0x10a   :  { %v4019_v12 = vpack.c.bf16 %v513_v6, %v492_v5  ;;  %v659_v2 = vld [vmem:[%s9135_s1 + $0x13f0] sm:$0xff]  ;;  %v661_v4 = vld [vmem:[%s9135_s1 + $0x1400] sm:$0xff]  ;;  %v682_v6 = vld [vmem:[%s9135_s1 + $0x14a8] sm:$0xff] }
 0x10c   :  { %3986 = vmatpush1.bf16.msra.mxu0 %v3985_v33  ;;  %4110 = vmatpush1.bf16.msra.mxu1 %v4109_v34  ;;  %v368_v33 = vld [vmem:[%s9135_s1 + $0xad8] sm:$0xff]  ;;  %v389_v34 = vld [vmem:[%s9135_s1 + $0xb80] sm:$0xff] }
 0x10d   :  { %3988 = vmatprep.subr.bf16.mxu0 %v3987_v35  ;;  %4112 = vmatprep.subr.bf16.mxu1 %v4111_v40  ;;  %v4005_v35 = vpack.c.bf16 %v344_v26, %v323_v23  ;;  %v386_v40 = vld [vmem:[%s9135_s1 + $0xb68] sm:$0xff]  ;;  %v4131_v42 = vpack.c.bf16 %v389_v34, %v368_v33  ;;  %v4145_v23 = vpack.c.bf16 %v514_v17, %v493_v15  ;;  %v576_v33 = vld [vmem:[%s9135_s1 + $0x1158] sm:$0xff]  ;;  %v597_v34 = vld [vmem:[%s9135_s1 + $0x1200] sm:$0xff] }
 0x10e   :  { %v4023_v26 = vpack.c.bf16 %v555_v19, %v534_v18  ;;  %v701_v15 = vld [vmem:[%s9135_s1 + $0x1540] sm:$0xff]  ;;  %v703_v17 = vld [vmem:[%s9135_s1 + $0x1550] sm:$0xff]  ;;  %v724_v19 = vld [vmem:[%s9135_s1 + $0x15f8] sm:$0xff] }
 0x110   :  { %3990 = vmatpush1.bf16.msra.mxu0 %v3989_v46  ;;  %4114 = vmatpush1.bf16.msra.mxu1 %v4113_v47  ;;  %v410_v46 = vld [vmem:[%s9135_s1 + $0xc28] sm:$0xff]  ;;  %v431_v47 = vld [vmem:[%s9135_s1 + $0xcd0] sm:$0xff] }
 0x111   :  { %3992 = vmatprep.subr.bf16.mxu0 %v3991_v48  ;;  %4116 = vmatprep.subr.bf16.mxu1 %v4115_v52  ;;  %v4009_v48 = vpack.c.bf16 %v386_v40, %v365_v38  ;;  %v428_v52 = vld [vmem:[%s9135_s1 + $0xcb8] sm:$0xff]  ;;  %v4135_v54 = vpack.c.bf16 %v431_v47, %v410_v46  ;;  %v4149_v38 = vpack.c.bf16 %v556_v31, %v535_v29  ;;  %v618_v46 = vld [vmem:[%s9135_s1 + $0x12a8] sm:$0xff]  ;;  %v639_v47 = vld [vmem:[%s9135_s1 + $0x1350] sm:$0xff] }
 0x112   :  { %v4027_v40 = vpack.c.bf16 %v597_v34, %v576_v33  ;;  %v743_v29 = vld [vmem:[%s9135_s1 + $0x1690] sm:$0xff]  ;;  %v745_v31 = vld [vmem:[%s9135_s1 + $0x16a0] sm:$0xff]  ;;  %v766_v34 = vld [vmem:[%s9135_s1 + $0x1748] sm:$0xff] }
 0x114   :  { %3994 = vmatpush1.bf16.msra.mxu0 %v3993_v58  ;;  %4118 = vmatpush1.bf16.msra.mxu1 %v4117_v59  ;;  %v452_v58 = vld [vmem:[%s9135_s1 + $0xd78] sm:$0xff]  ;;  %v473_v59 = vld [vmem:[%s9135_s1 + $0xe20] sm:$0xff] }
 0x115   :  { %3996 = vmatprep.subr.bf16.mxu0 %v3995_v60  ;;  %4120 = vmatprep.subr.bf16.mxu1 %v4119_v1  ;;  %v4013_v60 = vpack.c.bf16 %v428_v52, %v407_v51  ;;  %v470_v1 = vld [vmem:[%s9135_s1 + $0xe08] sm:$0xff]  ;;  %v4139_v3 = vpack.c.bf16 %v473_v59, %v452_v58  ;;  %v4153_v51 = vpack.c.bf16 %v598_v45, %v577_v43  ;;  %v660_v58 = vld [vmem:[%s9135_s1 + $0x13f8] sm:$0xff]  ;;  %v681_v59 = vld [vmem:[%s9135_s1 + $0x14a0] sm:$0xff] }
 0x116   :  { %v4031_v52 = vpack.c.bf16 %v639_v47, %v618_v46  ;;  %v785_v43 = vld [vmem:[%s9135_s1 + $0x17e0] sm:$0xff]  ;;  %v787_v45 = vld [vmem:[%s9135_s1 + $0x17f0] sm:$0xff]  ;;  %v808_v47 = vld [vmem:[%s9135_s1 + $0x1898] sm:$0xff] }
 0x118   :  { %3998 = vmatpush1.bf16.msra.mxu0 %v3997_v7  ;;  %4122 = vmatpush1.bf16.msra.mxu1 %v4121_v8  ;;  %v494_v7 = vld [vmem:[%s9135_s1 + $0xec8] sm:$0xff]  ;;  %v515_v8 = vld [vmem:[%s9135_s1 + $0xf70] sm:$0xff] }
 0x119   :  { %4000 = vmatprep.subr.bf16.mxu0 %v3999_v9  ;;  %4124 = vmatprep.subr.bf16.mxu1 %v4123_v14  ;;  %v4017_v9 = vpack.c.bf16 %v470_v1, %v449_v0  ;;  %v512_v14 = vld [vmem:[%s9135_s1 + $0xf58] sm:$0xff]  ;;  %v4143_v16 = vpack.c.bf16 %v515_v8, %v494_v7  ;;  %v4157_v0 = vpack.c.bf16 %v640_v57, %v619_v55  ;;  %v702_v7 = vld [vmem:[%s9135_s1 + $0x1548] sm:$0xff]  ;;  %v723_v8 = vld [vmem:[%s9135_s1 + $0x15f0] sm:$0xff] }
 0x11a   :  { %v4035_v1 = vpack.c.bf16 %v681_v59, %v660_v58  ;;  %v827_v55 = vld [vmem:[%s9135_s1 + $0x1930] sm:$0xff]  ;;  %v829_v57 = vld [vmem:[%s9135_s1 + $0x1940] sm:$0xff]  ;;  %v850_v59 = vld [vmem:[%s9135_s1 + $0x19e8] sm:$0xff] }
 0x11c   :  { %4002 = vmatpush1.bf16.msra.mxu0 %v4001_v20  ;;  %4126 = vmatpush1.bf16.msra.mxu1 %v4125_v21  ;;  %v536_v20 = vld [vmem:[%s9135_s1 + $0x1018] sm:$0xff]  ;;  %v557_v21 = vld [vmem:[%s9135_s1 + $0x10c0] sm:$0xff] }
 0x11d   :  { %4004 = vmatprep.subr.bf16.mxu0 %v4003_v22  ;;  %4128 = vmatprep.subr.bf16.mxu1 %v4127_v28  ;;  %v4021_v22 = vpack.c.bf16 %v512_v14, %v491_v13  ;;  %v554_v28 = vld [vmem:[%s9135_s1 + $0x10a8] sm:$0xff]  ;;  %v4147_v30 = vpack.c.bf16 %v557_v21, %v536_v20  ;;  %v4161_v13 = vpack.c.bf16 %v682_v6, %v661_v4  ;;  %v744_v20 = vld [vmem:[%s9135_s1 + $0x1698] sm:$0xff]  ;;  %v765_v21 = vld [vmem:[%s9135_s1 + $0x1740] sm:$0xff] }
 0x11e   :  { %v4039_v14 = vpack.c.bf16 %v723_v8, %v702_v7  ;;  %v869_v4 = vld [vmem:[%s9135_s1 + $0x1a80] sm:$0xff]  ;;  %v871_v6 = vld [vmem:[%s9135_s1 + $0x1a90] sm:$0xff]  ;;  %v892_v8 = vld [vmem:[%s9135_s1 + $0x1b38] sm:$0xff] }
 0x120   :  { %4006 = vmatpush1.bf16.msra.mxu0 %v4005_v35  ;;  %4130 = vmatpush1.bf16.msra.mxu1 %v4129_v36  ;;  %v578_v35 = vld [vmem:[%s9135_s1 + $0x1168] sm:$0xff]  ;;  %v599_v36 = vld [vmem:[%s9135_s1 + $0x1210] sm:$0xff] }
 0x121   :  { %4008 = vmatprep.subr.bf16.mxu0 %v4007_v37  ;;  %4132 = vmatprep.subr.bf16.mxu1 %v4131_v42  ;;  %v4025_v37 = vpack.c.bf16 %v554_v28, %v533_v27  ;;  %v596_v42 = vld [vmem:[%s9135_s1 + $0x11f8] sm:$0xff]  ;;  %v4151_v44 = vpack.c.bf16 %v599_v36, %v578_v35  ;;  %v4165_v27 = vpack.c.bf16 %v724_v19, %v703_v17  ;;  %v786_v35 = vld [vmem:[%s9135_s1 + $0x17e8] sm:$0xff]  ;;  %v807_v36 = vld [vmem:[%s9135_s1 + $0x1890] sm:$0xff] }
 0x122   :  { %v4043_v28 = vpack.c.bf16 %v765_v21, %v744_v20  ;;  %v1344_v17 = vld [vmem:[%s9137_s2] sm:$0xff]  ;;  %v6979_v20 = vsub.s32 1, %v5128_v61  ;;  %v4181_v21 = vpack.c.bf16 %v892_v8, %v871_v6 }
 0x123   :  { %v6976_v19 = vld [vmem:[%s9139_s4] sm:$0xff] }
 0x124   :  { %4010 = vmatpush1.bf16.msra.mxu0 %v4009_v48  ;;  %4134 = vmatpush1.bf16.msra.mxu1 %v4133_v49  ;;  %v620_v48 = vld [vmem:[%s9135_s1 + $0x12b8] sm:$0xff]  ;;  %v641_v49 = vld [vmem:[%s9135_s1 + $0x1360] sm:$0xff] }
 0x125   :  { %4012 = vmatprep.subr.bf16.mxu0 %v4011_v50  ;;  %4136 = vmatprep.subr.bf16.mxu1 %v4135_v54  ;;  %v4029_v50 = vpack.c.bf16 %v596_v42, %v575_v41  ;;  %v638_v54 = vld [vmem:[%s9135_s1 + $0x1348] sm:$0xff]  ;;  %v4155_v56 = vpack.c.bf16 %v641_v49, %v620_v48  ;;  %v4169_v41 = vpack.c.bf16 %v766_v34, %v745_v31  ;;  %v828_v48 = vld [vmem:[%s9135_s1 + $0x1938] sm:$0xff]  ;;  %v849_v49 = vld [vmem:[%s9135_s1 + $0x19e0] sm:$0xff] }
 0x126   :  { %v4047_v42 = vpack.c.bf16 %v807_v36, %v786_v35  ;;  %v954_v31 = vld [vmem:[%s9135_s1 + $0x1d28] sm:$0xff]  ;;  %v956_v36 = vld [vmem:[%s9135_s1 + $0x1d38] sm:$0xff] }
 0x128   :  { %4014 = vmatpush1.bf16.msra.mxu0 %v4013_v60  ;;  %4138 = vmatpush1.bf16.msra.mxu1 %v4137_v62  ;;  %v662_v60 = vld [vmem:[%s9135_s1 + $0x1408] sm:$0xff]  ;;  %v683_v62 = vld [vmem:[%s9135_s1 + $0x14b0] sm:$0xff] }
 0x129   :  { %4016 = vmatprep.subr.bf16.mxu0 %v4015_v63  ;;  %4140 = vmatprep.subr.bf16.mxu1 %v4139_v3  ;;  %v4033_v63 = vpack.c.bf16 %v638_v54, %v617_v53  ;;  %v680_v3 = vld [vmem:[%s9135_s1 + $0x1498] sm:$0xff]  ;;  %v4159_v5 = vpack.c.bf16 %v683_v62, %v662_v60  ;;  %v4173_v53 = vpack.c.bf16 %v808_v47, %v787_v45  ;;  %v870_v60 = vld [vmem:[%s9135_s1 + $0x1a88] sm:$0xff]  ;;  %v891_v62 = vld [vmem:[%s9135_s1 + $0x1b30] sm:$0xff] }
 0x12a   :  { %v4051_v54 = vpack.c.bf16 %v849_v49, %v828_v48  ;;  %v974_v47 = vld [vmem:[%s9135_s1 + $0x1dc8] sm:$0xff]  ;;  %v955_v48 = vld [vmem:[%s9135_s1 + $0x1d30] sm:$0xff]  ;;  %v976_v49 = vld [vmem:[%s9135_s1 + $0x1dd8] sm:$0xff] }
 0x12b   :  { %v4189_v6 = vpack.c.bf16 %v976_v49, %v955_v48  ;;  %v1103_v48 = vld [vmem:[%s9135_s1 + $0x21d0] sm:$0xff] }
 0x12c   :  { %4018 = vmatpush1.bf16.msra.mxu0 %v4017_v9  ;;  %4142 = vmatpush1.bf16.msra.mxu1 %v4141_v10  ;;  %v704_v9 = vld [vmem:[%s9135_s1 + $0x1558] sm:$0xff]  ;;  %v725_v10 = vld [vmem:[%s9135_s1 + $0x1600] sm:$0xff] }
 0x12d   :  { %4020 = vmatprep.subr.bf16.mxu0 %v4019_v12  ;;  %4144 = vmatprep.subr.bf16.mxu1 %v4143_v16  ;;  %v4037_v12 = vpack.c.bf16 %v680_v3, %v659_v2  ;;  %v722_v16 = vld [vmem:[%s9135_s1 + $0x15e8] sm:$0xff]  ;;  %v4163_v18 = vpack.c.bf16 %v725_v10, %v704_v9  ;;  %v4177_v2 = vpack.c.bf16 %v850_v59, %v829_v57  ;;  %v912_v9 = vld [vmem:[%s9135_s1 + $0x1bd8] sm:$0xff]  ;;  %v933_v10 = vld [vmem:[%s9135_s1 + $0x1c80] sm:$0xff] }
 0x12e   :  { %v4055_v3 = vpack.c.bf16 %v891_v62, %v870_v60  ;;  %v3184_v60 = vrot.slane %v6976_v19, %v6979_v20 }
 0x130   :  { %4022 = vmatpush1.bf16.msra.mxu0 %v4021_v22  ;;  %4146 = vmatpush1.bf16.msra.mxu1 %v4145_v23  ;;  %v746_v22 = vld [vmem:[%s9135_s1 + $0x16a8] sm:$0xff]  ;;  %v767_v23 = vld [vmem:[%s9135_s1 + $0x1750] sm:$0xff] }
 0x131   :  { %4024 = vmatprep.subr.bf16.mxu0 %v4023_v26  ;;  %4148 = vmatprep.subr.bf16.mxu1 %v4147_v30  ;;  %v4041_v26 = vpack.c.bf16 %v722_v16, %v701_v15  ;;  %v764_v30 = vld [vmem:[%s9135_s1 + $0x1738] sm:$0xff]  ;;  %v4167_v33 = vpack.c.bf16 %v767_v23, %v746_v22  ;;  %v6963_v15 = vsub.s32 2, %v5128_v61  ;;  %v4059_v22 = vpack.c.bf16 %v933_v10, %v912_v9  ;;  %v911_v23 = vld [vmem:[%s9135_s1 + $0x1bd0] sm:$0xff] }
 0x132   :  { %v995_v10 = vld [vmem:[%s9135_s1 + $0x1e70] sm:$0xff] }
 0x133   :  { %v1361_v35 = vrot.slane %v1344_v17, %v6963_v15 }
 0x134   :  { %4026 = vmatpush1.bf16.msra.mxu0 %v4025_v37  ;;  %4150 = vmatpush1.bf16.msra.mxu1 %v4149_v38  ;;  %v788_v37 = vld [vmem:[%s9135_s1 + $0x17f8] sm:$0xff]  ;;  %v809_v38 = vld [vmem:[%s9135_s1 + $0x18a0] sm:$0xff] }
 0x135   :  { %4028 = vmatprep.subr.bf16.mxu0 %v4027_v40  ;;  %4152 = vmatprep.subr.bf16.mxu1 %v4151_v44  ;;  %v4045_v40 = vpack.c.bf16 %v764_v30, %v743_v29  ;;  %v806_v44 = vld [vmem:[%s9135_s1 + $0x1888] sm:$0xff]  ;;  %v4171_v46 = vpack.c.bf16 %v809_v38, %v788_v37  ;;  %v977_v37 = vld [vmem:[%s9135_s1 + $0x1de0] sm:$0xff] }
 0x136   :  { %v934_v30 = vld [vmem:[%s9135_s1 + $0x1c88] sm:$0xff] }
 0x138   :  { %4030 = vmatpush1.bf16.msra.mxu0 %v4029_v50  ;;  %4154 = vmatpush1.bf16.msra.mxu1 %v4153_v51  ;;  %v830_v50 = vld [vmem:[%s9135_s1 + $0x1948] sm:$0xff]  ;;  %v851_v51 = vld [vmem:[%s9135_s1 + $0x19f0] sm:$0xff] }
 0x139   :  { %4032 = vmatprep.subr.bf16.mxu0 %v4031_v52  ;;  %4156 = vmatprep.subr.bf16.mxu1 %v4155_v56  ;;  %v4049_v52 = vpack.c.bf16 %v806_v44, %v785_v43  ;;  %v848_v56 = vld [vmem:[%s9135_s1 + $0x19d8] sm:$0xff]  ;;  %v4175_v58 = vpack.c.bf16 %v851_v51, %v830_v50  ;;  %v953_v43 = vld [vmem:[%s9135_s1 + $0x1d20] sm:$0xff] }
 0x13c   :  { %4034 = vmatpush1.bf16.msra.mxu0 %v4033_v63  ;;  %4158 = vmatpush1.bf16.msra.mxu1 %v4157_v0  ;;  %v872_v63 = vld [vmem:[%s9135_s1 + $0x1a98] sm:$0xff]  ;;  %v893_v0 = vld [vmem:[%s9135_s1 + $0x1b40] sm:$0xff] }
 0x13d   :  { %4036 = vmatprep.subr.bf16.mxu0 %v4035_v1  ;;  %4160 = vmatprep.subr.bf16.mxu1 %v4159_v5  ;;  %v4053_v1 = vpack.c.bf16 %v848_v56, %v827_v55  ;;  %v890_v5 = vld [vmem:[%s9135_s1 + $0x1b28] sm:$0xff]  ;;  %v4179_v7 = vpack.c.bf16 %v893_v0, %v872_v63  ;;  %v996_v55 = vld [vmem:[%s9135_s1 + $0x1e78] sm:$0xff]  ;;  %v1017_v56 = vld [vmem:[%s9135_s1 + $0x1f20] sm:$0xff] }
 0x13e   :  { %v4057_v16 = vpack.c.bf16 %v890_v5, %v869_v4  ;;  %v998_v0 = vld [vmem:[%s9135_s1 + $0x1e88] sm:$0xff]  ;;  %v4065_v5 = vpack.c.bf16 %v974_v47, %v953_v43  ;;  %v4067_v9 = vpack.c.bf16 %v1017_v56, %v996_v55  ;;  %v1060_v43 = vld [vmem:[%s9135_s1 + $0x2078] sm:$0xff]  ;;  %v1081_v56 = vld [vmem:[%s9135_s1 + $0x2120] sm:$0xff] }
 0x13f   :  { %v1082_v47 = vld [vmem:[%s9135_s1 + $0x2128] sm:$0xff]  ;;  %v1100_v55 = vld [vmem:[%s9135_s1 + $0x21b8] sm:$0xff] }
 0x140   :  { %4038 = vmatpush1.bf16.msra.mxu0 %v4037_v12  ;;  %4162 = vmatpush1.bf16.msra.mxu1 %v4161_v13  ;;  %v914_v12 = vld [vmem:[%s9135_s1 + $0x1be8] sm:$0xff]  ;;  %v935_v13 = vld [vmem:[%s9135_s1 + $0x1c90] sm:$0xff] }
 0x141   :  { %4040 = vmatprep.subr.bf16.mxu0 %v4039_v14  ;;  %4164 = vmatprep.subr.bf16.mxu1 %v4163_v18  ;;  %v6960_v14 = vsub.s32 0, %v5128_v61  ;;  %v6971_v18 = vld [vmem:[%s9138_s3] sm:$0xff]  ;;  %v4183_v29 = vpack.c.bf16 %v935_v13, %v914_v12  ;;  %v1016_v12 = vld [vmem:[%s9135_s1 + $0x1f18] sm:$0xff] }
 0x142   :  { %v3056_v51 = vrot.slane %v6971_v18, %v6963_v15  ;;  %v997_v13 = vld [vmem:[%s9135_s1 + $0x1e80] sm:$0xff] }
 0x143   :  { %2112 = vmatmul.mubr.f32.vlgmr.msra.gmra.mrb[4].mxu0 %v5188_v25  ;;  %2254 = vmatmul.mubr.f32.vlgmr.msra.gmra.mrb[4].mxu1 %v5188_v25  ;;  %v1353_v34 = vrot.slane %v1344_v17, %v6960_v14  ;;  %v3048_v38 = vrot.slane %v6971_v18, %v6960_v14 }
 0x144   :  { %4042 = vmatpush1.bf16.msra.mxu0 %v4041_v26  ;;  %4166 = vmatpush1.bf16.msra.mxu1 %v4165_v27  ;;  %v932_v26 = vld [vmem:[%s9135_s1 + $0x1c78] sm:$0xff]  ;;  %v913_v27 = vld [vmem:[%s9135_s1 + $0x1be0] sm:$0xff] }
 0x145   :  { %4044 = vmatprep.subr.bf16.mxu0 %v4043_v28  ;;  %4168 = vmatprep.subr.bf16.mxu1 %v4167_v33  ;;  %v6991_v28 = vsub.s32 3, %v5128_v61  ;;  %v975_v33 = vld [vmem:[%s9135_s1 + $0x1dd0] sm:$0xff]  ;;  %v4185_v44 = vpack.c.bf16 %v934_v30, %v913_v27  ;;  %v1040_v27 = vld [vmem:[%s9135_s1 + $0x1fd8] sm:$0xff] }
 0x146   :  { %3436 = vmatprep.mubr.msk.f32.mxu0 %vm1476_vm0, %v5341_v39  ;;  %3437 = vmatprep.mubr.msk.f32.mxu1 %vm1476_vm0, %v5341_v39 }
 0x147   :  { %v1365_v45 = vrot.slane %v1344_v17, %v6991_v28  ;;  %v3060_v62 = vrot.slane %v6971_v18, %v6991_v28  ;;  %v3192_v63 = vrot.slane %v6976_v19, %v6991_v28 }
 0x148   :  { %4046 = vmatpush1.bf16.msra.mxu0 %v4045_v40  ;;  %4170 = vmatpush1.bf16.msra.mxu1 %v4169_v41  ;;  %v3180_v40 = vrot.slane %v6976_v19, %v6960_v14  ;;  %v4061_v41 = vpack.c.bf16 %v932_v26, %v911_v23 }
 0x149   :  { %4048 = vmatprep.subr.bf16.mxu0 %v4047_v42  ;;  %4172 = vmatprep.subr.bf16.mxu1 %v4171_v46  ;;  %v1357_v42 = vrot.slane %v1344_v17, %v6979_v20  ;;  %v4063_v46 = vpack.c.bf16 %v975_v33, %v954_v31  ;;  %v4069_v33 = vpack.c.bf16 %v1016_v12, %v995_v10  ;;  %v1185_v10 = vld [vmem:[%s9135_s1 + $0x2460] sm:$0xff]  ;;  %v1166_v12 = vld [vmem:[%s9135_s1 + $0x23c8] sm:$0xff] }
 0x14c   :  { %4050 = vmatpush1.bf16.msra.mxu0 %v4049_v52  ;;  %4174 = vmatpush1.bf16.msra.mxu1 %v4173_v53  ;;  %v3188_v52 = vrot.slane %v6976_v19, %v6963_v15  ;;  %v3052_v53 = vrot.slane %v6971_v18, %v6979_v20  ;;  %v1018_v19 = vld [vmem:[%s9135_s1 + $0x1f28] sm:$0xff] }
 0x14d   :  { %4052 = vmatprep.subr.bf16.mxu0 %v4051_v54  ;;  %4176 = vmatprep.subr.bf16.mxu1 %v4175_v58  ;;  %v4187_v54 = vpack.c.bf16 %v977_v37, %v956_v36  ;;  %v1037_v37 = vld [vmem:[%s9135_s1 + $0x1fc0] sm:$0xff] }
 0x150   :  { %4054 = vmatpush1.bf16.msra.mxu0 %v4053_v1  ;;  %4178 = vmatpush1.bf16.msra.mxu1 %v4177_v2  ;;  %v1019_v1 = vld [vmem:[%s9135_s1 + $0x1f30] sm:$0xff] }
 0x151   :  { %4056 = vmatprep.subr.bf16.mxu0 %v4055_v3  ;;  %4180 = vmatprep.subr.bf16.mxu1 %v4179_v7  ;;  %v4191_v18 = vpack.c.bf16 %v1019_v1, %v998_v0  ;;  %v1145_v0 = vld [vmem:[%s9135_s1 + $0x2320] sm:$0xff] }
 0x154   :  { %4058 = vmatpush1.bf16.msra.mxu0 %v4057_v16  ;;  %4182 = vmatpush1.bf16.msra.mxu1 %v4181_v21  ;;  %v1038_v21 = vld [vmem:[%s9135_s1 + $0x1fc8] sm:$0xff] }
 0x155   :  { %4060 = vmatprep.subr.bf16.mxu0 %v4059_v22  ;;  %4184 = vmatprep.subr.bf16.mxu1 %v4183_v29  ;;  %v1059_v22 = vld [vmem:[%s9135_s1 + $0x2070] sm:$0xff]  ;;  %v1061_v29 = vld [vmem:[%s9135_s1 + $0x2080] sm:$0xff] }
 0x156   :  { %v1616_v50 = vpop.f32.mrb[0].mxu0  ;;  %v1758_v58 = vpop.f32.mrb[0].mxu1  ;;  %v4071_v36 = vpack.c.bf16 %v1059_v22, %v1038_v21  ;;  %v1184_v21 = vld [vmem:[%s9135_s1 + $0x2458] sm:$0xff]  ;;  %v1165_v22 = vld [vmem:[%s9135_s1 + $0x23c0] sm:$0xff] }
 0x157   :  { %v4796_v57 = vadd.f32 %v1616_v50, %v1353_v34  ;;  %v1618_v59 = vpop.f32.mrb[1].mxu0  ;;  %v4798_v2 = vadd.f32 %v1758_v58, %v1361_v35  ;;  %v1760_v4 = vpop.f32.mrb[1].mxu1  ;;  %v4193_v35 = vpack.c.bf16 %v1018_v19, %v997_v13  ;;  %v1102_v58 = vld [vmem:[%s9135_s1 + $0x21c8] sm:$0xff]  ;;  %v1187_v13 = vld [vmem:[%s9135_s1 + $0x2470] sm:$0xff] }
 0x158   :  { %4062 = vmatpush1.bf16.msra.mxu0 %v4061_v41  ;;  %v4797_v3 = vadd.f32 %v1618_v59, %v1357_v42  ;;  %4186 = vmatpush1.bf16.msra.mxu1 %v4185_v44  ;;  %v4799_v8 = vadd.f32 %v1760_v4, %v1365_v45  ;;  %v4195_v42 = vpack.c.bf16 %v1061_v29, %v1040_v27  ;;  %v1080_v44 = vld [vmem:[%s9135_s1 + $0x2118] sm:$0xff]  ;;  %v1101_v45 = vld [vmem:[%s9135_s1 + $0x21c0] sm:$0xff]  ;;  %v1122_v59 = vld [vmem:[%s9135_s1 + $0x2268] sm:$0xff] }
 0x159   :  { %v3150_v7 = vmul.f32 %v4796_v57, %v3048_v38  ;;  %4064 = vmatprep.subr.bf16.mxu0 %v4063_v46  ;;  %v3152_v16 = vmul.f32 %v4798_v2, %v3056_v51  ;;  %4188 = vmatprep.subr.bf16.mxu1 %v4187_v54  ;;  %v1058_v38 = vld [vmem:[%s9135_s1 + $0x2068] sm:$0xff]  ;;  %v1079_v54 = vld [vmem:[%s9135_s1 + $0x2110] sm:$0xff]  ;;  %v4199_v57 = vpack.c.bf16 %v1103_v48, %v1082_v47  ;;  %v1121_v4 = vld [vmem:[%s9135_s1 + $0x2260] sm:$0xff] }
 0x15a   :  { %v3151_v17 = vmul.f32 %v4797_v3, %v3052_v53  ;;  %v3153_v26 = vmul.f32 %v4799_v8, %v3060_v62  ;;  %v4073_v50 = vpack.c.bf16 %v1058_v38, %v1037_v37  ;;  %v4075_v53 = vpack.c.bf16 %v1101_v45, %v1080_v44  ;;  %v1144_v8 = vld [vmem:[%s9135_s1 + $0x2318] sm:$0xff]  ;;  %v1163_v19 = vld [vmem:[%s9135_s1 + $0x23b0] sm:$0xff]  ;;  %v1206_v27 = vld [vmem:[%s9135_s1 + $0x2508] sm:$0xff] }
 0x15b   :  { %v3282_v23 = vadd.f32 %v3180_v40, %v3150_v7  ;;  %v3284_v30 = vadd.f32 %v3188_v52, %v3152_v16  ;;  %v1039_v40 = vld [vmem:[%s9135_s1 + $0x1fd0] sm:$0xff]  ;;  %v4077_v1 = vpack.c.bf16 %v1100_v55, %v1079_v54  ;;  %v4201_v2 = vpack.c.bf16 %v1102_v58, %v1081_v56  ;;  %v1226_v37 = vld [vmem:[%s9135_s1 + $0x25a8] sm:$0xff]  ;;  %v1292_v56 = vld [vmem:[%s9135_s1 + $0x27b8] sm:$0xff] }
 0x15c   :  { %v3283_v31 = vadd.f32 %v3184_v60, %v3151_v17  ;;  %4066 = vmatpush1.bf16.msra.mxu0 %v4065_v5  ;;  %v3285_v34 = vadd.f32 %v3192_v63, %v3153_v26  ;;  %4190 = vmatpush1.bf16.msra.mxu1 %v4189_v6  ;;  %v4197_v52 = vpack.c.bf16 %v1060_v43, %v1039_v40  ;;  %v1143_v60 = vld [vmem:[%s9135_s1 + $0x2310] sm:$0xff]  ;;  %v1124_v63 = vld [vmem:[%s9135_s1 + $0x2278] sm:$0xff]  ;;  %v1142_v5 = vld [vmem:[%s9135_s1 + $0x2308] sm:$0xff] }
 0x15d   :  { %4068 = vmatprep.subr.bf16.mxu0 %v4067_v9  ;;  %4192 = vmatprep.subr.bf16.mxu1 %v4191_v18  ;;  %v4079_v3 = vpack.c.bf16 %v1143_v60, %v1122_v59  ;;  %v1123_v6 = vld [vmem:[%s9135_s1 + $0x2270] sm:$0xff]  ;;  %v4203_v7 = vpack.c.bf16 %v1145_v0, %v1124_v63  ;;  %v1164_v9 = vld [vmem:[%s9135_s1 + $0x23b8] sm:$0xff]  ;;  %v4081_v16 = vpack.c.bf16 %v1142_v5, %v1121_v4  ;;  %v1186_v26 = vld [vmem:[%s9135_s1 + $0x2468] sm:$0xff] }
 0x15e   :  { %v3324_v41 = vcombine.low %v3282_v23, %v3283_v31  ;;  %v3325_v46 = vcombine.low %v3284_v30, %v3285_v34  ;;  %v4205_v17 = vpack.c.bf16 %v1144_v8, %v1123_v6  ;;  %v4083_v18 = vpack.c.bf16 %v1185_v10, %v1164_v9  ;;  %v1227_v29 = vld [vmem:[%s9135_s1 + $0x25b0] sm:$0xff]  ;;  %v1208_v30 = vld [vmem:[%s9135_s1 + $0x2518] sm:$0xff]  ;;  %v1229_v31 = vld [vmem:[%s9135_s1 + $0x25c0] sm:$0xff] }
 0x15f   :  { %v4207_v23 = vpack.c.bf16 %v1187_v13, %v1166_v12  ;;  %v4209_v34 = vpack.c.bf16 %v1186_v26, %v1165_v22  ;;  %v1207_v38 = vld [vmem:[%s9135_s1 + $0x2510] sm:$0xff]  ;;  %v4211_v40 = vpack.c.bf16 %v1229_v31, %v1208_v30  ;;  %v1269_v43 = vld [vmem:[%s9135_s1 + $0x2700] sm:$0xff]  ;;  %v1250_v44 = vld [vmem:[%s9135_s1 + $0x2668] sm:$0xff] }
 0x160   :  { %v3332_v49 = vrot.slane %v3324_v41, %v5155_v11  ;;  %4070 = vmatpush1.bf16.msra.mxu0 %v4069_v33  ;;  %v3339_v51 = vrot.slane %v3325_v46, %v5155_v11  ;;  %4194 = vmatpush1.bf16.msra.mxu1 %v4193_v35  ;;  %v4085_v33 = vpack.c.bf16 %v1184_v21, %v1163_v19  ;;  %v1228_v41 = vld [vmem:[%s9135_s1 + $0x25b8] sm:$0xff]  ;;  %v1271_v45 = vld [vmem:[%s9135_s1 + $0x2710] sm:$0xff]  ;;  %v1290_v54 = vld [vmem:[%s9135_s1 + $0x27a8] sm:$0xff] }
 0x161   :  { %4072 = vmatprep.subr.bf16.mxu0 %v4071_v36  ;;  %4196 = vmatprep.subr.bf16.mxu1 %v4195_v42  ;;  %v4087_v35 = vpack.c.bf16 %v1227_v29, %v1206_v27  ;;  %v1205_v36 = vld [vmem:[%s9135_s1 + $0x2500] sm:$0xff]  ;;  %v1248_v42 = vld [vmem:[%s9135_s1 + $0x2658] sm:$0xff]  ;;  %v4213_v47 = vpack.c.bf16 %v1228_v41, %v1207_v38  ;;  %v1311_v55 = vld [vmem:[%s9135_s1 + $0x2850] sm:$0xff] }
 0x162   :  { %v3340_v62 = vcombine.low %v3332_v49, %v3339_v51  ;;  %v4089_v46 = vpack.c.bf16 %v1226_v37, %v1205_v36  ;;  %v4091_v48 = vpack.c.bf16 %v1269_v43, %v1248_v42  ;;  %v1247_v49 = vld [vmem:[%s9135_s1 + $0x2650] sm:$0xff]  ;;  %v1249_v51 = vld [vmem:[%s9135_s1 + $0x2660] sm:$0xff]  ;;  %v4095_v60 = vpack.c.bf16 %v1311_v55, %v1290_v54  ;;  %v1310_v63 = vld [vmem:[%s9135_s1 + $0x2848] sm:$0xff] }
 0x163   :  { %v1332_v5 = vld [vmem:[%s9135_s1 + $0x28f8] sm:$0xff]  ;;  %v1334_v6 = vld [vmem:[%s9135_s1 + $0x2908] sm:$0xff]  ;;  %v1331_v8 = vld [vmem:[%s9135_s1 + $0x28f0] sm:$0xff] }
 0x164   :  { %4074 = vmatpush1.bf16.msra.mxu0 %v4073_v50  ;;  %3422 = vst [vmem:[%s9140_s5] sm:$0xff] %v3340_v62  ;;  %4198 = vmatpush1.bf16.msra.mxu1 %v4197_v52  ;;  %v1268_v50 = vld [vmem:[%s9135_s1 + $0x26f8] sm:$0xff]  ;;  %v4215_v52 = vpack.c.bf16 %v1271_v45, %v1250_v44  ;;  %v1289_v62 = vld [vmem:[%s9135_s1 + $0x27a0] sm:$0xff]  ;;  %v55_v9 = vld [vmem:[%s9135_s1 + $0x110] sm:$0xff] }
 0x165   :  { %4076 = vmatprep.subr.bf16.mxu0 %v4075_v53  ;;  %4200 = vmatprep.subr.bf16.mxu1 %v4199_v57  ;;  %v1270_v53 = vld [vmem:[%s9135_s1 + $0x2708] sm:$0xff]  ;;  %v1313_v57 = vld [vmem:[%s9135_s1 + $0x2860] sm:$0xff]  ;;  %v4093_v58 = vpack.c.bf16 %v1268_v50, %v1247_v49  ;;  %v36_v10 = vld [vmem:[%s9135_s1 + $0x78] sm:$0xff] }
 0x166   :  { %v4217_v59 = vpack.c.bf16 %v1270_v53, %v1249_v51  ;;  %v4219_v0 = vpack.c.bf16 %v1313_v57, %v1292_v56  ;;  %v57_v12 = vld [vmem:[%s9135_s1 + $0x120] sm:$0xff]  ;;  %v76_v19 = vld [vmem:[%s9135_s1 + $0x1b8] sm:$0xff]  ;;  %v78_v26 = vld [vmem:[%s9135_s1 + $0x1c8] sm:$0xff] }
 0x167   :  { %v33_v13 = vld [vmem:[%s9135_s1 + $0x60] sm:$0xff]  ;;  %v99_v27 = vld [vmem:[%s9135_s1 + $0x270] sm:$0xff]  ;;  %v4347_v29 = vpack.c.bf16 %v57_v12, %v36_v10  ;;  %v98_v38 = vld [vmem:[%s9135_s1 + $0x268] sm:$0xff] }
 0x168   :  { %4078 = vmatpush1.bf16.msra.mxu0 %v4077_v1  ;;  %4202 = vmatpush1.bf16.msra.mxu1 %v4201_v2  ;;  %v1291_v1 = vld [vmem:[%s9135_s1 + $0x27b0] sm:$0xff]  ;;  %v1312_v2 = vld [vmem:[%s9135_s1 + $0x2858] sm:$0xff]  ;;  %v97_v21 = vld [vmem:[%s9135_s1 + $0x260] sm:$0xff]  ;;  %v4351_v37 = vpack.c.bf16 %v99_v27, %v78_v26 }
 0x169   :  { %4080 = vmatprep.subr.bf16.mxu0 %v4079_v3  ;;  %4204 = vmatprep.subr.bf16.mxu1 %v4203_v7  ;;  %v4097_v3 = vpack.c.bf16 %v1310_v63, %v1289_v62  ;;  %v4221_v4 = vpack.c.bf16 %v1312_v2, %v1291_v1  ;;  %v34_v7 = vld [vmem:[%s9135_s1 + $0x68] sm:$0xff]  ;;  %v1333_v22 = vld [vmem:[%s9135_s1 + $0x2900] sm:$0xff]  ;;  %v139_v41 = vld [vmem:[%s9135_s1 + $0x3b0] sm:$0xff] }
 0x16a   :  { %v77_v36 = vld [vmem:[%s9135_s1 + $0x1c0] sm:$0xff]  ;;  %v120_v42 = vld [vmem:[%s9135_s1 + $0x318] sm:$0xff]  ;;  %v119_v49 = vld [vmem:[%s9135_s1 + $0x310] sm:$0xff] }
 0x16b   :  { %v141_v43 = vld [vmem:[%s9135_s1 + $0x3c0] sm:$0xff]  ;;  %v4353_v45 = vpack.c.bf16 %v98_v38, %v77_v36  ;;  %v140_v51 = vld [vmem:[%s9135_s1 + $0x3b8] sm:$0xff]  ;;  %v162_v54 = vld [vmem:[%s9135_s1 + $0x468] sm:$0xff] }
 0x16c   :  { %4082 = vmatpush1.bf16.msra.mxu0 %v4081_v16  ;;  %4206 = vmatpush1.bf16.msra.mxu1 %v4205_v17  ;;  %v54_v16 = vld [vmem:[%s9135_s1 + $0x108] sm:$0xff]  ;;  %v35_v17 = vld [vmem:[%s9135_s1 + $0x70] sm:$0xff]  ;;  %v4355_v50 = vpack.c.bf16 %v141_v43, %v120_v42  ;;  %v181_v53 = vld [vmem:[%s9135_s1 + $0x500] sm:$0xff]  ;;  %v4357_v57 = vpack.c.bf16 %v140_v51, %v119_v49 }
 0x16d   :  { %4084 = vmatprep.subr.bf16.mxu0 %v4083_v18  ;;  %4208 = vmatprep.subr.bf16.mxu1 %v4207_v23  ;;  %v56_v18 = vld [vmem:[%s9135_s1 + $0x118] sm:$0xff]  ;;  %v4223_v23 = vpack.c.bf16 %v55_v9, %v34_v7  ;;  %v4225_v30 = vpack.c.bf16 %v54_v16, %v33_v13  ;;  %v183_v55 = vld [vmem:[%s9135_s1 + $0x510] sm:$0xff]  ;;  %v161_v62 = vld [vmem:[%s9135_s1 + $0x460] sm:$0xff] }
 0x16e   :  { %v4349_v31 = vpack.c.bf16 %v56_v18, %v35_v17  ;;  %v4359_v63 = vpack.c.bf16 %v183_v55, %v162_v54  ;;  %v202_v1 = vld [vmem:[%s9135_s1 + $0x5a8] sm:$0xff]  ;;  %v223_v2 = vld [vmem:[%s9135_s1 + $0x650] sm:$0xff]  ;;  %v224_v13 = vld [vmem:[%s9135_s1 + $0x658] sm:$0xff] }
 0x16f   :  { %v4239_v7 = vpack.c.bf16 %v223_v2, %v202_v1  ;;  %v222_v9 = vld [vmem:[%s9135_s1 + $0x648] sm:$0xff]  ;;  %v203_v10 = vld [vmem:[%s9135_s1 + $0x5b0] sm:$0xff]  ;;  %v244_v16 = vld [vmem:[%s9135_s1 + $0x6f8] sm:$0xff] }
 0x170   :  { %4086 = vmatpush1.bf16.msra.mxu0 %v4085_v33  ;;  %4210 = vmatpush1.bf16.msra.mxu1 %v4209_v34  ;;  %v4227_v33 = vpack.c.bf16 %v97_v21, %v76_v19  ;;  %v75_v34 = vld [vmem:[%s9135_s1 + $0x1b0] sm:$0xff]  ;;  %v265_v17 = vld [vmem:[%s9135_s1 + $0x7a0] sm:$0xff]  ;;  %v246_v18 = vld [vmem:[%s9135_s1 + $0x708] sm:$0xff] }
 0x171   :  { %4088 = vmatprep.subr.bf16.mxu0 %v4087_v35  ;;  %4212 = vmatprep.subr.bf16.mxu1 %v4211_v40  ;;  %v96_v35 = vld [vmem:[%s9135_s1 + $0x258] sm:$0xff]  ;;  %v118_v40 = vld [vmem:[%s9135_s1 + $0x308] sm:$0xff]  ;;  %v267_v19 = vld [vmem:[%s9135_s1 + $0x7b0] sm:$0xff] }
 0x172   :  { %v4229_v44 = vpack.c.bf16 %v96_v35, %v75_v34  ;;  %v243_v26 = vld [vmem:[%s9135_s1 + $0x6f0] sm:$0xff]  ;;  %v264_v27 = vld [vmem:[%s9135_s1 + $0x798] sm:$0xff]  ;;  %v309_v36 = vld [vmem:[%s9135_s1 + $0x900] sm:$0xff] }
 0x173   :  { %v307_v34 = vld [vmem:[%s9135_s1 + $0x8f0] sm:$0xff]  ;;  %v288_v35 = vld [vmem:[%s9135_s1 + $0x858] sm:$0xff]  ;;  %v306_v42 = vld [vmem:[%s9135_s1 + $0x8e8] sm:$0xff] }
 0x174   :  { %4090 = vmatpush1.bf16.msra.mxu0 %v4089_v46  ;;  %4214 = vmatpush1.bf16.msra.mxu1 %v4213_v47  ;;  %v4231_v46 = vpack.c.bf16 %v139_v41, %v118_v40  ;;  %v117_v47 = vld [vmem:[%s9135_s1 + $0x300] sm:$0xff]  ;;  %v287_v43 = vld [vmem:[%s9135_s1 + $0x850] sm:$0xff]  ;;  %v348_v54 = vld [vmem:[%s9135_s1 + $0xa38] sm:$0xff] }
 0x175   :  { %4092 = vmatprep.subr.bf16.mxu0 %v4091_v48  ;;  %4216 = vmatprep.subr.bf16.mxu1 %v4215_v52  ;;  %v138_v48 = vld [vmem:[%s9135_s1 + $0x3a8] sm:$0xff]  ;;  %v160_v52 = vld [vmem:[%s9135_s1 + $0x458] sm:$0xff]  ;;  %v285_v41 = vld [vmem:[%s9135_s1 + $0x840] sm:$0xff] }
 0x176   :  { %v4233_v56 = vpack.c.bf16 %v138_v48, %v117_v47  ;;  %v349_v47 = vld [vmem:[%s9135_s1 + $0xa40] sm:$0xff]  ;;  %v330_v48 = vld [vmem:[%s9135_s1 + $0x9a8] sm:$0xff]  ;;  %v351_v49 = vld [vmem:[%s9135_s1 + $0xa50] sm:$0xff] }
 0x177   :  { %v329_v55 = vld [vmem:[%s9135_s1 + $0x9a0] sm:$0xff] }
 0x178   :  { %4094 = vmatpush1.bf16.msra.mxu0 %v4093_v58  ;;  %4218 = vmatpush1.bf16.msra.mxu1 %v4217_v59  ;;  %v4235_v58 = vpack.c.bf16 %v181_v53, %v160_v52  ;;  %v159_v59 = vld [vmem:[%s9135_s1 + $0x450] sm:$0xff]  ;;  %v369_v2 = vld [vmem:[%s9135_s1 + $0xae0] sm:$0xff] }
 0x179   :  { %4096 = vmatprep.subr.bf16.mxu0 %v4095_v60  ;;  %4220 = vmatprep.subr.bf16.mxu1 %v4219_v0  ;;  %v180_v60 = vld [vmem:[%s9135_s1 + $0x4f8] sm:$0xff]  ;;  %v182_v0 = vld [vmem:[%s9135_s1 + $0x508] sm:$0xff]  ;;  %v327_v53 = vld [vmem:[%s9135_s1 + $0x990] sm:$0xff] }
 0x17c   :  { %4098 = vmatpush1.bf16.msra.mxu0 %v4097_v3  ;;  %4222 = vmatpush1.bf16.msra.mxu1 %v4221_v4  ;;  %v204_v3 = vld [vmem:[%s9135_s1 + $0x5b8] sm:$0xff]  ;;  %v225_v4 = vld [vmem:[%s9135_s1 + $0x660] sm:$0xff] }
 0x17d   :  { %2178 = vmatprep.subr.mxu0 %v1332_v5  ;;  %2320 = vmatprep.subr.mxu1 %v1334_v6  ;;  %v4237_v5 = vpack.c.bf16 %v180_v60, %v159_v59  ;;  %v4361_v6 = vpack.c.bf16 %v182_v0, %v161_v62  ;;  %v4363_v12 = vpack.c.bf16 %v225_v4, %v204_v3  ;;  %v391_v59 = vld [vmem:[%s9135_s1 + $0xb90] sm:$0xff]  ;;  %v372_v60 = vld [vmem:[%s9135_s1 + $0xaf8] sm:$0xff]  ;;  %v393_v62 = vld [vmem:[%s9135_s1 + $0xba0] sm:$0xff] }
 0x17e   :  { %v390_v3 = vld [vmem:[%s9135_s1 + $0xb88] sm:$0xff]  ;;  %v371_v4 = vld [vmem:[%s9135_s1 + $0xaf0] sm:$0xff] }
 0x180   :  { %2179 = vmatpush1.msra.mxu0 %v1331_v8  ;;  %2321 = vmatpush1.msra.mxu1 %v1333_v22  ;;  %v201_v8 = vld [vmem:[%s9135_s1 + $0x5a0] sm:$0xff]  ;;  %v4365_v22 = vpack.c.bf16 %v224_v13, %v203_v10  ;;  %v435_v10 = vld [vmem:[%s9135_s1 + $0xcf0] sm:$0xff] }
 0x181   :  { %2183 = vmatmul.mubr.f32.vlgmr.msra.gmra.mrb[4].mxu0 %v5313_v24  ;;  %2325 = vmatmul.mubr.f32.vlgmr.msra.gmra.mrb[4].mxu1 %v5313_v24  ;;  %v4241_v21 = vpack.c.bf16 %v222_v9, %v201_v8  ;;  %v433_v8 = vld [vmem:[%s9135_s1 + $0xce0] sm:$0xff]  ;;  %v414_v9 = vld [vmem:[%s9135_s1 + $0xc48] sm:$0xff] }
 0x182   :  { %4224 = vmatprep.subr.bf16.mxu0 %v4223_v23  ;;  %4348 = vmatprep.subr.bf16.mxu1 %v4347_v29  ;;  %v4243_v23 = vpack.c.bf16 %v265_v17, %v244_v16  ;;  %v245_v29 = vld [vmem:[%s9135_s1 + $0x700] sm:$0xff]  ;;  %v411_v17 = vld [vmem:[%s9135_s1 + $0xc30] sm:$0xff] }
 0x183   :  { %4226 = vmatpush1.bf16.msra.mxu0 %v4225_v30  ;;  %4350 = vmatpush1.bf16.msra.mxu1 %v4349_v31  ;;  %v4367_v30 = vpack.c.bf16 %v267_v19, %v246_v18  ;;  %v266_v31 = vld [vmem:[%s9135_s1 + $0x7a8] sm:$0xff]  ;;  %v432_v18 = vld [vmem:[%s9135_s1 + $0xcd8] sm:$0xff]  ;;  %v413_v19 = vld [vmem:[%s9135_s1 + $0xc40] sm:$0xff] }
 0x184   :  { %4228 = vmatprep.subr.bf16.mxu0 %v4227_v33  ;;  %4352 = vmatprep.subr.bf16.mxu1 %v4351_v37  ;;  %v286_v33 = vld [vmem:[%s9135_s1 + $0x848] sm:$0xff]  ;;  %v4245_v37 = vpack.c.bf16 %v264_v27, %v243_v26  ;;  %v4369_v38 = vpack.c.bf16 %v266_v31, %v245_v29  ;;  %v475_v26 = vld [vmem:[%s9135_s1 + $0xe30] sm:$0xff]  ;;  %v456_v27 = vld [vmem:[%s9135_s1 + $0xd98] sm:$0xff] }
 0x185   :  { %2395 = vmatprep.mubr.f32.mxu0 %v5201_v32  ;;  %2537 = vmatprep.mubr.f32.mxu1 %v5201_v32  ;;  %v4247_v40 = vpack.c.bf16 %v307_v34, %v286_v33  ;;  %v477_v29 = vld [vmem:[%s9135_s1 + $0xe40] sm:$0xff] }
 0x186   :  { %v453_v34 = vld [vmem:[%s9135_s1 + $0xd80] sm:$0xff] }
 0x187   :  { %4230 = vmatpush1.bf16.msra.mxu0 %v4229_v44  ;;  %4354 = vmatpush1.bf16.msra.mxu1 %v4353_v45  ;;  %v4371_v44 = vpack.c.bf16 %v309_v36, %v288_v35  ;;  %v308_v45 = vld [vmem:[%s9135_s1 + $0x8f8] sm:$0xff]  ;;  %v474_v35 = vld [vmem:[%s9135_s1 + $0xe28] sm:$0xff]  ;;  %v455_v36 = vld [vmem:[%s9135_s1 + $0xd90] sm:$0xff] }
 0x188   :  { %4232 = vmatprep.subr.bf16.mxu0 %v4231_v46  ;;  %4356 = vmatprep.subr.bf16.mxu1 %v4355_v50  ;;  %v328_v46 = vld [vmem:[%s9135_s1 + $0x998] sm:$0xff]  ;;  %v4249_v50 = vpack.c.bf16 %v306_v42, %v285_v41  ;;  %v4373_v51 = vpack.c.bf16 %v308_v45, %v287_v43  ;;  %v517_v41 = vld [vmem:[%s9135_s1 + $0xf80] sm:$0xff]  ;;  %v498_v42 = vld [vmem:[%s9135_s1 + $0xee8] sm:$0xff] }
 0x189   :  { %v4251_v52 = vpack.c.bf16 %v349_v47, %v328_v46  ;;  %v519_v43 = vld [vmem:[%s9135_s1 + $0xf90] sm:$0xff] }
 0x18a   :  { %v495_v47 = vld [vmem:[%s9135_s1 + $0xed0] sm:$0xff] }
 0x18b   :  { %4234 = vmatpush1.bf16.msra.mxu0 %v4233_v56  ;;  %4358 = vmatpush1.bf16.msra.mxu1 %v4357_v57  ;;  %v4375_v56 = vpack.c.bf16 %v351_v49, %v330_v48  ;;  %v350_v57 = vld [vmem:[%s9135_s1 + $0xa48] sm:$0xff]  ;;  %v516_v48 = vld [vmem:[%s9135_s1 + $0xf78] sm:$0xff]  ;;  %v497_v49 = vld [vmem:[%s9135_s1 + $0xee0] sm:$0xff] }
 0x18c   :  { %4236 = vmatprep.subr.bf16.mxu0 %v4235_v58  ;;  %4360 = vmatprep.subr.bf16.mxu1 %v4359_v63  ;;  %v370_v58 = vld [vmem:[%s9135_s1 + $0xae8] sm:$0xff]  ;;  %v4253_v63 = vpack.c.bf16 %v348_v54, %v327_v53  ;;  %v4377_v0 = vpack.c.bf16 %v350_v57, %v329_v55  ;;  %v559_v53 = vld [vmem:[%s9135_s1 + $0x10d0] sm:$0xff]  ;;  %v540_v54 = vld [vmem:[%s9135_s1 + $0x1038] sm:$0xff] }
 0x18d   :  { %v4255_v1 = vpack.c.bf16 %v391_v59, %v370_v58  ;;  %v561_v55 = vld [vmem:[%s9135_s1 + $0x10e0] sm:$0xff] }
 0x18e   :  { %v537_v59 = vld [vmem:[%s9135_s1 + $0x1020] sm:$0xff] }
 0x18f   :  { %4238 = vmatpush1.bf16.msra.mxu0 %v4237_v5  ;;  %4362 = vmatpush1.bf16.msra.mxu1 %v4361_v6  ;;  %v4379_v5 = vpack.c.bf16 %v393_v62, %v372_v60  ;;  %v392_v6 = vld [vmem:[%s9135_s1 + $0xb98] sm:$0xff]  ;;  %v558_v60 = vld [vmem:[%s9135_s1 + $0x10c8] sm:$0xff]  ;;  %v539_v62 = vld [vmem:[%s9135_s1 + $0x1030] sm:$0xff] }
 0x190   :  { %4240 = vmatprep.subr.bf16.mxu0 %v4239_v7  ;;  %4364 = vmatprep.subr.bf16.mxu1 %v4363_v12  ;;  %v412_v7 = vld [vmem:[%s9135_s1 + $0xc38] sm:$0xff]  ;;  %v4257_v12 = vpack.c.bf16 %v390_v3, %v369_v2  ;;  %v4381_v13 = vpack.c.bf16 %v392_v6, %v371_v4  ;;  %v601_v2 = vld [vmem:[%s9135_s1 + $0x1220] sm:$0xff]  ;;  %v582_v3 = vld [vmem:[%s9135_s1 + $0x1188] sm:$0xff] }
 0x191   :  { %v4259_v16 = vpack.c.bf16 %v433_v8, %v412_v7  ;;  %v603_v4 = vld [vmem:[%s9135_s1 + $0x1230] sm:$0xff] }
 0x192   :  { %v579_v8 = vld [vmem:[%s9135_s1 + $0x1170] sm:$0xff] }
 0x193   :  { %4242 = vmatpush1.bf16.msra.mxu0 %v4241_v21  ;;  %4366 = vmatpush1.bf16.msra.mxu1 %v4365_v22  ;;  %v4383_v21 = vpack.c.bf16 %v435_v10, %v414_v9  ;;  %v434_v22 = vld [vmem:[%s9135_s1 + $0xce8] sm:$0xff]  ;;  %v600_v9 = vld [vmem:[%s9135_s1 + $0x1218] sm:$0xff]  ;;  %v581_v10 = vld [vmem:[%s9135_s1 + $0x1180] sm:$0xff] }
 0x194   :  { %4244 = vmatprep.subr.bf16.mxu0 %v4243_v23  ;;  %4368 = vmatprep.subr.bf16.mxu1 %v4367_v30  ;;  %v454_v23 = vld [vmem:[%s9135_s1 + $0xd88] sm:$0xff]  ;;  %v4261_v30 = vpack.c.bf16 %v432_v18, %v411_v17  ;;  %v4385_v31 = vpack.c.bf16 %v434_v22, %v413_v19  ;;  %v643_v17 = vld [vmem:[%s9135_s1 + $0x1370] sm:$0xff]  ;;  %v624_v18 = vld [vmem:[%s9135_s1 + $0x12d8] sm:$0xff] }
 0x195   :  { %v4263_v33 = vpack.c.bf16 %v475_v26, %v454_v23  ;;  %v645_v19 = vld [vmem:[%s9135_s1 + $0x1380] sm:$0xff] }
 0x196   :  { %v621_v26 = vld [vmem:[%s9135_s1 + $0x12c0] sm:$0xff] }
 0x197   :  { %4246 = vmatpush1.bf16.msra.mxu0 %v4245_v37  ;;  %4370 = vmatpush1.bf16.msra.mxu1 %v4369_v38  ;;  %v4387_v37 = vpack.c.bf16 %v477_v29, %v456_v27  ;;  %v476_v38 = vld [vmem:[%s9135_s1 + $0xe38] sm:$0xff]  ;;  %v642_v27 = vld [vmem:[%s9135_s1 + $0x1368] sm:$0xff]  ;;  %v623_v29 = vld [vmem:[%s9135_s1 + $0x12d0] sm:$0xff] }
 0x198   :  { %4248 = vmatprep.subr.bf16.mxu0 %v4247_v40  ;;  %4372 = vmatprep.subr.bf16.mxu1 %v4371_v44  ;;  %v496_v40 = vld [vmem:[%s9135_s1 + $0xed8] sm:$0xff]  ;;  %v4265_v44 = vpack.c.bf16 %v474_v35, %v453_v34  ;;  %v4389_v45 = vpack.c.bf16 %v476_v38, %v455_v36  ;;  %v685_v34 = vld [vmem:[%s9135_s1 + $0x14c0] sm:$0xff]  ;;  %v666_v35 = vld [vmem:[%s9135_s1 + $0x1428] sm:$0xff] }
 0x199   :  { %v4267_v46 = vpack.c.bf16 %v517_v41, %v496_v40  ;;  %v687_v36 = vld [vmem:[%s9135_s1 + $0x14d0] sm:$0xff] }
 0x19a   :  { %v663_v41 = vld [vmem:[%s9135_s1 + $0x1410] sm:$0xff] }
 0x19b   :  { %4250 = vmatpush1.bf16.msra.mxu0 %v4249_v50  ;;  %4374 = vmatpush1.bf16.msra.mxu1 %v4373_v51  ;;  %v4391_v50 = vpack.c.bf16 %v519_v43, %v498_v42  ;;  %v518_v51 = vld [vmem:[%s9135_s1 + $0xf88] sm:$0xff]  ;;  %v684_v42 = vld [vmem:[%s9135_s1 + $0x14b8] sm:$0xff]  ;;  %v665_v43 = vld [vmem:[%s9135_s1 + $0x1420] sm:$0xff] }
 0x19c   :  { %4252 = vmatprep.subr.bf16.mxu0 %v4251_v52  ;;  %4376 = vmatprep.subr.bf16.mxu1 %v4375_v56  ;;  %v538_v52 = vld [vmem:[%s9135_s1 + $0x1028] sm:$0xff]  ;;  %v4269_v56 = vpack.c.bf16 %v516_v48, %v495_v47  ;;  %v4393_v57 = vpack.c.bf16 %v518_v51, %v497_v49  ;;  %v727_v47 = vld [vmem:[%s9135_s1 + $0x1610] sm:$0xff]  ;;  %v708_v48 = vld [vmem:[%s9135_s1 + $0x1578] sm:$0xff] }
 0x19d   :  { %v4271_v58 = vpack.c.bf16 %v559_v53, %v538_v52  ;;  %v729_v49 = vld [vmem:[%s9135_s1 + $0x1620] sm:$0xff] }
 0x19e   :  { %v705_v53 = vld [vmem:[%s9135_s1 + $0x1560] sm:$0xff] }
 0x19f   :  { %4254 = vmatpush1.bf16.msra.mxu0 %v4253_v63  ;;  %4378 = vmatpush1.bf16.msra.mxu1 %v4377_v0  ;;  %v4395_v63 = vpack.c.bf16 %v561_v55, %v540_v54  ;;  %v560_v0 = vld [vmem:[%s9135_s1 + $0x10d8] sm:$0xff]  ;;  %v726_v54 = vld [vmem:[%s9135_s1 + $0x1608] sm:$0xff]  ;;  %v707_v55 = vld [vmem:[%s9135_s1 + $0x1570] sm:$0xff] }
 0x1a0   :  { %4256 = vmatprep.subr.bf16.mxu0 %v4255_v1  ;;  %4380 = vmatprep.subr.bf16.mxu1 %v4379_v5  ;;  %v580_v1 = vld [vmem:[%s9135_s1 + $0x1178] sm:$0xff]  ;;  %v4273_v5 = vpack.c.bf16 %v558_v60, %v537_v59  ;;  %v4397_v6 = vpack.c.bf16 %v560_v0, %v539_v62  ;;  %v769_v59 = vld [vmem:[%s9135_s1 + $0x1760] sm:$0xff]  ;;  %v750_v60 = vld [vmem:[%s9135_s1 + $0x16c8] sm:$0xff] }
 0x1a1   :  { %v4275_v7 = vpack.c.bf16 %v601_v2, %v580_v1  ;;  %v771_v62 = vld [vmem:[%s9135_s1 + $0x1770] sm:$0xff] }
 0x1a2   :  { %v747_v2 = vld [vmem:[%s9135_s1 + $0x16b0] sm:$0xff] }
 0x1a3   :  { %4258 = vmatpush1.bf16.msra.mxu0 %v4257_v12  ;;  %4382 = vmatpush1.bf16.msra.mxu1 %v4381_v13  ;;  %v4399_v12 = vpack.c.bf16 %v603_v4, %v582_v3  ;;  %v602_v13 = vld [vmem:[%s9135_s1 + $0x1228] sm:$0xff]  ;;  %v768_v3 = vld [vmem:[%s9135_s1 + $0x1758] sm:$0xff]  ;;  %v749_v4 = vld [vmem:[%s9135_s1 + $0x16c0] sm:$0xff] }
 0x1a4   :  { %4260 = vmatprep.subr.bf16.mxu0 %v4259_v16  ;;  %4384 = vmatprep.subr.bf16.mxu1 %v4383_v21  ;;  %v622_v16 = vld [vmem:[%s9135_s1 + $0x12c8] sm:$0xff]  ;;  %v4277_v21 = vpack.c.bf16 %v600_v9, %v579_v8  ;;  %v4401_v22 = vpack.c.bf16 %v602_v13, %v581_v10  ;;  %v811_v8 = vld [vmem:[%s9135_s1 + $0x18b0] sm:$0xff]  ;;  %v792_v9 = vld [vmem:[%s9135_s1 + $0x1818] sm:$0xff] }
 0x1a5   :  { %v4279_v23 = vpack.c.bf16 %v643_v17, %v622_v16  ;;  %v813_v10 = vld [vmem:[%s9135_s1 + $0x18c0] sm:$0xff] }
 0x1a6   :  { %v789_v17 = vld [vmem:[%s9135_s1 + $0x1800] sm:$0xff] }
 0x1a7   :  { %4262 = vmatpush1.bf16.msra.mxu0 %v4261_v30  ;;  %4386 = vmatpush1.bf16.msra.mxu1 %v4385_v31  ;;  %v4403_v30 = vpack.c.bf16 %v645_v19, %v624_v18  ;;  %v644_v31 = vld [vmem:[%s9135_s1 + $0x1378] sm:$0xff]  ;;  %v810_v18 = vld [vmem:[%s9135_s1 + $0x18a8] sm:$0xff]  ;;  %v791_v19 = vld [vmem:[%s9135_s1 + $0x1810] sm:$0xff] }
 0x1a8   :  { %4264 = vmatprep.subr.bf16.mxu0 %v4263_v33  ;;  %4388 = vmatprep.subr.bf16.mxu1 %v4387_v37  ;;  %v664_v33 = vld [vmem:[%s9135_s1 + $0x1418] sm:$0xff]  ;;  %v4281_v37 = vpack.c.bf16 %v642_v27, %v621_v26  ;;  %v4405_v38 = vpack.c.bf16 %v644_v31, %v623_v29  ;;  %v853_v26 = vld [vmem:[%s9135_s1 + $0x1a00] sm:$0xff]  ;;  %v834_v27 = vld [vmem:[%s9135_s1 + $0x1968] sm:$0xff] }
 0x1a9   :  { %v4283_v40 = vpack.c.bf16 %v685_v34, %v664_v33  ;;  %v855_v29 = vld [vmem:[%s9135_s1 + $0x1a10] sm:$0xff] }
 0x1aa   :  { %v831_v34 = vld [vmem:[%s9135_s1 + $0x1950] sm:$0xff] }
 0x1ab   :  { %4266 = vmatpush1.bf16.msra.mxu0 %v4265_v44  ;;  %4390 = vmatpush1.bf16.msra.mxu1 %v4389_v45  ;;  %v4407_v44 = vpack.c.bf16 %v687_v36, %v666_v35  ;;  %v686_v45 = vld [vmem:[%s9135_s1 + $0x14c8] sm:$0xff]  ;;  %v852_v35 = vld [vmem:[%s9135_s1 + $0x19f8] sm:$0xff]  ;;  %v833_v36 = vld [vmem:[%s9135_s1 + $0x1960] sm:$0xff] }
 0x1ac   :  { %4268 = vmatprep.subr.bf16.mxu0 %v4267_v46  ;;  %4392 = vmatprep.subr.bf16.mxu1 %v4391_v50  ;;  %v706_v46 = vld [vmem:[%s9135_s1 + $0x1568] sm:$0xff]  ;;  %v4285_v50 = vpack.c.bf16 %v684_v42, %v663_v41  ;;  %v4409_v51 = vpack.c.bf16 %v686_v45, %v665_v43  ;;  %v895_v41 = vld [vmem:[%s9135_s1 + $0x1b50] sm:$0xff]  ;;  %v876_v42 = vld [vmem:[%s9135_s1 + $0x1ab8] sm:$0xff] }
 0x1ad   :  { %v4287_v52 = vpack.c.bf16 %v727_v47, %v706_v46  ;;  %v897_v43 = vld [vmem:[%s9135_s1 + $0x1b60] sm:$0xff] }
 0x1ae   :  { %v873_v47 = vld [vmem:[%s9135_s1 + $0x1aa0] sm:$0xff] }
 0x1af   :  { %4270 = vmatpush1.bf16.msra.mxu0 %v4269_v56  ;;  %4394 = vmatpush1.bf16.msra.mxu1 %v4393_v57  ;;  %v4411_v56 = vpack.c.bf16 %v729_v49, %v708_v48  ;;  %v728_v57 = vld [vmem:[%s9135_s1 + $0x1618] sm:$0xff]  ;;  %v894_v48 = vld [vmem:[%s9135_s1 + $0x1b48] sm:$0xff]  ;;  %v875_v49 = vld [vmem:[%s9135_s1 + $0x1ab0] sm:$0xff] }
 0x1b0   :  { %4272 = vmatprep.subr.bf16.mxu0 %v4271_v58  ;;  %4396 = vmatprep.subr.bf16.mxu1 %v4395_v63  ;;  %v748_v58 = vld [vmem:[%s9135_s1 + $0x16b8] sm:$0xff]  ;;  %v4289_v63 = vpack.c.bf16 %v726_v54, %v705_v53  ;;  %v4413_v0 = vpack.c.bf16 %v728_v57, %v707_v55  ;;  %v937_v53 = vld [vmem:[%s9135_s1 + $0x1ca0] sm:$0xff]  ;;  %v918_v54 = vld [vmem:[%s9135_s1 + $0x1c08] sm:$0xff]  ;;  %v4305_v57 = vpack.c.bf16 %v894_v48, %v873_v47 }
 0x1b1   :  { %v4291_v1 = vpack.c.bf16 %v769_v59, %v748_v58  ;;  %v939_v55 = vld [vmem:[%s9135_s1 + $0x1cb0] sm:$0xff]  ;;  %v7779_v58 = vsub.s32 6, %v5128_v61 }
 0x1b2   :  { %v915_v59 = vld [vmem:[%s9135_s1 + $0x1bf0] sm:$0xff] }
 0x1b3   :  { %4274 = vmatpush1.bf16.msra.mxu0 %v4273_v5  ;;  %4398 = vmatpush1.bf16.msra.mxu1 %v4397_v6  ;;  %v4415_v5 = vpack.c.bf16 %v771_v62, %v750_v60  ;;  %v770_v6 = vld [vmem:[%s9135_s1 + $0x1768] sm:$0xff]  ;;  %v936_v60 = vld [vmem:[%s9135_s1 + $0x1c98] sm:$0xff]  ;;  %v7788_v62 = vsub.s32 5, %v5128_v61  ;;  %v1023_v47 = vld [vmem:[%s9135_s1 + $0x1f50] sm:$0xff] }
 0x1b4   :  { %4276 = vmatprep.subr.bf16.mxu0 %v4275_v7  ;;  %4400 = vmatprep.subr.bf16.mxu1 %v4399_v12  ;;  %v790_v7 = vld [vmem:[%s9135_s1 + $0x1808] sm:$0xff]  ;;  %v4293_v12 = vpack.c.bf16 %v768_v3, %v747_v2  ;;  %v4417_v13 = vpack.c.bf16 %v770_v6, %v749_v4  ;;  %v7794_v2 = vsub.s32 7, %v5128_v61  ;;  %v4431_v3 = vpack.c.bf16 %v939_v55, %v918_v54  ;;  %v979_v6 = vld [vmem:[%s9135_s1 + $0x1df0] sm:$0xff] }
 0x1b5   :  { %v4295_v16 = vpack.c.bf16 %v811_v8, %v790_v7  ;;  %v938_v4 = vld [vmem:[%s9135_s1 + $0x1ca8] sm:$0xff]  ;;  %v4840_v7 = vld [vmem:[%s9137_s2] sm:$0xff]  ;;  %v4309_v8 = vpack.c.bf16 %v936_v60, %v915_v59  ;;  %v1020_v59 = vld [vmem:[%s9135_s1 + $0x1f38] sm:$0xff] }
 0x1b6   :  { %v1001_v60 = vld [vmem:[%s9135_s1 + $0x1ea0] sm:$0xff] }
 0x1b7   :  { %4278 = vmatpush1.bf16.msra.mxu0 %v4277_v21  ;;  %4402 = vmatpush1.bf16.msra.mxu1 %v4401_v22  ;;  %v4419_v21 = vpack.c.bf16 %v813_v10, %v792_v9  ;;  %v812_v22 = vld [vmem:[%s9135_s1 + $0x18b8] sm:$0xff]  ;;  %v981_v10 = vld [vmem:[%s9135_s1 + $0x1e00] sm:$0xff] }
 0x1b8   :  { %4280 = vmatprep.subr.bf16.mxu0 %v4279_v23  ;;  %4404 = vmatprep.subr.bf16.mxu1 %v4403_v30  ;;  %v832_v23 = vld [vmem:[%s9135_s1 + $0x1958] sm:$0xff]  ;;  %v4297_v30 = vpack.c.bf16 %v810_v18, %v789_v17  ;;  %v4421_v31 = vpack.c.bf16 %v812_v22, %v791_v19  ;;  %v1377_v18 = vrot.slane %v4840_v7, %v7779_v58 }
 0x1b9   :  { %v4299_v33 = vpack.c.bf16 %v853_v26, %v832_v23  ;;  %v960_v9 = vld [vmem:[%s9135_s1 + $0x1d58] sm:$0xff]  ;;  %v1373_v19 = vrot.slane %v4840_v7, %v7788_v62  ;;  %v1381_v23 = vrot.slane %v4840_v7, %v7794_v2 }
 0x1bb   :  { %4282 = vmatpush1.bf16.msra.mxu0 %v4281_v37  ;;  %4406 = vmatpush1.bf16.msra.mxu1 %v4405_v38  ;;  %v4423_v37 = vpack.c.bf16 %v855_v29, %v834_v27  ;;  %v854_v38 = vld [vmem:[%s9135_s1 + $0x1a08] sm:$0xff]  ;;  %v959_v29 = vld [vmem:[%s9135_s1 + $0x1d50] sm:$0xff] }
 0x1bc   :  { %4284 = vmatprep.subr.bf16.mxu0 %v4283_v40  ;;  %4408 = vmatprep.subr.bf16.mxu1 %v4407_v44  ;;  %v874_v40 = vld [vmem:[%s9135_s1 + $0x1aa8] sm:$0xff]  ;;  %v4301_v44 = vpack.c.bf16 %v852_v35, %v831_v34  ;;  %v4425_v45 = vpack.c.bf16 %v854_v38, %v833_v36  ;;  %v4435_v36 = vpack.c.bf16 %v981_v10, %v960_v9  ;;  %v1021_v38 = vld [vmem:[%s9135_s1 + $0x1f40] sm:$0xff] }
 0x1bd   :  { %v4303_v46 = vpack.c.bf16 %v895_v41, %v874_v40  ;;  %v978_v27 = vld [vmem:[%s9135_s1 + $0x1de8] sm:$0xff] }
 0x1bf   :  { %4286 = vmatpush1.bf16.msra.mxu0 %v4285_v50  ;;  %4410 = vmatpush1.bf16.msra.mxu1 %v4409_v51  ;;  %v4427_v50 = vpack.c.bf16 %v897_v43, %v876_v42  ;;  %v896_v51 = vld [vmem:[%s9135_s1 + $0x1b58] sm:$0xff] }
 0x1c0   :  { %4288 = vmatprep.subr.bf16.mxu0 %v4287_v52  ;;  %4412 = vmatprep.subr.bf16.mxu1 %v4411_v56  ;;  %v916_v52 = vld [vmem:[%s9135_s1 + $0x1bf8] sm:$0xff]  ;;  %v7776_v56 = vsub.s32 4, %v5128_v61 }
 0x1c2   :  { %2396 = vmatmul.mubr.f32.vlgmr.msra.gmra.mrb[6].mxu0 %v5188_v25  ;;  %2538 = vmatmul.mubr.f32.vlgmr.msra.gmra.mrb[6].mxu1 %v5188_v25  ;;  %v1369_v61 = vrot.slane %v4840_v7, %v7776_v56 }
 0x1c3   :  { %4290 = vmatpush1.bf16.msra.mxu0 %v4289_v63  ;;  %4414 = vmatpush1.bf16.msra.mxu1 %v4413_v0  ;;  %v4429_v63 = vpack.c.bf16 %v896_v51, %v875_v49  ;;  %v4307_v0 = vpack.c.bf16 %v937_v53, %v916_v52 }
 0x1c4   :  { %4292 = vmatprep.subr.bf16.mxu0 %v4291_v1  ;;  %4416 = vmatprep.subr.bf16.mxu1 %v4415_v5  ;;  %v917_v1 = vld [vmem:[%s9135_s1 + $0x1c00] sm:$0xff]  ;;  %v958_v5 = vld [vmem:[%s9135_s1 + $0x1d48] sm:$0xff] }
 0x1c5   :  { %3438 = vmatprep.mubr.msk.f32.mxu0 %vm1476_vm0, %v5341_v39  ;;  %3439 = vmatprep.mubr.msk.f32.mxu1 %vm1476_vm0, %v5341_v39  ;;  %v4433_v22 = vpack.c.bf16 %v938_v4, %v917_v1  ;;  %v4311_v26 = vpack.c.bf16 %v979_v6, %v958_v5  ;;  %v1042_v4 = vld [vmem:[%s9135_s1 + $0x1fe8] sm:$0xff]  ;;  %v1063_v5 = vld [vmem:[%s9135_s1 + $0x2090] sm:$0xff] }
 0x1c7   :  { %4294 = vmatpush1.bf16.msra.mxu0 %v4293_v12  ;;  %4418 = vmatpush1.bf16.msra.mxu1 %v4417_v13  ;;  %v4841_v12 = vld [vmem:[%s9138_s3] sm:$0xff] }
 0x1c8   :  { %4296 = vmatprep.subr.bf16.mxu0 %v4295_v16  ;;  %4420 = vmatprep.subr.bf16.mxu1 %v4419_v21  ;;  %v3064_v13 = vrot.slane %v4841_v12, %v7776_v56  ;;  %v4842_v16 = vld [vmem:[%s9139_s4] sm:$0xff]  ;;  %v3068_v35 = vrot.slane %v4841_v12, %v7788_v62 }
 0x1c9   :  { %v3196_v17 = vrot.slane %v4842_v16, %v7776_v56  ;;  %v957_v21 = vld [vmem:[%s9135_s1 + $0x1d40] sm:$0xff]  ;;  %v3204_v34 = vrot.slane %v4842_v16, %v7779_v58  ;;  %v3200_v43 = vrot.slane %v4842_v16, %v7788_v62 }
 0x1ca   :  { %v4313_v51 = vpack.c.bf16 %v978_v27, %v957_v21  ;;  %v1043_v21 = vld [vmem:[%s9135_s1 + $0x1ff0] sm:$0xff]  ;;  %v1084_v27 = vld [vmem:[%s9135_s1 + $0x2138] sm:$0xff] }
 0x1cb   :  { %4298 = vmatpush1.bf16.msra.mxu0 %v4297_v30  ;;  %4422 = vmatpush1.bf16.msra.mxu1 %v4421_v31  ;;  %v980_v30 = vld [vmem:[%s9135_s1 + $0x1df8] sm:$0xff] }
 0x1cc   :  { %4300 = vmatprep.subr.bf16.mxu0 %v4299_v33  ;;  %4424 = vmatprep.subr.bf16.mxu1 %v4423_v37  ;;  %v3072_v33 = vrot.slane %v4841_v12, %v7779_v58  ;;  %v1000_v37 = vld [vmem:[%s9135_s1 + $0x1e98] sm:$0xff]  ;;  %v4437_v52 = vpack.c.bf16 %v980_v30, %v959_v29  ;;  %v1105_v29 = vld [vmem:[%s9135_s1 + $0x21e0] sm:$0xff] }
 0x1cd   :  { %v4315_v55 = vpack.c.bf16 %v1021_v38, %v1000_v37  ;;  %v4323_v38 = vpack.c.bf16 %v1105_v29, %v1084_v27  ;;  %v1232_v27 = vld [vmem:[%s9135_s1 + $0x25d8] sm:$0xff] }
 0x1ce   :  { %v1252_v29 = vld [vmem:[%s9135_s1 + $0x2678] sm:$0xff] }
 0x1cf   :  { %4302 = vmatpush1.bf16.msra.mxu0 %v4301_v44  ;;  %4426 = vmatpush1.bf16.msra.mxu1 %v4425_v45  ;;  %v3076_v44 = vrot.slane %v4841_v12, %v7794_v2  ;;  %v3208_v45 = vrot.slane %v4842_v16, %v7794_v2 }
 0x1d0   :  { %4304 = vmatprep.subr.bf16.mxu0 %v4303_v46  ;;  %4428 = vmatprep.subr.bf16.mxu1 %v4427_v50  ;;  %v1002_v46 = vld [vmem:[%s9135_s1 + $0x1ea8] sm:$0xff] }
 0x1d1   :  { %v4439_v1 = vpack.c.bf16 %v1023_v47, %v1002_v46  ;;  %v1147_v46 = vld [vmem:[%s9135_s1 + $0x2330] sm:$0xff] }
 0x1d3   :  { %4306 = vmatpush1.bf16.msra.mxu0 %v4305_v57  ;;  %4430 = vmatpush1.bf16.msra.mxu1 %v4429_v63  ;;  %v999_v57 = vld [vmem:[%s9135_s1 + $0x1e90] sm:$0xff] }
 0x1d4   :  { %4308 = vmatprep.subr.bf16.mxu0 %v4307_v0  ;;  %4432 = vmatprep.subr.bf16.mxu1 %v4431_v3  ;;  %v1022_v3 = vld [vmem:[%s9135_s1 + $0x1f48] sm:$0xff]  ;;  %v4317_v12 = vpack.c.bf16 %v1020_v59, %v999_v57  ;;  %v1148_v59 = vld [vmem:[%s9135_s1 + $0x2338] sm:$0xff] }
 0x1d5   :  { %v1900_v31 = vpop.f32.mrb[2].mxu0  ;;  %v2042_v41 = vpop.f32.mrb[2].mxu1  ;;  %v4441_v16 = vpack.c.bf16 %v1022_v3, %v1001_v60  ;;  %v1168_v60 = vld [vmem:[%s9135_s1 + $0x23d8] sm:$0xff] }
 0x1d6   :  { %v4800_v40 = vadd.f32 %v1900_v31, %v1369_v61  ;;  %v1902_v42 = vpop.f32.mrb[3].mxu0  ;;  %v4802_v48 = vadd.f32 %v2042_v41, %v1377_v18  ;;  %v2044_v50 = vpop.f32.mrb[3].mxu1  ;;  %v1044_v61 = vld [vmem:[%s9135_s1 + $0x1ff8] sm:$0xff]  ;;  %v4319_v18 = vpack.c.bf16 %v1063_v5, %v1042_v4  ;;  %v1086_v31 = vld [vmem:[%s9135_s1 + $0x2148] sm:$0xff] }
 0x1d7   :  { %4310 = vmatpush1.bf16.msra.mxu0 %v4309_v8  ;;  %v4801_v49 = vadd.f32 %v1902_v42, %v1373_v19  ;;  %4434 = vmatpush1.bf16.msra.mxu1 %v4433_v22  ;;  %v4803_v54 = vadd.f32 %v2044_v50, %v1381_v23  ;;  %v1065_v8 = vld [vmem:[%s9135_s1 + $0x20a0] sm:$0xff]  ;;  %v1062_v19 = vld [vmem:[%s9135_s1 + $0x2088] sm:$0xff]  ;;  %v1104_v41 = vld [vmem:[%s9135_s1 + $0x21d8] sm:$0xff] }
 0x1d8   :  { %v3154_v53 = vmul.f32 %v4800_v40, %v3064_v13  ;;  %4312 = vmatprep.subr.bf16.mxu0 %v4311_v26  ;;  %v3156_v63 = vmul.f32 %v4802_v48, %v3072_v33  ;;  %4436 = vmatprep.subr.bf16.mxu1 %v4435_v36  ;;  %v4443_v23 = vpack.c.bf16 %v1065_v8, %v1044_v61  ;;  %v1064_v26 = vld [vmem:[%s9135_s1 + $0x2098] sm:$0xff]  ;;  %v1107_v33 = vld [vmem:[%s9135_s1 + $0x21f0] sm:$0xff]  ;;  %v1085_v42 = vld [vmem:[%s9135_s1 + $0x2140] sm:$0xff] }
 0x1d9   :  { %v3155_v0 = vmul.f32 %v4801_v49, %v3068_v35  ;;  %v3157_v7 = vmul.f32 %v4803_v54, %v3076_v44  ;;  %v4445_v37 = vpack.c.bf16 %v1064_v26, %v1043_v21  ;;  %v1083_v40 = vld [vmem:[%s9135_s1 + $0x2130] sm:$0xff]  ;;  %v1106_v44 = vld [vmem:[%s9135_s1 + $0x21e8] sm:$0xff]  ;;  %v1128_v48 = vld [vmem:[%s9135_s1 + $0x2298] sm:$0xff] }
 0x1da   :  { %v3286_v6 = vadd.f32 %v3196_v17, %v3154_v53  ;;  %v3288_v9 = vadd.f32 %v3204_v34, %v3156_v63  ;;  %v1041_v17 = vld [vmem:[%s9135_s1 + $0x1fe0] sm:$0xff]  ;;  %v4325_v50 = vpack.c.bf16 %v1104_v41, %v1083_v40  ;;  %v1146_v54 = vld [vmem:[%s9135_s1 + $0x2328] sm:$0xff] }
 0x1db   :  { %v3287_v10 = vadd.f32 %v3200_v43, %v3155_v0  ;;  %4314 = vmatpush1.bf16.msra.mxu0 %v4313_v51  ;;  %v3289_v13 = vadd.f32 %v3208_v45, %v3157_v7  ;;  %4438 = vmatpush1.bf16.msra.mxu1 %v4437_v52  ;;  %v4321_v35 = vpack.c.bf16 %v1062_v19, %v1041_v17  ;;  %v1126_v45 = vld [vmem:[%s9135_s1 + $0x2288] sm:$0xff]  ;;  %v1149_v49 = vld [vmem:[%s9135_s1 + $0x2340] sm:$0xff]  ;;  %v1188_v7 = vld [vmem:[%s9135_s1 + $0x2478] sm:$0xff] }
 0x1dc   :  { %4316 = vmatprep.subr.bf16.mxu0 %v4315_v55  ;;  %4440 = vmatprep.subr.bf16.mxu1 %v4439_v1  ;;  %v4447_v43 = vpack.c.bf16 %v1107_v33, %v1086_v31  ;;  %v4449_v51 = vpack.c.bf16 %v1106_v44, %v1085_v42  ;;  %v4327_v52 = vpack.c.bf16 %v1147_v46, %v1126_v45  ;;  %v1125_v53 = vld [vmem:[%s9135_s1 + $0x2280] sm:$0xff]  ;;  %v1127_v55 = vld [vmem:[%s9135_s1 + $0x2290] sm:$0xff]  ;;  %v1170_v0 = vld [vmem:[%s9135_s1 + $0x23e8] sm:$0xff] }
 0x1dd   :  { %v3341_v22 = vcombine.low %v3286_v6, %v3287_v10  ;;  %v3342_v30 = vcombine.low %v3288_v9, %v3289_v13  ;;  %v4451_v57 = vpack.c.bf16 %v1149_v49, %v1128_v48  ;;  %v1189_v63 = vld [vmem:[%s9135_s1 + $0x2480] sm:$0xff]  ;;  %v1191_v1 = vld [vmem:[%s9135_s1 + $0x2490] sm:$0xff]  ;;  %v4329_v3 = vpack.c.bf16 %v1146_v54, %v1125_v53  ;;  %v1190_v9 = vld [vmem:[%s9135_s1 + $0x2488] sm:$0xff] }
 0x1de   :  { %v4453_v4 = vpack.c.bf16 %v1148_v59, %v1127_v55  ;;  %v4331_v5 = vpack.c.bf16 %v1189_v63, %v1168_v60  ;;  %v1167_v6 = vld [vmem:[%s9135_s1 + $0x23d0] sm:$0xff]  ;;  %v1169_v61 = vld [vmem:[%s9135_s1 + $0x23e0] sm:$0xff]  ;;  %v4455_v8 = vpack.c.bf16 %v1191_v1, %v1170_v0  ;;  %v1210_v10 = vld [vmem:[%s9135_s1 + $0x2528] sm:$0xff] }
 0x1df   :  { %v3349_v34 = vrot.slane %v3341_v22, %v5155_v11  ;;  %4318 = vmatpush1.bf16.msra.mxu0 %v4317_v12  ;;  %v3356_v36 = vrot.slane %v3342_v30, %v5155_v11  ;;  %4442 = vmatpush1.bf16.msra.mxu1 %v4441_v16  ;;  %v1231_v12 = vld [vmem:[%s9135_s1 + $0x25d0] sm:$0xff]  ;;  %v1212_v13 = vld [vmem:[%s9135_s1 + $0x2538] sm:$0xff]  ;;  %v1233_v16 = vld [vmem:[%s9135_s1 + $0x25e0] sm:$0xff]  ;;  %v4457_v17 = vpack.c.bf16 %v1190_v9, %v1169_v61 }
 0x1e0   :  { %4320 = vmatprep.subr.bf16.mxu0 %v4319_v18  ;;  %4444 = vmatprep.subr.bf16.mxu1 %v4443_v23  ;;  %v4333_v18 = vpack.c.bf16 %v1188_v7, %v1167_v6  ;;  %v4335_v19 = vpack.c.bf16 %v1231_v12, %v1210_v10  ;;  %v1209_v21 = vld [vmem:[%s9135_s1 + $0x2520] sm:$0xff]  ;;  %v1230_v22 = vld [vmem:[%s9135_s1 + $0x25c8] sm:$0xff]  ;;  %v1211_v23 = vld [vmem:[%s9135_s1 + $0x2530] sm:$0xff]  ;;  %v4459_v26 = vpack.c.bf16 %v1233_v16, %v1212_v13 }
 0x1e1   :  { %v3357_v47 = vcombine.low %v3349_v34, %v3356_v36  ;;  %v1273_v30 = vld [vmem:[%s9135_s1 + $0x2720] sm:$0xff]  ;;  %v1254_v31 = vld [vmem:[%s9135_s1 + $0x2688] sm:$0xff]  ;;  %v1275_v33 = vld [vmem:[%s9135_s1 + $0x2730] sm:$0xff]  ;;  %v4337_v34 = vpack.c.bf16 %v1230_v22, %v1209_v21 }
 0x1e2   :  { %v4339_v36 = vpack.c.bf16 %v1273_v30, %v1252_v29  ;;  %v1253_v40 = vld [vmem:[%s9135_s1 + $0x2680] sm:$0xff]  ;;  %v4463_v41 = vpack.c.bf16 %v1275_v33, %v1254_v31  ;;  %v1274_v42 = vld [vmem:[%s9135_s1 + $0x2728] sm:$0xff]  ;;  %v1315_v44 = vld [vmem:[%s9135_s1 + $0x2870] sm:$0xff] }
 0x1e3   :  { %4322 = vmatpush1.bf16.msra.mxu0 %v4321_v35  ;;  %3423 = vst [vmem:[%s9140_s5 + $0x8] sm:$0xff] %v3357_v47  ;;  %4446 = vmatpush1.bf16.msra.mxu1 %v4445_v37  ;;  %v4461_v35 = vpack.c.bf16 %v1232_v27, %v1211_v23  ;;  %v1251_v37 = vld [vmem:[%s9135_s1 + $0x2670] sm:$0xff]  ;;  %v1296_v45 = vld [vmem:[%s9135_s1 + $0x27d8] sm:$0xff]  ;;  %v1317_v46 = vld [vmem:[%s9135_s1 + $0x2880] sm:$0xff]  ;;  %v4465_v48 = vpack.c.bf16 %v1274_v42, %v1253_v40 }
 0x1e4   :  { %4324 = vmatprep.subr.bf16.mxu0 %v4323_v38  ;;  %4448 = vmatprep.subr.bf16.mxu1 %v4447_v43  ;;  %v1272_v38 = vld [vmem:[%s9135_s1 + $0x2718] sm:$0xff]  ;;  %v1294_v43 = vld [vmem:[%s9135_s1 + $0x27c8] sm:$0xff]  ;;  %v1295_v53 = vld [vmem:[%s9135_s1 + $0x27d0] sm:$0xff] }
 0x1e5   :  { %v4341_v47 = vpack.c.bf16 %v1272_v38, %v1251_v37  ;;  %v4343_v49 = vpack.c.bf16 %v1315_v44, %v1294_v43  ;;  %v1316_v54 = vld [vmem:[%s9135_s1 + $0x2878] sm:$0xff]  ;;  %v1338_v60 = vld [vmem:[%s9135_s1 + $0x2928] sm:$0xff]  ;;  %v1335_v0 = vld [vmem:[%s9135_s1 + $0x2910] sm:$0xff] }
 0x1e6   :  { %v1336_v59 = vld [vmem:[%s9135_s1 + $0x2918] sm:$0xff]  ;;  %v38_v63 = vld [vmem:[%s9135_s1 + $0x88] sm:$0xff]  ;;  %v59_v1 = vld [vmem:[%s9135_s1 + $0x130] sm:$0xff] }
 0x1e7   :  { %4326 = vmatpush1.bf16.msra.mxu0 %v4325_v50  ;;  %4450 = vmatpush1.bf16.msra.mxu1 %v4449_v51  ;;  %v1293_v50 = vld [vmem:[%s9135_s1 + $0x27c0] sm:$0xff]  ;;  %v1314_v51 = vld [vmem:[%s9135_s1 + $0x2868] sm:$0xff]  ;;  %v39_v7 = vld [vmem:[%s9135_s1 + $0x90] sm:$0xff]  ;;  %v4471_v12 = vpack.c.bf16 %v59_v1, %v38_v63 }
 0x1e8   :  { %4328 = vmatprep.subr.bf16.mxu0 %v4327_v52  ;;  %4452 = vmatprep.subr.bf16.mxu1 %v4451_v57  ;;  %v4467_v52 = vpack.c.bf16 %v1317_v46, %v1296_v45  ;;  %v4345_v55 = vpack.c.bf16 %v1314_v51, %v1293_v50  ;;  %v4469_v57 = vpack.c.bf16 %v1316_v54, %v1295_v53  ;;  %v58_v6 = vld [vmem:[%s9135_s1 + $0x128] sm:$0xff]  ;;  %v60_v61 = vld [vmem:[%s9135_s1 + $0x138] sm:$0xff]  ;;  %v101_v9 = vld [vmem:[%s9135_s1 + $0x280] sm:$0xff] }
 0x1e9   :  { %v1337_v10 = vld [vmem:[%s9135_s1 + $0x2920] sm:$0xff]  ;;  %v82_v13 = vld [vmem:[%s9135_s1 + $0x1e8] sm:$0xff]  ;;  %v103_v16 = vld [vmem:[%s9135_s1 + $0x290] sm:$0xff] }
 0x1ea   :  { %v79_v22 = vld [vmem:[%s9135_s1 + $0x1d0] sm:$0xff]  ;;  %v100_v23 = vld [vmem:[%s9135_s1 + $0x278] sm:$0xff]  ;;  %v4599_v27 = vpack.c.bf16 %v103_v16, %v82_v13  ;;  %v102_v29 = vld [vmem:[%s9135_s1 + $0x288] sm:$0xff] }
 0x1eb   :  { %4330 = vmatpush1.bf16.msra.mxu0 %v4329_v3  ;;  %4454 = vmatpush1.bf16.msra.mxu1 %v4453_v4  ;;  %v40_v3 = vld [vmem:[%s9135_s1 + $0x98] sm:$0xff]  ;;  %v61_v4 = vld [vmem:[%s9135_s1 + $0x140] sm:$0xff]  ;;  %v122_v30 = vld [vmem:[%s9135_s1 + $0x328] sm:$0xff] }
 0x1ec   :  { %4332 = vmatprep.subr.bf16.mxu0 %v4331_v5  ;;  %4456 = vmatprep.subr.bf16.mxu1 %v4455_v8  ;;  %v37_v5 = vld [vmem:[%s9135_s1 + $0x80] sm:$0xff]  ;;  %v80_v8 = vld [vmem:[%s9135_s1 + $0x1d8] sm:$0xff]  ;;  %v143_v31 = vld [vmem:[%s9135_s1 + $0x3d0] sm:$0xff] }
 0x1ed   :  { %v4475_v21 = vpack.c.bf16 %v101_v9, %v80_v8  ;;  %v124_v33 = vld [vmem:[%s9135_s1 + $0x338] sm:$0xff]  ;;  %v4479_v37 = vpack.c.bf16 %v143_v31, %v122_v30  ;;  %v121_v38 = vld [vmem:[%s9135_s1 + $0x320] sm:$0xff]  ;;  %v142_v40 = vld [vmem:[%s9135_s1 + $0x3c8] sm:$0xff] }
 0x1ee   :  { %v144_v43 = vld [vmem:[%s9135_s1 + $0x3d8] sm:$0xff]  ;;  %v185_v45 = vld [vmem:[%s9135_s1 + $0x520] sm:$0xff]  ;;  %v166_v46 = vld [vmem:[%s9135_s1 + $0x488] sm:$0xff] }
 0x1ef   :  { %4334 = vmatpush1.bf16.msra.mxu0 %v4333_v18  ;;  %4458 = vmatpush1.bf16.msra.mxu1 %v4457_v17  ;;  %v4595_v18 = vpack.c.bf16 %v61_v4, %v40_v3  ;;  %v4473_v17 = vpack.c.bf16 %v58_v6, %v37_v5  ;;  %v164_v44 = vld [vmem:[%s9135_s1 + $0x478] sm:$0xff]  ;;  %v163_v51 = vld [vmem:[%s9135_s1 + $0x470] sm:$0xff]  ;;  %v165_v53 = vld [vmem:[%s9135_s1 + $0x480] sm:$0xff] }
 0x1f0   :  { %4336 = vmatprep.subr.bf16.mxu0 %v4335_v19  ;;  %4460 = vmatprep.subr.bf16.mxu1 %v4459_v26  ;;  %v4597_v19 = vpack.c.bf16 %v60_v61, %v39_v7  ;;  %v81_v26 = vld [vmem:[%s9135_s1 + $0x1e0] sm:$0xff]  ;;  %v4483_v50 = vpack.c.bf16 %v185_v45, %v164_v44  ;;  %v226_v5 = vld [vmem:[%s9135_s1 + $0x668] sm:$0xff]  ;;  %v207_v6 = vld [vmem:[%s9135_s1 + $0x5d0] sm:$0xff] }
 0x1f1   :  { %v229_v63 = vld [vmem:[%s9135_s1 + $0x680] sm:$0xff]  ;;  %v228_v61 = vld [vmem:[%s9135_s1 + $0x678] sm:$0xff]  ;;  %v355_v44 = vld [vmem:[%s9135_s1 + $0xa70] sm:$0xff] }
 0x1f2   :  { %v205_v4 = vld [vmem:[%s9135_s1 + $0x5c0] sm:$0xff]  ;;  %v248_v8 = vld [vmem:[%s9135_s1 + $0x718] sm:$0xff]  ;;  %v4613_v16 = vpack.c.bf16 %v228_v61, %v207_v6  ;;  %v418_v61 = vld [vmem:[%s9135_s1 + $0xc68] sm:$0xff] }
 0x1f3   :  { %4338 = vmatpush1.bf16.msra.mxu0 %v4337_v34  ;;  %4462 = vmatpush1.bf16.msra.mxu1 %v4461_v35  ;;  %v145_v34 = vld [vmem:[%s9135_s1 + $0x3e0] sm:$0xff]  ;;  %v4477_v35 = vpack.c.bf16 %v100_v23, %v79_v22  ;;  %v4489_v13 = vpack.c.bf16 %v226_v5, %v205_v4  ;;  %v270_v23 = vld [vmem:[%s9135_s1 + $0x7c8] sm:$0xff]  ;;  %v396_v5 = vld [vmem:[%s9135_s1 + $0xbb8] sm:$0xff] }
 0x1f4   :  { %4340 = vmatprep.subr.bf16.mxu0 %v4339_v36  ;;  %4464 = vmatprep.subr.bf16.mxu1 %v4463_v41  ;;  %v4601_v36 = vpack.c.bf16 %v102_v29, %v81_v26  ;;  %v123_v41 = vld [vmem:[%s9135_s1 + $0x330] sm:$0xff]  ;;  %v4603_v42 = vpack.c.bf16 %v145_v34, %v124_v33  ;;  %v269_v9 = vld [vmem:[%s9135_s1 + $0x7c0] sm:$0xff]  ;;  %v290_v26 = vld [vmem:[%s9135_s1 + $0x868] sm:$0xff] }
 0x1f5   :  { %v292_v29 = vld [vmem:[%s9135_s1 + $0x878] sm:$0xff]  ;;  %v313_v30 = vld [vmem:[%s9135_s1 + $0x920] sm:$0xff] }
 0x1f6   :  { %v416_v6 = vld [vmem:[%s9135_s1 + $0xc58] sm:$0xff] }
 0x1f7   :  { %4342 = vmatpush1.bf16.msra.mxu0 %v4341_v47  ;;  %4466 = vmatpush1.bf16.msra.mxu1 %v4465_v48  ;;  %v187_v47 = vld [vmem:[%s9135_s1 + $0x530] sm:$0xff]  ;;  %v4481_v48 = vpack.c.bf16 %v142_v40, %v121_v38  ;;  %v4619_v38 = vpack.c.bf16 %v313_v30, %v292_v29  ;;  %v312_v40 = vld [vmem:[%s9135_s1 + $0x918] sm:$0xff] }
 0x1f8   :  { %4344 = vmatprep.subr.bf16.mxu0 %v4343_v49  ;;  %4468 = vmatprep.subr.bf16.mxu1 %v4467_v52  ;;  %v4605_v49 = vpack.c.bf16 %v144_v43, %v123_v41  ;;  %v184_v52 = vld [vmem:[%s9135_s1 + $0x518] sm:$0xff]  ;;  %v4607_v54 = vpack.c.bf16 %v187_v47, %v166_v46  ;;  %v334_v43 = vld [vmem:[%s9135_s1 + $0x9c8] sm:$0xff] }
 0x1f9   :  { %v332_v41 = vld [vmem:[%s9135_s1 + $0x9b8] sm:$0xff] }
 0x1fb   :  { %4346 = vmatpush1.bf16.msra.mxu0 %v4345_v55  ;;  %4470 = vmatpush1.bf16.msra.mxu1 %v4469_v57  ;;  %v186_v55 = vld [vmem:[%s9135_s1 + $0x528] sm:$0xff] }
 0x1fc   :  { %2462 = vmatprep.subr.mxu0 %v1336_v59  ;;  %2604 = vmatprep.subr.mxu1 %v1338_v60  ;;  %v206_v57 = vld [vmem:[%s9135_s1 + $0x5c8] sm:$0xff]  ;;  %v227_v59 = vld [vmem:[%s9135_s1 + $0x670] sm:$0xff]  ;;  %v208_v60 = vld [vmem:[%s9135_s1 + $0x5d8] sm:$0xff]  ;;  %v4609_v1 = vpack.c.bf16 %v186_v55, %v165_v53 }
 0x1fd   :  { %v4487_v3 = vpack.c.bf16 %v227_v59, %v206_v57  ;;  %v4611_v7 = vpack.c.bf16 %v229_v63, %v208_v60  ;;  %v374_v53 = vld [vmem:[%s9135_s1 + $0xb08] sm:$0xff]  ;;  %v376_v55 = vld [vmem:[%s9135_s1 + $0xb18] sm:$0xff]  ;;  %v397_v57 = vld [vmem:[%s9135_s1 + $0xbc0] sm:$0xff] }
 0x1fe   :  { %v4627_v4 = vpack.c.bf16 %v397_v57, %v376_v55 }
 0x1ff   :  { %2463 = vmatpush1.msra.mxu0 %v1335_v0  ;;  %2605 = vmatpush1.msra.mxu1 %v1337_v10  ;;  %v4485_v0 = vpack.c.bf16 %v184_v52, %v163_v51  ;;  %v250_v10 = vld [vmem:[%s9135_s1 + $0x728] sm:$0xff]  ;;  %v4623_v51 = vpack.c.bf16 %v355_v44, %v334_v43 }
 0x200   :  { %2467 = vmatmul.mubr.f32.vlgmr.msra.gmra.mrb[6].mxu0 %v5313_v24  ;;  %2609 = vmatmul.mubr.f32.vlgmr.msra.gmra.mrb[6].mxu1 %v5313_v24  ;;  %v354_v52 = vld [vmem:[%s9135_s1 + $0xa68] sm:$0xff] }
 0x201   :  { %4472 = vmatprep.subr.bf16.mxu0 %v4471_v12  ;;  %4596 = vmatprep.subr.bf16.mxu1 %v4595_v18  ;;  %v271_v12 = vld [vmem:[%s9135_s1 + $0x7d0] sm:$0xff]  ;;  %v4491_v18 = vpack.c.bf16 %v269_v9, %v248_v8 }
 0x202   :  { %4474 = vmatpush1.bf16.msra.mxu0 %v4473_v17  ;;  %4598 = vmatpush1.bf16.msra.mxu1 %v4597_v19  ;;  %v247_v17 = vld [vmem:[%s9135_s1 + $0x710] sm:$0xff]  ;;  %v268_v19 = vld [vmem:[%s9135_s1 + $0x7b8] sm:$0xff]  ;;  %v4615_v22 = vpack.c.bf16 %v271_v12, %v250_v10 }
 0x203   :  { %4476 = vmatprep.subr.bf16.mxu0 %v4475_v21  ;;  %4600 = vmatprep.subr.bf16.mxu1 %v4599_v27  ;;  %v249_v21 = vld [vmem:[%s9135_s1 + $0x720] sm:$0xff]  ;;  %v311_v27 = vld [vmem:[%s9135_s1 + $0x910] sm:$0xff]  ;;  %v4493_v31 = vpack.c.bf16 %v268_v19, %v247_v17  ;;  %v438_v19 = vld [vmem:[%s9135_s1 + $0xd08] sm:$0xff] }
 0x204   :  { %2679 = vmatprep.mubr.f32.mxu0 %v5201_v32  ;;  %2821 = vmatprep.mubr.f32.mxu1 %v5201_v32  ;;  %v4617_v33 = vpack.c.bf16 %v270_v23, %v249_v21  ;;  %v4495_v34 = vpack.c.bf16 %v311_v27, %v290_v26  ;;  %v439_v8 = vld [vmem:[%s9135_s1 + $0xd10] sm:$0xff]  ;;  %v458_v21 = vld [vmem:[%s9135_s1 + $0xda8] sm:$0xff]  ;;  %v460_v23 = vld [vmem:[%s9135_s1 + $0xdb8] sm:$0xff] }
 0x205   :  { %v4631_v17 = vpack.c.bf16 %v439_v8, %v418_v61  ;;  %v481_v26 = vld [vmem:[%s9135_s1 + $0xe60] sm:$0xff] }
 0x206   :  { %4478 = vmatpush1.bf16.msra.mxu0 %v4477_v35  ;;  %4602 = vmatpush1.bf16.msra.mxu1 %v4601_v36  ;;  %v289_v35 = vld [vmem:[%s9135_s1 + $0x860] sm:$0xff]  ;;  %v310_v36 = vld [vmem:[%s9135_s1 + $0x908] sm:$0xff] }
 0x207   :  { %4480 = vmatprep.subr.bf16.mxu0 %v4479_v37  ;;  %4604 = vmatprep.subr.bf16.mxu1 %v4603_v42  ;;  %v291_v37 = vld [vmem:[%s9135_s1 + $0x870] sm:$0xff]  ;;  %v353_v42 = vld [vmem:[%s9135_s1 + $0xa60] sm:$0xff]  ;;  %v4497_v45 = vpack.c.bf16 %v310_v36, %v289_v35  ;;  %v4635_v35 = vpack.c.bf16 %v481_v26, %v460_v23  ;;  %v480_v36 = vld [vmem:[%s9135_s1 + $0xe58] sm:$0xff] }
 0x208   :  { %v4621_v46 = vpack.c.bf16 %v312_v40, %v291_v37  ;;  %v4499_v47 = vpack.c.bf16 %v353_v42, %v332_v41  ;;  %v500_v37 = vld [vmem:[%s9135_s1 + $0xef8] sm:$0xff]  ;;  %v502_v40 = vld [vmem:[%s9135_s1 + $0xf08] sm:$0xff]  ;;  %v523_v41 = vld [vmem:[%s9135_s1 + $0xfb0] sm:$0xff] }
 0x20a   :  { %4482 = vmatpush1.bf16.msra.mxu0 %v4481_v48  ;;  %4606 = vmatpush1.bf16.msra.mxu1 %v4605_v49  ;;  %v331_v48 = vld [vmem:[%s9135_s1 + $0x9b0] sm:$0xff]  ;;  %v352_v49 = vld [vmem:[%s9135_s1 + $0xa58] sm:$0xff] }
 0x20b   :  { %4484 = vmatprep.subr.bf16.mxu0 %v4483_v50  ;;  %4608 = vmatprep.subr.bf16.mxu1 %v4607_v54  ;;  %v333_v50 = vld [vmem:[%s9135_s1 + $0x9c0] sm:$0xff]  ;;  %v395_v54 = vld [vmem:[%s9135_s1 + $0xbb0] sm:$0xff]  ;;  %v4501_v59 = vpack.c.bf16 %v352_v49, %v331_v48  ;;  %v4639_v48 = vpack.c.bf16 %v523_v41, %v502_v40  ;;  %v522_v49 = vld [vmem:[%s9135_s1 + $0xfa8] sm:$0xff] }
 0x20c   :  { %v4625_v60 = vpack.c.bf16 %v354_v52, %v333_v50  ;;  %v4503_v63 = vpack.c.bf16 %v395_v54, %v374_v53  ;;  %v542_v50 = vld [vmem:[%s9135_s1 + $0x1048] sm:$0xff]  ;;  %v544_v52 = vld [vmem:[%s9135_s1 + $0x1058] sm:$0xff]  ;;  %v565_v53 = vld [vmem:[%s9135_s1 + $0x1100] sm:$0xff] }
 0x20e   :  { %4486 = vmatpush1.bf16.msra.mxu0 %v4485_v0  ;;  %4610 = vmatpush1.bf16.msra.mxu1 %v4609_v1  ;;  %v373_v0 = vld [vmem:[%s9135_s1 + $0xb00] sm:$0xff]  ;;  %v394_v1 = vld [vmem:[%s9135_s1 + $0xba8] sm:$0xff] }
 0x20f   :  { %4488 = vmatprep.subr.bf16.mxu0 %v4487_v3  ;;  %4612 = vmatprep.subr.bf16.mxu1 %v4611_v7  ;;  %v375_v3 = vld [vmem:[%s9135_s1 + $0xb10] sm:$0xff]  ;;  %v437_v7 = vld [vmem:[%s9135_s1 + $0xd00] sm:$0xff]  ;;  %v4505_v9 = vpack.c.bf16 %v394_v1, %v373_v0  ;;  %v4643_v0 = vpack.c.bf16 %v565_v53, %v544_v52  ;;  %v564_v1 = vld [vmem:[%s9135_s1 + $0x10f8] sm:$0xff] }
 0x210   :  { %v4629_v10 = vpack.c.bf16 %v396_v5, %v375_v3  ;;  %v4507_v12 = vpack.c.bf16 %v437_v7, %v416_v6  ;;  %v584_v3 = vld [vmem:[%s9135_s1 + $0x1198] sm:$0xff]  ;;  %v586_v5 = vld [vmem:[%s9135_s1 + $0x11a8] sm:$0xff]  ;;  %v607_v6 = vld [vmem:[%s9135_s1 + $0x1250] sm:$0xff] }
 0x212   :  { %4490 = vmatpush1.bf16.msra.mxu0 %v4489_v13  ;;  %4614 = vmatpush1.bf16.msra.mxu1 %v4613_v16  ;;  %v415_v13 = vld [vmem:[%s9135_s1 + $0xc50] sm:$0xff]  ;;  %v436_v16 = vld [vmem:[%s9135_s1 + $0xcf8] sm:$0xff] }
 0x213   :  { %4492 = vmatprep.subr.bf16.mxu0 %v4491_v18  ;;  %4616 = vmatprep.subr.bf16.mxu1 %v4615_v22  ;;  %v417_v18 = vld [vmem:[%s9135_s1 + $0xc60] sm:$0xff]  ;;  %v479_v22 = vld [vmem:[%s9135_s1 + $0xe50] sm:$0xff]  ;;  %v4509_v27 = vpack.c.bf16 %v436_v16, %v415_v13  ;;  %v4647_v13 = vpack.c.bf16 %v607_v6, %v586_v5  ;;  %v606_v16 = vld [vmem:[%s9135_s1 + $0x1248] sm:$0xff] }
 0x214   :  { %v4633_v29 = vpack.c.bf16 %v438_v19, %v417_v18  ;;  %v4511_v30 = vpack.c.bf16 %v479_v22, %v458_v21  ;;  %v626_v18 = vld [vmem:[%s9135_s1 + $0x12e8] sm:$0xff]  ;;  %v628_v19 = vld [vmem:[%s9135_s1 + $0x12f8] sm:$0xff]  ;;  %v649_v21 = vld [vmem:[%s9135_s1 + $0x13a0] sm:$0xff] }
 0x216   :  { %4494 = vmatpush1.bf16.msra.mxu0 %v4493_v31  ;;  %4618 = vmatpush1.bf16.msra.mxu1 %v4617_v33  ;;  %v457_v31 = vld [vmem:[%s9135_s1 + $0xda0] sm:$0xff]  ;;  %v478_v33 = vld [vmem:[%s9135_s1 + $0xe48] sm:$0xff] }
 0x217   :  { %4496 = vmatprep.subr.bf16.mxu0 %v4495_v34  ;;  %4620 = vmatprep.subr.bf16.mxu1 %v4619_v38  ;;  %v459_v34 = vld [vmem:[%s9135_s1 + $0xdb0] sm:$0xff]  ;;  %v521_v38 = vld [vmem:[%s9135_s1 + $0xfa0] sm:$0xff]  ;;  %v4513_v42 = vpack.c.bf16 %v478_v33, %v457_v31  ;;  %v4651_v31 = vpack.c.bf16 %v649_v21, %v628_v19  ;;  %v648_v33 = vld [vmem:[%s9135_s1 + $0x1398] sm:$0xff] }
 0x218   :  { %v4637_v43 = vpack.c.bf16 %v480_v36, %v459_v34  ;;  %v4515_v44 = vpack.c.bf16 %v521_v38, %v500_v37  ;;  %v668_v34 = vld [vmem:[%s9135_s1 + $0x1438] sm:$0xff]  ;;  %v670_v36 = vld [vmem:[%s9135_s1 + $0x1448] sm:$0xff]  ;;  %v691_v37 = vld [vmem:[%s9135_s1 + $0x14f0] sm:$0xff] }
 0x21a   :  { %4498 = vmatpush1.bf16.msra.mxu0 %v4497_v45  ;;  %4622 = vmatpush1.bf16.msra.mxu1 %v4621_v46  ;;  %v499_v45 = vld [vmem:[%s9135_s1 + $0xef0] sm:$0xff]  ;;  %v520_v46 = vld [vmem:[%s9135_s1 + $0xf98] sm:$0xff] }
 0x21b   :  { %4500 = vmatprep.subr.bf16.mxu0 %v4499_v47  ;;  %4624 = vmatprep.subr.bf16.mxu1 %v4623_v51  ;;  %v501_v47 = vld [vmem:[%s9135_s1 + $0xf00] sm:$0xff]  ;;  %v563_v51 = vld [vmem:[%s9135_s1 + $0x10f0] sm:$0xff]  ;;  %v4517_v54 = vpack.c.bf16 %v520_v46, %v499_v45  ;;  %v4655_v45 = vpack.c.bf16 %v691_v37, %v670_v36  ;;  %v690_v46 = vld [vmem:[%s9135_s1 + $0x14e8] sm:$0xff] }
 0x21c   :  { %v4641_v55 = vpack.c.bf16 %v522_v49, %v501_v47  ;;  %v4519_v57 = vpack.c.bf16 %v563_v51, %v542_v50  ;;  %v710_v47 = vld [vmem:[%s9135_s1 + $0x1588] sm:$0xff]  ;;  %v712_v49 = vld [vmem:[%s9135_s1 + $0x1598] sm:$0xff]  ;;  %v733_v50 = vld [vmem:[%s9135_s1 + $0x1640] sm:$0xff] }
 0x21e   :  { %4502 = vmatpush1.bf16.msra.mxu0 %v4501_v59  ;;  %4626 = vmatpush1.bf16.msra.mxu1 %v4625_v60  ;;  %v541_v59 = vld [vmem:[%s9135_s1 + $0x1040] sm:$0xff]  ;;  %v562_v60 = vld [vmem:[%s9135_s1 + $0x10e8] sm:$0xff] }
 0x21f   :  { %4504 = vmatprep.subr.bf16.mxu0 %v4503_v63  ;;  %4628 = vmatprep.subr.bf16.mxu1 %v4627_v4  ;;  %v543_v63 = vld [vmem:[%s9135_s1 + $0x1050] sm:$0xff]  ;;  %v605_v4 = vld [vmem:[%s9135_s1 + $0x1240] sm:$0xff]  ;;  %v4521_v7 = vpack.c.bf16 %v562_v60, %v541_v59  ;;  %v4659_v59 = vpack.c.bf16 %v733_v50, %v712_v49  ;;  %v732_v60 = vld [vmem:[%s9135_s1 + $0x1638] sm:$0xff] }
 0x220   :  { %v4645_v61 = vpack.c.bf16 %v564_v1, %v543_v63  ;;  %v4523_v8 = vpack.c.bf16 %v605_v4, %v584_v3  ;;  %v752_v63 = vld [vmem:[%s9135_s1 + $0x16d8] sm:$0xff]  ;;  %v754_v1 = vld [vmem:[%s9135_s1 + $0x16e8] sm:$0xff]  ;;  %v775_v3 = vld [vmem:[%s9135_s1 + $0x1790] sm:$0xff] }
 0x222   :  { %4506 = vmatpush1.bf16.msra.mxu0 %v4505_v9  ;;  %4630 = vmatpush1.bf16.msra.mxu1 %v4629_v10  ;;  %v583_v9 = vld [vmem:[%s9135_s1 + $0x1190] sm:$0xff]  ;;  %v604_v10 = vld [vmem:[%s9135_s1 + $0x1238] sm:$0xff] }
 0x223   :  { %4508 = vmatprep.subr.bf16.mxu0 %v4507_v12  ;;  %4632 = vmatprep.subr.bf16.mxu1 %v4631_v17  ;;  %v585_v12 = vld [vmem:[%s9135_s1 + $0x11a0] sm:$0xff]  ;;  %v647_v17 = vld [vmem:[%s9135_s1 + $0x1390] sm:$0xff]  ;;  %v4525_v22 = vpack.c.bf16 %v604_v10, %v583_v9  ;;  %v4663_v9 = vpack.c.bf16 %v775_v3, %v754_v1  ;;  %v774_v10 = vld [vmem:[%s9135_s1 + $0x1788] sm:$0xff] }
 0x224   :  { %v4649_v23 = vpack.c.bf16 %v606_v16, %v585_v12  ;;  %v4527_v26 = vpack.c.bf16 %v647_v17, %v626_v18  ;;  %v794_v12 = vld [vmem:[%s9135_s1 + $0x1828] sm:$0xff]  ;;  %v796_v16 = vld [vmem:[%s9135_s1 + $0x1838] sm:$0xff]  ;;  %v817_v18 = vld [vmem:[%s9135_s1 + $0x18e0] sm:$0xff] }
 0x225   :  { %v8582_v1 = vld [vmem:[%s9137_s2 + $0x8] sm:$0xff] }
 0x226   :  { %4510 = vmatpush1.bf16.msra.mxu0 %v4509_v27  ;;  %4634 = vmatpush1.bf16.msra.mxu1 %v4633_v29  ;;  %v625_v27 = vld [vmem:[%s9135_s1 + $0x12e0] sm:$0xff]  ;;  %v646_v29 = vld [vmem:[%s9135_s1 + $0x1388] sm:$0xff] }
 0x227   :  { %4512 = vmatprep.subr.bf16.mxu0 %v4511_v30  ;;  %4636 = vmatprep.subr.bf16.mxu1 %v4635_v35  ;;  %v627_v30 = vld [vmem:[%s9135_s1 + $0x12f0] sm:$0xff]  ;;  %v689_v35 = vld [vmem:[%s9135_s1 + $0x14e0] sm:$0xff]  ;;  %v4529_v38 = vpack.c.bf16 %v646_v29, %v625_v27  ;;  %v4667_v27 = vpack.c.bf16 %v817_v18, %v796_v16  ;;  %v816_v29 = vld [vmem:[%s9135_s1 + $0x18d8] sm:$0xff]  ;;  %v1385_v16 = vrot.slane %v8582_v1, %v6960_v14 }
 0x228   :  { %v4653_v40 = vpack.c.bf16 %v648_v33, %v627_v30  ;;  %v4531_v41 = vpack.c.bf16 %v689_v35, %v668_v34  ;;  %v836_v30 = vld [vmem:[%s9135_s1 + $0x1978] sm:$0xff]  ;;  %v838_v33 = vld [vmem:[%s9135_s1 + $0x1988] sm:$0xff]  ;;  %v859_v34 = vld [vmem:[%s9135_s1 + $0x1a30] sm:$0xff] }
 0x229   :  { %v8587_v3 = vld [vmem:[%s9138_s3 + $0x8] sm:$0xff] }
 0x22a   :  { %4514 = vmatpush1.bf16.msra.mxu0 %v4513_v42  ;;  %4638 = vmatpush1.bf16.msra.mxu1 %v4637_v43  ;;  %v667_v42 = vld [vmem:[%s9135_s1 + $0x1430] sm:$0xff]  ;;  %v688_v43 = vld [vmem:[%s9135_s1 + $0x14d8] sm:$0xff]  ;;  %v3080_v18 = vrot.slane %v8587_v3, %v6960_v14 }
 0x22b   :  { %4516 = vmatprep.subr.bf16.mxu0 %v4515_v44  ;;  %4640 = vmatprep.subr.bf16.mxu1 %v4639_v48  ;;  %v669_v44 = vld [vmem:[%s9135_s1 + $0x1440] sm:$0xff]  ;;  %v731_v48 = vld [vmem:[%s9135_s1 + $0x1630] sm:$0xff]  ;;  %v4533_v51 = vpack.c.bf16 %v688_v43, %v667_v42  ;;  %v4671_v42 = vpack.c.bf16 %v859_v34, %v838_v33  ;;  %v858_v43 = vld [vmem:[%s9135_s1 + $0x1a28] sm:$0xff] }
 0x22c   :  { %v4657_v52 = vpack.c.bf16 %v690_v46, %v669_v44  ;;  %v4535_v53 = vpack.c.bf16 %v731_v48, %v710_v47  ;;  %v878_v44 = vld [vmem:[%s9135_s1 + $0x1ac8] sm:$0xff]  ;;  %v880_v46 = vld [vmem:[%s9135_s1 + $0x1ad8] sm:$0xff]  ;;  %v901_v47 = vld [vmem:[%s9135_s1 + $0x1b80] sm:$0xff] }
 0x22d   :  { %v982_v33 = vld [vmem:[%s9135_s1 + $0x1e08] sm:$0xff]  ;;  %v963_v34 = vld [vmem:[%s9135_s1 + $0x1d70] sm:$0xff] }
 0x22e   :  { %4518 = vmatpush1.bf16.msra.mxu0 %v4517_v54  ;;  %4642 = vmatpush1.bf16.msra.mxu1 %v4641_v55  ;;  %v709_v54 = vld [vmem:[%s9135_s1 + $0x1580] sm:$0xff]  ;;  %v730_v55 = vld [vmem:[%s9135_s1 + $0x1628] sm:$0xff] }
 0x22f   :  { %4520 = vmatprep.subr.bf16.mxu0 %v4519_v57  ;;  %4644 = vmatprep.subr.bf16.mxu1 %v4643_v0  ;;  %v711_v57 = vld [vmem:[%s9135_s1 + $0x1590] sm:$0xff]  ;;  %v773_v0 = vld [vmem:[%s9135_s1 + $0x1780] sm:$0xff]  ;;  %v4537_v4 = vpack.c.bf16 %v730_v55, %v709_v54  ;;  %v4675_v54 = vpack.c.bf16 %v901_v47, %v880_v46  ;;  %v900_v55 = vld [vmem:[%s9135_s1 + $0x1b78] sm:$0xff] }
 0x230   :  { %v4661_v5 = vpack.c.bf16 %v732_v60, %v711_v57  ;;  %v4539_v6 = vpack.c.bf16 %v773_v0, %v752_v63  ;;  %v920_v57 = vld [vmem:[%s9135_s1 + $0x1c18] sm:$0xff]  ;;  %v922_v60 = vld [vmem:[%s9135_s1 + $0x1c28] sm:$0xff]  ;;  %v943_v63 = vld [vmem:[%s9135_s1 + $0x1cd0] sm:$0xff] }
 0x232   :  { %4522 = vmatpush1.bf16.msra.mxu0 %v4521_v7  ;;  %4646 = vmatpush1.bf16.msra.mxu1 %v4645_v61  ;;  %v751_v7 = vld [vmem:[%s9135_s1 + $0x16d0] sm:$0xff]  ;;  %v772_v61 = vld [vmem:[%s9135_s1 + $0x1778] sm:$0xff] }
 0x233   :  { %4524 = vmatprep.subr.bf16.mxu0 %v4523_v8  ;;  %4648 = vmatprep.subr.bf16.mxu1 %v4647_v13  ;;  %v753_v8 = vld [vmem:[%s9135_s1 + $0x16e0] sm:$0xff]  ;;  %v815_v13 = vld [vmem:[%s9135_s1 + $0x18d0] sm:$0xff]  ;;  %v4541_v17 = vpack.c.bf16 %v772_v61, %v751_v7  ;;  %v940_v7 = vld [vmem:[%s9135_s1 + $0x1cb8] sm:$0xff] }
 0x234   :  { %v4665_v19 = vpack.c.bf16 %v774_v10, %v753_v8  ;;  %v4543_v21 = vpack.c.bf16 %v815_v13, %v794_v12  ;;  %v921_v61 = vld [vmem:[%s9135_s1 + $0x1c20] sm:$0xff]  ;;  %v942_v8 = vld [vmem:[%s9135_s1 + $0x1cc8] sm:$0xff]  ;;  %v983_v13 = vld [vmem:[%s9135_s1 + $0x1e10] sm:$0xff] }
 0x235   :  { %v8604_v10 = vld [vmem:[%s9139_s4 + $0x8] sm:$0xff] }
 0x236   :  { %4526 = vmatpush1.bf16.msra.mxu0 %v4525_v22  ;;  %4650 = vmatpush1.bf16.msra.mxu1 %v4649_v23  ;;  %v793_v22 = vld [vmem:[%s9135_s1 + $0x1820] sm:$0xff]  ;;  %v814_v23 = vld [vmem:[%s9135_s1 + $0x18c8] sm:$0xff]  ;;  %v3216_v47 = vrot.slane %v8604_v10, %v6979_v20 }
 0x237   :  { %4528 = vmatprep.subr.bf16.mxu0 %v4527_v26  ;;  %4652 = vmatprep.subr.bf16.mxu1 %v4651_v31  ;;  %v795_v26 = vld [vmem:[%s9135_s1 + $0x1830] sm:$0xff]  ;;  %v857_v31 = vld [vmem:[%s9135_s1 + $0x1a20] sm:$0xff]  ;;  %v4545_v35 = vpack.c.bf16 %v814_v23, %v793_v22  ;;  %v962_v12 = vld [vmem:[%s9135_s1 + $0x1d68] sm:$0xff]  ;;  %v4681_v23 = vpack.c.bf16 %v942_v8, %v921_v61 }
 0x238   :  { %v4669_v36 = vpack.c.bf16 %v816_v29, %v795_v26  ;;  %v4547_v37 = vpack.c.bf16 %v857_v31, %v836_v30  ;;  %v1389_v26 = vrot.slane %v8582_v1, %v6979_v20  ;;  %v3212_v29 = vrot.slane %v8604_v10, %v6960_v14  ;;  %v1026_v8 = vld [vmem:[%s9135_s1 + $0x1f68] sm:$0xff] }
 0x239   :  { %v1397_v30 = vrot.slane %v8582_v1, %v6991_v28  ;;  %v4559_v31 = vpack.c.bf16 %v983_v13, %v962_v12  ;;  %v1067_v12 = vld [vmem:[%s9135_s1 + $0x20b0] sm:$0xff] }
 0x23a   :  { %4530 = vmatpush1.bf16.msra.mxu0 %v4529_v38  ;;  %4654 = vmatpush1.bf16.msra.mxu1 %v4653_v40  ;;  %v835_v38 = vld [vmem:[%s9135_s1 + $0x1970] sm:$0xff]  ;;  %v856_v40 = vld [vmem:[%s9135_s1 + $0x1a18] sm:$0xff] }
 0x23b   :  { %4532 = vmatprep.subr.bf16.mxu0 %v4531_v41  ;;  %4656 = vmatprep.subr.bf16.mxu1 %v4655_v45  ;;  %v837_v41 = vld [vmem:[%s9135_s1 + $0x1980] sm:$0xff]  ;;  %v899_v45 = vld [vmem:[%s9135_s1 + $0x1b70] sm:$0xff]  ;;  %v4549_v48 = vpack.c.bf16 %v856_v40, %v835_v38  ;;  %v3220_v38 = vrot.slane %v8604_v10, %v6963_v15  ;;  %v3084_v40 = vrot.slane %v8587_v3, %v6979_v20 }
 0x23c   :  { %v4673_v49 = vpack.c.bf16 %v858_v43, %v837_v41  ;;  %v4551_v50 = vpack.c.bf16 %v899_v45, %v878_v44  ;;  %v1025_v43 = vld [vmem:[%s9135_s1 + $0x1f60] sm:$0xff] }
 0x23e   :  { %4534 = vmatpush1.bf16.msra.mxu0 %v4533_v51  ;;  %4658 = vmatpush1.bf16.msra.mxu1 %v4657_v52  ;;  %v877_v51 = vld [vmem:[%s9135_s1 + $0x1ac0] sm:$0xff]  ;;  %v898_v52 = vld [vmem:[%s9135_s1 + $0x1b68] sm:$0xff] }
 0x23f   :  { %4536 = vmatprep.subr.bf16.mxu0 %v4535_v53  ;;  %4660 = vmatprep.subr.bf16.mxu1 %v4659_v59  ;;  %v879_v53 = vld [vmem:[%s9135_s1 + $0x1ad0] sm:$0xff]  ;;  %v941_v59 = vld [vmem:[%s9135_s1 + $0x1cc0] sm:$0xff]  ;;  %v4553_v0 = vpack.c.bf16 %v898_v52, %v877_v51 }
 0x240   :  { %v1027_v51 = vld [vmem:[%s9135_s1 + $0x1f70] sm:$0xff] }
 0x241   :  { %2680 = vmatmul.mubr.f32.vlgmr.msra.gmra.mrb[8].mxu0 %v5188_v25  ;;  %2822 = vmatmul.mubr.f32.vlgmr.msra.gmra.mrb[8].mxu1 %v5188_v25 }
 0x242   :  { %4538 = vmatpush1.bf16.msra.mxu0 %v4537_v4  ;;  %4662 = vmatpush1.bf16.msra.mxu1 %v4661_v5  ;;  %v919_v4 = vld [vmem:[%s9135_s1 + $0x1c10] sm:$0xff]  ;;  %v4677_v5 = vpack.c.bf16 %v900_v55, %v879_v53 }
 0x243   :  { %4540 = vmatprep.subr.bf16.mxu0 %v4539_v6  ;;  %4664 = vmatprep.subr.bf16.mxu1 %v4663_v9  ;;  %v4555_v6 = vpack.c.bf16 %v941_v59, %v920_v57  ;;  %v4679_v9 = vpack.c.bf16 %v943_v63, %v922_v60  ;;  %v4557_v22 = vpack.c.bf16 %v940_v7, %v919_v4  ;;  %v1024_v4 = vld [vmem:[%s9135_s1 + $0x1f58] sm:$0xff] }
 0x244   :  { %3440 = vmatprep.mubr.msk.f32.mxu0 %vm1476_vm0, %v5341_v39  ;;  %3441 = vmatprep.mubr.msk.f32.mxu1 %vm1476_vm0, %v5341_v39 }
 0x246   :  { %4542 = vmatpush1.bf16.msra.mxu0 %v4541_v17  ;;  %4666 = vmatpush1.bf16.msra.mxu1 %v4665_v19  ;;  %v964_v17 = vld [vmem:[%s9135_s1 + $0x1d78] sm:$0xff]  ;;  %v985_v19 = vld [vmem:[%s9135_s1 + $0x1e20] sm:$0xff] }
 0x247   :  { %4544 = vmatprep.subr.bf16.mxu0 %v4543_v21  ;;  %4668 = vmatprep.subr.bf16.mxu1 %v4667_v27  ;;  %v1393_v21 = vrot.slane %v8582_v1, %v6963_v15  ;;  %v961_v27 = vld [vmem:[%s9135_s1 + $0x1d60] sm:$0xff]  ;;  %v4683_v41 = vpack.c.bf16 %v985_v19, %v964_v17 }
 0x248   :  { %v4561_v55 = vpack.c.bf16 %v982_v33, %v961_v27  ;;  %v1069_v17 = vld [vmem:[%s9135_s1 + $0x20c0] sm:$0xff] }
 0x24a   :  { %4546 = vmatpush1.bf16.msra.mxu0 %v4545_v35  ;;  %4670 = vmatpush1.bf16.msra.mxu1 %v4669_v36  ;;  %v984_v35 = vld [vmem:[%s9135_s1 + $0x1e18] sm:$0xff] }
 0x24b   :  { %4548 = vmatprep.subr.bf16.mxu0 %v4547_v37  ;;  %4672 = vmatprep.subr.bf16.mxu1 %v4671_v42  ;;  %v3088_v37 = vrot.slane %v8587_v3, %v6963_v15  ;;  %v1004_v42 = vld [vmem:[%s9135_s1 + $0x1eb8] sm:$0xff]  ;;  %v4685_v57 = vpack.c.bf16 %v984_v35, %v963_v34 }
 0x24c   :  { %v4563_v63 = vpack.c.bf16 %v1025_v43, %v1004_v42  ;;  %v1068_v35 = vld [vmem:[%s9135_s1 + $0x20b8] sm:$0xff] }
 0x24e   :  { %4550 = vmatpush1.bf16.msra.mxu0 %v4549_v48  ;;  %4674 = vmatpush1.bf16.msra.mxu1 %v4673_v49  ;;  %v3092_v48 = vrot.slane %v8587_v3, %v6991_v28  ;;  %v3224_v49 = vrot.slane %v8604_v10, %v6991_v28 }
 0x24f   :  { %4552 = vmatprep.subr.bf16.mxu0 %v4551_v50  ;;  %4676 = vmatprep.subr.bf16.mxu1 %v4675_v54  ;;  %v1006_v50 = vld [vmem:[%s9135_s1 + $0x1ec8] sm:$0xff] }
 0x250   :  { %v4687_v61 = vpack.c.bf16 %v1027_v51, %v1006_v50  ;;  %v1110_v51 = vld [vmem:[%s9135_s1 + $0x2208] sm:$0xff] }
 0x252   :  { %4554 = vmatpush1.bf16.msra.mxu0 %v4553_v0  ;;  %4678 = vmatpush1.bf16.msra.mxu1 %v4677_v5  ;;  %v1003_v0 = vld [vmem:[%s9135_s1 + $0x1eb0] sm:$0xff]  ;;  %v1005_v5 = vld [vmem:[%s9135_s1 + $0x1ec0] sm:$0xff] }
 0x253   :  { %4556 = vmatprep.subr.bf16.mxu0 %v4555_v6  ;;  %4680 = vmatprep.subr.bf16.mxu1 %v4679_v9  ;;  %v1046_v9 = vld [vmem:[%s9135_s1 + $0x2008] sm:$0xff] }
 0x254   :  { %v2184_v36 = vpop.f32.mrb[4].mxu0  ;;  %v2326_v45 = vpop.f32.mrb[4].mxu1  ;;  %v4567_v27 = vpack.c.bf16 %v1067_v12, %v1046_v9  ;;  %v1174_v9 = vld [vmem:[%s9135_s1 + $0x2408] sm:$0xff]  ;;  %v1195_v12 = vld [vmem:[%s9135_s1 + $0x24b0] sm:$0xff] }
 0x255   :  { %v4804_v44 = vadd.f32 %v2184_v36, %v1385_v16  ;;  %v2186_v46 = vpop.f32.mrb[5].mxu0  ;;  %v4806_v52 = vadd.f32 %v2326_v45, %v1393_v21  ;;  %v2328_v54 = vpop.f32.mrb[5].mxu1  ;;  %v1088_v36 = vld [vmem:[%s9135_s1 + $0x2158] sm:$0xff] }
 0x256   :  { %4558 = vmatpush1.bf16.msra.mxu0 %v4557_v22  ;;  %v4805_v53 = vadd.f32 %v2186_v46, %v1389_v26  ;;  %4682 = vmatpush1.bf16.msra.mxu1 %v4681_v23  ;;  %v4807_v60 = vadd.f32 %v2328_v54, %v1397_v30  ;;  %v4565_v22 = vpack.c.bf16 %v1024_v4, %v1003_v0  ;;  %v1066_v30 = vld [vmem:[%s9135_s1 + $0x20a8] sm:$0xff]  ;;  %v1129_v0 = vld [vmem:[%s9135_s1 + $0x22a0] sm:$0xff] }
 0x257   :  { %v3158_v59 = vmul.f32 %v4804_v44, %v3080_v18  ;;  %4560 = vmatprep.subr.bf16.mxu0 %v4559_v31  ;;  %v3160_v6 = vmul.f32 %v4806_v52, %v3088_v37  ;;  %4684 = vmatprep.subr.bf16.mxu1 %v4683_v41  ;;  %v1048_v18 = vld [vmem:[%s9135_s1 + $0x2018] sm:$0xff]  ;;  %v4689_v26 = vpack.c.bf16 %v1026_v8, %v1005_v5  ;;  %v1047_v31 = vld [vmem:[%s9135_s1 + $0x2010] sm:$0xff]  ;;  %v1109_v37 = vld [vmem:[%s9135_s1 + $0x2200] sm:$0xff] }
 0x258   :  { %v3159_v7 = vmul.f32 %v4805_v53, %v3084_v40  ;;  %v3161_v16 = vmul.f32 %v4807_v60, %v3092_v48  ;;  %v4691_v34 = vpack.c.bf16 %v1069_v17, %v1048_v18  ;;  %v1090_v40 = vld [vmem:[%s9135_s1 + $0x2168] sm:$0xff]  ;;  %v1111_v41 = vld [vmem:[%s9135_s1 + $0x2210] sm:$0xff]  ;;  %v4693_v45 = vpack.c.bf16 %v1068_v35, %v1047_v31  ;;  %v1108_v48 = vld [vmem:[%s9135_s1 + $0x21f8] sm:$0xff] }
 0x259   :  { %v3290_v13 = vadd.f32 %v3212_v29, %v3158_v59  ;;  %v3292_v19 = vadd.f32 %v3220_v38, %v3160_v6  ;;  %v1045_v29 = vld [vmem:[%s9135_s1 + $0x2000] sm:$0xff]  ;;  %v4571_v46 = vpack.c.bf16 %v1109_v37, %v1088_v36  ;;  %v4695_v50 = vpack.c.bf16 %v1111_v41, %v1090_v40  ;;  %v1130_v52 = vld [vmem:[%s9135_s1 + $0x22a8] sm:$0xff]  ;;  %v1151_v53 = vld [vmem:[%s9135_s1 + $0x2350] sm:$0xff] }
 0x25a   :  { %v3291_v21 = vadd.f32 %v3216_v47, %v3159_v7  ;;  %4562 = vmatpush1.bf16.msra.mxu0 %v4561_v55  ;;  %v3293_v23 = vadd.f32 %v3224_v49, %v3161_v16  ;;  %4686 = vmatpush1.bf16.msra.mxu1 %v4685_v57  ;;  %v4569_v43 = vpack.c.bf16 %v1066_v30, %v1045_v29  ;;  %v1087_v47 = vld [vmem:[%s9135_s1 + $0x2150] sm:$0xff]  ;;  %v1089_v49 = vld [vmem:[%s9135_s1 + $0x2160] sm:$0xff]  ;;  %v1132_v55 = vld [vmem:[%s9135_s1 + $0x22b8] sm:$0xff] }
 0x25b   :  { %4564 = vmatprep.subr.bf16.mxu0 %v4563_v63  ;;  %4688 = vmatprep.subr.bf16.mxu1 %v4687_v61  ;;  %v1153_v57 = vld [vmem:[%s9135_s1 + $0x2360] sm:$0xff]  ;;  %v4573_v59 = vpack.c.bf16 %v1108_v48, %v1087_v47  ;;  %v4697_v60 = vpack.c.bf16 %v1110_v51, %v1089_v49  ;;  %v4575_v63 = vpack.c.bf16 %v1151_v53, %v1130_v52  ;;  %v1150_v4 = vld [vmem:[%s9135_s1 + $0x2348] sm:$0xff]  ;;  %v1131_v5 = vld [vmem:[%s9135_s1 + $0x22b0] sm:$0xff] }
 0x25c   :  { %v3358_v33 = vcombine.low %v3290_v13, %v3291_v21  ;;  %v3359_v38 = vcombine.low %v3292_v19, %v3293_v23  ;;  %v4699_v6 = vpack.c.bf16 %v1153_v57, %v1132_v55  ;;  %v1152_v7 = vld [vmem:[%s9135_s1 + $0x2358] sm:$0xff]  ;;  %v1193_v8 = vld [vmem:[%s9135_s1 + $0x24a0] sm:$0xff]  ;;  %v4577_v13 = vpack.c.bf16 %v1150_v4, %v1129_v0  ;;  %v1171_v17 = vld [vmem:[%s9135_s1 + $0x23f0] sm:$0xff] }
 0x25d   :  { %v1172_v61 = vld [vmem:[%s9135_s1 + $0x23f8] sm:$0xff]  ;;  %v4701_v16 = vpack.c.bf16 %v1152_v7, %v1131_v5  ;;  %v1173_v21 = vld [vmem:[%s9135_s1 + $0x2400] sm:$0xff]  ;;  %v1194_v23 = vld [vmem:[%s9135_s1 + $0x24a8] sm:$0xff] }
 0x25e   :  { %v3366_v42 = vrot.slane %v3358_v33, %v5155_v11  ;;  %4566 = vmatpush1.bf16.msra.mxu0 %v4565_v22  ;;  %v3373_v44 = vrot.slane %v3359_v38, %v5155_v11  ;;  %4690 = vmatpush1.bf16.msra.mxu1 %v4689_v26  ;;  %v4579_v18 = vpack.c.bf16 %v1193_v8, %v1172_v61  ;;  %v1192_v19 = vld [vmem:[%s9135_s1 + $0x2498] sm:$0xff]  ;;  %v1214_v26 = vld [vmem:[%s9135_s1 + $0x2548] sm:$0xff]  ;;  %v1237_v30 = vld [vmem:[%s9135_s1 + $0x2600] sm:$0xff] }
 0x25f   :  { %4568 = vmatprep.subr.bf16.mxu0 %v4567_v27  ;;  %4692 = vmatprep.subr.bf16.mxu1 %v4691_v34  ;;  %v4703_v22 = vpack.c.bf16 %v1195_v12, %v1174_v9  ;;  %v1235_v27 = vld [vmem:[%s9135_s1 + $0x25f0] sm:$0xff]  ;;  %v1216_v29 = vld [vmem:[%s9135_s1 + $0x2558] sm:$0xff]  ;;  %v4581_v31 = vpack.c.bf16 %v1192_v19, %v1171_v17  ;;  %v4705_v33 = vpack.c.bf16 %v1194_v23, %v1173_v21  ;;  %v1213_v35 = vld [vmem:[%s9135_s1 + $0x2540] sm:$0xff] }
 0x260   :  { %v3374_v54 = vcombine.low %v3366_v42, %v3373_v44  ;;  %v4583_v34 = vpack.c.bf16 %v1235_v27, %v1214_v26  ;;  %v1234_v36 = vld [vmem:[%s9135_s1 + $0x25e8] sm:$0xff]  ;;  %v1215_v37 = vld [vmem:[%s9135_s1 + $0x2550] sm:$0xff]  ;;  %v4707_v38 = vpack.c.bf16 %v1237_v30, %v1216_v29  ;;  %v1236_v40 = vld [vmem:[%s9135_s1 + $0x25f8] sm:$0xff] }
 0x261   :  { %v1256_v41 = vld [vmem:[%s9135_s1 + $0x2698] sm:$0xff]  ;;  %v1277_v42 = vld [vmem:[%s9135_s1 + $0x2740] sm:$0xff]  ;;  %v1279_v44 = vld [vmem:[%s9135_s1 + $0x2750] sm:$0xff] }
 0x262   :  { %4570 = vmatpush1.bf16.msra.mxu0 %v4569_v43  ;;  %3424 = vst [vmem:[%s9140_s5 + $0x10] sm:$0xff] %v3374_v54  ;;  %4694 = vmatpush1.bf16.msra.mxu1 %v4693_v45  ;;  %v1258_v43 = vld [vmem:[%s9135_s1 + $0x26a8] sm:$0xff]  ;;  %v4585_v45 = vpack.c.bf16 %v1234_v36, %v1213_v35  ;;  %v4587_v47 = vpack.c.bf16 %v1277_v42, %v1256_v41  ;;  %v1255_v48 = vld [vmem:[%s9135_s1 + $0x2690] sm:$0xff]  ;;  %v1276_v49 = vld [vmem:[%s9135_s1 + $0x2738] sm:$0xff] }
 0x263   :  { %4572 = vmatprep.subr.bf16.mxu0 %v4571_v46  ;;  %4696 = vmatprep.subr.bf16.mxu1 %v4695_v50  ;;  %v4709_v46 = vpack.c.bf16 %v1236_v40, %v1215_v37  ;;  %v1257_v50 = vld [vmem:[%s9135_s1 + $0x26a0] sm:$0xff]  ;;  %v4711_v51 = vpack.c.bf16 %v1279_v44, %v1258_v43  ;;  %v1278_v52 = vld [vmem:[%s9135_s1 + $0x2748] sm:$0xff]  ;;  %v1319_v54 = vld [vmem:[%s9135_s1 + $0x2890] sm:$0xff] }
 0x264   :  { %v1298_v53 = vld [vmem:[%s9135_s1 + $0x27e8] sm:$0xff]  ;;  %v1300_v55 = vld [vmem:[%s9135_s1 + $0x27f8] sm:$0xff]  ;;  %v1321_v57 = vld [vmem:[%s9135_s1 + $0x28a0] sm:$0xff] }
 0x265   :  { %v1297_v0 = vld [vmem:[%s9135_s1 + $0x27e0] sm:$0xff]  ;;  %v1318_v4 = vld [vmem:[%s9135_s1 + $0x2888] sm:$0xff]  ;;  %v4715_v5 = vpack.c.bf16 %v1321_v57, %v1300_v55  ;;  %v1320_v7 = vld [vmem:[%s9135_s1 + $0x2898] sm:$0xff] }
 0x266   :  { %4574 = vmatpush1.bf16.msra.mxu0 %v4573_v59  ;;  %4698 = vmatpush1.bf16.msra.mxu1 %v4697_v60  ;;  %v4589_v59 = vpack.c.bf16 %v1276_v49, %v1255_v48  ;;  %v4713_v60 = vpack.c.bf16 %v1278_v52, %v1257_v50  ;;  %v4593_v61 = vpack.c.bf16 %v1318_v4, %v1297_v0  ;;  %v1340_v9 = vld [vmem:[%s9135_s1 + $0x2938] sm:$0xff]  ;;  %v1342_v12 = vld [vmem:[%s9135_s1 + $0x2948] sm:$0xff]  ;;  %v1339_v19 = vld [vmem:[%s9135_s1 + $0x2930] sm:$0xff] }
 0x267   :  { %4576 = vmatprep.subr.bf16.mxu0 %v4575_v63  ;;  %4700 = vmatprep.subr.bf16.mxu1 %v4699_v6  ;;  %v4591_v63 = vpack.c.bf16 %v1319_v54, %v1298_v53  ;;  %v1299_v6 = vld [vmem:[%s9135_s1 + $0x27f0] sm:$0xff]  ;;  %v398_v17 = vld [vmem:[%s9135_s1 + $0xbc8] sm:$0xff]  ;;  %v41_v21 = vld [vmem:[%s9135_s1 + $0xa0] sm:$0xff] }
 0x268   :  { %v4717_v8 = vpack.c.bf16 %v1320_v7, %v1299_v6  ;;  %v1341_v23 = vld [vmem:[%s9135_s1 + $0x2940] sm:$0xff]  ;;  %v419_v26 = vld [vmem:[%s9135_s1 + $0xc70] sm:$0xff]  ;;  %v440_v27 = vld [vmem:[%s9135_s1 + $0xd18] sm:$0xff] }
 0x269   :  { %v4723_v35 = vpack.c.bf16 %v440_v27, %v419_v26  ;;  %v83_v36 = vld [vmem:[%s9135_s1 + $0x1f0] sm:$0xff]  ;;  %v104_v37 = vld [vmem:[%s9135_s1 + $0x298] sm:$0xff]  ;;  %v461_v40 = vld [vmem:[%s9135_s1 + $0xdc0] sm:$0xff] }
 0x26a   :  { %4578 = vmatpush1.bf16.msra.mxu0 %v4577_v13  ;;  %4702 = vmatpush1.bf16.msra.mxu1 %v4701_v16  ;;  %v713_v13 = vld [vmem:[%s9135_s1 + $0x15a0] sm:$0xff]  ;;  %v734_v16 = vld [vmem:[%s9135_s1 + $0x1648] sm:$0xff]  ;;  %v503_v49 = vld [vmem:[%s9135_s1 + $0xf10] sm:$0xff] }
 0x26b   :  { %4580 = vmatprep.subr.bf16.mxu0 %v4579_v18  ;;  %4704 = vmatprep.subr.bf16.mxu1 %v4703_v22  ;;  %v377_v18 = vld [vmem:[%s9135_s1 + $0xb20] sm:$0xff]  ;;  %v62_v22 = vld [vmem:[%s9135_s1 + $0x148] sm:$0xff]  ;;  %v4752_v29 = vpack.c.bf16 %v734_v16, %v713_v13  ;;  %v524_v50 = vld [vmem:[%s9135_s1 + $0xfb8] sm:$0xff] }
 0x26c   :  { %v4719_v30 = vpack.c.bf16 %v398_v17, %v377_v18  ;;  %v482_v41 = vld [vmem:[%s9135_s1 + $0xe68] sm:$0xff]  ;;  %v797_v43 = vld [vmem:[%s9135_s1 + $0x1840] sm:$0xff]  ;;  %v839_v52 = vld [vmem:[%s9135_s1 + $0x1990] sm:$0xff]  ;;  %v4731_v54 = vpack.c.bf16 %v524_v50, %v503_v49 }
 0x26d   :  { %v818_v44 = vld [vmem:[%s9135_s1 + $0x18e8] sm:$0xff]  ;;  %v188_v55 = vld [vmem:[%s9135_s1 + $0x538] sm:$0xff]  ;;  %v545_v57 = vld [vmem:[%s9135_s1 + $0x1060] sm:$0xff] }
 0x26e   :  { %4582 = vmatpush1.bf16.msra.mxu0 %v4581_v31  ;;  %4706 = vmatpush1.bf16.msra.mxu1 %v4705_v33  ;;  %v755_v31 = vld [vmem:[%s9135_s1 + $0x16f0] sm:$0xff]  ;;  %v776_v33 = vld [vmem:[%s9135_s1 + $0x1798] sm:$0xff]  ;;  %v146_v48 = vld [vmem:[%s9135_s1 + $0x3e8] sm:$0xff] }
 0x26f   :  { %4584 = vmatprep.subr.bf16.mxu0 %v4583_v34  ;;  %4708 = vmatprep.subr.bf16.mxu1 %v4707_v38  ;;  %v4721_v34 = vpack.c.bf16 %v62_v22, %v41_v21  ;;  %v4844_v38 = vmov 0.0|0.0   ;;  %v4755_v42 = vpack.c.bf16 %v776_v33, %v755_v31  ;;  %v902_v0 = vld [vmem:[%s9135_s1 + $0x1b88] sm:$0xff]  ;;  %v209_v6 = vld [vmem:[%s9135_s1 + $0x5e0] sm:$0xff]  ;;  %v944_v13 = vld [vmem:[%s9135_s1 + $0x1cd8] sm:$0xff] }
 0x270   :  { %v230_v7 = vld [vmem:[%s9135_s1 + $0x688] sm:$0xff]  ;;  %v251_v17 = vld [vmem:[%s9135_s1 + $0x730] sm:$0xff]  ;;  %v629_v21 = vld [vmem:[%s9135_s1 + $0x1300] sm:$0xff] }
 0x271   :  { %v4737_v16 = vpack.c.bf16 %v230_v7, %v209_v6  ;;  %v650_v22 = vld [vmem:[%s9135_s1 + $0x13a8] sm:$0xff]  ;;  %v965_v26 = vld [vmem:[%s9135_s1 + $0x1d80] sm:$0xff]  ;;  %v1091_v50 = vld [vmem:[%s9135_s1 + $0x2170] sm:$0xff] }
 0x272   :  { %4586 = vmatpush1.bf16.msra.mxu0 %v4585_v45  ;;  %4710 = vmatpush1.bf16.msra.mxu1 %v4709_v46  ;;  %v4725_v45 = vpack.c.bf16 %v104_v37, %v83_v36  ;;  %v4727_v46 = vpack.c.bf16 %v482_v41, %v461_v40  ;;  %v986_v27 = vld [vmem:[%s9135_s1 + $0x1e28] sm:$0xff]  ;;  %v293_v31 = vld [vmem:[%s9135_s1 + $0x880] sm:$0xff]  ;;  %v1007_v37 = vld [vmem:[%s9135_s1 + $0x1ed0] sm:$0xff] }
 0x273   :  { %4588 = vmatprep.subr.bf16.mxu0 %v4587_v47  ;;  %4712 = vmatprep.subr.bf16.mxu1 %v4711_v51  ;;  %v125_v47 = vld [vmem:[%s9135_s1 + $0x340] sm:$0xff]  ;;  %v4758_v51 = vpack.c.bf16 %v818_v44, %v797_v43  ;;  %v314_v33 = vld [vmem:[%s9135_s1 + $0x928] sm:$0xff]  ;;  %v4770_v36 = vpack.c.bf16 %v986_v27, %v965_v26  ;;  %v1028_v40 = vld [vmem:[%s9135_s1 + $0x1f78] sm:$0xff]  ;;  %v3108_v26 = vrot.slane %v8587_v3, %v7794_v2 }
 0x274   :  { %v4729_v53 = vpack.c.bf16 %v146_v48, %v125_v47  ;;  %v4745_v41 = vpack.c.bf16 %v314_v33, %v293_v31  ;;  %v335_v43 = vld [vmem:[%s9135_s1 + $0x9d0] sm:$0xff]  ;;  %v356_v44 = vld [vmem:[%s9135_s1 + $0xa78] sm:$0xff]  ;;  %v1070_v47 = vld [vmem:[%s9135_s1 + $0x20c8] sm:$0xff] }
 0x275   :  { %v4749_v48 = vpack.c.bf16 %v356_v44, %v335_v43  ;;  %v1322_v6 = vld [vmem:[%s9135_s1 + $0x28a8] sm:$0xff] }
 0x276   :  { %4590 = vmatpush1.bf16.msra.mxu0 %v4589_v59  ;;  %4714 = vmatpush1.bf16.msra.mxu1 %v4713_v60  ;;  %v566_v59 = vld [vmem:[%s9135_s1 + $0x1108] sm:$0xff] }
 0x277   :  { %4592 = vmatprep.subr.bf16.mxu0 %v4591_v63  ;;  %4716 = vmatprep.subr.bf16.mxu1 %v4715_v5  ;;  %v881_v63 = vld [vmem:[%s9135_s1 + $0x1ae0] sm:$0xff]  ;;  %v4735_v5 = vpack.c.bf16 %v566_v59, %v545_v57  ;;  %v1238_v59 = vld [vmem:[%s9135_s1 + $0x2608] sm:$0xff] }
 0x278   :  { %v1217_v57 = vld [vmem:[%s9135_s1 + $0x2560] sm:$0xff] }
 0x27a   :  { %4594 = vmatpush1.bf16.msra.mxu0 %v4593_v61  ;;  %4718 = vmatpush1.bf16.msra.mxu1 %v4717_v8  ;;  %v587_v61 = vld [vmem:[%s9135_s1 + $0x11b0] sm:$0xff]  ;;  %v608_v8 = vld [vmem:[%s9135_s1 + $0x1258] sm:$0xff] }
 0x27b   :  { %2746 = vmatprep.subr.mxu0 %v1340_v9  ;;  %2888 = vmatprep.subr.mxu1 %v1342_v12  ;;  %v4764_v9 = vpack.c.bf16 %v902_v0, %v881_v63  ;;  %v923_v12 = vld [vmem:[%s9135_s1 + $0x1c30] sm:$0xff]  ;;  %v4739_v18 = vpack.c.bf16 %v608_v8, %v587_v61  ;;  %v1280_v0 = vld [vmem:[%s9135_s1 + $0x2758] sm:$0xff]  ;;  %v4845_v61 = vmov 0.0  }
 0x27c   :  { %v1259_v63 = vld [vmem:[%s9135_s1 + $0x26b0] sm:$0xff] }
 0x27d   :  { %v1343_v8 = vld [vmem:[%s9135_s1 + $0x2950] sm:$0xff] }
 0x27e   :  { %2747 = vmatpush1.msra.mxu0 %v1339_v19  ;;  %2889 = vmatpush1.msra.mxu1 %v1341_v23  ;;  %v272_v19 = vld [vmem:[%s9135_s1 + $0x7d8] sm:$0xff]  ;;  %v4767_v23 = vpack.c.bf16 %v944_v13, %v923_v12  ;;  %v1409_v12 = vrot.slane %v8582_v1, %v7779_v58  ;;  %v1405_v13 = vrot.slane %v8582_v1, %v7788_v62 }
 0x27f   :  { %2751 = vmatmul.mubr.f32.vlgmr.msra.gmra.mrb[8].mxu0 %v5313_v24  ;;  %2893 = vmatmul.mubr.f32.vlgmr.msra.gmra.mrb[8].mxu1 %v5313_v24 }
 0x280   :  { %4751 = vmatprep.subr.bf16.mxu1 %v4844_v38  ;;  %4720 = vmatprep.subr.bf16.mxu0 %v4719_v30  ;;  %v4743_v30 = vpack.c.bf16 %v650_v22, %v629_v21  ;;  %v3228_v21 = vrot.slane %v8604_v10, %v7776_v56 }
 0x281   :  { %4753 = vmatpush1.bf16.msra.mxu1 %v4752_v29  ;;  %4722 = vmatpush3.bf16.msra.mxu0 %v4721_v34  ;;  %v4741_v29 = vpack.c.bf16 %v272_v19, %v251_v17  ;;  %v671_v34 = vld [vmem:[%s9135_s1 + $0x1450] sm:$0xff]  ;;  %v3104_v17 = vrot.slane %v8587_v3, %v7779_v58 }
 0x282   :  { %4754 = vmatprep.subr.bf16.mxu1 %v4844_v38  ;;  %4724 = vmatprep.subr.bf16.mxu0 %v4723_v35  ;;  %v692_v35 = vld [vmem:[%s9135_s1 + $0x14f8] sm:$0xff] }
 0x283   :  { %2963 = vmatprep.mubr.f32.mxu0 %v5201_v32  ;;  %3442 = vmatprep.mubr.msk.f32.mxu1 %vm1476_vm0, %v5341_v39  ;;  %v860_v32 = vld [vmem:[%s9135_s1 + $0x1a38] sm:$0xff]  ;;  %v167_v39 = vld [vmem:[%s9135_s1 + $0x490] sm:$0xff] }
 0x284   :  { %v4761_v60 = vpack.c.bf16 %v860_v32, %v839_v52  ;;  %v4733_v4 = vpack.c.bf16 %v188_v55, %v167_v39  ;;  %v1133_v32 = vld [vmem:[%s9135_s1 + $0x22c0] sm:$0xff]  ;;  %v1175_v39 = vld [vmem:[%s9135_s1 + $0x2410] sm:$0xff] }
 0x285   :  { %4756 = vmatpush1.bf16.msra.mxu1 %v4755_v42  ;;  %4726 = vmatpush3.bf16.msra.mxu0 %v4725_v45  ;;  %v4747_v42 = vpack.c.bf16 %v692_v35, %v671_v34  ;;  %v4773_v45 = vpack.c.bf16 %v1028_v40, %v1007_v37  ;;  %v3240_v35 = vrot.slane %v8604_v10, %v7794_v2 }
 0x286   :  { %4757 = vmatprep.subr.bf16.mxu1 %v4844_v38  ;;  %4728 = vmatprep.subr.bf16.mxu0 %v4727_v46  ;;  %v1049_v46 = vld [vmem:[%s9135_s1 + $0x2020] sm:$0xff] }
 0x287   :  { %v4776_v49 = vpack.c.bf16 %v1070_v47, %v1049_v46 }
 0x289   :  { %4759 = vmatpush1.bf16.msra.mxu1 %v4758_v51  ;;  %4730 = vmatpush3.bf16.msra.mxu0 %v4729_v53  ;;  %v1112_v51 = vld [vmem:[%s9135_s1 + $0x2218] sm:$0xff]  ;;  %v1154_v53 = vld [vmem:[%s9135_s1 + $0x2368] sm:$0xff] }
 0x28a   :  { %4760 = vmatprep.subr.bf16.mxu1 %v4844_v38  ;;  %4732 = vmatprep.subr.bf16.mxu0 %v4731_v54  ;;  %v4779_v52 = vpack.c.bf16 %v1112_v51, %v1091_v50  ;;  %v4782_v54 = vpack.c.bf16 %v1154_v53, %v1133_v32 }
 0x28d   :  { %4762 = vmatpush1.bf16.msra.mxu1 %v4761_v60  ;;  %4734 = vmatpush3.bf16.msra.mxu0 %v4733_v4  ;;  %v4788_v60 = vpack.c.bf16 %v1238_v59, %v1217_v57  ;;  %v4791_v4 = vpack.c.bf16 %v1280_v0, %v1259_v63 }
 0x28e   :  { %4763 = vmatprep.subr.bf16.mxu1 %v4844_v38  ;;  %4736 = vmatprep.subr.bf16.mxu0 %v4735_v5  ;;  %v1301_v5 = vld [vmem:[%s9135_s1 + $0x2800] sm:$0xff] }
 0x28f   :  { %v4794_v7 = vpack.c.bf16 %v1322_v6, %v1301_v5 }
 0x291   :  { %4765 = vmatpush1.bf16.msra.mxu1 %v4764_v9  ;;  %4738 = vmatpush3.bf16.msra.mxu0 %v4737_v16  ;;  %v1401_v9 = vrot.slane %v8582_v1, %v7776_v56  ;;  %v1413_v16 = vrot.slane %v8582_v1, %v7794_v2  ;;  %v3236_v1 = vrot.slane %v8604_v10, %v7779_v58  ;;  %v1346_v2 = vld [vmem:[%s9137_s2 + $0x10] sm:$0x1f] }
 0x292   :  { %4766 = vmatprep.subr.bf16.mxu1 %v4844_v38  ;;  %4740 = vmatprep.subr.bf16.mxu0 %v4739_v18  ;;  %v1417_v47 = vrot.slane %v1346_v2, %v6960_v14  ;;  %v1421_v50 = vrot.slane %v1346_v2, %v6979_v20 }
 0x295   :  { %4768 = vmatpush1.bf16.msra.mxu1 %v4767_v23  ;;  %4742 = vmatpush3.bf16.msra.mxu0 %v4741_v29 }
 0x296   :  { %4769 = vmatprep.subr.bf16.mxu1 %v4844_v38  ;;  %4744 = vmatprep.subr.bf16.mxu0 %v4743_v30  ;;  %v3232_v30 = vrot.slane %v8604_v10, %v7788_v62  ;;  %v3041_v10 = vld [vmem:[%s9138_s3 + $0x10] sm:$0x1f] }
 0x297   :  { %v3112_v51 = vrot.slane %v3041_v10, %v6960_v14  ;;  %v3120_v53 = vrot.slane %v3041_v10, %v6963_v15  ;;  %v3124_v59 = vrot.slane %v3041_v10, %v6991_v28 }
 0x299   :  { %4771 = vmatpush1.bf16.msra.mxu1 %v4770_v36  ;;  %4746 = vmatpush3.bf16.msra.mxu0 %v4745_v41 }
 0x29a   :  { %4772 = vmatprep.subr.bf16.mxu1 %v4844_v38  ;;  %4748 = vmatprep.subr.bf16.mxu0 %v4747_v42 }
 0x29d   :  { %4774 = vmatpush1.bf16.msra.mxu1 %v4773_v45  ;;  %4750 = vmatpush3.bf16.msra.mxu0 %v4749_v48  ;;  %v3173_v48 = vld [vmem:[%s9139_s4 + $0x10] sm:$0x1f] }
 0x29e   :  { %4775 = vmatprep.subr.bf16.mxu1 %v4844_v38  ;;  %v3252_v63 = vrot.slane %v3173_v48, %v6963_v15 }
 0x2a0   :  { %2964 = vmatmul.mubr.f32.vlgmr.msra.gmra.mrb[10].mxu0 %v5188_v25  ;;  %v1196_v25 = vld [vmem:[%s9135_s1 + $0x24b8] sm:$0xff] }
 0x2a1   :  { %4777 = vmatpush1.bf16.msra.mxu1 %v4776_v49  ;;  %v4785_v55 = vpack.c.bf16 %v1196_v25, %v1175_v39  ;;  %v1425_v49 = vrot.slane %v1346_v2, %v6963_v15  ;;  %v3244_v25 = vrot.slane %v3173_v48, %v6960_v14 }
 0x2a2   :  { %4778 = vmatprep.subr.bf16.mxu1 %v4844_v38 }
 0x2a5   :  { %4780 = vmatpush1.bf16.msra.mxu1 %v4779_v52  ;;  %v1429_v52 = vrot.slane %v1346_v2, %v6991_v28 }
 0x2a6   :  { %4781 = vmatprep.subr.bf16.mxu1 %v4844_v38 }
 0x2a9   :  { %4783 = vmatpush1.bf16.msra.mxu1 %v4782_v54  ;;  %v3116_v54 = vrot.slane %v3041_v10, %v6979_v20 }
 0x2aa   :  { %4784 = vmatprep.subr.bf16.mxu1 %v4844_v38 }
 0x2ad   :  { %4786 = vmatpush1.bf16.msra.mxu1 %v4785_v55 }
 0x2ae   :  { %4787 = vmatprep.subr.bf16.mxu1 %v4844_v38 }
 0x2b1   :  { %4789 = vmatpush1.bf16.msra.mxu1 %v4788_v60 }
 0x2b2   :  { %4790 = vmatprep.subr.bf16.mxu1 %v4844_v38 }
 0x2b5   :  { %4792 = vmatpush1.bf16.msra.mxu1 %v4791_v4  ;;  %v3248_v4 = vrot.slane %v3173_v48, %v6979_v20 }
 0x2b6   :  { %4793 = vmatprep.subr.bf16.mxu1 %v4844_v38  ;;  %v3096_v38 = vrot.slane %v8587_v3, %v7776_v56 }
 0x2b9   :  { %4795 = vmatpush1.bf16.msra.mxu1 %v4794_v7 }
 0x2ba   :  { %3029 = vmatprep.subr.mxu1 %v4845_v61  ;;  %v3256_v61 = vrot.slane %v3173_v48, %v6991_v28 }
 0x2bd   :  { %3030 = vmatpush1.msra.mxu1 %v1343_v8 }
 0x2be   :  { %3034 = vmatmul.mubr.f32.vlgmr.msra.gmra.mrb[10].mxu1 %v5313_v24  ;;  %v3100_v24 = vrot.slane %v8587_v3, %v7788_v62 }
 0x2d3   :  { %v2468_v18 = vpop.f32.mrb[6].mxu0  ;;  %v2610_v22 = vpop.f32.mrb[6].mxu1 }
 0x2d4   :  { %v4808_v19 = vadd.f32 %v2468_v18, %v1401_v9  ;;  %v2470_v23 = vpop.f32.mrb[7].mxu0  ;;  %v4810_v27 = vadd.f32 %v2610_v22, %v1409_v12  ;;  %v2612_v31 = vpop.f32.mrb[7].mxu1  ;;  %v1433_v22 = vrot.slane %v1346_v2, %v7776_v56 }
 0x2d5   :  { %v4809_v29 = vadd.f32 %v2470_v23, %v1405_v13  ;;  %v4811_v34 = vadd.f32 %v2612_v31, %v1413_v16 }
 0x2d6   :  { %v3162_v33 = vmul.f32 %v4808_v19, %v3096_v38  ;;  %v3164_v36 = vmul.f32 %v4810_v27, %v3104_v17 }
 0x2d7   :  { %v3163_v37 = vmul.f32 %v4809_v29, %v3100_v24  ;;  %v3165_v41 = vmul.f32 %v4811_v34, %v3108_v26  ;;  %v3128_v26 = vrot.slane %v3041_v10, %v7776_v56  ;;  %v3260_v29 = vrot.slane %v3173_v48, %v7776_v56 }
 0x2d8   :  { %v3294_v40 = vadd.f32 %v3228_v21, %v3162_v33  ;;  %v3296_v42 = vadd.f32 %v3236_v1, %v3164_v36 }
 0x2d9   :  { %v3295_v3 = vadd.f32 %v3232_v30, %v3163_v37  ;;  %v3297_v43 = vadd.f32 %v3240_v35, %v3165_v41 }
 0x2db   :  { %v3375_v44 = vcombine.low %v3294_v40, %v3295_v3  ;;  %v3376_v45 = vcombine.low %v3296_v42, %v3297_v43 }
 0x2dd   :  { %v3383_v58 = vrot.slane %v3375_v44, %v5155_v11  ;;  %v3390_v46 = vrot.slane %v3376_v45, %v5155_v11 }
 0x2df   :  { %v3391_v62 = vcombine.low %v3383_v58, %v3390_v46 }
 0x2e1   :  { %3425 = vst [vmem:[%s9140_s5 + $0x18] sm:$0xff] %v3391_v62 }
 0x352   :  { %v2752_v32 = vpop.f32.mrb[8].mxu0  ;;  %v2894_v55 = vpop.f32.mrb[8].mxu1 }
 0x353   :  { %v4812_v39 = vadd.f32 %v2752_v32, %v1417_v47  ;;  %v2754_v57 = vpop.f32.mrb[9].mxu0  ;;  %v4814_v60 = vadd.f32 %v2894_v55, %v1425_v49  ;;  %v2896_v5 = vpop.f32.mrb[9].mxu1 }
 0x354   :  { %v4813_v0 = vadd.f32 %v2754_v57, %v1421_v50  ;;  %v4815_v7 = vadd.f32 %v2896_v5, %v1429_v52 }
 0x355   :  { %v3166_v6 = vmul.f32 %v4812_v39, %v3112_v51  ;;  %v3168_v8 = vmul.f32 %v4814_v60, %v3120_v53 }
 0x356   :  { %v3167_v9 = vmul.f32 %v4813_v0, %v3116_v54  ;;  %v3169_v13 = vmul.f32 %v4815_v7, %v3124_v59 }
 0x357   :  { %v3298_v12 = vadd.f32 %v3244_v25, %v3166_v6  ;;  %v3300_v14 = vadd.f32 %v3252_v63, %v3168_v8 }
 0x358   :  { %v3299_v38 = vadd.f32 %v3248_v4, %v3167_v9  ;;  %v3301_v16 = vadd.f32 %v3256_v61, %v3169_v13 }
 0x35a   :  { %v3392_v18 = vcombine.low %v3298_v12, %v3299_v38  ;;  %v3393_v17 = vcombine.low %v3300_v14, %v3301_v16 }
 0x35c   :  { %v3400_v24 = vrot.slane %v3392_v18, %v5155_v11  ;;  %v3407_v15 = vrot.slane %v3393_v17, %v5155_v11 }
 0x35e   :  { %v3408_v19 = vcombine.low %v3400_v24, %v3407_v15 }
 0x360   :  { %3426 = vst [vmem:[%s9140_s5 + $0x20] sm:$0xff] %v3408_v19 }
 0x373   :  { %v3476_v20 = vpop.f32.mrb[10].mxu0 }
 0x374   :  { %v3477_v28 = vpop.f32.mrb[11].mxu0 }
 0x375   :  { %v3478_v21 = vadd.f32 %v3477_v28, %v3476_v20 }
 0x377   :  { %v2966_v23 = vadd.f32 %v3478_v21, %v1433_v22 }
 0x391   :  { %v3035_v27 = vpop.f32.mrb[10].mxu1 }
 0x392   :  { %v3036_v1 = vadd.f32 %v3035_v27, %v2966_v23  ;;  %v3037_v30 = vpop.f32.mrb[11].mxu1 }
 0x394   :  { %v3170_v31 = vmul.f32 %v3128_v26, %v3036_v1 }
 0x396   :  { %v3302_v11 = vadd.f32 %v3260_v29, %v3170_v31 }
 0x398   :  { %3443 = vst.sshfl [vmem:[%s9140_s5 + $0x28] sm:$0x3 pattern:$0x76325410] %v3302_v11 }

</bundles_post_ra>
